<compile_context>
chip_gen: v6e
topology: v6e:2x2x1
jax: 0.10.0
libtpu: 0.0.40
codegen_flags: <defaults>
</compile_context>

<pallas_src>
import functools

import jax
import jax.numpy as jnp
from jax.experimental import pallas as pl
from jax.experimental.pallas import tpu as pltpu


def _round_up(x, m):
    return ((x + m - 1) // m) * m


# ---------------------------------------------------------------------------
# Pallas kernel: single-shot matmul (full K in VMEM) + fused activation
# ---------------------------------------------------------------------------
def _matmul_act_kernel(x_ref, w_ref, *out_refs, act):
    """out_refs:
         act == "leaky"        -> (feature_f32, next_layer_bf16)
         act == "none"         -> (linear_f32,)
         act == "sigmoid_pair" -> (linear_f32, sigmoid_f32)
    """
    y = jnp.dot(x_ref[...], w_ref[...], preferred_element_type=jnp.float32)
    if act == "leaky":
        a = jnp.maximum(y, 0.2 * y)            # LeakyReLU(0.2): one mul + max
        out_refs[0][...] = a.astype(out_refs[0].dtype)   # f32 feature
        out_refs[1][...] = a.astype(out_refs[1].dtype)   # bf16 next-layer input
    elif act == "none":
        out_refs[0][...] = y.astype(out_refs[0].dtype)
    elif act == "sigmoid_pair":
        out_refs[0][...] = y.astype(out_refs[0].dtype)   # linear conv5 feature
        sig = pl.reciprocal(1.0 + jnp.exp(-y), approx=True)  # EUP divide
        out_refs[1][...] = sig.astype(out_refs[1].dtype)
    else:
        raise ValueError(f"unknown act: {act}")


def _fused_matmul_act(patches, wmat, act):
    """(M, K) @ (K, Cout) in bf16 with f32 accumulation and fused activation.

    Returns a list of (M, Cout) arrays whose dtypes depend on `act`.
    """
    M, K = patches.shape
    Cout = wmat.shape[1]

    # Lane-dense output: pad Cout up to a multiple of 128 (zeros), slice later.
    cout_p = max(128, _round_up(Cout, 128))
    if cout_p != Cout:
        wmat = jnp.pad(wmat, ((0, 0), (0, cout_p - Cout)))

    # M tile: multiple of 16 (bf16 sublane packing), capped at 256 (MXU width
    # on v6e/v7x); tiny layers are not padded up to 128.
    tm = min(256, _round_up(M, 16))
    mp = _round_up(M, tm)
    if mp != M:
        patches = jnp.pad(patches, ((0, mp - M), (0, 0)))

    # Wider lane-dense N tiles; 256 keeps the RHS block <= 2 MiB bf16 even for
    # conv4/conv5, safe on every TPU generation.
    tn = min(256, cout_p)

    # bf16 operands, f32 accumulation inside the kernel (MXU-native).
    patches = patches.astype(jnp.bfloat16)
    wmat = wmat.astype(jnp.bfloat16)

    if act == "leaky":
        out_dtypes = (jnp.float32, jnp.bfloat16)
    elif act == "sigmoid_pair":
        out_dtypes = (jnp.float32, jnp.float32)
    else:  # "none"
        out_dtypes = (jnp.float32,)

    out_shape = tuple(jax.ShapeDtypeStruct((mp, cout_p), dt) for dt in out_dtypes)
    out_specs = tuple(pl.BlockSpec((tm, tn), lambda i, j: (i, j))
                      for _ in out_dtypes)

    bytes_out = sum(mp * cout_p * jnp.dtype(dt).itemsize for dt in out_dtypes)
    cost = pl.CostEstimate(
        flops=2 * mp * K * cout_p,
        transcendentals=(mp * cout_p if act == "sigmoid_pair" else 0),
        bytes_accessed=mp * K * 2 + K * cout_p * 2 + bytes_out,
    )

    outs = pl.pallas_call(
        functools.partial(_matmul_act_kernel, act=act),
        out_shape=out_shape,
        grid=(mp // tm, cout_p // tn),
        in_specs=[
            pl.BlockSpec((tm, K), lambda i, j: (i, 0)),   # full K resident
            pl.BlockSpec((K, tn), lambda i, j: (0, j)),
        ],
        out_specs=out_specs,
        compiler_params=pltpu.CompilerParams(
            dimension_semantics=("parallel", "parallel"),
            vmem_limit_bytes=32 * 1024 * 1024),
        cost_estimate=cost,
    )(patches, wmat)
    if not isinstance(outs, (tuple, list)):
        outs = (outs,)
    return [o[:M, :Cout] for o in outs]


# ---------------------------------------------------------------------------
# Conv layer = im2col (XLA glue, bf16) + Pallas fused matmul/activation
# ---------------------------------------------------------------------------
def conv2d_k4(x_nhwc, w_oihw, stride, act):
    """4x4 conv, padding=1, no bias, fused activation.  x is NHWC.

    Returns the list produced by _fused_matmul_act, reshaped to NHWC.
    """
    # TODO(synk): for large H/W, fold im2col into the Pallas kernel (strided
    # in-kernel windows) instead of materializing the 16x patches tensor.
    N, H, W, Cin = x_nhwc.shape
    Cout = w_oihw.shape[0]
    # Cast once before the 16x im2col expansion (no-op for layers >= 2, whose
    # kernels already emit bf16); accumulation stays f32 inside the kernel.
    xp = jnp.pad(x_nhwc.astype(jnp.bfloat16), ((0, 0), (1, 1), (1, 1), (0, 0)))
    Hout = (H + 2 - 4) // stride + 1
    Wout = (W + 2 - 4) // stride + 1
    # im2col: channel ordering (kh, kw, cin) to match the weight matrix below.
    cols = [
        xp[:, kh:kh + stride * (Hout - 1) + 1:stride,
              kw:kw + stride * (Wout - 1) + 1:stride, :]
        for kh in range(4) for kw in range(4)
    ]
    patches = jnp.concatenate(cols, axis=-1)               # (N,Hout,Wout,16*Cin)
    patches = patches.reshape(N * Hout * Wout, 16 * Cin)   # (M, K)
    # OIHW -> (KH, KW, Cin, Cout) -> (K, Cout)
    wmat = jnp.transpose(w_oihw, (2, 3, 1, 0)).reshape(16 * Cin, Cout)
    outs = _fused_matmul_act(patches, wmat, act)
    return [y.reshape(N, Hout, Wout, Cout) for y in outs]


# ---------------------------------------------------------------------------
# Parameters (synthetic, deterministic) + spectral norm
# ---------------------------------------------------------------------------
def spectral_normalize(w, key, n_iter=20, eps=1e-12):
    """Divide conv weight (OIHW) by its spectral norm (power iteration)."""
    cout = w.shape[0]
    wmat = w.reshape(cout, -1)
    u = jax.random.normal(key, (cout,), dtype=w.dtype)
    u = u / (jnp.linalg.norm(u) + eps)
    v = None
    for _ in range(n_iter):
        v = wmat.T @ u
        v = v / (jnp.linalg.norm(v) + eps)
        u = wmat @ v
        u = u / (jnp.linalg.norm(u) + eps)
    sigma = u @ (wmat @ v)
    return w / sigma


def init_discriminator_params(key, in_channels):
    shapes = [
        (64, in_channels, 4, 4),
        (128, 64, 4, 4),
        (256, 128, 4, 4),
        (512, 256, 4, 4),
        (1, 512, 4, 4),
    ]
    params = {}
    keys = jax.random.split(key, 2 * len(shapes))
    for i, shp in enumerate(shapes):
        w = 0.02 * jax.random.normal(keys[2 * i], shp, dtype=jnp.float32)
        w = spectral_normalize(w, keys[2 * i + 1])
        params[f"w{i + 1}"] = w
    return params


# ---------------------------------------------------------------------------
# Forward pass (matches Discriminator.forward)
# ---------------------------------------------------------------------------
def discriminator_forward(params, x_nchw, use_sigmoid=True):
    x = jnp.transpose(x_nchw, (0, 2, 3, 1))  # NCHW -> NHWC once, up front
    c1, a1 = conv2d_k4(x, params["w1"], stride=2, act="leaky")
    c2, a2 = conv2d_k4(a1, params["w2"], stride=2, act="leaky")
    c3, a3 = conv2d_k4(a2, params["w3"], stride=2, act="leaky")
    c4, a4 = conv2d_k4(a3, params["w4"], stride=1, act="leaky")
    if use_sigmoid:
        # One kernel emits both pre-sigmoid conv5 (feature) and its sigmoid.
        c5, outputs = conv2d_k4(a4, params["w5"], stride=1, act="sigmoid_pair")
    else:
        (c5,) = conv2d_k4(a4, params["w5"], stride=1, act="none")
        outputs = c5

    def to_nchw(t):
        return jnp.transpose(t, (0, 3, 1, 2))

    feats = [to_nchw(c1), to_nchw(c2), to_nchw(c3), to_nchw(c4), to_nchw(c5)]
    return to_nchw(outputs), feats


if __name__ == "__main__":
    key = jax.random.PRNGKey(0)
    pkey, xkey = jax.random.split(key)

    in_channels = 4
    # Spatial 32 so the 5-layer stack keeps positive spatial dims
    # (32 -> 16 -> 8 -> 4 -> 3 -> 2).
    x = jax.random.normal(xkey, (2, in_channels, 32, 32), dtype=jnp.float32)

    params = init_discriminator_params(pkey, in_channels)

    outputs, feats = jax.jit(discriminator_forward)(params, x)
    jax.block_until_ready(outputs)
    for f in feats:
        jax.block_until_ready(f)

    assert outputs.shape == (2, 1, 2, 2)
    assert feats[0].shape == (2, 64, 16, 16)
    assert feats[1].shape == (2, 128, 8, 8)
    assert feats[2].shape == (2, 256, 4, 4)
    assert feats[3].shape == (2, 512, 3, 3)
    assert feats[4].shape == (2, 1, 2, 2)
    assert bool(jnp.all(jnp.isfinite(outputs)))
    assert bool(jnp.all((outputs >= 0.0) & (outputs <= 1.0)))
    print("KERNEL_OK")
</pallas_src>

<mosaic_0001>
module attributes {stable_mosaic.version = 11 : i64} {
  func.func @_matmul_act_kernel(%arg0: i32, %arg1: i32, %arg2: memref<256x64xbf16, #tpu.memory_space<vmem>>, %arg3: memref<64x128xbf16, #tpu.memory_space<vmem>>, %arg4: memref<256x128xf32, #tpu.memory_space<vmem>>, %arg5: memref<256x128xbf16, #tpu.memory_space<vmem>>) attributes {dimension_semantics = [#tpu.dimension_semantics<parallel>, #tpu.dimension_semantics<parallel>], iteration_bounds = array<i64: 2, 1>, scalar_prefetch = 0 : i64, scratch_operands = 0 : i64, tpu.core_type = #tpu.core_type<tc>, window_params = [{transform_indices = @transform_0, window_bounds = array<i64: 256, 64>}, {transform_indices = @transform_1, window_bounds = array<i64: 64, 128>}, {transform_indices = @transform_2, window_bounds = array<i64: 256, 128>}, {transform_indices = @transform_3, window_bounds = array<i64: 256, 128>}]} {
    %c0 = arith.constant 0 : index
    %c0_0 = arith.constant 0 : index
    %0 = vector.load %arg2[%c0, %c0_0] : memref<256x64xbf16, #tpu.memory_space<vmem>>, vector<256x64xbf16>
    %c0_1 = arith.constant 0 : index
    %c0_2 = arith.constant 0 : index
    %1 = vector.load %arg3[%c0_1, %c0_2] : memref<64x128xbf16, #tpu.memory_space<vmem>>, vector<64x128xbf16>
    %cst = arith.constant dense<0.000000e+00> : vector<256x128xf32>
    %2 = tpu.matmul %0, %1, %cst {dimension_numbers = #tpu.dot_dimension_numbers<[1], [0], [0], [1], [0, 0, 1, 1], [], []>} : vector<256x64xbf16>, vector<64x128xbf16>, vector<256x128xf32> -> vector<256x128xf32>
    %cst_3 = arith.constant 2.000000e-01 : f32
    %3 = vector.broadcast %cst_3 : f32 to vector<256x128xf32>
    %4 = arith.mulf %3, %2 : vector<256x128xf32>
    %5 = arith.maximumf %2, %4 : vector<256x128xf32>
    %c0_4 = arith.constant 0 : index
    %c0_5 = arith.constant 0 : index
    %6 = vector.load %arg4[%c0_4, %c0_5] : memref<256x128xf32, #tpu.memory_space<vmem>>, vector<256x128xf32>
    tpu.vector_store %arg4[%c0_4, %c0_5], %5 {strides = array<i32>} : memref<256x128xf32, #tpu.memory_space<vmem>>, vector<256x128xf32>,
    %7 = arith.truncf %5 : vector<256x128xf32> to vector<256x128xbf16>
    %c0_6 = arith.constant 0 : index
    %c0_7 = arith.constant 0 : index
    %8 = vector.load %arg5[%c0_6, %c0_7] : memref<256x128xbf16, #tpu.memory_space<vmem>>, vector<256x128xbf16>
    tpu.vector_store %arg5[%c0_6, %c0_7], %7 {strides = array<i32>} : memref<256x128xbf16, #tpu.memory_space<vmem>>, vector<256x128xbf16>,
    return
  }
  func.func @transform_0(%arg0: i32, %arg1: i32) -> (i32, i32) {
    %c0_i32 = arith.constant 0 : i32
    %c0_i32_0 = arith.constant 0 : i32
    return %arg0, %c0_i32 : i32, i32
  }
  func.func @transform_1(%arg0: i32, %arg1: i32) -> (i32, i32) {
    %c0_i32 = arith.constant 0 : i32
    %c0_i32_0 = arith.constant 0 : i32
    return %c0_i32, %arg1 : i32, i32
  }
  func.func @transform_2(%arg0: i32, %arg1: i32) -> (i32, i32) {
    %c0_i32 = arith.constant 0 : i32
    return %arg0, %arg1 : i32, i32
  }
  func.func @transform_3(%arg0: i32, %arg1: i32) -> (i32, i32) {
    %c0_i32 = arith.constant 0 : i32
    return %arg0, %arg1 : i32, i32
  }
}

module attributes {stable_mosaic.version = 11 : i64} {
  func.func @_matmul_act_kernel(%arg0: i32, %arg1: i32, %arg2: memref<128x1024xbf16, #tpu.memory_space<vmem>>, %arg3: memref<1024x128xbf16, #tpu.memory_space<vmem>>, %arg4: memref<128x128xf32, #tpu.memory_space<vmem>>, %arg5: memref<128x128xbf16, #tpu.memory_space<vmem>>) attributes {dimension_semantics = [#tpu.dimension_semantics<parallel>, #tpu.dimension_semantics<parallel>], iteration_bounds = array<i64: 1, 1>, scalar_prefetch = 0 : i64, scratch_operands = 0 : i64, tpu.core_type = #tpu.core_type<tc>, window_params = [{transform_indices = @transform_0, window_bounds = array<i64: 128, 1024>}, {transform_indices = @transform_1, window_bounds = array<i64: 1024, 128>}, {transform_indices = @transform_2, window_bounds = array<i64: 128, 128>}, {transform_indices = @transform_3, window_bounds = array<i64: 128, 128>}]} {
    %c0 = arith.constant 0 : index
    %c0_0 = arith.constant 0 : index
    %0 = vector.load %arg2[%c0, %c0_0] : memref<128x1024xbf16, #tpu.memory_space<vmem>>, vector<128x1024xbf16>
    %c0_1 = arith.constant 0 : index
    %c0_2 = arith.constant 0 : index
    %1 = vector.load %arg3[%c0_1, %c0_2] : memref<1024x128xbf16, #tpu.memory_space<vmem>>, vector<1024x128xbf16>
    %cst = arith.constant dense<0.000000e+00> : vector<128x128xf32>
    %2 = tpu.matmul %0, %1, %cst {dimension_numbers = #tpu.dot_dimension_numbers<[1], [0], [0], [1], [0, 0, 1, 1], [], []>} : vector<128x1024xbf16>, vector<1024x128xbf16>, vector<128x128xf32> -> vector<128x128xf32>
    %cst_3 = arith.constant 2.000000e-01 : f32
    %3 = vector.broadcast %cst_3 : f32 to vector<128x128xf32>
    %4 = arith.mulf %3, %2 : vector<128x128xf32>
    %5 = arith.maximumf %2, %4 : vector<128x128xf32>
    %c0_4 = arith.constant 0 : index
    %c0_5 = arith.constant 0 : index
    %6 = vector.load %arg4[%c0_4, %c0_5] : memref<128x128xf32, #tpu.memory_space<vmem>>, vector<128x128xf32>
    tpu.vector_store %arg4[%c0_4, %c0_5], %5 {strides = array<i32>} : memref<128x128xf32, #tpu.memory_space<vmem>>, vector<128x128xf32>,
    %7 = arith.truncf %5 : vector<128x128xf32> to vector<128x128xbf16>
    %c0_6 = arith.constant 0 : index
    %c0_7 = arith.constant 0 : index
    %8 = vector.load %arg5[%c0_6, %c0_7] : memref<128x128xbf16, #tpu.memory_space<vmem>>, vector<128x128xbf16>
    tpu.vector_store %arg5[%c0_6, %c0_7], %7 {strides = array<i32>} : memref<128x128xbf16, #tpu.memory_space<vmem>>, vector<128x128xbf16>,
    return
  }
  func.func @transform_0(%arg0: i32, %arg1: i32) -> (i32, i32) {
    %c0_i32 = arith.constant 0 : i32
    %c0_i32_0 = arith.constant 0 : i32
    return %arg0, %c0_i32 : i32, i32
  }
  func.func @transform_1(%arg0: i32, %arg1: i32) -> (i32, i32) {
    %c0_i32 = arith.constant 0 : i32
    %c0_i32_0 = arith.constant 0 : i32
    return %c0_i32, %arg1 : i32, i32
  }
  func.func @transform_2(%arg0: i32, %arg1: i32) -> (i32, i32) {
    %c0_i32 = arith.constant 0 : i32
    return %arg0, %arg1 : i32, i32
  }
  func.func @transform_3(%arg0: i32, %arg1: i32) -> (i32, i32) {
    %c0_i32 = arith.constant 0 : i32
    return %arg0, %arg1 : i32, i32
  }
}

module attributes {stable_mosaic.version = 11 : i64} {
  func.func @_matmul_act_kernel(%arg0: i32, %arg1: i32, %arg2: memref<32x2048xbf16, #tpu.memory_space<vmem>>, %arg3: memref<2048x256xbf16, #tpu.memory_space<vmem>>, %arg4: memref<32x256xf32, #tpu.memory_space<vmem>>, %arg5: memref<32x256xbf16, #tpu.memory_space<vmem>>) attributes {dimension_semantics = [#tpu.dimension_semantics<parallel>, #tpu.dimension_semantics<parallel>], iteration_bounds = array<i64: 1, 1>, scalar_prefetch = 0 : i64, scratch_operands = 0 : i64, tpu.core_type = #tpu.core_type<tc>, window_params = [{transform_indices = @transform_0, window_bounds = array<i64: 32, 2048>}, {transform_indices = @transform_1, window_bounds = array<i64: 2048, 256>}, {transform_indices = @transform_2, window_bounds = array<i64: 32, 256>}, {transform_indices = @transform_3, window_bounds = array<i64: 32, 256>}]} {
    %c0 = arith.constant 0 : index
    %c0_0 = arith.constant 0 : index
    %0 = vector.load %arg2[%c0, %c0_0] : memref<32x2048xbf16, #tpu.memory_space<vmem>>, vector<32x2048xbf16>
    %c0_1 = arith.constant 0 : index
    %c0_2 = arith.constant 0 : index
    %1 = vector.load %arg3[%c0_1, %c0_2] : memref<2048x256xbf16, #tpu.memory_space<vmem>>, vector<2048x256xbf16>
    %cst = arith.constant dense<0.000000e+00> : vector<32x256xf32>
    %2 = tpu.matmul %0, %1, %cst {dimension_numbers = #tpu.dot_dimension_numbers<[1], [0], [0], [1], [0, 0, 1, 1], [], []>} : vector<32x2048xbf16>, vector<2048x256xbf16>, vector<32x256xf32> -> vector<32x256xf32>
    %cst_3 = arith.constant 2.000000e-01 : f32
    %3 = vector.broadcast %cst_3 : f32 to vector<32x256xf32>
    %4 = arith.mulf %3, %2 : vector<32x256xf32>
    %5 = arith.maximumf %2, %4 : vector<32x256xf32>
    %c0_4 = arith.constant 0 : index
    %c0_5 = arith.constant 0 : index
    %6 = vector.load %arg4[%c0_4, %c0_5] : memref<32x256xf32, #tpu.memory_space<vmem>>, vector<32x256xf32>
    tpu.vector_store %arg4[%c0_4, %c0_5], %5 {strides = array<i32>} : memref<32x256xf32, #tpu.memory_space<vmem>>, vector<32x256xf32>,
    %7 = arith.truncf %5 : vector<32x256xf32> to vector<32x256xbf16>
    %c0_6 = arith.constant 0 : index
    %c0_7 = arith.constant 0 : index
    %8 = vector.load %arg5[%c0_6, %c0_7] : memref<32x256xbf16, #tpu.memory_space<vmem>>, vector<32x256xbf16>
    tpu.vector_store %arg5[%c0_6, %c0_7], %7 {strides = array<i32>} : memref<32x256xbf16, #tpu.memory_space<vmem>>, vector<32x256xbf16>,
    return
  }
  func.func @transform_0(%arg0: i32, %arg1: i32) -> (i32, i32) {
    %c0_i32 = arith.constant 0 : i32
    %c0_i32_0 = arith.constant 0 : i32
    return %arg0, %c0_i32 : i32, i32
  }
  func.func @transform_1(%arg0: i32, %arg1: i32) -> (i32, i32) {
    %c0_i32 = arith.constant 0 : i32
    %c0_i32_0 = arith.constant 0 : i32
    return %c0_i32, %arg1 : i32, i32
  }
  func.func @transform_2(%arg0: i32, %arg1: i32) -> (i32, i32) {
    %c0_i32 = arith.constant 0 : i32
    return %arg0, %arg1 : i32, i32
  }
  func.func @transform_3(%arg0: i32, %arg1: i32) -> (i32, i32) {
    %c0_i32 = arith.constant 0 : i32
    return %arg0, %arg1 : i32, i32
  }
}

module attributes {stable_mosaic.version = 11 : i64} {
  func.func @_matmul_act_kernel(%arg0: i32, %arg1: i32, %arg2: memref<32x4096xbf16, #tpu.memory_space<vmem>>, %arg3: memref<4096x256xbf16, #tpu.memory_space<vmem>>, %arg4: memref<32x256xf32, #tpu.memory_space<vmem>>, %arg5: memref<32x256xbf16, #tpu.memory_space<vmem>>) attributes {dimension_semantics = [#tpu.dimension_semantics<parallel>, #tpu.dimension_semantics<parallel>], iteration_bounds = array<i64: 1, 2>, scalar_prefetch = 0 : i64, scratch_operands = 0 : i64, tpu.core_type = #tpu.core_type<tc>, window_params = [{transform_indices = @transform_0, window_bounds = array<i64: 32, 4096>}, {transform_indices = @transform_1, window_bounds = array<i64: 4096, 256>}, {transform_indices = @transform_2, window_bounds = array<i64: 32, 256>}, {transform_indices = @transform_3, window_bounds = array<i64: 32, 256>}]} {
    %c0 = arith.constant 0 : index
    %c0_0 = arith.constant 0 : index
    %0 = vector.load %arg2[%c0, %c0_0] : memref<32x4096xbf16, #tpu.memory_space<vmem>>, vector<32x4096xbf16>
    %c0_1 = arith.constant 0 : index
    %c0_2 = arith.constant 0 : index
    %1 = vector.load %arg3[%c0_1, %c0_2] : memref<4096x256xbf16, #tpu.memory_space<vmem>>, vector<4096x256xbf16>
    %cst = arith.constant dense<0.000000e+00> : vector<32x256xf32>
    %2 = tpu.matmul %0, %1, %cst {dimension_numbers = #tpu.dot_dimension_numbers<[1], [0], [0], [1], [0, 0, 1, 1], [], []>} : vector<32x4096xbf16>, vector<4096x256xbf16>, vector<32x256xf32> -> vector<32x256xf32>
    %cst_3 = arith.constant 2.000000e-01 : f32
    %3 = vector.broadcast %cst_3 : f32 to vector<32x256xf32>
    %4 = arith.mulf %3, %2 : vector<32x256xf32>
    %5 = arith.maximumf %2, %4 : vector<32x256xf32>
    %c0_4 = arith.constant 0 : index
    %c0_5 = arith.constant 0 : index
    %6 = vector.load %arg4[%c0_4, %c0_5] : memref<32x256xf32, #tpu.memory_space<vmem>>, vector<32x256xf32>
    tpu.vector_store %arg4[%c0_4, %c0_5], %5 {strides = array<i32>} : memref<32x256xf32, #tpu.memory_space<vmem>>, vector<32x256xf32>,
    %7 = arith.truncf %5 : vector<32x256xf32> to vector<32x256xbf16>
    %c0_6 = arith.constant 0 : index
    %c0_7 = arith.constant 0 : index
    %8 = vector.load %arg5[%c0_6, %c0_7] : memref<32x256xbf16, #tpu.memory_space<vmem>>, vector<32x256xbf16>
    tpu.vector_store %arg5[%c0_6, %c0_7], %7 {strides = array<i32>} : memref<32x256xbf16, #tpu.memory_space<vmem>>, vector<32x256xbf16>,
    return
  }
  func.func @transform_0(%arg0: i32, %arg1: i32) -> (i32, i32) {
    %c0_i32 = arith.constant 0 : i32
    %c0_i32_0 = arith.constant 0 : i32
    return %arg0, %c0_i32 : i32, i32
  }
  func.func @transform_1(%arg0: i32, %arg1: i32) -> (i32, i32) {
    %c0_i32 = arith.constant 0 : i32
    %c0_i32_0 = arith.constant 0 : i32
    return %c0_i32, %arg1 : i32, i32
  }
  func.func @transform_2(%arg0: i32, %arg1: i32) -> (i32, i32) {
    %c0_i32 = arith.constant 0 : i32
    return %arg0, %arg1 : i32, i32
  }
  func.func @transform_3(%arg0: i32, %arg1: i32) -> (i32, i32) {
    %c0_i32 = arith.constant 0 : i32
    return %arg0, %arg1 : i32, i32
  }
}

module attributes {stable_mosaic.version = 11 : i64} {
  func.func @_matmul_act_kernel(%arg0: i32, %arg1: i32, %arg2: memref<16x8192xbf16, #tpu.memory_space<vmem>>, %arg3: memref<8192x128xbf16, #tpu.memory_space<vmem>>, %arg4: memref<16x128xf32, #tpu.memory_space<vmem>>, %arg5: memref<16x128xf32, #tpu.memory_space<vmem>>) attributes {dimension_semantics = [#tpu.dimension_semantics<parallel>, #tpu.dimension_semantics<parallel>], iteration_bounds = array<i64: 1, 1>, scalar_prefetch = 0 : i64, scratch_operands = 0 : i64, tpu.core_type = #tpu.core_type<tc>, window_params = [{transform_indices = @transform_0, window_bounds = array<i64: 16, 8192>}, {transform_indices = @transform_1, window_bounds = array<i64: 8192, 128>}, {transform_indices = @transform_2, window_bounds = array<i64: 16, 128>}, {transform_indices = @transform_3, window_bounds = array<i64: 16, 128>}]} {
    %c0 = arith.constant 0 : index
    %c0_0 = arith.constant 0 : index
    %0 = vector.load %arg2[%c0, %c0_0] : memref<16x8192xbf16, #tpu.memory_space<vmem>>, vector<16x8192xbf16>
    %c0_1 = arith.constant 0 : index
    %c0_2 = arith.constant 0 : index
    %1 = vector.load %arg3[%c0_1, %c0_2] : memref<8192x128xbf16, #tpu.memory_space<vmem>>, vector<8192x128xbf16>
    %cst = arith.constant dense<0.000000e+00> : vector<16x128xf32>
    %2 = tpu.matmul %0, %1, %cst {dimension_numbers = #tpu.dot_dimension_numbers<[1], [0], [0], [1], [0, 0, 1, 1], [], []>} : vector<16x8192xbf16>, vector<8192x128xbf16>, vector<16x128xf32> -> vector<16x128xf32>
    %c0_3 = arith.constant 0 : index
    %c0_4 = arith.constant 0 : index
    %3 = vector.load %arg4[%c0_3, %c0_4] : memref<16x128xf32, #tpu.memory_space<vmem>>, vector<16x128xf32>
    tpu.vector_store %arg4[%c0_3, %c0_4], %2 {strides = array<i32>} : memref<16x128xf32, #tpu.memory_space<vmem>>, vector<16x128xf32>,
    %cst_5 = arith.constant 0.000000e+00 : f32
    %4 = vector.broadcast %cst_5 : f32 to vector<16x128xf32>
    %5 = arith.subf %4, %2 : vector<16x128xf32>
    %6 = math.exp %5 : vector<16x128xf32>
    %cst_6 = arith.constant 1.000000e+00 : f32
    %7 = vector.broadcast %cst_6 : f32 to vector<16x128xf32>
    %8 = arith.addf %7, %6 : vector<16x128xf32>
    %9 = tpu.reciprocal %8 {approx = true} : vector<16x128xf32> -> vector<16x128xf32>
    %c0_7 = arith.constant 0 : index
    %c0_8 = arith.constant 0 : index
    %10 = vector.load %arg5[%c0_7, %c0_8] : memref<16x128xf32, #tpu.memory_space<vmem>>, vector<16x128xf32>
    tpu.vector_store %arg5[%c0_7, %c0_8], %9 {strides = array<i32>} : memref<16x128xf32, #tpu.memory_space<vmem>>, vector<16x128xf32>,
    return
  }
  func.func @transform_0(%arg0: i32, %arg1: i32) -> (i32, i32) {
    %c0_i32 = arith.constant 0 : i32
    %c0_i32_0 = arith.constant 0 : i32
    return %arg0, %c0_i32 : i32, i32
  }
  func.func @transform_1(%arg0: i32, %arg1: i32) -> (i32, i32) {
    %c0_i32 = arith.constant 0 : i32
    %c0_i32_0 = arith.constant 0 : i32
    return %c0_i32, %arg1 : i32, i32
  }
  func.func @transform_2(%arg0: i32, %arg1: i32) -> (i32, i32) {
    %c0_i32 = arith.constant 0 : i32
    return %arg0, %arg1 : i32, i32
  }
  func.func @transform_3(%arg0: i32, %arg1: i32) -> (i32, i32) {
    %c0_i32 = arith.constant 0 : i32
    return %arg0, %arg1 : i32, i32
  }
}

</mosaic_0001>

<bundles_post_ra>
// kernel: discriminator_forward.5
= control target key start
LH: loop header
LB: loop body
LE: loop exit
PB: predicated region body
PF: predicated region fallthrough
CT: control target
= control target key end

     0   :  { %9 = vsyncpa [#allocation3], 0  ;;  %s1666_s0 = inlined_call_operand.vmem [shape: bf16[512,64], index: 0, kind: input, shape index: {}]   ;;  %s1667_s1 = inlined_call_operand.vmem [shape: bf16[64,128], index: 1, kind: input, shape index: {}]   ;;  %s1668_s2 = inlined_call_operand.hbm [shape: f32[512,128], index: 2, kind: output, shape index: {0}]   ;;  %s1669_s3 = inlined_call_operand.vmem [shape: bf16[512,128], index: 3, kind: output, shape index: {1}]  }
   0x1   :  { %11 = vsyncpa [#allocation3 + $0x1], 0  ;;  %s1440_s12 = smov 0   ;;  %s1442_s13 = smov 0  }
   0x2   :  { %s1444_s14 = smov 0   ;;  %s1446_s15 = smov 0  }
   0x3   :  { %s1448_s16 = smov 0   ;;  %s1450_s17 = smov 0  }
   0x4 LB: > { %s982_s18 = sadd.s32 4294967295, %s1415_s17   ;;  %s983_s19 = sadd.s32 4294967294, %s1415_s17   ;;  %s1415_s17 = sphi %s1450_s17, %s17_s17   ;;  %s1411_s16 = sphi %s1448_s16, %s1676_s16   ;;  %s1407_s15 = sphi %s1446_s15, %s1675_s15   ;;  %s1403_s14 = sphi %s1444_s14, %s1674_s14   ;;  %s1399_s13 = sphi %s1442_s13, %s1673_s13   ;;  %s1395_s12 = sphi %s1440_s12, %s1672_s12  }
   0x5   : > { %s29_s20 = sadd.s32 1, %s1411_s16  ;;  %s90_s21 = sadd.s32 1, %s1403_s14 }
   0x6   : > { %p31_p0 = scmp.ge.s32.totalorder %s29_s20, 2  ;;  %p100_p1 = scmp.ne.s32.totalorder %s1403_s14, %s1399_s13 }
   0x7   : > { %p101_p2 = scmp.eq.s32.totalorder %s982_s18, 1  ;;  %p106_p3 = scmp.ne.s32.totalorder %s1399_s13, %s1395_s12 }
   0x8   : > { %s1678_s20 = smov (%p31_p0, %s29_s20), 0  ;;  %p107_p5 = scmp.eq.s32.totalorder %s983_s19, 1 }
   0x9   : > { %p1480_p4 = por %p101_p2, %p100_p1  ;;  %s85_s23 = ssub.s32 %s1411_s16, %s1678_s20 }
   0xa   : > { %p987_p6 = scmp.ge.s32.totalorder %s1415_s17, 1  ;;  %p88_p7 = scmp.eq.s32.totalorder %s85_s23, 0 }
   0xb   : > { %p1487_p8 = por %p107_p5, %p106_p3  ;;  %p169_p9 = scmp.lt.s32.totalorder %s1415_s17, 3 }
   0xc   : > { %s1493_s25 = scalar_select %p88_p7, %s1403_s14, %s90_s21  }
   0xd   : > { %p170_p10 = pnand %p987_p6, %p169_p9 }
   0xe   : > { %s989_s28 = sshll.u32 (!%p170_p10), %s1407_s15, 5  ;;  %s192_s18 = sand.u32 (!%p170_p10), 1, %s1399_s13  }
   0xf   : > { %173 = sbr.rel (%p170_p10) target bundleno = 279 (0x117), region = 28  ;;  %p206_p11 = scmp.lt.s32.totalorder (!%p170_p10), %s989_s28, 63 }
  0x10   : > { %s988_s19 = sshll.u32 (!%p170_p10), %s192_s18, 8  ;;  %s1619_s5 = scalar_lea.sflag (!%p170_p10), [#allocation3], %s192_s18 }
  0x11   : > { %s1553_s21 = scalar_lea.vmem (!%p170_p10), [#allocation2], %s988_s19  ;;  %s1417_s7 = smov (!%p170_p10), [#allocation2]  }
  0x12   : > { %s859_s29 = sshll.u32 (!%p170_p10), %s1553_s21, 4  ;;  %s1343_s8 = sshll.u32 (!%p170_p10), %s1417_s7, 4  ;;  %s1609_s29 = int_to_ptr.vmem [resolvable:$true] %s859_s29  ;;  %s1344_s8 = int_to_ptr.vmem [resolvable:$false] %s1343_s8 }
  0x13   : > { %s1345_s9 = scalar_lea.vmem (!%p170_p10), %s1344_s8, 8192  ;;  %p1346_p1 = scmp.lt.s32.totalorder (!%p170_p10), %s1609_s29, %s1344_s8 }
  0x14   : > { %v1319_v0 = vld [vmem:[%s1667_s1 + $0x18] sm:$0xff]   ;;  %v1320_v1 = vld [vmem:[%s1667_s1 + $0x10] sm:$0xff]   ;;  %s1680_s28 = smov (!%p206_p11, %s989_s28), 63  ;;  %v1321_v2 = vld [vmem:[%s1667_s1 + $0x8] sm:$0xff]   ;;  %vm370_vm0 = vcmask 523264  }
  0x15   : > { %1214 = vmatprep.subr.bf16.mxu0 %v1319_v0  ;;  %1254 = vmatprep.subr.bf16.mxu1 %v1319_v0  ;;  %s990_s6 = sshll.u32 %s1680_s28, 2  ;;  %v1322_v3 = vld [vmem:[%s1667_s1] sm:$0xff]   ;;  %s1098_s28 = sshll.u32 %s1407_s15, 12 }
  0x16   : > { %1215 = vmatpush3.bf16.msra.mxu0 %v1319_v0  ;;  %1258 = vmatpush3.bf16.msra.mxu1 %v1319_v0  ;;  %s1516_s11 = scalar_lea.vmem %s1666_s0, %s990_s6  ;;  %s1564_s27 = scalar_lea.vmem %s1669_s3, %s990_s6 }
  0x17   : > { %1216 = vmatprep.subr.bf16.mxu0 %v1320_v1  ;;  %1255 = vmatprep.subr.bf16.mxu1 %v1320_v1  ;;  %v1323_v4 = vld [vmem:[%s1516_s11] sm:$0xff]   ;;  %v1325_v6 = vld [vmem:[%s1516_s11 + $0x8] sm:$0xff]   ;;  %v1327_v8 = vld [vmem:[%s1516_s11 + $0x10] sm:$0xff]   ;;  %s1607_s15 = scalar_lea.hbm %s1668_s2, %s1098_s28  ;;  %s1339_s6 = scalar_lea.vmem %s1609_s29, 4096 }
  0x18   : > { %v1324_v5 = vld [vmem:[%s1516_s11 + $0x40] sm:$0xff]   ;;  %1222 = vmatprep.mubr.msk.bf16.mxu0 %vm370_vm0, %v1323_v4  ;;  %v1326_v7 = vld [vmem:[%s1516_s11 + $0x48] sm:$0xff]   ;;  %v1328_v9 = vld [vmem:[%s1516_s11 + $0x50] sm:$0xff]   ;;  %p1340_p12 = scmp.ne.s32.totalorder %s1609_s29, %s1339_s6  ;;  %p1347_p2 = scmp.lt.s32.totalorder %s1345_s9, %s1339_s6 }
  0x19   : > { %1238 = vmatprep.mubr.msk.bf16.mxu1 %vm370_vm0, %v1324_v5  ;;  %v1329_v10 = vld [vmem:[%s1516_s11 + $0x18] sm:$0xff]   ;;  %v1331_v12 = vld [vmem:[%s1516_s11 + $0x20] sm:$0xff]   ;;  %v1333_v14 = vld [vmem:[%s1516_s11 + $0x28] sm:$0xff]  }
  0x1a   : > { %1217 = vmatpush3.bf16.msra.mxu0 %v1320_v1  ;;  %1259 = vmatpush3.bf16.msra.mxu1 %v1320_v1  ;;  %v1330_v11 = vld [vmem:[%s1516_s11 + $0x58] sm:$0xff]   ;;  %v1332_v13 = vld [vmem:[%s1516_s11 + $0x60] sm:$0xff]   ;;  %v1334_v15 = vld [vmem:[%s1516_s11 + $0x68] sm:$0xff]   ;;  %p1341_p13 = pnand %p1340_p12, %p1480_p4  ;;  %p1348_p3 = por %p1347_p2, %p1346_p1 }
  0x1b   : > { %1218 = vmatprep.subr.bf16.mxu0 %v1321_v2  ;;  %1256 = vmatprep.subr.bf16.mxu1 %v1321_v2  ;;  %v1335_v16 = vld [vmem:[%s1516_s11 + $0x30] sm:$0xff]   ;;  %v1337_v18 = vld [vmem:[%s1516_s11 + $0x38] sm:$0xff]  }
  0x1c   : > { %v1336_v17 = vld [vmem:[%s1516_s11 + $0x70] sm:$0xff]   ;;  %v1338_v19 = vld [vmem:[%s1516_s11 + $0x78] sm:$0xff]   ;;  %p1342_p0 = pneg %p1341_p13 }
  0x1e   : > { %1219 = vmatpush3.bf16.msra.mxu0 %v1321_v2  ;;  %1260 = vmatpush3.bf16.msra.mxu1 %v1321_v2  ;;  %p1349_p5 = pnand %p1348_p3, %p1342_p0 }
  0x1f   : > { %1220 = vmatprep.subr.bf16.mxu0 %v1322_v3  ;;  %1257 = vmatprep.subr.bf16.mxu1 %v1322_v3 }
  0x22   : > { %1221 = vmatpush3.bf16.msra.mxu0 %v1322_v3  ;;  %1261 = vmatpush3.bf16.msra.mxu1 %v1322_v3 }
  0x25   : > { %1223 = vmatmul.mubr.msk.bf16.vlgmr.msra.gmra.mxu0 %vm370_vm0, %v1325_v6  ;;  %1239 = vmatmul.mubr.msk.bf16.vlgmr.msra.gmra.mxu1 %vm370_vm0, %v1326_v7 }
  0x26   : > { %1226 = vmatprep.mubr.msk.bf16.mxu0 %vm370_vm0, %v1327_v8  ;;  %1242 = vmatprep.mubr.msk.bf16.mxu1 %vm370_vm0, %v1328_v9 }
  0x2d   : > { %1227 = vmatmul.mubr.msk.bf16.gmra.mxu0 %vm370_vm0, %v1329_v10  ;;  %1243 = vmatmul.mubr.msk.bf16.gmra.mxu1 %vm370_vm0, %v1330_v11 }
  0x2e   : > { %1230 = vmatprep.mubr.msk.bf16.mxu0 %vm370_vm0, %v1331_v12  ;;  %1246 = vmatprep.mubr.msk.bf16.mxu1 %vm370_vm0, %v1332_v13 }
  0x35   : > { %1231 = vmatmul.mubr.msk.bf16.gmra.mxu0 %vm370_vm0, %v1333_v14  ;;  %1247 = vmatmul.mubr.msk.bf16.gmra.mxu1 %vm370_vm0, %v1334_v15 }
  0x36   : > { %1234 = vmatprep.mubr.msk.bf16.mxu0 %vm370_vm0, %v1335_v16  ;;  %1250 = vmatprep.mubr.msk.bf16.mxu1 %vm370_vm0, %v1336_v17 }
  0x3d   : > { %1235 = vmatmul.mubr.msk.bf16.gmra.mxu0 %vm370_vm0, %v1337_v18  ;;  %1251 = vmatmul.mubr.msk.bf16.gmra.mxu1 %vm370_vm0, %v1338_v19 }
  0xe5   : > { %v1224_v20 = vpop.f32.mrf.mxu0  ;;  %v1240_v21 = vpop.f32.mrf.mxu1 }
  0xe6   : > { %v582_v22 = vmul.f32 0.2, %v1224_v20  ;;  %v598_v23 = vmul.f32 0.2, %v1240_v21 }
  0xe7   : > { %v453_v24 = vpop.f32.mrf.mxu0  ;;  %v517_v25 = vpop.f32.mrf.mxu1 }
  0xe8   : > { %v614_v26 = vmax.f32 %v1224_v20, %v582_v22  ;;  %v630_v27 = vmax.f32 %v1240_v21, %v598_v23  ;;  %v580_v28 = vmul.f32 0.2, %v453_v24  ;;  %v596_v29 = vmul.f32 0.2, %v517_v25 }
  0xe9   : > { %v1225_v30 = vpop.f32.mrf.mxu0  ;;  %v1241_v31 = vpop.f32.mrf.mxu1 }
  0xea   : > { %646 = vst [vmem:[%s1553_s21 + $0x10] sm:$0xff] %v614_v26  ;;  %662 = vst [vmem:[%s1553_s21 + $0x90] sm:$0xff] %v630_v27  ;;  %v612_v32 = vmax.f32 %v453_v24, %v580_v28  ;;  %v628_v33 = vmax.f32 %v517_v25, %v596_v29  ;;  %v583_v34 = vmul.f32 0.2, %v1225_v30  ;;  %v599_v35 = vmul.f32 0.2, %v1241_v31 }
  0xeb   : > { %v456_v36 = vpop.f32.mrf.mxu0  ;;  %v520_v37 = vpop.f32.mrf.mxu1 }
  0xec   : > { %644 = vst [vmem:[%s1553_s21] sm:$0xff] %v612_v32  ;;  %660 = vst [vmem:[%s1553_s21 + $0x80] sm:$0xff] %v628_v33  ;;  %v615_v38 = vmax.f32 %v1225_v30, %v583_v34  ;;  %v631_v39 = vmax.f32 %v1241_v31, %v599_v35  ;;  %v581_v40 = vmul.f32 0.2, %v456_v36  ;;  %v597_v41 = vmul.f32 0.2, %v520_v37 }
  0xed   : > { %v1228_v42 = vpop.f32.mrf.mxu0  ;;  %v1244_v43 = vpop.f32.mrf.mxu1 }
  0xee   : > { %647 = vst [vmem:[%s1553_s21 + $0x18] sm:$0xff] %v615_v38  ;;  %v1107_v44 = vpack.c.bf16 %v615_v38, %v614_v26  ;;  %663 = vst [vmem:[%s1553_s21 + $0x98] sm:$0xff] %v631_v39  ;;  %v1147_v45 = vpack.c.bf16 %v631_v39, %v630_v27  ;;  %v613_v46 = vmax.f32 %v456_v36, %v581_v40  ;;  %v586_v48 = vmul.f32 0.2, %v1228_v42 }
  0xef   : > { %v629_v47 = vmax.f32 %v520_v37, %v597_v41  ;;  %v602_v49 = vmul.f32 0.2, %v1244_v43  ;;  %v469_v50 = vpop.f32.mrf.mxu0  ;;  %v533_v51 = vpop.f32.mrf.mxu1 }
  0xf0   : > { %1179 = vst [vmem:[%s1564_s27 + $0x8] sm:$0xff] %v1107_v44   ;;  %1187 = vst [vmem:[%s1564_s27 + $0x48] sm:$0xff] %v1147_v45   ;;  %v1102_v52 = vpack.c.bf16 %v613_v46, %v612_v32  ;;  %v584_v54 = vmul.f32 0.2, %v469_v50  ;;  %v600_v55 = vmul.f32 0.2, %v533_v51  ;;  %v618_v56 = vmax.f32 %v1228_v42, %v586_v48 }
  0xf1   : > { %645 = vst [vmem:[%s1553_s21 + $0x8] sm:$0xff] %v613_v46  ;;  %661 = vst [vmem:[%s1553_s21 + $0x88] sm:$0xff] %v629_v47  ;;  %v1142_v53 = vpack.c.bf16 %v629_v47, %v628_v33  ;;  %v634_v57 = vmax.f32 %v1244_v43, %v602_v49  ;;  %v1229_v58 = vpop.f32.mrf.mxu0  ;;  %v1245_v59 = vpop.f32.mrf.mxu1 }
  0xf2   : > { %1103 = vst [vmem:[%s1564_s27] sm:$0xff] %v1102_v52   ;;  %v616_v60 = vmax.f32 %v469_v50, %v584_v54  ;;  %v632_v61 = vmax.f32 %v533_v51, %v600_v55  ;;  %v587_v62 = vmul.f32 0.2, %v1229_v58  ;;  %v603_v63 = vmul.f32 0.2, %v1245_v59  ;;  %650 = vst [vmem:[%s1553_s21 + $0x30] sm:$0xff] %v618_v56 }
  0xf3   : > { %1186 = vst [vmem:[%s1564_s27 + $0x40] sm:$0xff] %v1142_v53   ;;  %666 = vst [vmem:[%s1553_s21 + $0xb0] sm:$0xff] %v634_v57  ;;  %v472_v0 = vpop.f32.mrf.mxu0  ;;  %v536_v1 = vpop.f32.mrf.mxu1 }
  0xf4   : > { %648 = vst [vmem:[%s1553_s21 + $0x20] sm:$0xff] %v616_v60  ;;  %664 = vst [vmem:[%s1553_s21 + $0xa0] sm:$0xff] %v632_v61  ;;  %v619_v2 = vmax.f32 %v1229_v58, %v587_v62  ;;  %v635_v3 = vmax.f32 %v1245_v59, %v603_v63  ;;  %v585_v4 = vmul.f32 0.2, %v472_v0  ;;  %v601_v5 = vmul.f32 0.2, %v536_v1 }
  0xf5   : > { %v1232_v6 = vpop.f32.mrf.mxu0  ;;  %v1248_v7 = vpop.f32.mrf.mxu1 }
  0xf6   : > { %651 = vst [vmem:[%s1553_s21 + $0x38] sm:$0xff] %v619_v2  ;;  %v1117_v8 = vpack.c.bf16 %v619_v2, %v618_v56  ;;  %667 = vst [vmem:[%s1553_s21 + $0xb8] sm:$0xff] %v635_v3  ;;  %v1157_v9 = vpack.c.bf16 %v635_v3, %v634_v57  ;;  %v617_v10 = vmax.f32 %v472_v0, %v585_v4  ;;  %v590_v12 = vmul.f32 0.2, %v1232_v6 }
  0xf7   : > { %v633_v11 = vmax.f32 %v536_v1, %v601_v5  ;;  %v606_v13 = vmul.f32 0.2, %v1248_v7  ;;  %v485_v14 = vpop.f32.mrf.mxu0  ;;  %v549_v15 = vpop.f32.mrf.mxu1 }
  0xf8   : > { %1181 = vst [vmem:[%s1564_s27 + $0x18] sm:$0xff] %v1117_v8   ;;  %1189 = vst [vmem:[%s1564_s27 + $0x58] sm:$0xff] %v1157_v9   ;;  %v1112_v16 = vpack.c.bf16 %v617_v10, %v616_v60  ;;  %v588_v18 = vmul.f32 0.2, %v485_v14  ;;  %v604_v19 = vmul.f32 0.2, %v549_v15  ;;  %v622_v20 = vmax.f32 %v1232_v6, %v590_v12 }
  0xf9   : > { %649 = vst [vmem:[%s1553_s21 + $0x28] sm:$0xff] %v617_v10  ;;  %665 = vst [vmem:[%s1553_s21 + $0xa8] sm:$0xff] %v633_v11  ;;  %v1152_v17 = vpack.c.bf16 %v633_v11, %v632_v61  ;;  %v638_v21 = vmax.f32 %v1248_v7, %v606_v13  ;;  %v1233_v22 = vpop.f32.mrf.mxu0  ;;  %v1249_v23 = vpop.f32.mrf.mxu1 }
  0xfa   : > { %1180 = vst [vmem:[%s1564_s27 + $0x10] sm:$0xff] %v1112_v16   ;;  %v620_v24 = vmax.f32 %v485_v14, %v588_v18  ;;  %v636_v25 = vmax.f32 %v549_v15, %v604_v19  ;;  %v591_v26 = vmul.f32 0.2, %v1233_v22  ;;  %v607_v27 = vmul.f32 0.2, %v1249_v23  ;;  %654 = vst [vmem:[%s1553_s21 + $0x50] sm:$0xff] %v622_v20 }
  0xfb   : > { %1188 = vst [vmem:[%s1564_s27 + $0x50] sm:$0xff] %v1152_v17   ;;  %670 = vst [vmem:[%s1553_s21 + $0xd0] sm:$0xff] %v638_v21  ;;  %v488_v28 = vpop.f32.mrf.mxu0  ;;  %v552_v29 = vpop.f32.mrf.mxu1 }
  0xfc   : > { %652 = vst [vmem:[%s1553_s21 + $0x40] sm:$0xff] %v620_v24  ;;  %668 = vst [vmem:[%s1553_s21 + $0xc0] sm:$0xff] %v636_v25  ;;  %v623_v30 = vmax.f32 %v1233_v22, %v591_v26  ;;  %v639_v31 = vmax.f32 %v1249_v23, %v607_v27  ;;  %v589_v32 = vmul.f32 0.2, %v488_v28  ;;  %v605_v33 = vmul.f32 0.2, %v552_v29 }
  0xfd   : > { %v1236_v34 = vpop.f32.mrf.mxu0  ;;  %v1252_v35 = vpop.f32.mrf.mxu1 }
  0xfe   : > { %655 = vst [vmem:[%s1553_s21 + $0x58] sm:$0xff] %v623_v30  ;;  %v1127_v36 = vpack.c.bf16 %v623_v30, %v622_v20  ;;  %671 = vst [vmem:[%s1553_s21 + $0xd8] sm:$0xff] %v639_v31  ;;  %v1167_v37 = vpack.c.bf16 %v639_v31, %v638_v21  ;;  %v621_v38 = vmax.f32 %v488_v28, %v589_v32  ;;  %v594_v40 = vmul.f32 0.2, %v1236_v34 }
  0xff   : > { %v637_v39 = vmax.f32 %v552_v29, %v605_v33  ;;  %v610_v41 = vmul.f32 0.2, %v1252_v35  ;;  %v501_v42 = vpop.f32.mrf.mxu0  ;;  %v565_v43 = vpop.f32.mrf.mxu1 }
 0x100   : > { %1183 = vst [vmem:[%s1564_s27 + $0x28] sm:$0xff] %v1127_v36   ;;  %1191 = vst [vmem:[%s1564_s27 + $0x68] sm:$0xff] %v1167_v37   ;;  %v1122_v44 = vpack.c.bf16 %v621_v38, %v620_v24  ;;  %v592_v46 = vmul.f32 0.2, %v501_v42  ;;  %v608_v47 = vmul.f32 0.2, %v565_v43  ;;  %v626_v48 = vmax.f32 %v1236_v34, %v594_v40 }
 0x101   : > { %653 = vst [vmem:[%s1553_s21 + $0x48] sm:$0xff] %v621_v38  ;;  %669 = vst [vmem:[%s1553_s21 + $0xc8] sm:$0xff] %v637_v39  ;;  %v1162_v45 = vpack.c.bf16 %v637_v39, %v636_v25  ;;  %v642_v49 = vmax.f32 %v1252_v35, %v610_v41  ;;  %v1237_v50 = vpop.f32.mrf.mxu0  ;;  %v1253_v51 = vpop.f32.mrf.mxu1 }
 0x102   : > { %1182 = vst [vmem:[%s1564_s27 + $0x20] sm:$0xff] %v1122_v44   ;;  %v624_v52 = vmax.f32 %v501_v42, %v592_v46  ;;  %v640_v53 = vmax.f32 %v565_v43, %v608_v47  ;;  %v595_v54 = vmul.f32 0.2, %v1237_v50  ;;  %v611_v55 = vmul.f32 0.2, %v1253_v51  ;;  %658 = vst [vmem:[%s1553_s21 + $0x70] sm:$0xff] %v626_v48 }
 0x103   : > { %1190 = vst [vmem:[%s1564_s27 + $0x60] sm:$0xff] %v1162_v45   ;;  %674 = vst [vmem:[%s1553_s21 + $0xf0] sm:$0xff] %v642_v49  ;;  %v504_v56 = vpop.f32.mrf.mxu0  ;;  %v568_v57 = vpop.f32.mrf.mxu1 }
 0x104   : > { %656 = vst [vmem:[%s1553_s21 + $0x60] sm:$0xff] %v624_v52  ;;  %672 = vst [vmem:[%s1553_s21 + $0xe0] sm:$0xff] %v640_v53  ;;  %v627_v58 = vmax.f32 %v1237_v50, %v595_v54  ;;  %v643_v59 = vmax.f32 %v1253_v51, %v611_v55  ;;  %v593_v60 = vmul.f32 0.2, %v504_v56  ;;  %v609_v61 = vmul.f32 0.2, %v568_v57 }
 0x106   : > { %659 = vst [vmem:[%s1553_s21 + $0x78] sm:$0xff] %v627_v58  ;;  %v1137_v62 = vpack.c.bf16 %v627_v58, %v626_v48  ;;  %675 = vst [vmem:[%s1553_s21 + $0xf8] sm:$0xff] %v643_v59  ;;  %v1177_v63 = vpack.c.bf16 %v643_v59, %v642_v49  ;;  %v625_v0 = vmax.f32 %v504_v56, %v593_v60 }
 0x107   : > { %v641_v1 = vmax.f32 %v568_v57, %v609_v61 }
 0x108   : > { %1185 = vst [vmem:[%s1564_s27 + $0x38] sm:$0xff] %v1137_v62   ;;  %1193 = vst [vmem:[%s1564_s27 + $0x78] sm:$0xff] %v1177_v63   ;;  %v1132_v2 = vpack.c.bf16 %v625_v0, %v624_v52 }
 0x109   : > { %657 = vst [vmem:[%s1553_s21 + $0x68] sm:$0xff] %v625_v0  ;;  %673 = vst [vmem:[%s1553_s21 + $0xe8] sm:$0xff] %v641_v1  ;;  %v1172_v3 = vpack.c.bf16 %v641_v1, %v640_v53 }
 0x10a   : > { %1352 = shalt.err (!%p1349_p5)
}
 0x10b   : > { %s1353_s10 = scalar_lea.hbm %s1607_s15, 4096  ;;  %s1357_s19 = scalar_lea.hbm %s1668_s2, 8192 }
 0x10c   : > { %p1354_p6 = scmp.ne.s32.totalorder %s1607_s15, %s1353_s10  ;;  %p1358_p10 = scmp.lt.s32.totalorder %s1607_s15, %s1668_s2 }
 0x10d   : > { %p1359_p11 = scmp.lt.s32.totalorder %s1357_s19, %s1353_s10 }
 0x10e   : > { %p1355_p7 = pnand %p1354_p6, %p1480_p4 }
 0x10f   : > { %p1360_p12 = por %p1359_p11, %p1358_p10 }
 0x110   : > { %p1356_p9 = pneg %p1355_p7 }
 0x112   : > { %p1361_p13 = pnand %p1360_p12, %p1356_p9 }
 0x114   : > { %1364 = shalt.err (!%p1361_p13)
}
 0x115   : > { %s1418_s26 = smov 128   ;;  %s1419_s28 = smov 8   ;;  %1184 = vst [vmem:[%s1564_s27 + $0x30] sm:$0xff] %v1132_v2   ;;  %1192 = vst [vmem:[%s1564_s27 + $0x70] sm:$0xff] %v1172_v3  }
 0x116   : > { %1262 = dma.vmem_to_hbm [thread:$0]  (%p1480_p4), %s1609_s29, 4096, %s1607_s15, %s1619_s5, %s1418_s26, %s1418_s26, %s1419_s28  }
 0x117 PF: > { %p1268_p0 = scmp.ge.s32.totalorder %s1415_s17, 2  ;;  %s878_s30 = sand.u32 1, %s1395_s12  }
 0x118   : > { %s879_s4 = scalar_lea.sflag [#allocation3], %s878_s30 }
 0x119   : > { %p1265_p1 = pnand %p1268_p0, %p1487_p8 }
 0x11b   : > { %p1266_p2 = pneg %p1265_p1 }
 0x11d   : > { %1390 = dma.done.wait (%p1266_p2), %s879_s4, 4096  }
 0x11e   : > { %1392 = vsyncadd (%p1266_p2), %s879_s4, 4294963200  ;;  %s17_s17 = sadd.s32 1, %s1415_s17   ;;  %s1672_s12 = smov %s1399_s13 }
 0x11f   : > { %p14_p3 = scmp.ge.s32.totalorder %s17_s17, 4   ;;  %s1673_s13 = smov %s1403_s14 }
 0x120   : > { %s1674_s14 = smov %s1493_s25  ;;  %s1675_s15 = smov %s1411_s16 }
 0x121   : > { %s1676_s16 = smov %s1678_s20  ;;  %16 = sbr.rel (!%p14_p3) target bundleno = 4 (0x4), region = 78 }
 0x126   :  { %895 = vsyncpa [#allocation3], 1 }
 0x127   :  { %897 = vsyncpa [#allocation3 + $0x1], 1 }

// kernel: discriminator_forward.6
= control target key start
LH: loop header
LB: loop body
LE: loop exit
PB: predicated region body
PF: predicated region fallthrough
CT: control target
= control target key end

     0   :  { %s2619_s0 = inlined_call_operand.vmem [shape: bf16[128,1024], index: 0, kind: input, shape index: {}]   ;;  %s2620_s1 = inlined_call_operand.vmem [shape: bf16[1024,128], index: 1, kind: input, shape index: {}]   ;;  %s2621_s2 = inlined_call_operand.hbm [shape: f32[128,128], index: 2, kind: output, shape index: {0}]   ;;  %s2622_s3 = inlined_call_operand.vmem [shape: bf16[128,128], index: 3, kind: output, shape index: {1}]  }
   0x1   :  { %v1913_v0 = vld [vmem:[%s2620_s1 + $0x78] sm:$0xff]   ;;  %v1917_v4 = vld [vmem:[%s2620_s1 + $0x70] sm:$0xff]   ;;  %v1921_v8 = vld [vmem:[%s2620_s1 + $0x68] sm:$0xff]  }
   0x2   :  { %v1914_v1 = vld [vmem:[%s2620_s1 + $0xf8] sm:$0xff]   ;;  %1654 = vmatprep.subr.bf16.mxu0 %v1913_v0  ;;  %v1918_v5 = vld [vmem:[%s2620_s1 + $0xf0] sm:$0xff]   ;;  %v1922_v9 = vld [vmem:[%s2620_s1 + $0xe8] sm:$0xff]  }
   0x3   :  { %v1915_v2 = vld [vmem:[%s2620_s1 + $0x38] sm:$0xff]   ;;  %1718 = vmatprep.subr.bf16.mxu1 %v1914_v1  ;;  %v1919_v6 = vld [vmem:[%s2620_s1 + $0x30] sm:$0xff]   ;;  %v1923_v10 = vld [vmem:[%s2620_s1 + $0x28] sm:$0xff]  }
   0x4   :  { %v1916_v3 = vld [vmem:[%s2620_s1 + $0xb8] sm:$0xff]   ;;  %1655 = vmatpush3.bf16.msra.mxu0 %v1915_v2  ;;  %v1920_v7 = vld [vmem:[%s2620_s1 + $0xb0] sm:$0xff]   ;;  %v1924_v11 = vld [vmem:[%s2620_s1 + $0xa8] sm:$0xff]  }
   0x5   :  { %1719 = vmatpush3.bf16.msra.mxu1 %v1916_v3  ;;  %1656 = vmatprep.subr.bf16.mxu0 %v1917_v4  ;;  %v1925_v12 = vld [vmem:[%s2620_s1 + $0x60] sm:$0xff]   ;;  %v1929_v16 = vld [vmem:[%s2620_s1 + $0x58] sm:$0xff]   ;;  %v1933_v20 = vld [vmem:[%s2620_s1 + $0x50] sm:$0xff]  }
   0x6   :  { %1720 = vmatprep.subr.bf16.mxu1 %v1918_v5  ;;  %v1926_v13 = vld [vmem:[%s2620_s1 + $0xe0] sm:$0xff]   ;;  %v1930_v17 = vld [vmem:[%s2620_s1 + $0xd8] sm:$0xff]   ;;  %v1934_v21 = vld [vmem:[%s2620_s1 + $0xd0] sm:$0xff]  }
   0x7   :  { %v1927_v14 = vld [vmem:[%s2620_s1 + $0x20] sm:$0xff]   ;;  %v1931_v18 = vld [vmem:[%s2620_s1 + $0x18] sm:$0xff]   ;;  %v1935_v22 = vld [vmem:[%s2620_s1 + $0x10] sm:$0xff]  }
   0x8   :  { %1657 = vmatpush3.bf16.msra.mxu0 %v1919_v6  ;;  %v1928_v15 = vld [vmem:[%s2620_s1 + $0xa0] sm:$0xff]   ;;  %v1932_v19 = vld [vmem:[%s2620_s1 + $0x98] sm:$0xff]   ;;  %v1936_v23 = vld [vmem:[%s2620_s1 + $0x90] sm:$0xff]  }
   0x9   :  { %1721 = vmatpush3.bf16.msra.mxu1 %v1920_v7  ;;  %1658 = vmatprep.subr.bf16.mxu0 %v1921_v8  ;;  %v1937_v24 = vld [vmem:[%s2620_s1 + $0x48] sm:$0xff]   ;;  %v1941_v28 = vld [vmem:[%s2620_s1 + $0x40] sm:$0xff]   ;;  %v1945_v40 = vld [vmem:[%s2620_s1 + $0x178] sm:$0xff]  }
   0xa   :  { %1722 = vmatprep.subr.bf16.mxu1 %v1922_v9  ;;  %v1938_v25 = vld [vmem:[%s2620_s1 + $0xc8] sm:$0xff]   ;;  %v1942_v29 = vld [vmem:[%s2620_s1 + $0xc0] sm:$0xff]   ;;  %v1946_v41 = vld [vmem:[%s2620_s1 + $0x138] sm:$0xff]  }
   0xb   :  { %v1939_v26 = vld [vmem:[%s2620_s1 + $0x8] sm:$0xff]   ;;  %v1943_v30 = vld [vmem:[%s2620_s1] sm:$0xff]   ;;  %v1947_v42 = vld [vmem:[%s2620_s1 + $0x1f8] sm:$0xff]  }
   0xc   :  { %1659 = vmatpush3.bf16.msra.mxu0 %v1923_v10  ;;  %v1940_v27 = vld [vmem:[%s2620_s1 + $0x88] sm:$0xff]   ;;  %v1944_v31 = vld [vmem:[%s2620_s1 + $0x80] sm:$0xff]   ;;  %v1948_v43 = vld [vmem:[%s2620_s1 + $0x1b8] sm:$0xff]  }
   0xd   :  { %1723 = vmatpush3.bf16.msra.mxu1 %v1924_v11  ;;  %1660 = vmatprep.subr.bf16.mxu0 %v1925_v12  ;;  %v15_v32 = vld [vmem:[%s2619_s0] sm:$0xff]  ;;  %v16_v34 = vld [vmem:[%s2619_s0 + $0x8] sm:$0xff]  ;;  %v1949_v50 = vld [vmem:[%s2620_s1 + $0x170] sm:$0xff]  }
   0xe   :  { %1724 = vmatprep.subr.bf16.mxu1 %v1926_v13  ;;  %v19_v33 = vld [vmem:[%s2619_s0 + $0x20] sm:$0xff]  ;;  %v20_v37 = vld [vmem:[%s2619_s0 + $0x28] sm:$0xff]  ;;  %v1950_v52 = vld [vmem:[%s2620_s1 + $0x130] sm:$0xff]  }
   0xf   :  { %v1447_v35 = vcombine.low %v15_v32, %v19_v33  ;;  %v1448_v36 = vcombine.high %v15_v32, %v19_v33  ;;  %v1449_v38 = vcombine.low %v16_v34, %v20_v37  ;;  %v1450_v39 = vcombine.high %v16_v34, %v20_v37  ;;  %v23_v44 = vld [vmem:[%s2619_s0 + $0x40] sm:$0xff]  ;;  %v24_v47 = vld [vmem:[%s2619_s0 + $0x48] sm:$0xff]  ;;  %v1951_v54 = vld [vmem:[%s2620_s1 + $0x1f0] sm:$0xff]  }
  0x10   :  { %1661 = vmatpush3.bf16.msra.mxu0 %v1927_v14  ;;  %v27_v45 = vld [vmem:[%s2619_s0 + $0x60] sm:$0xff]  ;;  %v28_v48 = vld [vmem:[%s2619_s0 + $0x68] sm:$0xff]  ;;  %v1952_v55 = vld [vmem:[%s2620_s1 + $0x1b0] sm:$0xff]  }
  0x11   :  { %1725 = vmatpush3.bf16.msra.mxu1 %v1928_v15  ;;  %1662 = vmatprep.subr.bf16.mxu0 %v1929_v16  ;;  %v1456_v46 = vcombine.high %v23_v44, %v27_v45  ;;  %v1458_v49 = vcombine.high %v24_v47, %v28_v48  ;;  %v1455_v51 = vcombine.low %v23_v44, %v27_v45  ;;  %v31_v56 = vld [vmem:[%s2619_s0 + $0x80] sm:$0xff]  ;;  %v32_v58 = vld [vmem:[%s2619_s0 + $0x88] sm:$0xff]  ;;  %v1967_v32 = vld [vmem:[%s2620_s1 + $0x1d0] sm:$0xff]  }
  0x12   :  { %1726 = vmatprep.subr.bf16.mxu1 %v1930_v17  ;;  %943 = vmatprep.mubr.bf16.mxu0 %v1448_v36  ;;  %v1457_v53 = vcombine.low %v24_v47, %v28_v48  ;;  %v35_v57 = vld [vmem:[%s2619_s0 + $0xa0] sm:$0xff]  ;;  %v36_v59 = vld [vmem:[%s2619_s0 + $0xa8] sm:$0xff]  ;;  %v1968_v33 = vld [vmem:[%s2620_s1 + $0x190] sm:$0xff]  }
  0x13   :  { %1040 = vmatprep.mubr.bf16.mxu1 %v1450_v39  ;;  %v1464_v60 = vcombine.high %v31_v56, %v35_v57  ;;  %v1466_v61 = vcombine.high %v32_v58, %v36_v59  ;;  %v1953_v62 = vld [vmem:[%s2620_s1 + $0x168] sm:$0xff]   ;;  %v1463_v2 = vcombine.low %v31_v56, %v35_v57  ;;  %v39_v3 = vld [vmem:[%s2619_s0 + $0xc0] sm:$0xff]  ;;  %v1465_v6 = vcombine.low %v32_v58, %v36_v59 }
  0x14   :  { %1663 = vmatpush3.bf16.msra.mxu0 %v1931_v18  ;;  %v1954_v63 = vld [vmem:[%s2620_s1 + $0x128] sm:$0xff]   ;;  %v43_v4 = vld [vmem:[%s2619_s0 + $0xe0] sm:$0xff]  ;;  %v1961_v18 = vld [vmem:[%s2620_s1 + $0x158] sm:$0xff]  }
  0x15   :  { %1727 = vmatpush3.bf16.msra.mxu1 %v1932_v19  ;;  %1664 = vmatprep.subr.bf16.mxu0 %v1933_v20  ;;  %v1955_v0 = vld [vmem:[%s2620_s1 + $0x1e8] sm:$0xff]   ;;  %v1472_v7 = vcombine.high %v39_v3, %v43_v4  ;;  %v1957_v10 = vld [vmem:[%s2620_s1 + $0x160] sm:$0xff]   ;;  %v1471_v19 = vcombine.low %v39_v3, %v43_v4  ;;  %v1962_v20 = vld [vmem:[%s2620_s1 + $0x118] sm:$0xff]  }
  0x16   :  { %1728 = vmatprep.subr.bf16.mxu1 %v1934_v21  ;;  %v1956_v1 = vld [vmem:[%s2620_s1 + $0x1a8] sm:$0xff]   ;;  %v1958_v11 = vld [vmem:[%s2620_s1 + $0x120] sm:$0xff]  }
  0x17   :  { %v40_v5 = vld [vmem:[%s2619_s0 + $0xc8] sm:$0xff]  ;;  %v1959_v12 = vld [vmem:[%s2620_s1 + $0x1e0] sm:$0xff]  }
  0x18   :  { %1665 = vmatpush3.bf16.msra.mxu0 %v1935_v22  ;;  %v44_v8 = vld [vmem:[%s2619_s0 + $0xe8] sm:$0xff]  ;;  %v1960_v13 = vld [vmem:[%s2620_s1 + $0x1a0] sm:$0xff]  }
  0x19   :  { %1729 = vmatpush3.bf16.msra.mxu1 %v1936_v23  ;;  %1666 = vmatprep.subr.bf16.mxu0 %v1937_v24  ;;  %v1474_v9 = vcombine.high %v40_v5, %v44_v8  ;;  %v47_v14 = vld [vmem:[%s2619_s0 + $0x100] sm:$0xff]  ;;  %v48_v16 = vld [vmem:[%s2619_s0 + $0x108] sm:$0xff]  ;;  %v1473_v21 = vcombine.low %v40_v5, %v44_v8  ;;  %v1963_v23 = vld [vmem:[%s2620_s1 + $0x1d8] sm:$0xff]  }
  0x1a   :  { %1730 = vmatprep.subr.bf16.mxu1 %v1938_v25  ;;  %v51_v15 = vld [vmem:[%s2619_s0 + $0x120] sm:$0xff]  ;;  %v52_v17 = vld [vmem:[%s2619_s0 + $0x128] sm:$0xff]  ;;  %v1964_v25 = vld [vmem:[%s2620_s1 + $0x198] sm:$0xff]  }
  0x1b   :  { %v1480_v22 = vcombine.high %v47_v14, %v51_v15  ;;  %v1482_v24 = vcombine.high %v48_v16, %v52_v17  ;;  %v1479_v34 = vcombine.low %v47_v14, %v51_v15  ;;  %v1970_v39 = vld [vmem:[%s2620_s1 + $0x108] sm:$0xff]   ;;  %v1974_v48 = vld [vmem:[%s2620_s1 + $0x100] sm:$0xff]  }
  0x1c   :  { %1667 = vmatpush3.bf16.msra.mxu0 %v1939_v26  ;;  %v55_v26 = vld [vmem:[%s2619_s0 + $0x140] sm:$0xff]  ;;  %v64_v44 = vld [vmem:[%s2619_s0 + $0x188] sm:$0xff] }
  0x1d   :  { %1731 = vmatpush3.bf16.msra.mxu1 %v1940_v27  ;;  %1668 = vmatprep.subr.bf16.mxu0 %v1941_v28  ;;  %v59_v27 = vld [vmem:[%s2619_s0 + $0x160] sm:$0xff]  ;;  %v1965_v28 = vld [vmem:[%s2620_s1 + $0x150] sm:$0xff]   ;;  %v68_v45 = vld [vmem:[%s2619_s0 + $0x1a8] sm:$0xff] }
  0x1e   :  { %1732 = vmatprep.subr.bf16.mxu1 %v1942_v29  ;;  %v56_v29 = vld [vmem:[%s2619_s0 + $0x148] sm:$0xff]  ;;  %v1488_v36 = vcombine.high %v55_v26, %v59_v27  ;;  %v1487_v47 = vcombine.low %v55_v26, %v59_v27  ;;  %v1497_v59 = vcombine.low %v64_v44, %v68_v45 }
  0x1f   :  { %v72_v56 = vld [vmem:[%s2619_s0 + $0x1c8] sm:$0xff] }
  0x20   :  { %1669 = vmatpush3.bf16.msra.mxu0 %v1943_v30  ;;  %v60_v30 = vld [vmem:[%s2619_s0 + $0x168] sm:$0xff] }
  0x21   :  { %1733 = vmatpush3.bf16.msra.mxu1 %v1944_v31  ;;  %1782 = vmatprep.subr.bf16.mxu0 %v1945_v40  ;;  %v1966_v31 = vld [vmem:[%s2620_s1 + $0x110] sm:$0xff]   ;;  %v1490_v37 = vcombine.high %v56_v29, %v60_v30  ;;  %v1971_v40 = vld [vmem:[%s2620_s1 + $0x1c8] sm:$0xff]  }
  0x22   :  { %1846 = vmatprep.subr.bf16.mxu1 %v1947_v42  ;;  %v67_v42 = vld [vmem:[%s2619_s0 + $0x1a0] sm:$0xff]  ;;  %v76_v57 = vld [vmem:[%s2619_s0 + $0x1e8] sm:$0xff] }
  0x23   :  { %944 = vmatmul.mubr.bf16.vlgmr.msra.gmra.mxu0 %v1447_v35  ;;  %v1481_v35 = vcombine.low %v48_v16, %v52_v17 }
  0x24   :  { %1041 = vmatmul.mubr.bf16.vlgmr.msra.gmra.mxu1 %v1449_v38  ;;  %1783 = vmatpush3.bf16.msra.mxu0 %v1946_v41  ;;  %v1969_v38 = vld [vmem:[%s2620_s1 + $0x148] sm:$0xff]   ;;  %v63_v41 = vld [vmem:[%s2619_s0 + $0x180] sm:$0xff] }
  0x25   :  { %1847 = vmatpush3.bf16.msra.mxu1 %v1948_v43  ;;  %951 = vmatprep.mubr.bf16.mxu0 %v1456_v46  ;;  %v1972_v43 = vld [vmem:[%s2620_s1 + $0x188] sm:$0xff]   ;;  %v1973_v46 = vld [vmem:[%s2620_s1 + $0x140] sm:$0xff]   ;;  %v1495_v58 = vcombine.low %v63_v41, %v67_v42 }
  0x26   :  { %1048 = vmatprep.mubr.bf16.mxu1 %v1458_v49  ;;  %1784 = vmatprep.subr.bf16.mxu0 %v1949_v50  ;;  %v1489_v49 = vcombine.low %v56_v29, %v60_v30  ;;  %v1496_v50 = vcombine.high %v63_v41, %v67_v42 }
  0x27   :  { %1848 = vmatprep.subr.bf16.mxu1 %v1951_v54  ;;  %v71_v54 = vld [vmem:[%s2619_s0 + $0x1c0] sm:$0xff] }
  0x28   :  { %1785 = vmatpush3.bf16.msra.mxu0 %v1950_v52  ;;  %v1498_v52 = vcombine.high %v64_v44, %v68_v45 }
  0x29   :  { %1849 = vmatpush3.bf16.msra.mxu1 %v1952_v55  ;;  %1786 = vmatprep.subr.bf16.mxu0 %v1953_v62  ;;  %v75_v55 = vld [vmem:[%s2619_s0 + $0x1e0] sm:$0xff] }
  0x2a   :  { %1850 = vmatprep.subr.bf16.mxu1 %v1955_v0 }
  0x2b   :  { %952 = vmatmul.mubr.bf16.gmra.mxu0 %v1455_v51  ;;  %v1975_v51 = vld [vmem:[%s2620_s1 + $0x1c0] sm:$0xff]  }
  0x2c   :  { %1049 = vmatmul.mubr.bf16.gmra.mxu1 %v1457_v53  ;;  %959 = vmatprep.mubr.bf16.mxu0 %v1464_v60  ;;  %v1976_v53 = vld [vmem:[%s2620_s1 + $0x180] sm:$0xff]   ;;  %v1504_v60 = vcombine.high %v71_v54, %v75_v55 }
  0x2d   :  { %1056 = vmatprep.mubr.bf16.mxu1 %v1466_v61  ;;  %1787 = vmatpush3.bf16.msra.mxu0 %v1954_v63  ;;  %v1506_v61 = vcombine.high %v72_v56, %v76_v57 }
  0x2e   :  { %1851 = vmatpush3.bf16.msra.mxu1 %v1956_v1  ;;  %1788 = vmatprep.subr.bf16.mxu0 %v1957_v10 }
  0x2f   :  { %1852 = vmatprep.subr.bf16.mxu1 %v1959_v12 }
  0x31   :  { %1789 = vmatpush3.bf16.msra.mxu0 %v1958_v11 }
  0x32   :  { %1853 = vmatpush3.bf16.msra.mxu1 %v1960_v13  ;;  %1790 = vmatprep.subr.bf16.mxu0 %v1961_v18 }
  0x33   :  { %960 = vmatmul.mubr.bf16.gmra.mxu0 %v1463_v2  ;;  %1854 = vmatprep.subr.bf16.mxu1 %v1963_v23 }
  0x34   :  { %1057 = vmatmul.mubr.bf16.gmra.mxu1 %v1465_v6  ;;  %967 = vmatprep.mubr.bf16.mxu0 %v1472_v7 }
  0x35   :  { %1064 = vmatprep.mubr.bf16.mxu1 %v1474_v9  ;;  %1791 = vmatpush3.bf16.msra.mxu0 %v1962_v20 }
  0x36   :  { %1855 = vmatpush3.bf16.msra.mxu1 %v1964_v25  ;;  %1792 = vmatprep.subr.bf16.mxu0 %v1965_v28 }
  0x37   :  { %1856 = vmatprep.subr.bf16.mxu1 %v1967_v32 }
  0x39   :  { %1793 = vmatpush3.bf16.msra.mxu0 %v1966_v31 }
  0x3a   :  { %1857 = vmatpush3.bf16.msra.mxu1 %v1968_v33  ;;  %1794 = vmatprep.subr.bf16.mxu0 %v1969_v38 }
  0x3b   :  { %968 = vmatmul.mubr.bf16.gmra.mxu0 %v1471_v19  ;;  %1858 = vmatprep.subr.bf16.mxu1 %v1971_v40 }
  0x3c   :  { %1065 = vmatmul.mubr.bf16.gmra.mxu1 %v1473_v21  ;;  %975 = vmatprep.mubr.bf16.mxu0 %v1480_v22 }
  0x3d   :  { %1072 = vmatprep.mubr.bf16.mxu1 %v1482_v24  ;;  %1795 = vmatpush3.bf16.msra.mxu0 %v1970_v39 }
  0x3e   :  { %1859 = vmatpush3.bf16.msra.mxu1 %v1972_v43  ;;  %1796 = vmatprep.subr.bf16.mxu0 %v1973_v46 }
  0x3f   :  { %1860 = vmatprep.subr.bf16.mxu1 %v1975_v51 }
  0x41   :  { %1797 = vmatpush3.bf16.msra.mxu0 %v1974_v48 }
  0x42   :  { %1861 = vmatpush3.bf16.msra.mxu1 %v1976_v53 }
  0x43   :  { %976 = vmatmul.mubr.bf16.gmra.mxu0 %v1479_v34 }
  0x44   :  { %1073 = vmatmul.mubr.bf16.gmra.mxu1 %v1481_v35  ;;  %983 = vmatprep.mubr.bf16.mxu0 %v1488_v36 }
  0x45   :  { %1080 = vmatprep.mubr.bf16.mxu1 %v1490_v37 }
  0x4b   :  { %984 = vmatmul.mubr.bf16.gmra.mxu0 %v1487_v47 }
  0x4c   :  { %1081 = vmatmul.mubr.bf16.gmra.mxu1 %v1489_v49  ;;  %991 = vmatprep.mubr.bf16.mxu0 %v1496_v50 }
  0x4d   :  { %1088 = vmatprep.mubr.bf16.mxu1 %v1498_v52 }
  0x53   :  { %992 = vmatmul.mubr.bf16.gmra.mxu0 %v1495_v58 }
  0x54   :  { %1089 = vmatmul.mubr.bf16.gmra.mxu1 %v1497_v59  ;;  %999 = vmatprep.mubr.bf16.mxu0 %v1504_v60 }
  0x55   :  { %9 = vsyncpa [#allocation3], 0  ;;  %1096 = vmatprep.mubr.bf16.mxu1 %v1506_v61  ;;  %v17_v62 = vld [vmem:[%s2619_s0 + $0x10] sm:$0xff]  ;;  %v18_v0 = vld [vmem:[%s2619_s0 + $0x18] sm:$0xff]  ;;  %v1503_v2 = vcombine.low %v71_v54, %v75_v55  ;;  %v1505_v3 = vcombine.low %v72_v56, %v76_v57  ;;  %s1999_s8 = smov [#allocation2]  }
  0x56   :  { %v21_v63 = vld [vmem:[%s2619_s0 + $0x30] sm:$0xff]  ;;  %v22_v1 = vld [vmem:[%s2619_s0 + $0x38] sm:$0xff]  ;;  %s1432_s9 = sshll.u32 %s1999_s8, 4  ;;  %s1433_s9 = int_to_ptr.vmem [resolvable:$true] %s1432_s9 }
  0x57   :  { %v1452_v4 = vcombine.high %v17_v62, %v21_v63  ;;  %v1454_v5 = vcombine.high %v18_v0, %v22_v1  ;;  %v25_v6 = vld [vmem:[%s2619_s0 + $0x50] sm:$0xff]  ;;  %v26_v8 = vld [vmem:[%s2619_s0 + $0x58] sm:$0xff]  ;;  %v1451_v10 = vcombine.low %v17_v62, %v21_v63  ;;  %v1453_v11 = vcombine.low %v18_v0, %v22_v1  ;;  %s1977_s10 = scalar_lea.vmem %s1433_s9, 2048  ;;  %p1982_p1 = scmp.lt.s32.totalorder %s1433_s9, %s1433_s9 }
  0x58   :  { %v29_v7 = vld [vmem:[%s2619_s0 + $0x70] sm:$0xff]  ;;  %v30_v9 = vld [vmem:[%s2619_s0 + $0x78] sm:$0xff]  ;;  %p1978_p0 = scmp.ne.s32.totalorder %s1433_s9, %s1977_s10  ;;  %p1983_p2 = scmp.lt.s32.totalorder %s1977_s10, %s1977_s10 }
  0x59   :  { %v1460_v12 = vcombine.high %v25_v6, %v29_v7  ;;  %v1462_v13 = vcombine.high %v26_v8, %v30_v9  ;;  %v33_v14 = vld [vmem:[%s2619_s0 + $0x90] sm:$0xff]  ;;  %v34_v16 = vld [vmem:[%s2619_s0 + $0x98] sm:$0xff]  ;;  %v1459_v18 = vcombine.low %v25_v6, %v29_v7  ;;  %v1461_v19 = vcombine.low %v26_v8, %v30_v9 }
  0x5a   :  { %v37_v15 = vld [vmem:[%s2619_s0 + $0xb0] sm:$0xff]  ;;  %v38_v17 = vld [vmem:[%s2619_s0 + $0xb8] sm:$0xff]  ;;  %p1984_p3 = por %p1983_p2, %p1982_p1 }
  0x5b   :  { %1000 = vmatmul.mubr.bf16.gmra.mxu0 %v1503_v2  ;;  %v1468_v20 = vcombine.high %v33_v14, %v37_v15  ;;  %v1470_v21 = vcombine.high %v34_v16, %v38_v17  ;;  %v41_v22 = vld [vmem:[%s2619_s0 + $0xd0] sm:$0xff]  ;;  %v42_v24 = vld [vmem:[%s2619_s0 + $0xd8] sm:$0xff]  ;;  %v1467_v26 = vcombine.low %v33_v14, %v37_v15  ;;  %v1469_v27 = vcombine.low %v34_v16, %v38_v17 }
  0x5c   :  { %1097 = vmatmul.mubr.bf16.gmra.mxu1 %v1505_v3  ;;  %1137 = vmatprep.mubr.bf16.mxu0 %v1452_v4  ;;  %v45_v23 = vld [vmem:[%s2619_s0 + $0xf0] sm:$0xff]  ;;  %v46_v25 = vld [vmem:[%s2619_s0 + $0xf8] sm:$0xff]  ;;  %p1985_p4 = pnand %p1984_p3, %p1978_p0 }
  0x5d   :  { %1234 = vmatprep.mubr.bf16.mxu1 %v1454_v5  ;;  %v1476_v28 = vcombine.high %v41_v22, %v45_v23  ;;  %v1478_v29 = vcombine.high %v42_v24, %v46_v25  ;;  %v49_v30 = vld [vmem:[%s2619_s0 + $0x110] sm:$0xff]  ;;  %v50_v32 = vld [vmem:[%s2619_s0 + $0x118] sm:$0xff]  ;;  %v1475_v34 = vcombine.low %v41_v22, %v45_v23  ;;  %v1477_v35 = vcombine.low %v42_v24, %v46_v25 }
  0x5e   :  { %v53_v31 = vld [vmem:[%s2619_s0 + $0x130] sm:$0xff]  ;;  %v54_v33 = vld [vmem:[%s2619_s0 + $0x138] sm:$0xff] }
  0x5f   :  { %v1484_v36 = vcombine.high %v49_v30, %v53_v31  ;;  %v1486_v37 = vcombine.high %v50_v32, %v54_v33  ;;  %v57_v38 = vld [vmem:[%s2619_s0 + $0x150] sm:$0xff]  ;;  %v58_v40 = vld [vmem:[%s2619_s0 + $0x158] sm:$0xff]  ;;  %v1483_v42 = vcombine.low %v49_v30, %v53_v31  ;;  %v1485_v43 = vcombine.low %v50_v32, %v54_v33 }
  0x60   :  { %v61_v39 = vld [vmem:[%s2619_s0 + $0x170] sm:$0xff]  ;;  %v62_v41 = vld [vmem:[%s2619_s0 + $0x178] sm:$0xff] }
  0x61   :  { %v1492_v44 = vcombine.high %v57_v38, %v61_v39  ;;  %v1494_v45 = vcombine.high %v58_v40, %v62_v41  ;;  %v65_v46 = vld [vmem:[%s2619_s0 + $0x190] sm:$0xff]  ;;  %v66_v48 = vld [vmem:[%s2619_s0 + $0x198] sm:$0xff]  ;;  %v1491_v50 = vcombine.low %v57_v38, %v61_v39  ;;  %v1493_v51 = vcombine.low %v58_v40, %v62_v41 }
  0x62   :  { %v69_v47 = vld [vmem:[%s2619_s0 + $0x1b0] sm:$0xff]  ;;  %v70_v49 = vld [vmem:[%s2619_s0 + $0x1b8] sm:$0xff] }
  0x63   :  { %1138 = vmatmul.mubr.bf16.vlgmr.msra.gmra.mxu0 %v1451_v10  ;;  %v1500_v52 = vcombine.high %v65_v46, %v69_v47  ;;  %v1502_v53 = vcombine.high %v66_v48, %v70_v49  ;;  %v73_v54 = vld [vmem:[%s2619_s0 + $0x1d0] sm:$0xff]  ;;  %v74_v56 = vld [vmem:[%s2619_s0 + $0x1d8] sm:$0xff]  ;;  %v1499_v58 = vcombine.low %v65_v46, %v69_v47  ;;  %v1501_v59 = vcombine.low %v66_v48, %v70_v49 }
  0x64   :  { %1235 = vmatmul.mubr.bf16.vlgmr.msra.gmra.mxu1 %v1453_v11  ;;  %1145 = vmatprep.mubr.bf16.mxu0 %v1460_v12  ;;  %v77_v55 = vld [vmem:[%s2619_s0 + $0x1f0] sm:$0xff]  ;;  %v78_v57 = vld [vmem:[%s2619_s0 + $0x1f8] sm:$0xff] }
  0x65   :  { %1242 = vmatprep.mubr.bf16.mxu1 %v1462_v13  ;;  %v1508_v60 = vcombine.high %v73_v54, %v77_v55  ;;  %v1510_v61 = vcombine.high %v74_v56, %v78_v57  ;;  %v1507_v62 = vcombine.low %v73_v54, %v77_v55  ;;  %v1509_v63 = vcombine.low %v74_v56, %v78_v57 }
  0x6b   :  { %1146 = vmatmul.mubr.bf16.gmra.mxu0 %v1459_v18 }
  0x6c   :  { %1243 = vmatmul.mubr.bf16.gmra.mxu1 %v1461_v19  ;;  %1153 = vmatprep.mubr.bf16.mxu0 %v1468_v20 }
  0x6d   :  { %1250 = vmatprep.mubr.bf16.mxu1 %v1470_v21 }
  0x73   :  { %1154 = vmatmul.mubr.bf16.gmra.mxu0 %v1467_v26 }
  0x74   :  { %1251 = vmatmul.mubr.bf16.gmra.mxu1 %v1469_v27  ;;  %1161 = vmatprep.mubr.bf16.mxu0 %v1476_v28 }
  0x75   :  { %1258 = vmatprep.mubr.bf16.mxu1 %v1478_v29 }
  0x7b   :  { %1162 = vmatmul.mubr.bf16.gmra.mxu0 %v1475_v34 }
  0x7c   :  { %1259 = vmatmul.mubr.bf16.gmra.mxu1 %v1477_v35  ;;  %1169 = vmatprep.mubr.bf16.mxu0 %v1484_v36 }
  0x7d   :  { %1266 = vmatprep.mubr.bf16.mxu1 %v1486_v37 }
  0x83   :  { %1170 = vmatmul.mubr.bf16.gmra.mxu0 %v1483_v42 }
  0x84   :  { %1267 = vmatmul.mubr.bf16.gmra.mxu1 %v1485_v43  ;;  %1177 = vmatprep.mubr.bf16.mxu0 %v1492_v44 }
  0x85   :  { %1274 = vmatprep.mubr.bf16.mxu1 %v1494_v45 }
  0x8b   :  { %1178 = vmatmul.mubr.bf16.gmra.mxu0 %v1491_v50 }
  0x8c   :  { %1275 = vmatmul.mubr.bf16.gmra.mxu1 %v1493_v51  ;;  %1185 = vmatprep.mubr.bf16.mxu0 %v1500_v52 }
  0x8d   :  { %1282 = vmatprep.mubr.bf16.mxu1 %v1502_v53 }
  0x93   :  { %1186 = vmatmul.mubr.bf16.gmra.mxu0 %v1499_v58 }
  0x94   :  { %1283 = vmatmul.mubr.bf16.gmra.mxu1 %v1501_v59  ;;  %1193 = vmatprep.mubr.bf16.mxu0 %v1508_v60 }
  0x95   :  { %1290 = vmatprep.mubr.bf16.mxu1 %v1510_v61 }
  0x9b   :  { %1194 = vmatmul.mubr.bf16.gmra.mxu0 %v1507_v62 }
  0x9c   :  { %1291 = vmatmul.mubr.bf16.gmra.mxu1 %v1509_v63 }
  0xe3   :  { %v2406_v0 = vpop.f32.mrf.mxu0 }
  0xe4   :  { %v2408_v1 = vpop.f32.mrf.mxu1 }
  0xe5   :  { %v1671_v2 = vpop.f32.mrf.mxu0 }
  0xe6   :  { %v1735_v3 = vpop.f32.mrf.mxu1  ;;  %v1672_v63 = vadd.f32 %v1671_v2, %v2406_v0 }
  0xe7   :  { %v2410_v4 = vpop.f32.mrf.mxu0 }
  0xe8   :  { %v2412_v5 = vpop.f32.mrf.mxu1 }
  0xe9   :  { %v2414_v6 = vpop.f32.mrf.mxu0 }
  0xea   :  { %v2416_v7 = vpop.f32.mrf.mxu1 }
  0xeb   :  { %v2418_v8 = vpop.f32.mrf.mxu0 }
  0xec   :  { %v2420_v9 = vpop.f32.mrf.mxu1 }
  0xed   :  { %v2422_v10 = vpop.f32.mrf.mxu0 }
  0xee   :  { %v2424_v11 = vpop.f32.mrf.mxu1 }
  0xef   :  { %v2426_v12 = vpop.f32.mrf.mxu0  ;;  %v1742_v2 = vadd.f32 %v2424_v11, %v2420_v9 }
  0xf0   :  { %v2428_v13 = vpop.f32.mrf.mxu1 }
  0xf1   :  { %v2430_v14 = vpop.f32.mrf.mxu0 }
  0xf2   :  { %v2432_v15 = vpop.f32.mrf.mxu1 }
  0xf3   :  { %v2434_v16 = vpop.f32.mrf.mxu0 }
  0xf4   :  { %v2436_v17 = vpop.f32.mrf.mxu1 }
  0xf5   :  { %v2438_v18 = vpop.f32.mrf.mxu0 }
  0xf6   :  { %v2440_v19 = vpop.f32.mrf.mxu1 }
  0xf7   :  { %v2442_v20 = vpop.f32.mrf.mxu0 }
  0xf8   :  { %v2444_v21 = vpop.f32.mrf.mxu1 }
  0xf9   :  { %v2446_v22 = vpop.f32.mrf.mxu0 }
  0xfa   :  { %v2448_v23 = vpop.f32.mrf.mxu1 }
  0xfb   :  { %v2450_v24 = vpop.f32.mrf.mxu0 }
  0xfc   :  { %v2452_v25 = vpop.f32.mrf.mxu1 }
  0xfd   :  { %v2454_v26 = vpop.f32.mrf.mxu0 }
  0xfe   :  { %v2456_v27 = vpop.f32.mrf.mxu1 }
  0xff   :  { %v2458_v28 = vpop.f32.mrf.mxu0 }
 0x100   :  { %v2460_v29 = vpop.f32.mrf.mxu1 }
 0x101   :  { %v2462_v30 = vpop.f32.mrf.mxu0 }
 0x102   :  { %v2464_v31 = vpop.f32.mrf.mxu1 }
 0x103   :  { %v2466_v32 = vpop.f32.mrf.mxu0 }
 0x104   :  { %v2468_v33 = vpop.f32.mrf.mxu1 }
 0x105   :  { %v2470_v34 = vpop.f32.mrf.mxu0 }
 0x106   :  { %v2472_v35 = vpop.f32.mrf.mxu1 }
 0x107   :  { %v2474_v36 = vpop.f32.mrf.mxu0 }
 0x108   :  { %v2476_v37 = vpop.f32.mrf.mxu1 }
 0x109   :  { %v2478_v38 = vpop.f32.mrf.mxu0 }
 0x10a   :  { %v2480_v39 = vpop.f32.mrf.mxu1 }
 0x10b   :  { %v2482_v40 = vpop.f32.mrf.mxu0 }
 0x10c   :  { %v2484_v41 = vpop.f32.mrf.mxu1 }
 0x10d   :  { %v2486_v42 = vpop.f32.mrf.mxu0 }
 0x10e   :  { %v2488_v43 = vpop.f32.mrf.mxu1 }
 0x10f   :  { %v2490_v44 = vpop.f32.mrf.mxu0 }
 0x110   :  { %v2492_v45 = vpop.f32.mrf.mxu1 }
 0x111   :  { %v2494_v46 = vpop.f32.mrf.mxu0 }
 0x112   :  { %v2496_v47 = vpop.f32.mrf.mxu1 }
 0x113   :  { %v2498_v48 = vpop.f32.mrf.mxu0 }
 0x114   :  { %v2500_v49 = vpop.f32.mrf.mxu1 }
 0x115   :  { %2623 = vst [vmem:[#allocation5_spill] sm:$0xff] %v2500_v49  ;;  %v2502_v50 = vpop.f32.mrf.mxu0 }
 0x116   :  { %2624 = vst [vmem:[#allocation6_spill] sm:$0xff] %v2502_v50  ;;  %v2504_v51 = vpop.f32.mrf.mxu1 }
 0x117   :  { %2625 = vst [vmem:[#allocation7_spill] sm:$0xff] %v2504_v51  ;;  %v2506_v52 = vpop.f32.mrf.mxu0 }
 0x118   :  { %2626 = vst [vmem:[#allocation8_spill] sm:$0xff] %v2506_v52  ;;  %v2508_v53 = vpop.f32.mrf.mxu1 }
 0x119   :  { %2627 = vst [vmem:[#allocation9_spill] sm:$0xff] %v2508_v53  ;;  %v2510_v54 = vpop.f32.mrf.mxu0  ;;  %v1736_v53 = vadd.f32 %v1735_v3, %v2408_v1  ;;  %v1678_v1 = vadd.f32 %v2422_v10, %v2418_v8  ;;  %v1745_v8 = vadd.f32 %v2432_v15, %v2428_v13 }
 0x11a   :  { %2628 = vst [vmem:[#allocation10_spill] sm:$0xff] %v2510_v54  ;;  %v2512_v55 = vpop.f32.mrf.mxu1 }
 0x11b   :  { %2629 = vst [vmem:[#allocation11_spill] sm:$0xff] %v2512_v55  ;;  %v2514_v56 = vpop.f32.mrf.mxu0 }
 0x11c   :  { %2630 = vst [vmem:[#allocation12_spill] sm:$0xff] %v2514_v56  ;;  %v2516_v57 = vpop.f32.mrf.mxu1 }
 0x11d   :  { %2631 = vst [vmem:[#allocation13_spill] sm:$0xff] %v2516_v57  ;;  %v2518_v58 = vpop.f32.mrf.mxu0  ;;  %v1043_v57 = vadd.f32 %v1736_v53, %v1672_v63 }
 0x11e   :  { %2632 = vst [vmem:[#allocation14_spill] sm:$0xff] %v2518_v58  ;;  %v2520_v59 = vpop.f32.mrf.mxu1  ;;  %v1675_v58 = vadd.f32 %v2414_v6, %v2410_v4 }
 0x11f   :  { %2633 = vst [vmem:[#allocation15_spill] sm:$0xff] %v2520_v59  ;;  %v2522_v60 = vpop.f32.mrf.mxu0 }
 0x120   :  { %2634 = vst [vmem:[#allocation16_spill] sm:$0xff] %v2522_v60  ;;  %v2524_v61 = vpop.f32.mrf.mxu1  ;;  %v1739_v60 = vadd.f32 %v2416_v7, %v2412_v5 }
 0x121   :  { %2635 = vst [vmem:[#allocation17_spill] sm:$0xff] %v2524_v61  ;;  %v2526_v62 = vpop.f32.mrf.mxu0 }
 0x122   :  { %2636 = vst [vmem:[#allocation18_spill] sm:$0xff] %v2526_v62  ;;  %v2530_v54 = vpop.f32.mrf.mxu1  ;;  %v1046_v53 = vadd.f32 %v1739_v60, %v1675_v58 }
 0x123   :  { %2637 = vst [vmem:[#allocation19_spill] sm:$0xff] %v2530_v54  ;;  %v1798_v55 = vpop.f32.mrf.mxu0 }
 0x124   :  { %v1862_v56 = vpop.f32.mrf.mxu1 }
 0x125   :  { %v1799_v52 = vpop.f32.mrf.mxu0 }
 0x126   :  { %v1800_v59 = vadd.f32 %v1799_v52, %v1798_v55  ;;  %v1863_v61 = vpop.f32.mrf.mxu1  ;;  %v1051_v55 = vadd.f32 %v1742_v2, %v1678_v1 }
 0x127   :  { %v1801_v51 = vpop.f32.mrf.mxu0  ;;  %v1864_v49 = vadd.f32 %v1863_v61, %v1862_v56  ;;  %v1681_v56 = vadd.f32 %v2430_v14, %v2426_v12  ;;  %v1684_v61 = vadd.f32 %v2438_v18, %v2434_v16  ;;  %v1748_v12 = vadd.f32 %v2440_v19, %v2436_v17 }
 0x128   :  { %v1140_v62 = vadd.f32 %v1800_v59, %v1043_v57  ;;  %v1865_v0 = vpop.f32.mrf.mxu1  ;;  %v1687_v16 = vadd.f32 %v2446_v22, %v2442_v20  ;;  %v1751_v17 = vadd.f32 %v2448_v23, %v2444_v21  ;;  %v1690_v20 = vadd.f32 %v2454_v26, %v2450_v24 }
 0x129   :  { %v1802_v3 = vpop.f32.mrf.mxu0  ;;  %v1754_v21 = vadd.f32 %v2456_v27, %v2452_v25  ;;  %v1693_v24 = vadd.f32 %v2462_v30, %v2458_v28  ;;  %v1757_v25 = vadd.f32 %v2464_v31, %v2460_v29  ;;  %v1696_v28 = vadd.f32 %v2470_v34, %v2466_v32 }
 0x12a   :  { %v1237_v63 = vadd.f32 %v1864_v49, %v1140_v62  ;;  %v1803_v54 = vadd.f32 %v1802_v3, %v1801_v51  ;;  %v1866_v4 = vpop.f32.mrf.mxu1  ;;  %v1054_v62 = vadd.f32 %v1745_v8, %v1681_v56  ;;  %v1062_v23 = vadd.f32 %v1751_v17, %v1687_v16 }
 0x12b   :  { %v1804_v6 = vpop.f32.mrf.mxu0  ;;  %v1867_v7 = vadd.f32 %v1866_v4, %v1865_v0  ;;  %v1760_v29 = vadd.f32 %v2472_v35, %v2468_v33  ;;  %v1070_v31 = vadd.f32 %v1757_v25, %v1693_v24  ;;  %v1699_v32 = vadd.f32 %v2478_v38, %v2474_v36 }
 0x12c   :  { %v1299_v50 = vmul.f32 0.2, %v1237_v63  ;;  %v1143_v5 = vadd.f32 %v1803_v54, %v1046_v53  ;;  %v1868_v52 = vpop.f32.mrf.mxu1  ;;  %v1763_v33 = vadd.f32 %v2480_v39, %v2476_v37  ;;  %v1702_v36 = vadd.f32 %v2486_v42, %v2482_v40 }
 0x12d   :  { %v1805_v57 = vpop.f32.mrf.mxu0  ;;  %v1766_v37 = vadd.f32 %v2488_v43, %v2484_v41  ;;  %v1705_v40 = vadd.f32 %v2494_v46, %v2490_v44  ;;  %v1769_v41 = vadd.f32 %v2496_v47, %v2492_v45  ;;  %v2638_v44 = vld [vmem:[#allocation6_spill] sm:$0xff] }
 0x12e   :  { %v1315_v10 = vmax.f32 %v1237_v63, %v1299_v50  ;;  %v1240_v9 = vadd.f32 %v1867_v7, %v1143_v5  ;;  %v1806_v11 = vadd.f32 %v1805_v57, %v1804_v6  ;;  %v1869_v58 = vpop.f32.mrf.mxu1  ;;  %v1059_v6 = vadd.f32 %v1748_v12, %v1684_v61 }
 0x12f   :  { %v1807_v49 = vpop.f32.mrf.mxu0  ;;  %v1870_v60 = vadd.f32 %v1869_v58, %v1868_v52  ;;  %v1078_v39 = vadd.f32 %v1763_v33, %v1699_v32  ;;  %v1708_v46 = vadd.f32 %v2638_v44, %v2498_v48 }
 0x130   :  { %1331 = vst [vmem:[#allocation2] sm:$0xff] %v1315_v10  ;;  %v1300_v51 = vmul.f32 0.2, %v1240_v9  ;;  %v1148_v59 = vadd.f32 %v1806_v11, %v1051_v55  ;;  %v1871_v54 = vpop.f32.mrf.mxu1 }
 0x131   :  { %v1808_v14 = vpop.f32.mrf.mxu0 }
 0x132   :  { %v1316_v0 = vmax.f32 %v1240_v9, %v1300_v51  ;;  %v1245_v13 = vadd.f32 %v1870_v60, %v1148_v59  ;;  %v1809_v15 = vadd.f32 %v1808_v14, %v1807_v49  ;;  %v1872_v50 = vpop.f32.mrf.mxu1  ;;  %v1067_v14 = vadd.f32 %v1754_v21, %v1690_v20 }
 0x133   :  { %v1810_v1 = vpop.f32.mrf.mxu0  ;;  %v1873_v63 = vadd.f32 %v1872_v50, %v1871_v54 }
 0x134   :  { %1332 = vst [vmem:[#allocation2 + $0x8] sm:$0xff] %v1316_v0  ;;  %v1610_v2 = vpack.c.bf16 %v1316_v0, %v1315_v10  ;;  %v1301_v3 = vmul.f32 0.2, %v1245_v13  ;;  %v1151_v53 = vadd.f32 %v1809_v15, %v1054_v62  ;;  %v1874_v4 = vpop.f32.mrf.mxu1 }
 0x135   :  { %v1811_v18 = vpop.f32.mrf.mxu0 }
 0x136   :  { %1611 = vst [vmem:[%s2622_s3] sm:$0xff] %v1610_v2   ;;  %v1317_v19 = vmax.f32 %v1245_v13, %v1301_v3  ;;  %v1248_v5 = vadd.f32 %v1873_v63, %v1151_v53  ;;  %v1812_v7 = vadd.f32 %v1811_v18, %v1810_v1  ;;  %v1875_v52 = vpop.f32.mrf.mxu1 }
 0x137   :  { %v1813_v55 = vpop.f32.mrf.mxu0  ;;  %v1876_v8 = vadd.f32 %v1875_v52, %v1874_v4  ;;  %v1075_v52 = vadd.f32 %v1760_v29, %v1696_v28 }
 0x138   :  { %1333 = vst [vmem:[#allocation2 + $0x10] sm:$0xff] %v1317_v19  ;;  %v1302_v56 = vmul.f32 0.2, %v1248_v5  ;;  %v1156_v57 = vadd.f32 %v1812_v7, %v1059_v6  ;;  %v1877_v10 = vpop.f32.mrf.mxu1 }
 0x139   :  { %v1814_v22 = vpop.f32.mrf.mxu0 }
 0x13a   :  { %v1318_v9 = vmax.f32 %v1248_v5, %v1302_v56  ;;  %v1253_v11 = vadd.f32 %v1876_v8, %v1156_v57  ;;  %v1815_v58 = vadd.f32 %v1814_v22, %v1813_v55  ;;  %v1878_v49 = vpop.f32.mrf.mxu1 }
 0x13b   :  { %v1816_v51 = vpop.f32.mrf.mxu0  ;;  %v1879_v61 = vadd.f32 %v1878_v49, %v1877_v10 }
 0x13c   :  { %1334 = vst [vmem:[#allocation2 + $0x18] sm:$0xff] %v1318_v9  ;;  %v1615_v59 = vpack.c.bf16 %v1318_v9, %v1317_v19  ;;  %v1303_v60 = vmul.f32 0.2, %v1253_v11  ;;  %v1159_v54 = vadd.f32 %v1815_v58, %v1062_v23  ;;  %v1880_v12 = vpop.f32.mrf.mxu1 }
 0x13d   :  { %v1817_v26 = vpop.f32.mrf.mxu0 }
 0x13e   :  { %1647 = vst [vmem:[%s2622_s3 + $0x8] sm:$0xff] %v1615_v59   ;;  %v1319_v27 = vmax.f32 %v1253_v11, %v1303_v60  ;;  %v1256_v62 = vadd.f32 %v1879_v61, %v1159_v54  ;;  %v1818_v0 = vadd.f32 %v1817_v26, %v1816_v51  ;;  %v1881_v13 = vpop.f32.mrf.mxu1 }
 0x13f   :  { %v1819_v15 = vpop.f32.mrf.mxu0  ;;  %v1882_v2 = vadd.f32 %v1881_v13, %v1880_v12  ;;  %v1083_v12 = vadd.f32 %v1766_v37, %v1702_v36  ;;  %v2647_v36 = vld [vmem:[#allocation13_spill] sm:$0xff]  ;;  %v2648_v37 = vld [vmem:[#allocation15_spill] sm:$0xff] }
 0x140   :  { %1335 = vst [vmem:[#allocation2 + $0x20] sm:$0xff] %v1319_v27  ;;  %v1304_v50 = vmul.f32 0.2, %v1256_v62  ;;  %v1164_v1 = vadd.f32 %v1818_v0, %v1067_v14  ;;  %v1883_v3 = vpop.f32.mrf.mxu1 }
 0x141   :  { %v1820_v30 = vpop.f32.mrf.mxu0 }
 0x142   :  { %v1320_v53 = vmax.f32 %v1256_v62, %v1304_v50  ;;  %v1261_v63 = vadd.f32 %v1882_v2, %v1164_v1  ;;  %v1821_v4 = vadd.f32 %v1820_v30, %v1819_v15  ;;  %v1884_v6 = vpop.f32.mrf.mxu1  ;;  %v2639_v15 = vld [vmem:[#allocation5_spill] sm:$0xff]  ;;  %v2640_v50 = vld [vmem:[#allocation7_spill] sm:$0xff]  ;;  %v1086_v1 = vadd.f32 %v1769_v41, %v1705_v40  ;;  %v2650_v41 = vld [vmem:[#allocation18_spill] sm:$0xff] }
 0x143   :  { %v1822_v16 = vpop.f32.mrf.mxu0  ;;  %v1885_v5 = vadd.f32 %v1884_v6, %v1883_v3  ;;  %v1772_v45 = vadd.f32 %v2640_v50, %v2639_v15 }
 0x144   :  { %1336 = vst [vmem:[#allocation2 + $0x28] sm:$0xff] %v1320_v53  ;;  %v1620_v18 = vpack.c.bf16 %v1320_v53, %v1319_v27  ;;  %v1305_v17 = vmul.f32 0.2, %v1261_v63  ;;  %v1167_v19 = vadd.f32 %v1821_v4, %v1070_v31  ;;  %v1886_v7 = vpop.f32.mrf.mxu1 }
 0x145   :  { %v1823_v34 = vpop.f32.mrf.mxu0 }
 0x146   :  { %1648 = vst [vmem:[%s2622_s3 + $0x10] sm:$0xff] %v1620_v18   ;;  %v1321_v35 = vmax.f32 %v1261_v63, %v1305_v17  ;;  %v1264_v55 = vadd.f32 %v1885_v5, %v1167_v19  ;;  %v1824_v56 = vadd.f32 %v1823_v34, %v1822_v16  ;;  %v1887_v57 = vpop.f32.mrf.mxu1  ;;  %v1091_v16 = vadd.f32 %v1772_v45, %v1708_v46  ;;  %v2641_v18 = vld [vmem:[#allocation8_spill] sm:$0xff]  ;;  %v2642_v17 = vld [vmem:[#allocation10_spill] sm:$0xff]  ;;  %v2643_v5 = vld [vmem:[#allocation9_spill] sm:$0xff] }
 0x147   :  { %v1825_v8 = vpop.f32.mrf.mxu0  ;;  %v1888_v21 = vadd.f32 %v1887_v57, %v1886_v7  ;;  %v1711_v48 = vadd.f32 %v2642_v17, %v2641_v18  ;;  %v2644_v7 = vld [vmem:[#allocation11_spill] sm:$0xff] }
 0x148   :  { %1337 = vst [vmem:[#allocation2 + $0x30] sm:$0xff] %v1321_v35  ;;  %v1306_v10 = vmul.f32 0.2, %v1264_v55  ;;  %v1172_v20 = vadd.f32 %v1824_v56, %v1075_v52  ;;  %v1889_v22 = vpop.f32.mrf.mxu1  ;;  %v1775_v52 = vadd.f32 %v2644_v7, %v2643_v5 }
 0x149   :  { %v1826_v38 = vpop.f32.mrf.mxu0 }
 0x14a   :  { %v1322_v23 = vmax.f32 %v1264_v55, %v1306_v10  ;;  %v1269_v9 = vadd.f32 %v1888_v21, %v1172_v20  ;;  %v1827_v11 = vadd.f32 %v1826_v38, %v1825_v8  ;;  %v1890_v58 = vpop.f32.mrf.mxu1  ;;  %v2645_v20 = vld [vmem:[#allocation12_spill] sm:$0xff]  ;;  %v2646_v21 = vld [vmem:[#allocation14_spill] sm:$0xff]  ;;  %v1778_v38 = vadd.f32 %v2648_v37, %v2647_v36 }
 0x14b   :  { %v1828_v49 = vpop.f32.mrf.mxu0  ;;  %v1891_v54 = vadd.f32 %v1890_v58, %v1889_v22  ;;  %v1714_v22 = vadd.f32 %v2646_v21, %v2645_v20 }
 0x14c   :  { %1338 = vst [vmem:[#allocation2 + $0x38] sm:$0xff] %v1322_v23  ;;  %v1625_v51 = vpack.c.bf16 %v1322_v23, %v1321_v35  ;;  %v1307_v59 = vmul.f32 0.2, %v1269_v9  ;;  %v1175_v60 = vadd.f32 %v1827_v11, %v1078_v39  ;;  %v1892_v61 = vpop.f32.mrf.mxu1  ;;  %v1094_v23 = vadd.f32 %v1775_v52, %v1711_v48 }
 0x14d   :  { %v1829_v42 = vpop.f32.mrf.mxu0  ;;  %v1099_v40 = vadd.f32 %v1778_v38, %v1714_v22 }
 0x14e   :  { %1649 = vst [vmem:[%s2622_s3 + $0x18] sm:$0xff] %v1625_v51   ;;  %v1323_v43 = vmax.f32 %v1269_v9, %v1307_v59  ;;  %v1272_v14 = vadd.f32 %v1891_v54, %v1175_v60  ;;  %v1830_v24 = vadd.f32 %v1829_v42, %v1828_v49  ;;  %v1893_v26 = vpop.f32.mrf.mxu1  ;;  %v2649_v42 = vld [vmem:[#allocation16_spill] sm:$0xff] }
 0x14f   :  { %v1831_v25 = vpop.f32.mrf.mxu0  ;;  %v1894_v0 = vadd.f32 %v1893_v26, %v1892_v61  ;;  %v2652_v26 = vld [vmem:[#allocation19_spill] sm:$0xff] }
 0x150   :  { %1339 = vst [vmem:[#allocation2 + $0x40] sm:$0xff] %v1323_v43  ;;  %v1308_v27 = vmul.f32 0.2, %v1272_v14  ;;  %v1180_v62 = vadd.f32 %v1830_v24, %v1083_v12  ;;  %v1895_v13 = vpop.f32.mrf.mxu1  ;;  %v2651_v24 = vld [vmem:[#allocation17_spill] sm:$0xff] }
 0x151   :  { %v1832_v47 = vpop.f32.mrf.mxu0 }
 0x152   :  { %v1324_v2 = vmax.f32 %v1272_v14, %v1308_v27  ;;  %v1277_v3 = vadd.f32 %v1894_v0, %v1180_v62  ;;  %v1833_v28 = vadd.f32 %v1832_v47, %v1831_v25  ;;  %v1896_v29 = vpop.f32.mrf.mxu1  ;;  %v1781_v25 = vadd.f32 %v2652_v26, %v2651_v24 }
 0x153   :  { %v1834_v30 = vpop.f32.mrf.mxu0  ;;  %v1897_v4 = vadd.f32 %v1896_v29, %v1895_v13 }
 0x154   :  { %1340 = vst [vmem:[#allocation2 + $0x48] sm:$0xff] %v1324_v2  ;;  %v1630_v31 = vpack.c.bf16 %v1324_v2, %v1323_v43  ;;  %v1309_v53 = vmul.f32 0.2, %v1277_v3  ;;  %v1183_v63 = vadd.f32 %v1833_v28, %v1086_v1  ;;  %v1898_v6 = vpop.f32.mrf.mxu1  ;;  %v1717_v43 = vadd.f32 %v2650_v41, %v2649_v42 }
 0x155   :  { %v1835_v19 = vpop.f32.mrf.mxu0 }
 0x156   :  { %1650 = vst [vmem:[%s2622_s3 + $0x20] sm:$0xff] %v1630_v31   ;;  %v1325_v32 = vmax.f32 %v1277_v3, %v1309_v53  ;;  %v1280_v34 = vadd.f32 %v1897_v4, %v1183_v63  ;;  %v1836_v33 = vadd.f32 %v1835_v19, %v1834_v30  ;;  %v1899_v35 = vpop.f32.mrf.mxu1  ;;  %v1102_v1 = vadd.f32 %v1781_v25, %v1717_v43 }
 0x157   :  { %v1837_v55 = vpop.f32.mrf.mxu0  ;;  %v1900_v8 = vadd.f32 %v1899_v35, %v1898_v6 }
 0x158   :  { %1341 = vst [vmem:[#allocation2 + $0x50] sm:$0xff] %v1325_v32  ;;  %v1310_v56 = vmul.f32 0.2, %v1280_v34  ;;  %v1188_v57 = vadd.f32 %v1836_v33, %v1091_v16  ;;  %v1901_v10 = vpop.f32.mrf.mxu1 }
 0x159   :  { %v1838_v39 = vpop.f32.mrf.mxu0 }
 0x15a   :  { %v1326_v9 = vmax.f32 %v1280_v34, %v1310_v56  ;;  %v1285_v11 = vadd.f32 %v1900_v8, %v1188_v57  ;;  %v1839_v58 = vadd.f32 %v1838_v39, %v1837_v55  ;;  %v1902_v49 = vpop.f32.mrf.mxu1 }
 0x15b   :  { %v1840_v51 = vpop.f32.mrf.mxu0  ;;  %v1903_v61 = vadd.f32 %v1902_v49, %v1901_v10 }
 0x15c   :  { %1342 = vst [vmem:[#allocation2 + $0x58] sm:$0xff] %v1326_v9  ;;  %v1635_v59 = vpack.c.bf16 %v1326_v9, %v1325_v32  ;;  %v1311_v60 = vmul.f32 0.2, %v1285_v11  ;;  %v1191_v54 = vadd.f32 %v1839_v58, %v1094_v23  ;;  %v1904_v12 = vpop.f32.mrf.mxu1 }
 0x15d   :  { %v1841_v14 = vpop.f32.mrf.mxu0 }
 0x15e   :  { %1651 = vst [vmem:[%s2622_s3 + $0x28] sm:$0xff] %v1635_v59   ;;  %v1327_v27 = vmax.f32 %v1285_v11, %v1311_v60  ;;  %v1288_v62 = vadd.f32 %v1903_v61, %v1191_v54  ;;  %v1842_v0 = vadd.f32 %v1841_v14, %v1840_v51  ;;  %v1905_v13 = vpop.f32.mrf.mxu1 }
 0x15f   :  { %v1843_v44 = vpop.f32.mrf.mxu0  ;;  %v1906_v50 = vadd.f32 %v1905_v13, %v1904_v12 }
 0x160   :  { %1343 = vst [vmem:[#allocation2 + $0x60] sm:$0xff] %v1327_v27  ;;  %v1312_v46 = vmul.f32 0.2, %v1288_v62  ;;  %v1196_v15 = vadd.f32 %v1842_v0, %v1099_v40  ;;  %v1907_v45 = vpop.f32.mrf.mxu1 }
 0x161   :  { %v1844_v47 = vpop.f32.mrf.mxu0 }
 0x162   :  { %v1328_v2 = vmax.f32 %v1288_v62, %v1312_v46  ;;  %v1293_v3 = vadd.f32 %v1906_v50, %v1196_v15  ;;  %v1845_v28 = vadd.f32 %v1844_v47, %v1843_v44  ;;  %v1908_v29 = vpop.f32.mrf.mxu1 }
 0x163   :  { %v1909_v63 = vadd.f32 %v1908_v29, %v1907_v45 }
 0x164   :  { %1344 = vst [vmem:[#allocation2 + $0x68] sm:$0xff] %v1328_v2  ;;  %v1640_v30 = vpack.c.bf16 %v1328_v2, %v1327_v27  ;;  %v1313_v31 = vmul.f32 0.2, %v1293_v3  ;;  %v1199_v53 = vadd.f32 %v1845_v28, %v1102_v1 }
 0x166   :  { %1652 = vst [vmem:[%s2622_s3 + $0x30] sm:$0xff] %v1640_v30   ;;  %v1329_v4 = vmax.f32 %v1293_v3, %v1313_v31  ;;  %v1296_v6 = vadd.f32 %v1909_v63, %v1199_v53 }
 0x168   :  { %1345 = vst [vmem:[#allocation2 + $0x70] sm:$0xff] %v1329_v4  ;;  %v1314_v16 = vmul.f32 0.2, %v1296_v6 }
 0x16a   :  { %v1330_v18 = vmax.f32 %v1296_v6, %v1314_v16 }
 0x16c   :  { %1346 = vst [vmem:[#allocation2 + $0x78] sm:$0xff] %v1330_v18  ;;  %v1645_v17 = vpack.c.bf16 %v1330_v18, %v1329_v4 }
 0x16d   :  { %1988 = shalt.err (!%p1985_p4)
}
 0x16e   :  { %s2000_s11 = smov 128   ;;  %s2001_s12 = smov 8   ;;  %1653 = vst [vmem:[%s2622_s3 + $0x38] sm:$0xff] %v1645_v17  }
 0x16f   :  { %1438 = dma.vmem_to_hbm [thread:$0]  %s1433_s9, 2048, %s2621_s2, [#allocation3], %s2000_s11, %s2000_s11, %s2001_s12  }
 0x170   :  { %1997 = dma.done.wait [#allocation3], 2048  }
 0x171   :  { %1998 = vsyncadd [#allocation3], 4294965248 }
 0x172   :  { %1446 = vsyncpa [#allocation3], 1 }

// kernel: discriminator_forward.7
= control target key start
LH: loop header
LB: loop body
LE: loop exit
PB: predicated region body
PF: predicated region fallthrough
CT: control target
= control target key end

     0   :  { %s3876_s1 = inlined_call_operand.vmem [shape: bf16[2048,256], index: 1, kind: input, shape index: {}]   ;;  %s3877_s0 = inlined_call_operand.vmem [shape: bf16[32,2048], index: 0, kind: input, shape index: {}]   ;;  %s3878_s2 = inlined_call_operand.vmem [shape: f32[32,256], index: 2, kind: output, shape index: {0}]   ;;  %s3879_s3 = inlined_call_operand.vmem [shape: bf16[32,256], index: 3, kind: output, shape index: {1}]  }
   0x1   :  { %v2521_v0 = vld [vmem:[%s3876_s1 + $0x74] ss:$8 sps:$4 sm:$0xff]   ;;  %v2525_v2 = vld [vmem:[%s3876_s1 + $0x70] ss:$8 sps:$4 sm:$0xff]   ;;  %v2527_v4 = vld [vmem:[%s3876_s1 + $0x64] ss:$8 sps:$4 sm:$0xff]  }
   0x2   :  { %v2523_v1 = vld [vmem:[%s3876_s1 + $0x174] ss:$8 sps:$4 sm:$0xff]   ;;  %1741 = vmatprep.subr.bf16.mxu0 %v2521_v0  ;;  %v2526_v3 = vld [vmem:[%s3876_s1 + $0x170] ss:$8 sps:$4 sm:$0xff]   ;;  %v2529_v5 = vld [vmem:[%s3876_s1 + $0x164] ss:$8 sps:$4 sm:$0xff]  }
   0x3   :  { %1794 = vmatprep.subr.bf16.mxu1 %v2523_v1  ;;  %1742 = vmatpush1.bf16.msra.mxu0 %v2525_v2  ;;  %v2531_v6 = vld [vmem:[%s3876_s1 + $0x60] ss:$8 sps:$4 sm:$0xff]   ;;  %v2533_v8 = vld [vmem:[%s3876_s1 + $0x54] ss:$8 sps:$4 sm:$0xff]   ;;  %v2537_v10 = vld [vmem:[%s3876_s1 + $0x50] ss:$8 sps:$4 sm:$0xff]  }
   0x4   :  { %1795 = vmatpush1.bf16.msra.mxu1 %v2526_v3  ;;  %1743 = vmatprep.subr.bf16.mxu0 %v2527_v4  ;;  %v2532_v7 = vld [vmem:[%s3876_s1 + $0x160] ss:$8 sps:$4 sm:$0xff]   ;;  %v2535_v9 = vld [vmem:[%s3876_s1 + $0x154] ss:$8 sps:$4 sm:$0xff]   ;;  %v2538_v11 = vld [vmem:[%s3876_s1 + $0x150] ss:$8 sps:$4 sm:$0xff]  }
   0x5   :  { %1796 = vmatprep.subr.bf16.mxu1 %v2529_v5  ;;  %v2539_v12 = vld [vmem:[%s3876_s1 + $0x44] ss:$8 sps:$4 sm:$0xff]   ;;  %v2543_v14 = vld [vmem:[%s3876_s1 + $0x40] ss:$8 sps:$4 sm:$0xff]   ;;  %v2545_v16 = vld [vmem:[%s3876_s1 + $0x34] ss:$8 sps:$4 sm:$0xff]  }
   0x6   :  { %v2541_v13 = vld [vmem:[%s3876_s1 + $0x144] ss:$8 sps:$4 sm:$0xff]   ;;  %v2544_v15 = vld [vmem:[%s3876_s1 + $0x140] ss:$8 sps:$4 sm:$0xff]   ;;  %v2547_v17 = vld [vmem:[%s3876_s1 + $0x134] ss:$8 sps:$4 sm:$0xff]  }
   0x7   :  { %1744 = vmatpush1.bf16.msra.mxu0 %v2531_v6  ;;  %v2549_v18 = vld [vmem:[%s3876_s1 + $0x30] ss:$8 sps:$4 sm:$0xff]   ;;  %v2551_v20 = vld [vmem:[%s3876_s1 + $0x24] ss:$8 sps:$4 sm:$0xff]   ;;  %v2555_v22 = vld [vmem:[%s3876_s1 + $0x20] ss:$8 sps:$4 sm:$0xff]  }
   0x8   :  { %1797 = vmatpush1.bf16.msra.mxu1 %v2532_v7  ;;  %1745 = vmatprep.subr.bf16.mxu0 %v2533_v8  ;;  %v2550_v19 = vld [vmem:[%s3876_s1 + $0x130] ss:$8 sps:$4 sm:$0xff]   ;;  %v2553_v21 = vld [vmem:[%s3876_s1 + $0x124] ss:$8 sps:$4 sm:$0xff]   ;;  %v2556_v23 = vld [vmem:[%s3876_s1 + $0x120] ss:$8 sps:$4 sm:$0xff]  }
   0x9   :  { %1798 = vmatprep.subr.bf16.mxu1 %v2535_v9  ;;  %v2557_v24 = vld [vmem:[%s3876_s1 + $0x14] ss:$8 sps:$4 sm:$0xff]   ;;  %v2561_v26 = vld [vmem:[%s3876_s1 + $0x10] ss:$8 sps:$4 sm:$0xff]   ;;  %v2563_v28 = vld [vmem:[%s3876_s1 + $0x4] ss:$8 sps:$4 sm:$0xff]  }
   0xa   :  { %v2559_v25 = vld [vmem:[%s3876_s1 + $0x114] ss:$8 sps:$4 sm:$0xff]   ;;  %v2562_v27 = vld [vmem:[%s3876_s1 + $0x110] ss:$8 sps:$4 sm:$0xff]   ;;  %v2565_v29 = vld [vmem:[%s3876_s1 + $0x104] ss:$8 sps:$4 sm:$0xff]  }
   0xb   :  { %1746 = vmatpush1.bf16.msra.mxu0 %v2537_v10  ;;  %v2567_v30 = vld [vmem:[%s3876_s1] ss:$8 sps:$4 sm:$0xff]   ;;  %v2569_v32 = vld [vmem:[%s3876_s1 + $0xf4] ss:$8 sps:$4 sm:$0xff]   ;;  %v2573_v34 = vld [vmem:[%s3876_s1 + $0xf0] ss:$8 sps:$4 sm:$0xff]  }
   0xc   :  { %1799 = vmatpush1.bf16.msra.mxu1 %v2538_v11  ;;  %1747 = vmatprep.subr.bf16.mxu0 %v2539_v12  ;;  %v2568_v31 = vld [vmem:[%s3876_s1 + $0x100] ss:$8 sps:$4 sm:$0xff]   ;;  %v2571_v33 = vld [vmem:[%s3876_s1 + $0x1f4] ss:$8 sps:$4 sm:$0xff]   ;;  %v2574_v35 = vld [vmem:[%s3876_s1 + $0x1f0] ss:$8 sps:$4 sm:$0xff]  }
   0xd   :  { %1800 = vmatprep.subr.bf16.mxu1 %v2541_v13  ;;  %v2575_v36 = vld [vmem:[%s3876_s1 + $0xe4] ss:$8 sps:$4 sm:$0xff]   ;;  %v2579_v38 = vld [vmem:[%s3876_s1 + $0xe0] ss:$8 sps:$4 sm:$0xff]   ;;  %v2581_v40 = vld [vmem:[%s3876_s1 + $0xd4] ss:$8 sps:$4 sm:$0xff]  }
   0xe   :  { %v2577_v37 = vld [vmem:[%s3876_s1 + $0x1e4] ss:$8 sps:$4 sm:$0xff]   ;;  %v2580_v39 = vld [vmem:[%s3876_s1 + $0x1e0] ss:$8 sps:$4 sm:$0xff]   ;;  %v2583_v41 = vld [vmem:[%s3876_s1 + $0x1d4] ss:$8 sps:$4 sm:$0xff]  }
   0xf   :  { %1748 = vmatpush1.bf16.msra.mxu0 %v2543_v14  ;;  %v2585_v42 = vld [vmem:[%s3876_s1 + $0xd0] ss:$8 sps:$4 sm:$0xff]   ;;  %v2587_v44 = vld [vmem:[%s3876_s1 + $0xc4] ss:$8 sps:$4 sm:$0xff]   ;;  %v2591_v46 = vld [vmem:[%s3876_s1 + $0xc0] ss:$8 sps:$4 sm:$0xff]  }
  0x10   :  { %1801 = vmatpush1.bf16.msra.mxu1 %v2544_v15  ;;  %1749 = vmatprep.subr.bf16.mxu0 %v2545_v16  ;;  %v2586_v43 = vld [vmem:[%s3876_s1 + $0x1d0] ss:$8 sps:$4 sm:$0xff]   ;;  %v2589_v45 = vld [vmem:[%s3876_s1 + $0x1c4] ss:$8 sps:$4 sm:$0xff]   ;;  %v2592_v47 = vld [vmem:[%s3876_s1 + $0x1c0] ss:$8 sps:$4 sm:$0xff]  }
  0x11   :  { %1802 = vmatprep.subr.bf16.mxu1 %v2547_v17  ;;  %v13_v48 = vld [vmem:[%s3877_s0] sm:$0xff]  ;;  %v14_v50 = vld [vmem:[%s3877_s0 + $0x8] sm:$0xff]  ;;  %v2593_v52 = vld [vmem:[%s3876_s1 + $0xb4] ss:$8 sps:$4 sm:$0xff]  }
  0x12   :  { %v21_v49 = vld [vmem:[%s3877_s0 + $0x40] sm:$0xff]  ;;  %v22_v51 = vld [vmem:[%s3877_s0 + $0x48] sm:$0xff]  ;;  %v2595_v54 = vld [vmem:[%s3876_s1 + $0x1b4] ss:$8 sps:$4 sm:$0xff]  }
  0x13   :  { %1750 = vmatpush1.bf16.msra.mxu0 %v2549_v18  ;;  %v2226_v53 = vcombine.high %v13_v48, %v21_v49  ;;  %v2228_v55 = vcombine.high %v14_v50, %v22_v51  ;;  %v2597_v56 = vld [vmem:[%s3876_s1 + $0xb0] ss:$8 sps:$4 sm:$0xff]   ;;  %v2599_v58 = vld [vmem:[%s3876_s1 + $0xa4] ss:$8 sps:$4 sm:$0xff]   ;;  %v2603_v60 = vld [vmem:[%s3876_s1 + $0xa0] ss:$8 sps:$4 sm:$0xff]   ;;  %v2225_v8 = vcombine.low %v13_v48, %v21_v49  ;;  %v2227_v9 = vcombine.low %v14_v50, %v22_v51 }
  0x14   :  { %1803 = vmatpush1.bf16.msra.mxu1 %v2550_v19  ;;  %1751 = vmatprep.subr.bf16.mxu0 %v2551_v20  ;;  %v2598_v57 = vld [vmem:[%s3876_s1 + $0x1b0] ss:$8 sps:$4 sm:$0xff]   ;;  %v2601_v59 = vld [vmem:[%s3876_s1 + $0x1a4] ss:$8 sps:$4 sm:$0xff]   ;;  %v2604_v61 = vld [vmem:[%s3876_s1 + $0x1a0] ss:$8 sps:$4 sm:$0xff]  }
  0x15   :  { %1804 = vmatprep.subr.bf16.mxu1 %v2553_v21  ;;  %1773 = vmatprep.mubr.bf16.mxu0 %v2226_v53  ;;  %v2605_v62 = vld [vmem:[%s3876_s1 + $0x94] ss:$8 sps:$4 sm:$0xff]   ;;  %v2609_v0 = vld [vmem:[%s3876_s1 + $0x90] ss:$8 sps:$4 sm:$0xff]   ;;  %v2611_v2 = vld [vmem:[%s3876_s1 + $0x84] ss:$8 sps:$4 sm:$0xff]  }
  0x16   :  { %1826 = vmatprep.mubr.bf16.mxu1 %v2228_v55  ;;  %v2607_v63 = vld [vmem:[%s3876_s1 + $0x194] ss:$8 sps:$4 sm:$0xff]   ;;  %v2610_v1 = vld [vmem:[%s3876_s1 + $0x190] ss:$8 sps:$4 sm:$0xff]   ;;  %v2613_v3 = vld [vmem:[%s3876_s1 + $0x184] ss:$8 sps:$4 sm:$0xff]  }
  0x17   :  { %1752 = vmatpush1.bf16.msra.mxu0 %v2555_v22  ;;  %v2615_v4 = vld [vmem:[%s3876_s1 + $0x80] ss:$8 sps:$4 sm:$0xff]   ;;  %v2619_v6 = vld [vmem:[%s3876_s1 + $0x274] ss:$8 sps:$4 sm:$0xff]   ;;  %v2617_v10 = vld [vmem:[%s3876_s1 + $0x270] ss:$8 sps:$4 sm:$0xff]  }
  0x18   :  { %1805 = vmatpush1.bf16.msra.mxu1 %v2556_v23  ;;  %1753 = vmatprep.subr.bf16.mxu0 %v2557_v24  ;;  %v2616_v5 = vld [vmem:[%s3876_s1 + $0x180] ss:$8 sps:$4 sm:$0xff]   ;;  %v2622_v7 = vld [vmem:[%s3876_s1 + $0x374] ss:$8 sps:$4 sm:$0xff]   ;;  %v2620_v11 = vld [vmem:[%s3876_s1 + $0x370] ss:$8 sps:$4 sm:$0xff]  }
  0x19   :  { %1806 = vmatprep.subr.bf16.mxu1 %v2559_v25  ;;  %v2625_v12 = vld [vmem:[%s3876_s1 + $0x264] ss:$8 sps:$4 sm:$0xff]   ;;  %v2623_v14 = vld [vmem:[%s3876_s1 + $0x260] ss:$8 sps:$4 sm:$0xff]   ;;  %v2631_v16 = vld [vmem:[%s3876_s1 + $0x254] ss:$8 sps:$4 sm:$0xff]  }
  0x1a   :  { %v2628_v13 = vld [vmem:[%s3876_s1 + $0x364] ss:$8 sps:$4 sm:$0xff]   ;;  %v2626_v15 = vld [vmem:[%s3876_s1 + $0x360] ss:$8 sps:$4 sm:$0xff]   ;;  %v2634_v17 = vld [vmem:[%s3876_s1 + $0x354] ss:$8 sps:$4 sm:$0xff]  }
  0x1b   :  { %1754 = vmatpush1.bf16.msra.mxu0 %v2561_v26  ;;  %v2629_v18 = vld [vmem:[%s3876_s1 + $0x250] ss:$8 sps:$4 sm:$0xff]   ;;  %v2637_v20 = vld [vmem:[%s3876_s1 + $0x244] ss:$8 sps:$4 sm:$0xff]   ;;  %v2635_v22 = vld [vmem:[%s3876_s1 + $0x240] ss:$8 sps:$4 sm:$0xff]  }
  0x1c   :  { %1807 = vmatpush1.bf16.msra.mxu1 %v2562_v27  ;;  %1755 = vmatprep.subr.bf16.mxu0 %v2563_v28  ;;  %v2632_v19 = vld [vmem:[%s3876_s1 + $0x350] ss:$8 sps:$4 sm:$0xff]   ;;  %v2640_v21 = vld [vmem:[%s3876_s1 + $0x344] ss:$8 sps:$4 sm:$0xff]   ;;  %v2638_v23 = vld [vmem:[%s3876_s1 + $0x340] ss:$8 sps:$4 sm:$0xff]  }
  0x1d   :  { %1808 = vmatprep.subr.bf16.mxu1 %v2565_v29  ;;  %v2643_v24 = vld [vmem:[%s3876_s1 + $0x234] ss:$8 sps:$4 sm:$0xff]   ;;  %v2641_v26 = vld [vmem:[%s3876_s1 + $0x230] ss:$8 sps:$4 sm:$0xff]   ;;  %v29_v28 = vld [vmem:[%s3877_s0 + $0x80] sm:$0xff] }
  0x1e   :  { %v2646_v25 = vld [vmem:[%s3876_s1 + $0x334] ss:$8 sps:$4 sm:$0xff]   ;;  %v2644_v27 = vld [vmem:[%s3876_s1 + $0x330] ss:$8 sps:$4 sm:$0xff]   ;;  %v37_v29 = vld [vmem:[%s3877_s0 + $0xc0] sm:$0xff] }
  0x1f   :  { %1756 = vmatpush1.bf16.msra.mxu0 %v2567_v30  ;;  %v30_v30 = vld [vmem:[%s3877_s0 + $0x88] sm:$0xff]  ;;  %v3244_v48 = vld [vmem:[%s3877_s0 + $0x18] sm:$0xff] }
  0x20   :  { %1809 = vmatpush1.bf16.msra.mxu1 %v2568_v31  ;;  %1757 = vmatprep.subr.bf16.mxu0 %v2569_v32  ;;  %v38_v31 = vld [vmem:[%s3877_s0 + $0xc8] sm:$0xff]  ;;  %v3251_v50 = vld [vmem:[%s3877_s0 + $0x58] sm:$0xff] }
  0x21   :  { %1810 = vmatprep.subr.bf16.mxu1 %v2571_v33  ;;  %v2649_v32 = vld [vmem:[%s3876_s1 + $0x224] ss:$8 sps:$4 sm:$0xff]   ;;  %v2242_v33 = vcombine.high %v29_v28, %v37_v29  ;;  %v2232_v51 = vcombine.high %v3244_v48, %v3251_v50  ;;  %v2662_v53 = vld [vmem:[%s3876_s1 + $0x300] ss:$8 sps:$4 sm:$0xff]   ;;  %v2670_v55 = vld [vmem:[%s3876_s1 + $0x3f4] ss:$8 sps:$4 sm:$0xff]  }
  0x23   :  { %1758 = vmatpush2.bf16.msra.mxu0 %v2573_v34  ;;  %v2244_v34 = vcombine.high %v30_v30, %v38_v31 }
  0x24   :  { %1811 = vmatpush2.bf16.msra.mxu1 %v2574_v35  ;;  %1759 = vmatprep.subr.bf16.mxu0 %v2575_v36  ;;  %v2241_v35 = vcombine.low %v29_v28, %v37_v29  ;;  %v2652_v36 = vld [vmem:[%s3876_s1 + $0x324] ss:$8 sps:$4 sm:$0xff]   ;;  %v2231_v29 = vcombine.low %v3244_v48, %v3251_v50 }
  0x25   :  { %1812 = vmatprep.subr.bf16.mxu1 %v2577_v37  ;;  %v2243_v37 = vcombine.low %v30_v30, %v38_v31  ;;  %v32_v30 = vld [vmem:[%s3877_s0 + $0x98] sm:$0xff]  ;;  %v2733_v48 = vld [vmem:[%s3876_s1 + $0x444] ss:$8 sps:$4 sm:$0xff]  }
  0x26   :  { %v40_v31 = vld [vmem:[%s3877_s0 + $0xd8] sm:$0xff] }
  0x27   :  { %1760 = vmatpush2.bf16.msra.mxu0 %v2579_v38  ;;  %v2647_v38 = vld [vmem:[%s3876_s1 + $0x220] ss:$8 sps:$4 sm:$0xff]  }
  0x28   :  { %1813 = vmatpush2.bf16.msra.mxu1 %v2580_v39  ;;  %1761 = vmatprep.subr.bf16.mxu0 %v2581_v40  ;;  %v2650_v39 = vld [vmem:[%s3876_s1 + $0x320] ss:$8 sps:$4 sm:$0xff]   ;;  %v2655_v40 = vld [vmem:[%s3876_s1 + $0x214] ss:$8 sps:$4 sm:$0xff]  }
  0x29   :  { %1814 = vmatprep.subr.bf16.mxu1 %v2583_v41  ;;  %v2658_v41 = vld [vmem:[%s3876_s1 + $0x314] ss:$8 sps:$4 sm:$0xff]  }
  0x2b   :  { %1762 = vmatpush2.bf16.msra.mxu0 %v2585_v42  ;;  %v2653_v42 = vld [vmem:[%s3876_s1 + $0x210] ss:$8 sps:$4 sm:$0xff]  }
  0x2c   :  { %1815 = vmatpush2.bf16.msra.mxu1 %v2586_v43  ;;  %1763 = vmatprep.subr.bf16.mxu0 %v2587_v44  ;;  %v2656_v43 = vld [vmem:[%s3876_s1 + $0x310] ss:$8 sps:$4 sm:$0xff]   ;;  %v2661_v44 = vld [vmem:[%s3876_s1 + $0x204] ss:$8 sps:$4 sm:$0xff]  }
  0x2d   :  { %1816 = vmatprep.subr.bf16.mxu1 %v2589_v45  ;;  %v2664_v45 = vld [vmem:[%s3876_s1 + $0x304] ss:$8 sps:$4 sm:$0xff]  }
  0x2f   :  { %1764 = vmatpush2.bf16.msra.mxu0 %v2591_v46  ;;  %v3234_v46 = vld [vmem:[%s3877_s0 + $0x10] sm:$0xff] }
  0x30   :  { %1817 = vmatpush2.bf16.msra.mxu1 %v2592_v47  ;;  %1765 = vmatprep.subr.bf16.mxu0 %v2593_v52  ;;  %v3239_v47 = vld [vmem:[%s3877_s0 + $0x50] sm:$0xff]  ;;  %v2659_v52 = vld [vmem:[%s3876_s1 + $0x200] ss:$8 sps:$4 sm:$0xff]  }
  0x31   :  { %1818 = vmatprep.subr.bf16.mxu1 %v2595_v54  ;;  %v2230_v49 = vcombine.high %v3234_v46, %v3239_v47  ;;  %v2667_v54 = vld [vmem:[%s3876_s1 + $0x2f4] ss:$8 sps:$4 sm:$0xff]   ;;  %v2229_v28 = vcombine.low %v3234_v46, %v3239_v47  ;;  %v3422_v46 = vld [vmem:[%s3877_s0 + $0x28] sm:$0xff] }
  0x32   :  { %v3427_v47 = vld [vmem:[%s3877_s0 + $0x68] sm:$0xff] }
  0x33   :  { %1766 = vmatpush2.bf16.msra.mxu0 %v2597_v56  ;;  %v2665_v56 = vld [vmem:[%s3876_s1 + $0x2f0] ss:$8 sps:$4 sm:$0xff]  }
  0x34   :  { %1819 = vmatpush2.bf16.msra.mxu1 %v2598_v57  ;;  %1767 = vmatprep.subr.bf16.mxu0 %v2599_v58  ;;  %v2668_v57 = vld [vmem:[%s3876_s1 + $0x3f0] ss:$8 sps:$4 sm:$0xff]   ;;  %v2673_v58 = vld [vmem:[%s3876_s1 + $0x2e4] ss:$8 sps:$4 sm:$0xff]  }
  0x35   :  { %1820 = vmatprep.subr.bf16.mxu1 %v2601_v59  ;;  %v2676_v59 = vld [vmem:[%s3876_s1 + $0x3e4] ss:$8 sps:$4 sm:$0xff]  }
  0x37   :  { %1768 = vmatpush2.bf16.msra.mxu0 %v2603_v60  ;;  %v2671_v60 = vld [vmem:[%s3876_s1 + $0x2e0] ss:$8 sps:$4 sm:$0xff]  }
  0x38   :  { %1821 = vmatpush2.bf16.msra.mxu1 %v2604_v61  ;;  %1769 = vmatprep.subr.bf16.mxu0 %v2605_v62  ;;  %v2674_v61 = vld [vmem:[%s3876_s1 + $0x3e0] ss:$8 sps:$4 sm:$0xff]   ;;  %v2679_v62 = vld [vmem:[%s3876_s1 + $0x2d4] ss:$8 sps:$4 sm:$0xff]  }
  0x39   :  { %1822 = vmatprep.subr.bf16.mxu1 %v2607_v63  ;;  %v2682_v63 = vld [vmem:[%s3876_s1 + $0x3d4] ss:$8 sps:$4 sm:$0xff]  }
  0x3b   :  { %1770 = vmatpush2.bf16.msra.mxu0 %v2609_v0  ;;  %v2677_v0 = vld [vmem:[%s3876_s1 + $0x2d0] ss:$8 sps:$4 sm:$0xff]  }
  0x3c   :  { %1823 = vmatpush2.bf16.msra.mxu1 %v2610_v1  ;;  %1771 = vmatprep.subr.bf16.mxu0 %v2611_v2  ;;  %v2680_v1 = vld [vmem:[%s3876_s1 + $0x3d0] ss:$8 sps:$4 sm:$0xff]   ;;  %v2685_v2 = vld [vmem:[%s3876_s1 + $0x2c4] ss:$8 sps:$4 sm:$0xff]  }
  0x3d   :  { %1824 = vmatprep.subr.bf16.mxu1 %v2613_v3  ;;  %v2688_v3 = vld [vmem:[%s3876_s1 + $0x3c4] ss:$8 sps:$4 sm:$0xff]  }
  0x3f   :  { %1772 = vmatpush2.bf16.msra.mxu0 %v2615_v4  ;;  %v2683_v4 = vld [vmem:[%s3876_s1 + $0x2c0] ss:$8 sps:$4 sm:$0xff]  }
  0x40   :  { %1825 = vmatpush2.bf16.msra.mxu1 %v2616_v5  ;;  %1847 = vmatprep.subr.bf16.mxu0 %v2619_v6  ;;  %v2686_v5 = vld [vmem:[%s3876_s1 + $0x3c0] ss:$8 sps:$4 sm:$0xff]   ;;  %v2691_v6 = vld [vmem:[%s3876_s1 + $0x2b4] ss:$8 sps:$4 sm:$0xff]  }
  0x41   :  { %1900 = vmatprep.subr.bf16.mxu1 %v2622_v7  ;;  %v2694_v7 = vld [vmem:[%s3876_s1 + $0x3b4] ss:$8 sps:$4 sm:$0xff]  }
  0x42   :  { %1774 = vmatmul.mubr.bf16.vlgmr.msra.gmra.mxu0 %v2225_v8  ;;  %v2689_v8 = vld [vmem:[%s3876_s1 + $0x2b0] ss:$8 sps:$4 sm:$0xff]  }
  0x43   :  { %1827 = vmatmul.mubr.bf16.vlgmr.msra.gmra.mxu1 %v2227_v9  ;;  %1848 = vmatpush1.bf16.msra.mxu0 %v2617_v10  ;;  %v2692_v9 = vld [vmem:[%s3876_s1 + $0x3b0] ss:$8 sps:$4 sm:$0xff]   ;;  %v2697_v10 = vld [vmem:[%s3876_s1 + $0x2a4] ss:$8 sps:$4 sm:$0xff]  }
  0x44   :  { %1901 = vmatpush1.bf16.msra.mxu1 %v2620_v11  ;;  %1849 = vmatprep.subr.bf16.mxu0 %v2625_v12  ;;  %v2700_v11 = vld [vmem:[%s3876_s1 + $0x3a4] ss:$8 sps:$4 sm:$0xff]   ;;  %v2695_v12 = vld [vmem:[%s3876_s1 + $0x2a0] ss:$8 sps:$4 sm:$0xff]  }
  0x45   :  { %1902 = vmatprep.subr.bf16.mxu1 %v2628_v13  ;;  %1783 = vmatprep.mubr.bf16.mxu0 %v2242_v33  ;;  %v2698_v13 = vld [vmem:[%s3876_s1 + $0x3a0] ss:$8 sps:$4 sm:$0xff]   ;;  %v2724_v33 = vld [vmem:[%s3876_s1 + $0x564] ss:$8 sps:$4 sm:$0xff]  }
  0x46   :  { %1836 = vmatprep.mubr.bf16.mxu1 %v2244_v34 }
  0x47   :  { %1850 = vmatpush1.bf16.msra.mxu0 %v2623_v14  ;;  %v2703_v14 = vld [vmem:[%s3876_s1 + $0x294] ss:$8 sps:$4 sm:$0xff]  }
  0x48   :  { %1903 = vmatpush1.bf16.msra.mxu1 %v2626_v15  ;;  %1851 = vmatprep.subr.bf16.mxu0 %v2631_v16  ;;  %v2706_v15 = vld [vmem:[%s3876_s1 + $0x394] ss:$8 sps:$4 sm:$0xff]   ;;  %v2701_v16 = vld [vmem:[%s3876_s1 + $0x290] ss:$8 sps:$4 sm:$0xff]  }
  0x49   :  { %1904 = vmatprep.subr.bf16.mxu1 %v2634_v17  ;;  %v2704_v17 = vld [vmem:[%s3876_s1 + $0x390] ss:$8 sps:$4 sm:$0xff]  }
  0x4a   :  { %1784 = vmatmul.mubr.bf16.gmra.mxu0 %v2241_v35  ;;  %v2248_v35 = vcombine.high %v32_v30, %v40_v31 }
  0x4b   :  { %1852 = vmatpush1.bf16.msra.mxu0 %v2629_v18  ;;  %1837 = vmatmul.mubr.bf16.gmra.mxu1 %v2243_v37  ;;  %v2709_v18 = vld [vmem:[%s3876_s1 + $0x284] ss:$8 sps:$4 sm:$0xff]   ;;  %v2722_v37 = vld [vmem:[%s3876_s1 + $0x560] ss:$8 sps:$4 sm:$0xff]  }
  0x4c   :  { %1905 = vmatpush1.bf16.msra.mxu1 %v2632_v19  ;;  %1853 = vmatprep.subr.bf16.mxu0 %v2637_v20  ;;  %v2712_v19 = vld [vmem:[%s3876_s1 + $0x384] ss:$8 sps:$4 sm:$0xff]   ;;  %v2707_v20 = vld [vmem:[%s3876_s1 + $0x280] ss:$8 sps:$4 sm:$0xff]  }
  0x4d   :  { %1906 = vmatprep.subr.bf16.mxu1 %v2640_v21  ;;  %1879 = vmatprep.mubr.bf16.mxu0 %v2230_v49  ;;  %v2710_v21 = vld [vmem:[%s3876_s1 + $0x380] ss:$8 sps:$4 sm:$0xff]   ;;  %v2736_v49 = vld [vmem:[%s3876_s1 + $0x544] ss:$8 sps:$4 sm:$0xff]  }
  0x4e   :  { %1932 = vmatprep.mubr.bf16.mxu1 %v2232_v51  ;;  %v2236_v51 = vcombine.high %v3422_v46, %v3427_v47 }
  0x4f   :  { %1854 = vmatpush1.bf16.msra.mxu0 %v2635_v22  ;;  %v2715_v22 = vld [vmem:[%s3876_s1 + $0x474] ss:$8 sps:$4 sm:$0xff]  }
  0x50   :  { %1907 = vmatpush1.bf16.msra.mxu1 %v2638_v23  ;;  %1855 = vmatprep.subr.bf16.mxu0 %v2643_v24  ;;  %v2718_v23 = vld [vmem:[%s3876_s1 + $0x574] ss:$8 sps:$4 sm:$0xff]   ;;  %v2713_v24 = vld [vmem:[%s3876_s1 + $0x470] ss:$8 sps:$4 sm:$0xff]  }
  0x51   :  { %1908 = vmatprep.subr.bf16.mxu1 %v2646_v25  ;;  %v2716_v25 = vld [vmem:[%s3876_s1 + $0x570] ss:$8 sps:$4 sm:$0xff]  }
  0x53   :  { %1856 = vmatpush1.bf16.msra.mxu0 %v2641_v26  ;;  %v31_v26 = vld [vmem:[%s3877_s0 + $0x90] sm:$0xff] }
  0x54   :  { %1909 = vmatpush1.bf16.msra.mxu1 %v2644_v27  ;;  %1857 = vmatprep.subr.bf16.mxu0 %v2649_v32  ;;  %v39_v27 = vld [vmem:[%s3877_s0 + $0xd0] sm:$0xff]  ;;  %v2721_v32 = vld [vmem:[%s3876_s1 + $0x464] ss:$8 sps:$4 sm:$0xff]  }
  0x55   :  { %1910 = vmatprep.subr.bf16.mxu1 %v2652_v36  ;;  %v2246_v34 = vcombine.high %v31_v26, %v39_v27  ;;  %v2719_v36 = vld [vmem:[%s3876_s1 + $0x460] ss:$8 sps:$4 sm:$0xff]  }
  0x57   :  { %1858 = vmatpush1.bf16.msra.mxu0 %v2647_v38  ;;  %v2727_v38 = vld [vmem:[%s3876_s1 + $0x454] ss:$8 sps:$4 sm:$0xff]  }
  0x58   :  { %1911 = vmatpush1.bf16.msra.mxu1 %v2650_v39  ;;  %1859 = vmatprep.subr.bf16.mxu0 %v2655_v40  ;;  %v2730_v39 = vld [vmem:[%s3876_s1 + $0x554] ss:$8 sps:$4 sm:$0xff]   ;;  %v2725_v40 = vld [vmem:[%s3876_s1 + $0x450] ss:$8 sps:$4 sm:$0xff]  }
  0x59   :  { %1912 = vmatprep.subr.bf16.mxu1 %v2658_v41  ;;  %v2728_v41 = vld [vmem:[%s3876_s1 + $0x550] ss:$8 sps:$4 sm:$0xff]  }
  0x5b   :  { %1860 = vmatpush1.bf16.msra.mxu0 %v2653_v42  ;;  %v3412_v42 = vld [vmem:[%s3877_s0 + $0x20] sm:$0xff] }
  0x5c   :  { %1913 = vmatpush1.bf16.msra.mxu1 %v2656_v43  ;;  %1861 = vmatprep.subr.bf16.mxu0 %v2661_v44  ;;  %v3417_v43 = vld [vmem:[%s3877_s0 + $0x60] sm:$0xff]  ;;  %v2245_v44 = vcombine.low %v31_v26, %v39_v27 }
  0x5d   :  { %1914 = vmatprep.subr.bf16.mxu1 %v2664_v45  ;;  %v2247_v45 = vcombine.low %v32_v30, %v40_v31  ;;  %v2234_v50 = vcombine.high %v3412_v42, %v3417_v43  ;;  %v2793_v26 = vld [vmem:[%s3876_s1 + $0x4a4] ss:$8 sps:$4 sm:$0xff]   ;;  %v2799_v30 = vld [vmem:[%s3876_s1 + $0x494] ss:$8 sps:$4 sm:$0xff]  }
  0x5e   :  { %v2796_v27 = vld [vmem:[%s3876_s1 + $0x5a4] ss:$8 sps:$4 sm:$0xff]   ;;  %v2802_v31 = vld [vmem:[%s3876_s1 + $0x594] ss:$8 sps:$4 sm:$0xff]  }
  0x5f   :  { %1862 = vmatpush1.bf16.msra.mxu0 %v2659_v52  ;;  %v2731_v52 = vld [vmem:[%s3876_s1 + $0x440] ss:$8 sps:$4 sm:$0xff]  }
  0x60   :  { %1915 = vmatpush1.bf16.msra.mxu1 %v2662_v53  ;;  %1863 = vmatprep.subr.bf16.mxu0 %v2667_v54  ;;  %v2734_v53 = vld [vmem:[%s3876_s1 + $0x540] ss:$8 sps:$4 sm:$0xff]   ;;  %v2739_v54 = vld [vmem:[%s3876_s1 + $0x434] ss:$8 sps:$4 sm:$0xff]  }
  0x61   :  { %1916 = vmatprep.subr.bf16.mxu1 %v2670_v55  ;;  %v2742_v55 = vld [vmem:[%s3876_s1 + $0x534] ss:$8 sps:$4 sm:$0xff]  }
  0x63   :  { %1864 = vmatpush2.bf16.msra.mxu0 %v2665_v56  ;;  %v2737_v56 = vld [vmem:[%s3876_s1 + $0x430] ss:$8 sps:$4 sm:$0xff]  }
  0x64   :  { %1917 = vmatpush2.bf16.msra.mxu1 %v2668_v57  ;;  %1865 = vmatprep.subr.bf16.mxu0 %v2673_v58  ;;  %v2740_v57 = vld [vmem:[%s3876_s1 + $0x530] ss:$8 sps:$4 sm:$0xff]   ;;  %v2745_v58 = vld [vmem:[%s3876_s1 + $0x424] ss:$8 sps:$4 sm:$0xff]  }
  0x65   :  { %1918 = vmatprep.subr.bf16.mxu1 %v2676_v59  ;;  %v2748_v59 = vld [vmem:[%s3876_s1 + $0x524] ss:$8 sps:$4 sm:$0xff]  }
  0x67   :  { %1866 = vmatpush2.bf16.msra.mxu0 %v2671_v60  ;;  %v2743_v60 = vld [vmem:[%s3876_s1 + $0x420] ss:$8 sps:$4 sm:$0xff]  }
  0x68   :  { %1919 = vmatpush2.bf16.msra.mxu1 %v2674_v61  ;;  %1867 = vmatprep.subr.bf16.mxu0 %v2679_v62  ;;  %v2746_v61 = vld [vmem:[%s3876_s1 + $0x520] ss:$8 sps:$4 sm:$0xff]   ;;  %v2751_v62 = vld [vmem:[%s3876_s1 + $0x414] ss:$8 sps:$4 sm:$0xff]  }
  0x69   :  { %1920 = vmatprep.subr.bf16.mxu1 %v2682_v63  ;;  %v2754_v63 = vld [vmem:[%s3876_s1 + $0x514] ss:$8 sps:$4 sm:$0xff]  }
  0x6b   :  { %1868 = vmatpush2.bf16.msra.mxu0 %v2677_v0  ;;  %v2749_v0 = vld [vmem:[%s3876_s1 + $0x410] ss:$8 sps:$4 sm:$0xff]  }
  0x6c   :  { %1921 = vmatpush2.bf16.msra.mxu1 %v2680_v1  ;;  %1869 = vmatprep.subr.bf16.mxu0 %v2685_v2  ;;  %v2752_v1 = vld [vmem:[%s3876_s1 + $0x510] ss:$8 sps:$4 sm:$0xff]   ;;  %v2757_v2 = vld [vmem:[%s3876_s1 + $0x404] ss:$8 sps:$4 sm:$0xff]  }
  0x6d   :  { %1922 = vmatprep.subr.bf16.mxu1 %v2688_v3  ;;  %v2760_v3 = vld [vmem:[%s3876_s1 + $0x504] ss:$8 sps:$4 sm:$0xff]  }
  0x6f   :  { %1870 = vmatpush2.bf16.msra.mxu0 %v2683_v4  ;;  %v2755_v4 = vld [vmem:[%s3876_s1 + $0x400] ss:$8 sps:$4 sm:$0xff]  }
  0x70   :  { %1923 = vmatpush2.bf16.msra.mxu1 %v2686_v5  ;;  %1871 = vmatprep.subr.bf16.mxu0 %v2691_v6  ;;  %v2758_v5 = vld [vmem:[%s3876_s1 + $0x500] ss:$8 sps:$4 sm:$0xff]   ;;  %v2763_v6 = vld [vmem:[%s3876_s1 + $0x4f4] ss:$8 sps:$4 sm:$0xff]  }
  0x71   :  { %1924 = vmatprep.subr.bf16.mxu1 %v2694_v7  ;;  %v2766_v7 = vld [vmem:[%s3876_s1 + $0x5f4] ss:$8 sps:$4 sm:$0xff]  }
  0x73   :  { %1872 = vmatpush2.bf16.msra.mxu0 %v2689_v8  ;;  %v2761_v8 = vld [vmem:[%s3876_s1 + $0x4f0] ss:$8 sps:$4 sm:$0xff]  }
  0x74   :  { %1925 = vmatpush2.bf16.msra.mxu1 %v2692_v9  ;;  %1873 = vmatprep.subr.bf16.mxu0 %v2697_v10  ;;  %v2764_v9 = vld [vmem:[%s3876_s1 + $0x5f0] ss:$8 sps:$4 sm:$0xff]   ;;  %v2769_v10 = vld [vmem:[%s3876_s1 + $0x4e4] ss:$8 sps:$4 sm:$0xff]  }
  0x75   :  { %1926 = vmatprep.subr.bf16.mxu1 %v2700_v11  ;;  %v2772_v11 = vld [vmem:[%s3876_s1 + $0x5e4] ss:$8 sps:$4 sm:$0xff]  }
  0x77   :  { %1874 = vmatpush2.bf16.msra.mxu0 %v2695_v12  ;;  %v2767_v12 = vld [vmem:[%s3876_s1 + $0x4e0] ss:$8 sps:$4 sm:$0xff]  }
  0x78   :  { %1927 = vmatpush2.bf16.msra.mxu1 %v2698_v13  ;;  %1875 = vmatprep.subr.bf16.mxu0 %v2703_v14  ;;  %v2770_v13 = vld [vmem:[%s3876_s1 + $0x5e0] ss:$8 sps:$4 sm:$0xff]   ;;  %v2775_v14 = vld [vmem:[%s3876_s1 + $0x4d4] ss:$8 sps:$4 sm:$0xff]  }
  0x79   :  { %1928 = vmatprep.subr.bf16.mxu1 %v2706_v15  ;;  %v2778_v15 = vld [vmem:[%s3876_s1 + $0x5d4] ss:$8 sps:$4 sm:$0xff]  }
  0x7b   :  { %1876 = vmatpush2.bf16.msra.mxu0 %v2701_v16  ;;  %v2773_v16 = vld [vmem:[%s3876_s1 + $0x4d0] ss:$8 sps:$4 sm:$0xff]  }
  0x7c   :  { %1929 = vmatpush2.bf16.msra.mxu1 %v2704_v17  ;;  %1877 = vmatprep.subr.bf16.mxu0 %v2709_v18  ;;  %v2776_v17 = vld [vmem:[%s3876_s1 + $0x5d0] ss:$8 sps:$4 sm:$0xff]   ;;  %v2781_v18 = vld [vmem:[%s3876_s1 + $0x4c4] ss:$8 sps:$4 sm:$0xff]  }
  0x7d   :  { %1930 = vmatprep.subr.bf16.mxu1 %v2712_v19  ;;  %v2784_v19 = vld [vmem:[%s3876_s1 + $0x5c4] ss:$8 sps:$4 sm:$0xff]  }
  0x7f   :  { %1878 = vmatpush2.bf16.msra.mxu0 %v2707_v20  ;;  %v2779_v20 = vld [vmem:[%s3876_s1 + $0x4c0] ss:$8 sps:$4 sm:$0xff]  }
  0x80   :  { %1931 = vmatpush2.bf16.msra.mxu1 %v2710_v21  ;;  %1953 = vmatprep.subr.bf16.mxu0 %v2715_v22  ;;  %v2782_v21 = vld [vmem:[%s3876_s1 + $0x5c0] ss:$8 sps:$4 sm:$0xff]   ;;  %v2787_v22 = vld [vmem:[%s3876_s1 + $0x4b4] ss:$8 sps:$4 sm:$0xff]  }
  0x81   :  { %2006 = vmatprep.subr.bf16.mxu1 %v2718_v23  ;;  %v2790_v23 = vld [vmem:[%s3876_s1 + $0x5b4] ss:$8 sps:$4 sm:$0xff]  }
  0x82   :  { %1880 = vmatmul.mubr.bf16.vlgmr.msra.gmra.mxu0 %v2229_v28  ;;  %v2791_v28 = vld [vmem:[%s3876_s1 + $0x4a0] ss:$8 sps:$4 sm:$0xff]  }
  0x83   :  { %1933 = vmatmul.mubr.bf16.vlgmr.msra.gmra.mxu1 %v2231_v29  ;;  %1954 = vmatpush1.bf16.msra.mxu0 %v2713_v24  ;;  %v2785_v24 = vld [vmem:[%s3876_s1 + $0x4b0] ss:$8 sps:$4 sm:$0xff]   ;;  %v2794_v29 = vld [vmem:[%s3876_s1 + $0x5a0] ss:$8 sps:$4 sm:$0xff]  }
  0x84   :  { %2007 = vmatpush1.bf16.msra.mxu1 %v2716_v25  ;;  %1955 = vmatprep.subr.bf16.mxu0 %v2721_v32  ;;  %v2788_v25 = vld [vmem:[%s3876_s1 + $0x5b0] ss:$8 sps:$4 sm:$0xff]  }
  0x85   :  { %2008 = vmatprep.subr.bf16.mxu1 %v2724_v33  ;;  %1889 = vmatprep.mubr.bf16.mxu0 %v2246_v34  ;;  %v2797_v32 = vld [vmem:[%s3876_s1 + $0x490] ss:$8 sps:$4 sm:$0xff]   ;;  %v2805_v34 = vld [vmem:[%s3876_s1 + $0x484] ss:$8 sps:$4 sm:$0xff]  }
  0x86   :  { %1942 = vmatprep.mubr.bf16.mxu1 %v2248_v35  ;;  %v2800_v33 = vld [vmem:[%s3876_s1 + $0x590] ss:$8 sps:$4 sm:$0xff]   ;;  %v2808_v35 = vld [vmem:[%s3876_s1 + $0x584] ss:$8 sps:$4 sm:$0xff]  }
  0x87   :  { %1956 = vmatpush1.bf16.msra.mxu0 %v2719_v36  ;;  %v2803_v36 = vld [vmem:[%s3876_s1 + $0x480] ss:$8 sps:$4 sm:$0xff]  }
  0x88   :  { %2009 = vmatpush1.bf16.msra.mxu1 %v2722_v37  ;;  %1957 = vmatprep.subr.bf16.mxu0 %v2727_v38  ;;  %v2806_v37 = vld [vmem:[%s3876_s1 + $0x580] ss:$8 sps:$4 sm:$0xff]   ;;  %v2811_v38 = vld [vmem:[%s3876_s1 + $0x674] ss:$8 sps:$4 sm:$0xff]  }
  0x89   :  { %2010 = vmatprep.subr.bf16.mxu1 %v2730_v39  ;;  %v2814_v39 = vld [vmem:[%s3876_s1 + $0x774] ss:$8 sps:$4 sm:$0xff]  }
  0x8a   :  { %1890 = vmatmul.mubr.bf16.gmra.mxu0 %v2245_v44  ;;  %v2235_v44 = vcombine.low %v3422_v46, %v3427_v47  ;;  %v2817_v46 = vld [vmem:[%s3876_s1 + $0x664] ss:$8 sps:$4 sm:$0xff]  }
  0x8b   :  { %1943 = vmatmul.mubr.bf16.gmra.mxu1 %v2247_v45  ;;  %1958 = vmatpush1.bf16.msra.mxu0 %v2725_v40  ;;  %v33_v40 = vld [vmem:[%s3877_s0 + $0xa0] sm:$0xff] }
  0x8c   :  { %2011 = vmatpush1.bf16.msra.mxu1 %v2728_v41  ;;  %1959 = vmatprep.subr.bf16.mxu0 %v2733_v48  ;;  %v2233_v41 = vcombine.low %v3412_v42, %v3417_v43  ;;  %v41_v45 = vld [vmem:[%s3877_s0 + $0xe0] sm:$0xff]  ;;  %v34_v48 = vld [vmem:[%s3877_s0 + $0xa8] sm:$0xff]  ;;  %v2809_v42 = vld [vmem:[%s3876_s1 + $0x670] ss:$8 sps:$4 sm:$0xff]  }
  0x8d   :  { %2012 = vmatprep.subr.bf16.mxu1 %v2736_v49  ;;  %1985 = vmatprep.mubr.bf16.mxu0 %v2234_v50  ;;  %v42_v49 = vld [vmem:[%s3877_s0 + $0xe8] sm:$0xff]  ;;  %v2812_v43 = vld [vmem:[%s3876_s1 + $0x770] ss:$8 sps:$4 sm:$0xff]   ;;  %v2250_v50 = vcombine.high %v33_v40, %v41_v45 }
  0x8e   :  { %2038 = vmatprep.mubr.bf16.mxu1 %v2236_v51  ;;  %v2820_v47 = vld [vmem:[%s3876_s1 + $0x764] ss:$8 sps:$4 sm:$0xff]   ;;  %v2252_v51 = vcombine.high %v34_v48, %v42_v49 }
  0x8f   :  { %1960 = vmatpush1.bf16.msra.mxu0 %v2731_v52  ;;  %v2815_v52 = vld [vmem:[%s3876_s1 + $0x660] ss:$8 sps:$4 sm:$0xff]  }
  0x90   :  { %2013 = vmatpush1.bf16.msra.mxu1 %v2734_v53  ;;  %1961 = vmatprep.subr.bf16.mxu0 %v2739_v54  ;;  %v2818_v53 = vld [vmem:[%s3876_s1 + $0x760] ss:$8 sps:$4 sm:$0xff]   ;;  %v2823_v54 = vld [vmem:[%s3876_s1 + $0x654] ss:$8 sps:$4 sm:$0xff]  }
  0x91   :  { %2014 = vmatprep.subr.bf16.mxu1 %v2742_v55  ;;  %v2826_v55 = vld [vmem:[%s3876_s1 + $0x754] ss:$8 sps:$4 sm:$0xff]  }
  0x93   :  { %1962 = vmatpush1.bf16.msra.mxu0 %v2737_v56  ;;  %v3638_v56 = vld [vmem:[%s3877_s0 + $0x30] sm:$0xff] }
  0x94   :  { %2015 = vmatpush1.bf16.msra.mxu1 %v2740_v57  ;;  %1963 = vmatprep.subr.bf16.mxu0 %v2745_v58  ;;  %v2249_v57 = vcombine.low %v33_v40, %v41_v45  ;;  %v2251_v58 = vcombine.low %v34_v48, %v42_v49  ;;  %v2881_v40 = vld [vmem:[%s3876_s1 + $0x6b0] ss:$8 sps:$4 sm:$0xff]   ;;  %v2892_v45 = vld [vmem:[%s3876_s1 + $0x7a4] ss:$8 sps:$4 sm:$0xff]   ;;  %v2887_v48 = vld [vmem:[%s3876_s1 + $0x6a0] ss:$8 sps:$4 sm:$0xff]  }
  0x95   :  { %2016 = vmatprep.subr.bf16.mxu1 %v2748_v59  ;;  %v3643_v59 = vld [vmem:[%s3877_s0 + $0x70] sm:$0xff]  ;;  %v2890_v49 = vld [vmem:[%s3876_s1 + $0x7a0] ss:$8 sps:$4 sm:$0xff]  }
  0x97   :  { %1964 = vmatpush1.bf16.msra.mxu0 %v2743_v60  ;;  %v3648_v60 = vld [vmem:[%s3877_s0 + $0x38] sm:$0xff] }
  0x98   :  { %2017 = vmatpush1.bf16.msra.mxu1 %v2746_v61  ;;  %1965 = vmatprep.subr.bf16.mxu0 %v2751_v62  ;;  %v3653_v61 = vld [vmem:[%s3877_s0 + $0x78] sm:$0xff] }
  0x99   :  { %2018 = vmatprep.subr.bf16.mxu1 %v2754_v63  ;;  %v2821_v62 = vld [vmem:[%s3876_s1 + $0x650] ss:$8 sps:$4 sm:$0xff]  }
  0x9a   :  { %v2824_v63 = vld [vmem:[%s3876_s1 + $0x750] ss:$8 sps:$4 sm:$0xff]  }
  0x9b   :  { %1966 = vmatpush1.bf16.msra.mxu0 %v2749_v0  ;;  %v2829_v0 = vld [vmem:[%s3876_s1 + $0x644] ss:$8 sps:$4 sm:$0xff]  }
  0x9c   :  { %2019 = vmatpush1.bf16.msra.mxu1 %v2752_v1  ;;  %1967 = vmatprep.subr.bf16.mxu0 %v2757_v2  ;;  %v2832_v1 = vld [vmem:[%s3876_s1 + $0x744] ss:$8 sps:$4 sm:$0xff]   ;;  %v2238_v2 = vcombine.high %v3638_v56, %v3643_v59 }
  0x9d   :  { %2020 = vmatprep.subr.bf16.mxu1 %v2760_v3  ;;  %v2240_v3 = vcombine.high %v3648_v60, %v3653_v61 }
  0x9f   :  { %1968 = vmatpush1.bf16.msra.mxu0 %v2755_v4  ;;  %v2827_v4 = vld [vmem:[%s3876_s1 + $0x640] ss:$8 sps:$4 sm:$0xff]  }
  0xa0   :  { %2021 = vmatpush1.bf16.msra.mxu1 %v2758_v5  ;;  %1969 = vmatprep.subr.bf16.mxu0 %v2763_v6  ;;  %v2830_v5 = vld [vmem:[%s3876_s1 + $0x740] ss:$8 sps:$4 sm:$0xff]   ;;  %v2835_v6 = vld [vmem:[%s3876_s1 + $0x634] ss:$8 sps:$4 sm:$0xff]  }
  0xa1   :  { %2022 = vmatprep.subr.bf16.mxu1 %v2766_v7  ;;  %v2838_v7 = vld [vmem:[%s3876_s1 + $0x734] ss:$8 sps:$4 sm:$0xff]  }
  0xa3   :  { %1970 = vmatpush2.bf16.msra.mxu0 %v2761_v8  ;;  %v2833_v8 = vld [vmem:[%s3876_s1 + $0x630] ss:$8 sps:$4 sm:$0xff]  }
  0xa4   :  { %2023 = vmatpush2.bf16.msra.mxu1 %v2764_v9  ;;  %1971 = vmatprep.subr.bf16.mxu0 %v2769_v10  ;;  %v2836_v9 = vld [vmem:[%s3876_s1 + $0x730] ss:$8 sps:$4 sm:$0xff]   ;;  %v2841_v10 = vld [vmem:[%s3876_s1 + $0x624] ss:$8 sps:$4 sm:$0xff]  }
  0xa5   :  { %2024 = vmatprep.subr.bf16.mxu1 %v2772_v11  ;;  %v2844_v11 = vld [vmem:[%s3876_s1 + $0x724] ss:$8 sps:$4 sm:$0xff]  }
  0xa7   :  { %1972 = vmatpush2.bf16.msra.mxu0 %v2767_v12  ;;  %v2839_v12 = vld [vmem:[%s3876_s1 + $0x620] ss:$8 sps:$4 sm:$0xff]  }
  0xa8   :  { %2025 = vmatpush2.bf16.msra.mxu1 %v2770_v13  ;;  %1973 = vmatprep.subr.bf16.mxu0 %v2775_v14  ;;  %v2842_v13 = vld [vmem:[%s3876_s1 + $0x720] ss:$8 sps:$4 sm:$0xff]   ;;  %v2847_v14 = vld [vmem:[%s3876_s1 + $0x614] ss:$8 sps:$4 sm:$0xff]  }
  0xa9   :  { %2026 = vmatprep.subr.bf16.mxu1 %v2778_v15  ;;  %v2850_v15 = vld [vmem:[%s3876_s1 + $0x714] ss:$8 sps:$4 sm:$0xff]  }
  0xab   :  { %1974 = vmatpush2.bf16.msra.mxu0 %v2773_v16  ;;  %v2845_v16 = vld [vmem:[%s3876_s1 + $0x610] ss:$8 sps:$4 sm:$0xff]  }
  0xac   :  { %2027 = vmatpush2.bf16.msra.mxu1 %v2776_v17  ;;  %1975 = vmatprep.subr.bf16.mxu0 %v2781_v18  ;;  %v2848_v17 = vld [vmem:[%s3876_s1 + $0x710] ss:$8 sps:$4 sm:$0xff]   ;;  %v2853_v18 = vld [vmem:[%s3876_s1 + $0x604] ss:$8 sps:$4 sm:$0xff]  }
  0xad   :  { %2028 = vmatprep.subr.bf16.mxu1 %v2784_v19  ;;  %v2856_v19 = vld [vmem:[%s3876_s1 + $0x704] ss:$8 sps:$4 sm:$0xff]  }
  0xaf   :  { %1976 = vmatpush2.bf16.msra.mxu0 %v2779_v20  ;;  %v2851_v20 = vld [vmem:[%s3876_s1 + $0x600] ss:$8 sps:$4 sm:$0xff]  }
  0xb0   :  { %2029 = vmatpush2.bf16.msra.mxu1 %v2782_v21  ;;  %1977 = vmatprep.subr.bf16.mxu0 %v2787_v22  ;;  %v2854_v21 = vld [vmem:[%s3876_s1 + $0x700] ss:$8 sps:$4 sm:$0xff]   ;;  %v2859_v22 = vld [vmem:[%s3876_s1 + $0x6f4] ss:$8 sps:$4 sm:$0xff]  }
  0xb1   :  { %2030 = vmatprep.subr.bf16.mxu1 %v2790_v23  ;;  %v2862_v23 = vld [vmem:[%s3876_s1 + $0x7f4] ss:$8 sps:$4 sm:$0xff]  }
  0xb3   :  { %1978 = vmatpush2.bf16.msra.mxu0 %v2785_v24  ;;  %v2857_v24 = vld [vmem:[%s3876_s1 + $0x6f0] ss:$8 sps:$4 sm:$0xff]  }
  0xb4   :  { %2031 = vmatpush2.bf16.msra.mxu1 %v2788_v25  ;;  %1979 = vmatprep.subr.bf16.mxu0 %v2793_v26  ;;  %v2860_v25 = vld [vmem:[%s3876_s1 + $0x7f0] ss:$8 sps:$4 sm:$0xff]   ;;  %v2865_v26 = vld [vmem:[%s3876_s1 + $0x6e4] ss:$8 sps:$4 sm:$0xff]  }
  0xb5   :  { %2032 = vmatprep.subr.bf16.mxu1 %v2796_v27  ;;  %v2868_v27 = vld [vmem:[%s3876_s1 + $0x7e4] ss:$8 sps:$4 sm:$0xff]  }
  0xb7   :  { %1980 = vmatpush2.bf16.msra.mxu0 %v2791_v28  ;;  %v2863_v28 = vld [vmem:[%s3876_s1 + $0x6e0] ss:$8 sps:$4 sm:$0xff]  }
  0xb8   :  { %2033 = vmatpush2.bf16.msra.mxu1 %v2794_v29  ;;  %1981 = vmatprep.subr.bf16.mxu0 %v2799_v30  ;;  %v2866_v29 = vld [vmem:[%s3876_s1 + $0x7e0] ss:$8 sps:$4 sm:$0xff]   ;;  %v2871_v30 = vld [vmem:[%s3876_s1 + $0x6d4] ss:$8 sps:$4 sm:$0xff]  }
  0xb9   :  { %2034 = vmatprep.subr.bf16.mxu1 %v2802_v31  ;;  %v2874_v31 = vld [vmem:[%s3876_s1 + $0x7d4] ss:$8 sps:$4 sm:$0xff]  }
  0xbb   :  { %1982 = vmatpush2.bf16.msra.mxu0 %v2797_v32  ;;  %v2869_v32 = vld [vmem:[%s3876_s1 + $0x6d0] ss:$8 sps:$4 sm:$0xff]  }
  0xbc   :  { %2035 = vmatpush2.bf16.msra.mxu1 %v2800_v33  ;;  %1983 = vmatprep.subr.bf16.mxu0 %v2805_v34  ;;  %v2872_v33 = vld [vmem:[%s3876_s1 + $0x7d0] ss:$8 sps:$4 sm:$0xff]   ;;  %v2877_v34 = vld [vmem:[%s3876_s1 + $0x6c4] ss:$8 sps:$4 sm:$0xff]  }
  0xbd   :  { %2036 = vmatprep.subr.bf16.mxu1 %v2808_v35  ;;  %v2880_v35 = vld [vmem:[%s3876_s1 + $0x7c4] ss:$8 sps:$4 sm:$0xff]  }
  0xbf   :  { %1984 = vmatpush2.bf16.msra.mxu0 %v2803_v36  ;;  %v2875_v36 = vld [vmem:[%s3876_s1 + $0x6c0] ss:$8 sps:$4 sm:$0xff]  }
  0xc0   :  { %2037 = vmatpush2.bf16.msra.mxu1 %v2806_v37  ;;  %2059 = vmatprep.subr.bf16.mxu0 %v2811_v38  ;;  %v2878_v37 = vld [vmem:[%s3876_s1 + $0x7c0] ss:$8 sps:$4 sm:$0xff]   ;;  %v2883_v38 = vld [vmem:[%s3876_s1 + $0x6b4] ss:$8 sps:$4 sm:$0xff]  }
  0xc1   :  { %2112 = vmatprep.subr.bf16.mxu1 %v2814_v39  ;;  %v2886_v39 = vld [vmem:[%s3876_s1 + $0x7b4] ss:$8 sps:$4 sm:$0xff]  }
  0xc2   :  { %1986 = vmatmul.mubr.bf16.vlgmr.msra.gmra.mxu0 %v2233_v41  ;;  %v2884_v41 = vld [vmem:[%s3876_s1 + $0x7b0] ss:$8 sps:$4 sm:$0xff]  }
  0xc3   :  { %2039 = vmatmul.mubr.bf16.vlgmr.msra.gmra.mxu1 %v2235_v44  ;;  %2060 = vmatpush1.bf16.msra.mxu0 %v2809_v42  ;;  %v2889_v44 = vld [vmem:[%s3876_s1 + $0x6a4] ss:$8 sps:$4 sm:$0xff]   ;;  %v2895_v42 = vld [vmem:[%s3876_s1 + $0x694] ss:$8 sps:$4 sm:$0xff]  }
  0xc4   :  { %2113 = vmatpush1.bf16.msra.mxu1 %v2812_v43  ;;  %2061 = vmatprep.subr.bf16.mxu0 %v2817_v46  ;;  %v2898_v43 = vld [vmem:[%s3876_s1 + $0x794] ss:$8 sps:$4 sm:$0xff]   ;;  %v2893_v46 = vld [vmem:[%s3876_s1 + $0x690] ss:$8 sps:$4 sm:$0xff]  }
  0xc5   :  { %2114 = vmatprep.subr.bf16.mxu1 %v2820_v47  ;;  %1995 = vmatprep.mubr.bf16.mxu0 %v2250_v50  ;;  %v2896_v47 = vld [vmem:[%s3876_s1 + $0x790] ss:$8 sps:$4 sm:$0xff]   ;;  %v2901_v50 = vld [vmem:[%s3876_s1 + $0x684] ss:$8 sps:$4 sm:$0xff]  }
  0xc6   :  { %2048 = vmatprep.mubr.bf16.mxu1 %v2252_v51  ;;  %v2904_v51 = vld [vmem:[%s3876_s1 + $0x784] ss:$8 sps:$4 sm:$0xff]  }
  0xc7   :  { %2062 = vmatpush1.bf16.msra.mxu0 %v2815_v52  ;;  %v2899_v52 = vld [vmem:[%s3876_s1 + $0x680] ss:$8 sps:$4 sm:$0xff]  }
  0xc8   :  { %2115 = vmatpush1.bf16.msra.mxu1 %v2818_v53  ;;  %2063 = vmatprep.subr.bf16.mxu0 %v2823_v54  ;;  %v2902_v53 = vld [vmem:[%s3876_s1 + $0x780] ss:$8 sps:$4 sm:$0xff]   ;;  %v35_v54 = vld [vmem:[%s3877_s0 + $0xb0] sm:$0xff] }
  0xc9   :  { %2116 = vmatprep.subr.bf16.mxu1 %v2826_v55  ;;  %v43_v55 = vld [vmem:[%s3877_s0 + $0xf0] sm:$0xff] }
  0xca   :  { %1996 = vmatmul.mubr.bf16.gmra.mxu0 %v2249_v57  ;;  %v36_v57 = vld [vmem:[%s3877_s0 + $0xb8] sm:$0xff] }
  0xcb   :  { %2049 = vmatmul.mubr.bf16.gmra.mxu1 %v2251_v58  ;;  %2064 = vmatpush1.bf16.msra.mxu0 %v2821_v62  ;;  %v44_v58 = vld [vmem:[%s3877_s0 + $0xf8] sm:$0xff]  ;;  %v2237_v62 = vcombine.low %v3638_v56, %v3643_v59 }
  0xcc   :  { %2117 = vmatpush1.bf16.msra.mxu1 %v2824_v63  ;;  %2065 = vmatprep.subr.bf16.mxu0 %v2829_v0  ;;  %v2239_v63 = vcombine.low %v3648_v60, %v3653_v61  ;;  %v2254_v0 = vcombine.high %v35_v54, %v43_v55 }
  0xcd   :  { %2118 = vmatprep.subr.bf16.mxu1 %v2832_v1  ;;  %2091 = vmatprep.mubr.bf16.mxu0 %v2238_v2  ;;  %v2256_v1 = vcombine.high %v36_v57, %v44_v58  ;;  %v2253_v2 = vcombine.low %v35_v54, %v43_v55 }
  0xce   :  { %2144 = vmatprep.mubr.bf16.mxu1 %v2240_v3  ;;  %v2255_v3 = vcombine.low %v36_v57, %v44_v58 }
  0xcf   :  { %2066 = vmatpush1.bf16.msra.mxu0 %v2827_v4 }
  0xd0   :  { %2119 = vmatpush1.bf16.msra.mxu1 %v2830_v5  ;;  %2067 = vmatprep.subr.bf16.mxu0 %v2835_v6 }
  0xd1   :  { %2120 = vmatprep.subr.bf16.mxu1 %v2838_v7 }
  0xd3   :  { %2068 = vmatpush1.bf16.msra.mxu0 %v2833_v8 }
  0xd4   :  { %2121 = vmatpush1.bf16.msra.mxu1 %v2836_v9  ;;  %2069 = vmatprep.subr.bf16.mxu0 %v2841_v10 }
  0xd5   :  { %2122 = vmatprep.subr.bf16.mxu1 %v2844_v11 }
  0xd7   :  { %2070 = vmatpush1.bf16.msra.mxu0 %v2839_v12 }
  0xd8   :  { %2123 = vmatpush1.bf16.msra.mxu1 %v2842_v13  ;;  %2071 = vmatprep.subr.bf16.mxu0 %v2847_v14 }
  0xd9   :  { %2124 = vmatprep.subr.bf16.mxu1 %v2850_v15 }
  0xdb   :  { %2072 = vmatpush1.bf16.msra.mxu0 %v2845_v16 }
  0xdc   :  { %2125 = vmatpush1.bf16.msra.mxu1 %v2848_v17  ;;  %2073 = vmatprep.subr.bf16.mxu0 %v2853_v18 }
  0xdd   :  { %2126 = vmatprep.subr.bf16.mxu1 %v2856_v19 }
  0xdf   :  { %2074 = vmatpush1.bf16.msra.mxu0 %v2851_v20 }
  0xe0   :  { %2127 = vmatpush1.bf16.msra.mxu1 %v2854_v21  ;;  %2075 = vmatprep.subr.bf16.mxu0 %v2859_v22 }
  0xe1   :  { %2128 = vmatprep.subr.bf16.mxu1 %v2862_v23 }
  0xe3   :  { %2076 = vmatpush2.bf16.msra.mxu0 %v2857_v24 }
  0xe4   :  { %2129 = vmatpush2.bf16.msra.mxu1 %v2860_v25  ;;  %2077 = vmatprep.subr.bf16.mxu0 %v2865_v26 }
  0xe5   :  { %2130 = vmatprep.subr.bf16.mxu1 %v2868_v27 }
  0xe7   :  { %2078 = vmatpush2.bf16.msra.mxu0 %v2863_v28 }
  0xe8   :  { %2131 = vmatpush2.bf16.msra.mxu1 %v2866_v29  ;;  %2079 = vmatprep.subr.bf16.mxu0 %v2871_v30 }
  0xe9   :  { %2132 = vmatprep.subr.bf16.mxu1 %v2874_v31 }
  0xeb   :  { %2080 = vmatpush2.bf16.msra.mxu0 %v2869_v32 }
  0xec   :  { %2133 = vmatpush2.bf16.msra.mxu1 %v2872_v33  ;;  %2081 = vmatprep.subr.bf16.mxu0 %v2877_v34 }
  0xed   :  { %2134 = vmatprep.subr.bf16.mxu1 %v2880_v35 }
  0xef   :  { %2082 = vmatpush2.bf16.msra.mxu0 %v2875_v36 }
  0xf0   :  { %2135 = vmatpush2.bf16.msra.mxu1 %v2878_v37  ;;  %2083 = vmatprep.subr.bf16.mxu0 %v2883_v38 }
  0xf1   :  { %2136 = vmatprep.subr.bf16.mxu1 %v2886_v39 }
  0xf3   :  { %2084 = vmatpush2.bf16.msra.mxu0 %v2881_v40 }
  0xf4   :  { %2137 = vmatpush2.bf16.msra.mxu1 %v2884_v41  ;;  %2085 = vmatprep.subr.bf16.mxu0 %v2889_v44 }
  0xf5   :  { %2138 = vmatprep.subr.bf16.mxu1 %v2892_v45 }
  0xf7   :  { %2086 = vmatpush2.bf16.msra.mxu0 %v2887_v48 }
  0xf8   :  { %2139 = vmatpush2.bf16.msra.mxu1 %v2890_v49  ;;  %2087 = vmatprep.subr.bf16.mxu0 %v2895_v42 }
  0xf9   :  { %2140 = vmatprep.subr.bf16.mxu1 %v2898_v43 }
  0xfb   :  { %2088 = vmatpush2.bf16.msra.mxu0 %v2893_v46 }
  0xfc   :  { %2141 = vmatpush2.bf16.msra.mxu1 %v2896_v47  ;;  %2089 = vmatprep.subr.bf16.mxu0 %v2901_v50 }
  0xfd   :  { %2142 = vmatprep.subr.bf16.mxu1 %v2904_v51 }
  0xff   :  { %2090 = vmatpush2.bf16.msra.mxu0 %v2899_v52 }
 0x100   :  { %2143 = vmatpush2.bf16.msra.mxu1 %v2902_v53 }
 0x102   :  { %2092 = vmatmul.mubr.bf16.vlgmr.msra.gmra.mxu0 %v2237_v62  ;;  %v1775_v4 = vpop.f32.mrf.mxu0 }
 0x103   :  { %2145 = vmatmul.mubr.bf16.vlgmr.msra.gmra.mxu1 %v2239_v63  ;;  %2101 = vmatprep.mubr.bf16.mxu0 %v2254_v0  ;;  %v1828_v5 = vpop.f32.mrf.mxu1 }
 0x104   :  { %2154 = vmatprep.mubr.bf16.mxu1 %v2256_v1  ;;  %v1777_v6 = vpop.f32.mrf.mxu0  ;;  %v1829_v44 = vadd.f32 %v1828_v5, %v1775_v4 }
 0x105   :  { %v1830_v7 = vpop.f32.mrf.mxu1 }
 0x106   :  { %v1779_v56 = vpop.f32.mrf.mxu0  ;;  %v1831_v45 = vadd.f32 %v1830_v7, %v1777_v6 }
 0x107   :  { %v1832_v59 = vpop.f32.mrf.mxu1 }
 0x108   :  { %v1781_v8 = vpop.f32.mrf.mxu0  ;;  %v1833_v43 = vadd.f32 %v1832_v59, %v1779_v56 }
 0x109   :  { %v1834_v61 = vpop.f32.mrf.mxu1 }
 0x10a   :  { %2102 = vmatmul.mubr.bf16.gmra.mxu0 %v2253_v2  ;;  %v1785_v60 = vpop.f32.mrf.mxu0  ;;  %v1835_v47 = vadd.f32 %v1834_v61, %v1781_v8 }
 0x10b   :  { %2155 = vmatmul.mubr.bf16.gmra.mxu1 %v2255_v3  ;;  %v1838_v9 = vpop.f32.mrf.mxu1 }
 0x10c   :  { %v1787_v10 = vpop.f32.mrf.mxu0  ;;  %v1839_v52 = vadd.f32 %v1838_v9, %v1785_v60 }
 0x10d   :  { %v1840_v11 = vpop.f32.mrf.mxu1 }
 0x10e   :  { %v1789_v12 = vpop.f32.mrf.mxu0  ;;  %v1841_v1 = vadd.f32 %v1840_v11, %v1787_v10 }
 0x10f   :  { %v1842_v13 = vpop.f32.mrf.mxu1 }
 0x110   :  { %v1791_v14 = vpop.f32.mrf.mxu0  ;;  %v1843_v2 = vadd.f32 %v1842_v13, %v1789_v12 }
 0x111   :  { %v1844_v16 = vpop.f32.mrf.mxu1 }
 0x112   :  { %v1845_v56 = vadd.f32 %v1844_v16, %v1791_v14 }
 0x142   :  { %v1881_v15 = vpop.f32.mrf.mxu0 }
 0x143   :  { %v1934_v17 = vpop.f32.mrf.mxu1  ;;  %v1882_v48 = vadd.f32 %v1881_v15, %v1829_v44 }
 0x144   :  { %v1883_v18 = vpop.f32.mrf.mxu0 }
 0x145   :  { %v1936_v19 = vpop.f32.mrf.mxu1  ;;  %v1884_v46 = vadd.f32 %v1883_v18, %v1831_v45  ;;  %v1935_v50 = vadd.f32 %v1934_v17, %v1882_v48 }
 0x146   :  { %v1885_v20 = vpop.f32.mrf.mxu0 }
 0x147   :  { %v1938_v21 = vpop.f32.mrf.mxu1  ;;  %v1886_v51 = vadd.f32 %v1885_v20, %v1833_v43  ;;  %v1937_v55 = vadd.f32 %v1936_v19, %v1884_v46 }
 0x148   :  { %v1887_v22 = vpop.f32.mrf.mxu0 }
 0x149   :  { %v1940_v23 = vpop.f32.mrf.mxu1  ;;  %v1888_v57 = vadd.f32 %v1887_v22, %v1835_v47  ;;  %v1939_v63 = vadd.f32 %v1938_v21, %v1886_v51 }
 0x14a   :  { %v1891_v24 = vpop.f32.mrf.mxu0 }
 0x14b   :  { %v1944_v25 = vpop.f32.mrf.mxu1  ;;  %v1892_v62 = vadd.f32 %v1891_v24, %v1839_v52  ;;  %v1941_v5 = vadd.f32 %v1940_v23, %v1888_v57 }
 0x14c   :  { %v1893_v26 = vpop.f32.mrf.mxu0 }
 0x14d   :  { %v1946_v27 = vpop.f32.mrf.mxu1  ;;  %v1894_v59 = vadd.f32 %v1893_v26, %v1841_v1  ;;  %v1945_v8 = vadd.f32 %v1944_v25, %v1892_v62 }
 0x14e   :  { %v1895_v28 = vpop.f32.mrf.mxu0 }
 0x14f   :  { %v1948_v29 = vpop.f32.mrf.mxu1  ;;  %v1896_v61 = vadd.f32 %v1895_v28, %v1843_v2  ;;  %v1947_v13 = vadd.f32 %v1946_v27, %v1894_v59 }
 0x150   :  { %v1897_v30 = vpop.f32.mrf.mxu0 }
 0x151   :  { %v1950_v31 = vpop.f32.mrf.mxu1  ;;  %v1898_v19 = vadd.f32 %v1897_v30, %v1845_v56  ;;  %v1949_v23 = vadd.f32 %v1948_v29, %v1896_v61 }
 0x153   :  { %v1951_v28 = vadd.f32 %v1950_v31, %v1898_v19 }
 0x182   :  { %v1987_v32 = vpop.f32.mrf.mxu0 }
 0x183   :  { %v2040_v33 = vpop.f32.mrf.mxu1  ;;  %v1988_v58 = vadd.f32 %v1987_v32, %v1935_v50 }
 0x184   :  { %v1989_v34 = vpop.f32.mrf.mxu0 }
 0x185   :  { %v2042_v35 = vpop.f32.mrf.mxu1  ;;  %v1990_v0 = vadd.f32 %v1989_v34, %v1937_v55  ;;  %v2041_v6 = vadd.f32 %v2040_v33, %v1988_v58 }
 0x186   :  { %v1991_v36 = vpop.f32.mrf.mxu0 }
 0x187   :  { %v2044_v37 = vpop.f32.mrf.mxu1  ;;  %v1992_v7 = vadd.f32 %v1991_v36, %v1939_v63  ;;  %v2043_v15 = vadd.f32 %v2042_v35, %v1990_v0 }
 0x188   :  { %v1993_v38 = vpop.f32.mrf.mxu0 }
 0x189   :  { %v2046_v39 = vpop.f32.mrf.mxu1  ;;  %v1994_v17 = vadd.f32 %v1993_v38, %v1941_v5  ;;  %v2045_v10 = vadd.f32 %v2044_v37, %v1992_v7 }
 0x18a   :  { %v1997_v40 = vpop.f32.mrf.mxu0 }
 0x18b   :  { %v2050_v41 = vpop.f32.mrf.mxu1  ;;  %v1998_v20 = vadd.f32 %v1997_v40, %v1945_v8  ;;  %v2047_v14 = vadd.f32 %v2046_v39, %v1994_v17 }
 0x18c   :  { %v1999_v49 = vpop.f32.mrf.mxu0 }
 0x18d   :  { %v3837_v42 = vpop.f32.mrf.mxu1  ;;  %v2000_v33 = vadd.f32 %v1999_v49, %v1947_v13  ;;  %v2051_v34 = vadd.f32 %v2050_v41, %v1998_v20 }
 0x18e   :  { %v2001_v53 = vpop.f32.mrf.mxu0 }
 0x18f   :  { %v2054_v54 = vpop.f32.mrf.mxu1  ;;  %v2002_v35 = vadd.f32 %v2001_v53, %v1949_v23  ;;  %v2053_v41 = vadd.f32 %v3837_v42, %v2000_v33 }
 0x190   :  { %v2003_v3 = vpop.f32.mrf.mxu0 }
 0x191   :  { %v2056_v4 = vpop.f32.mrf.mxu1  ;;  %v2004_v45 = vadd.f32 %v2003_v3, %v1951_v28  ;;  %v2055_v49 = vadd.f32 %v2054_v54, %v2002_v35 }
 0x193   :  { %v2057_v62 = vadd.f32 %v2056_v4, %v2004_v45 }
 0x1c2   :  { %v2093_v60 = vpop.f32.mrf.mxu0 }
 0x1c3   :  { %v2146_v9 = vpop.f32.mrf.mxu1  ;;  %v2094_v18 = vadd.f32 %v2093_v60, %v2041_v6 }
 0x1c4   :  { %v2095_v21 = vpop.f32.mrf.mxu0 }
 0x1c5   :  { %v2148_v22 = vpop.f32.mrf.mxu1  ;;  %v2147_v11 = vadd.f32 %v2146_v9, %v2094_v18  ;;  %v2096_v12 = vadd.f32 %v2095_v21, %v2043_v15 }
 0x1c6   :  { %v2097_v24 = vpop.f32.mrf.mxu0 }
 0x1c7   :  { %v2150_v32 = vpop.f32.mrf.mxu1  ;;  %v2165_v16 = vmul.f32 0.2, %v2147_v11  ;;  %v2149_v25 = vadd.f32 %v2148_v22, %v2096_v12  ;;  %v2098_v26 = vadd.f32 %v2097_v24, %v2045_v10 }
 0x1c8   :  { %v2099_v36 = vpop.f32.mrf.mxu0 }
 0x1c9   :  { %v2152_v30 = vpop.f32.mrf.mxu1  ;;  %v2173_v38 = vmax.f32 %v2147_v11, %v2165_v16  ;;  %v2166_v40 = vmul.f32 0.2, %v2149_v25  ;;  %v2151_v44 = vadd.f32 %v2150_v32, %v2098_v26  ;;  %v2100_v37 = vadd.f32 %v2099_v36, %v2047_v14 }
 0x1ca   :  { %v2103_v48 = vpop.f32.mrf.mxu0 }
 0x1cb   :  { %v2156_v27 = vpop.f32.mrf.mxu1  ;;  %2181 = vst [vmem:[%s3878_s2] sm:$0xff] %v2173_v38  ;;  %v2174_v29 = vmax.f32 %v2149_v25, %v2166_v40  ;;  %v2167_v39 = vmul.f32 0.2, %v2151_v44  ;;  %v2153_v43 = vadd.f32 %v2152_v30, %v2100_v37  ;;  %v2104_v31 = vadd.f32 %v2103_v48, %v2051_v34 }
 0x1cc   :  { %v2105_v46 = vpop.f32.mrf.mxu0 }
 0x1cd   :  { %v2158_v47 = vpop.f32.mrf.mxu1  ;;  %2182 = vst [vmem:[%s3878_s2 + $0x8] sm:$0xff] %v2174_v29  ;;  %v2517_v50 = vpack.c.bf16 %v2174_v29, %v2173_v38  ;;  %v2175_v51 = vmax.f32 %v2151_v44, %v2167_v39  ;;  %v2168_v52 = vmul.f32 0.2, %v2153_v43  ;;  %v2157_v53 = vadd.f32 %v2156_v27, %v2104_v31 }
 0x1ce   :  { %v2106_v55 = vadd.f32 %v2105_v46, %v2053_v41  ;;  %v2107_v57 = vpop.f32.mrf.mxu0 }
 0x1cf   :  { %v2160_v58 = vpop.f32.mrf.mxu1  ;;  %2213 = vst [vmem:[%s3879_s3] sm:$0xff] %v2517_v50  ;;  %2183 = vst [vmem:[%s3878_s2 + $0x10] sm:$0xff] %v2175_v51  ;;  %v2176_v42 = vmax.f32 %v2153_v43, %v2168_v52  ;;  %v2169_v54 = vmul.f32 0.2, %v2157_v53  ;;  %v2108_v63 = vadd.f32 %v2107_v57, %v2055_v49 }
 0x1d0   :  { %v2159_v0 = vadd.f32 %v2158_v47, %v2106_v55  ;;  %v2109_v1 = vpop.f32.mrf.mxu0 }
 0x1d1   :  { %2184 = vst [vmem:[%s3878_s2 + $0x18] sm:$0xff] %v2176_v42  ;;  %v2518_v2 = vpack.c.bf16 %v2176_v42, %v2175_v51  ;;  %v2177_v3 = vmax.f32 %v2157_v53, %v2169_v54  ;;  %v2161_v4 = vadd.f32 %v2160_v58, %v2108_v63  ;;  %v2110_v5 = vadd.f32 %v2109_v1, %v2057_v62  ;;  %v2162_v7 = vpop.f32.mrf.mxu1 }
 0x1d2   :  { %v2170_v6 = vmul.f32 0.2, %v2159_v0 }
 0x1d3   :  { %2214 = vst [vmem:[%s3879_s3 + $0x8] sm:$0xff] %v2518_v2  ;;  %2185 = vst [vmem:[%s3878_s2 + $0x20] sm:$0xff] %v2177_v3  ;;  %v2171_v56 = vmul.f32 0.2, %v2161_v4  ;;  %v2163_v59 = vadd.f32 %v2162_v7, %v2110_v5 }
 0x1d4   :  { %v2178_v8 = vmax.f32 %v2159_v0, %v2170_v6 }
 0x1d5   :  { %v2179_v61 = vmax.f32 %v2161_v4, %v2171_v56  ;;  %v2172_v60 = vmul.f32 0.2, %v2163_v59 }
 0x1d6   :  { %2186 = vst [vmem:[%s3878_s2 + $0x28] sm:$0xff] %v2178_v8  ;;  %v2519_v9 = vpack.c.bf16 %v2178_v8, %v2177_v3 }
 0x1d7   :  { %2187 = vst [vmem:[%s3878_s2 + $0x30] sm:$0xff] %v2179_v61  ;;  %v2180_v15 = vmax.f32 %v2163_v59, %v2172_v60 }
 0x1d8   :  { %2215 = vst [vmem:[%s3879_s3 + $0x10] sm:$0xff] %v2519_v9 }
 0x1d9   :  { %2188 = vst [vmem:[%s3878_s2 + $0x38] sm:$0xff] %v2180_v15  ;;  %v2520_v17 = vpack.c.bf16 %v2180_v15, %v2179_v61 }
 0x1db   :  { %2216 = vst [vmem:[%s3879_s3 + $0x18] sm:$0xff] %v2520_v17 }

// kernel: discriminator_forward.8
= control target key start
LH: loop header
LB: loop body
LE: loop exit
PB: predicated region body
PF: predicated region fallthrough
CT: control target
= control target key end

     0   :  { %s10442_s12 = smov 0   ;;  %s10444_s13 = smov 0   ;;  %s12673_s0 = inlined_call_operand.vmem [shape: bf16[32,4096], index: 0, kind: input, shape index: {}]   ;;  %s12674_s1 = inlined_call_operand.vmem [shape: bf16[4096,512], index: 1, kind: input, shape index: {}]   ;;  %s12675_s2 = inlined_call_operand.vmem [shape: f32[32,512], index: 2, kind: output, shape index: {0}]   ;;  %s12676_s3 = inlined_call_operand.vmem [shape: bf16[32,512], index: 3, kind: output, shape index: {1}]  }
   0x1   :  { %s10446_s14 = smov 0   ;;  %s10448_s15 = smov 0  }
   0x2   :  { %s10450_s16 = smov 0  }
   0x3 LB: > { %s23_s17 = sadd.s32 1, %s10416_s15  ;;  %s8967_s18 = sadd.s32 4294967295, %s10420_s16   ;;  %s10420_s16 = sphi %s10450_s16, %s14_s16   ;;  %s10416_s15 = sphi %s10448_s15, %s12719_s15   ;;  %s10412_s14 = sphi %s10446_s14, %s12718_s14   ;;  %s10408_s13 = sphi %s10444_s13, %s12717_s13   ;;  %s10404_s12 = sphi %s10442_s12, %s12716_s12  }
   0x4   : > { %p24_p0 = scmp.ge.s32.totalorder %s23_s17, 2  ;;  %p66_p1 = scmp.ne.s32.totalorder %s10408_s13, %s10404_s12 }
   0x5   : > { %p67_p2 = scmp.eq.s32.totalorder %s10420_s16, 0  ;;  %p98_p4 = scmp.eq.s32.totalorder %s8967_s18, 1 }
   0x6   : > { %s12721_s17 = smov (%p24_p0, %s23_s17), 0  ;;  %s59_s20 = sadd.s32 1, %s10408_s13 }
   0x7   : > { %p68_p3 = por %p67_p2, %p66_p1  ;;  %s56_s19 = ssub.s32 %s10416_s15, %s12721_s17 }
   0x8   : > { %p57_p5 = scmp.eq.s32.totalorder %s56_s19, 0  ;;  %p10477_p6 = por %p98_p4, %p66_p1 }
   0x9   : > { %p8971_p7 = scmp.ge.s32.totalorder %s10420_s16, 2 }
   0xa   : > { %s10482_s22 = scalar_select %p57_p5, %s10408_s13, %s59_s20  }
   0xb   : > { %158 = sbr.rel (%p8971_p7) target bundleno = 276 (0x114), region = 20 }
  0x10   : > { %161 = sbr.rel (!%p68_p3) target bundleno = 276 (0x114), region = 24  ;;  %s163_s23 = sand.u32 (%p68_p3), 1, %s10408_s13  }
  0x11   : > { %s9567_s24 = sshll.u32 (%p68_p3), %s10416_s15, 3  ;;  %s8972_s25 = sshll.u32 (%p68_p3), %s163_s23, 12 }
  0x12   : > { %s10490_s28 = scalar_lea.vmem (%p68_p3), %s12674_s1, %s9567_s24  ;;  %s10495_s29 = scalar_lea.vmem (%p68_p3), [#allocation2], %s8972_s25 }
  0x13   : > { %v1222_v0 = vld [vmem:[%s10490_s28] sm:$0xff] (%p68_p3)  ;;  %v1224_v1 = vld [vmem:[%s10490_s28 + $0x10] sm:$0xff] (%p68_p3) }
  0x14   : > { %v1226_v2 = vld [vmem:[%s10490_s28 + $0x20] sm:$0xff] (%p68_p3)  ;;  %1223 = vst [vmem:[%s10495_s29] sm:$0xff] (%p68_p3), %v1222_v0  ;;  %1225 = vst [vmem:[%s10495_s29 + $0x8] sm:$0xff] (%p68_p3), %v1224_v1  ;;  %v1228_v3 = vld [vmem:[%s10490_s28 + $0x30] sm:$0xff] (%p68_p3) }
  0x15   : > { %1227 = vst [vmem:[%s10495_s29 + $0x10] sm:$0xff] %v1226_v2  ;;  %v1230_v4 = vld [vmem:[%s10490_s28 + $0x40] sm:$0xff]  ;;  %v1232_v5 = vld [vmem:[%s10490_s28 + $0x50] sm:$0xff]  ;;  %1229 = vst [vmem:[%s10495_s29 + $0x18] sm:$0xff] %v1228_v3 }
  0x16   : > { %1231 = vst [vmem:[%s10495_s29 + $0x20] sm:$0xff] %v1230_v4  ;;  %1233 = vst [vmem:[%s10495_s29 + $0x28] sm:$0xff] %v1232_v5  ;;  %v1234_v6 = vld [vmem:[%s10490_s28 + $0x60] sm:$0xff]  ;;  %v1236_v7 = vld [vmem:[%s10490_s28 + $0x70] sm:$0xff] }
  0x17   : > { %v1238_v8 = vld [vmem:[%s10490_s28 + $0x80] sm:$0xff]  ;;  %1235 = vst [vmem:[%s10495_s29 + $0x30] sm:$0xff] %v1234_v6  ;;  %1237 = vst [vmem:[%s10495_s29 + $0x38] sm:$0xff] %v1236_v7  ;;  %v1240_v9 = vld [vmem:[%s10490_s28 + $0x90] sm:$0xff] }
  0x18   : > { %1239 = vst [vmem:[%s10495_s29 + $0x40] sm:$0xff] %v1238_v8  ;;  %v1242_v10 = vld [vmem:[%s10490_s28 + $0xa0] sm:$0xff]  ;;  %v1244_v11 = vld [vmem:[%s10490_s28 + $0xb0] sm:$0xff]  ;;  %1241 = vst [vmem:[%s10495_s29 + $0x48] sm:$0xff] %v1240_v9 }
  0x19   : > { %1243 = vst [vmem:[%s10495_s29 + $0x50] sm:$0xff] %v1242_v10  ;;  %1245 = vst [vmem:[%s10495_s29 + $0x58] sm:$0xff] %v1244_v11  ;;  %v1246_v12 = vld [vmem:[%s10490_s28 + $0xc0] sm:$0xff]  ;;  %v1248_v13 = vld [vmem:[%s10490_s28 + $0xd0] sm:$0xff] }
  0x1a   : > { %v1250_v14 = vld [vmem:[%s10490_s28 + $0xe0] sm:$0xff]  ;;  %1247 = vst [vmem:[%s10495_s29 + $0x60] sm:$0xff] %v1246_v12  ;;  %1249 = vst [vmem:[%s10495_s29 + $0x68] sm:$0xff] %v1248_v13  ;;  %v1252_v15 = vld [vmem:[%s10490_s28 + $0xf0] sm:$0xff] }
  0x1b   : > { %1251 = vst [vmem:[%s10495_s29 + $0x70] sm:$0xff] %v1250_v14  ;;  %v1254_v16 = vld [vmem:[%s10490_s28 + $0x100] sm:$0xff]  ;;  %v1256_v17 = vld [vmem:[%s10490_s28 + $0x110] sm:$0xff]  ;;  %1253 = vst [vmem:[%s10495_s29 + $0x78] sm:$0xff] %v1252_v15 }
  0x1c   : > { %1255 = vst [vmem:[%s10495_s29 + $0x80] sm:$0xff] %v1254_v16  ;;  %1257 = vst [vmem:[%s10495_s29 + $0x88] sm:$0xff] %v1256_v17  ;;  %v1258_v18 = vld [vmem:[%s10490_s28 + $0x120] sm:$0xff]  ;;  %v1260_v19 = vld [vmem:[%s10490_s28 + $0x130] sm:$0xff] }
  0x1d   : > { %v1262_v20 = vld [vmem:[%s10490_s28 + $0x140] sm:$0xff]  ;;  %1259 = vst [vmem:[%s10495_s29 + $0x90] sm:$0xff] %v1258_v18  ;;  %1261 = vst [vmem:[%s10495_s29 + $0x98] sm:$0xff] %v1260_v19  ;;  %v1264_v21 = vld [vmem:[%s10490_s28 + $0x150] sm:$0xff] }
  0x1e   : > { %1263 = vst [vmem:[%s10495_s29 + $0xa0] sm:$0xff] %v1262_v20  ;;  %v1266_v22 = vld [vmem:[%s10490_s28 + $0x160] sm:$0xff]  ;;  %v1268_v23 = vld [vmem:[%s10490_s28 + $0x170] sm:$0xff]  ;;  %1265 = vst [vmem:[%s10495_s29 + $0xa8] sm:$0xff] %v1264_v21 }
  0x1f   : > { %1267 = vst [vmem:[%s10495_s29 + $0xb0] sm:$0xff] %v1266_v22  ;;  %1269 = vst [vmem:[%s10495_s29 + $0xb8] sm:$0xff] %v1268_v23  ;;  %v1270_v24 = vld [vmem:[%s10490_s28 + $0x180] sm:$0xff]  ;;  %v1272_v25 = vld [vmem:[%s10490_s28 + $0x190] sm:$0xff] }
  0x20   : > { %v1274_v26 = vld [vmem:[%s10490_s28 + $0x1a0] sm:$0xff]  ;;  %1271 = vst [vmem:[%s10495_s29 + $0xc0] sm:$0xff] %v1270_v24  ;;  %1273 = vst [vmem:[%s10495_s29 + $0xc8] sm:$0xff] %v1272_v25  ;;  %v1276_v27 = vld [vmem:[%s10490_s28 + $0x1b0] sm:$0xff] }
  0x21   : > { %1275 = vst [vmem:[%s10495_s29 + $0xd0] sm:$0xff] %v1274_v26  ;;  %v1278_v28 = vld [vmem:[%s10490_s28 + $0x1c0] sm:$0xff]  ;;  %v1280_v29 = vld [vmem:[%s10490_s28 + $0x1d0] sm:$0xff]  ;;  %1277 = vst [vmem:[%s10495_s29 + $0xd8] sm:$0xff] %v1276_v27 }
  0x22   : > { %1279 = vst [vmem:[%s10495_s29 + $0xe0] sm:$0xff] %v1278_v28  ;;  %1281 = vst [vmem:[%s10495_s29 + $0xe8] sm:$0xff] %v1280_v29  ;;  %v1282_v30 = vld [vmem:[%s10490_s28 + $0x1e0] sm:$0xff]  ;;  %v1284_v31 = vld [vmem:[%s10490_s28 + $0x1f0] sm:$0xff] }
  0x23   : > { %v1286_v32 = vld [vmem:[%s10490_s28 + $0x200] sm:$0xff]  ;;  %1283 = vst [vmem:[%s10495_s29 + $0xf0] sm:$0xff] %v1282_v30  ;;  %1285 = vst [vmem:[%s10495_s29 + $0xf8] sm:$0xff] %v1284_v31  ;;  %v1288_v33 = vld [vmem:[%s10490_s28 + $0x210] sm:$0xff] }
  0x24   : > { %1287 = vst [vmem:[%s10495_s29 + $0x100] sm:$0xff] %v1286_v32  ;;  %v1290_v34 = vld [vmem:[%s10490_s28 + $0x220] sm:$0xff]  ;;  %v1292_v35 = vld [vmem:[%s10490_s28 + $0x230] sm:$0xff]  ;;  %1289 = vst [vmem:[%s10495_s29 + $0x108] sm:$0xff] %v1288_v33 }
  0x25   : > { %1291 = vst [vmem:[%s10495_s29 + $0x110] sm:$0xff] %v1290_v34  ;;  %1293 = vst [vmem:[%s10495_s29 + $0x118] sm:$0xff] %v1292_v35  ;;  %v1294_v36 = vld [vmem:[%s10490_s28 + $0x240] sm:$0xff]  ;;  %v1296_v37 = vld [vmem:[%s10490_s28 + $0x250] sm:$0xff] }
  0x26   : > { %v1298_v38 = vld [vmem:[%s10490_s28 + $0x260] sm:$0xff]  ;;  %1295 = vst [vmem:[%s10495_s29 + $0x120] sm:$0xff] %v1294_v36  ;;  %1297 = vst [vmem:[%s10495_s29 + $0x128] sm:$0xff] %v1296_v37  ;;  %v1300_v39 = vld [vmem:[%s10490_s28 + $0x270] sm:$0xff] }
  0x27   : > { %1299 = vst [vmem:[%s10495_s29 + $0x130] sm:$0xff] %v1298_v38  ;;  %v1302_v40 = vld [vmem:[%s10490_s28 + $0x280] sm:$0xff]  ;;  %v1304_v41 = vld [vmem:[%s10490_s28 + $0x290] sm:$0xff]  ;;  %1301 = vst [vmem:[%s10495_s29 + $0x138] sm:$0xff] %v1300_v39 }
  0x28   : > { %1303 = vst [vmem:[%s10495_s29 + $0x140] sm:$0xff] %v1302_v40  ;;  %1305 = vst [vmem:[%s10495_s29 + $0x148] sm:$0xff] %v1304_v41  ;;  %v1306_v42 = vld [vmem:[%s10490_s28 + $0x2a0] sm:$0xff]  ;;  %v1308_v43 = vld [vmem:[%s10490_s28 + $0x2b0] sm:$0xff] }
  0x29   : > { %v1310_v44 = vld [vmem:[%s10490_s28 + $0x2c0] sm:$0xff]  ;;  %1307 = vst [vmem:[%s10495_s29 + $0x150] sm:$0xff] %v1306_v42  ;;  %1309 = vst [vmem:[%s10495_s29 + $0x158] sm:$0xff] %v1308_v43  ;;  %v1312_v45 = vld [vmem:[%s10490_s28 + $0x2d0] sm:$0xff] }
  0x2a   : > { %1311 = vst [vmem:[%s10495_s29 + $0x160] sm:$0xff] %v1310_v44  ;;  %v1314_v46 = vld [vmem:[%s10490_s28 + $0x2e0] sm:$0xff]  ;;  %v1316_v47 = vld [vmem:[%s10490_s28 + $0x2f0] sm:$0xff]  ;;  %1313 = vst [vmem:[%s10495_s29 + $0x168] sm:$0xff] %v1312_v45 }
  0x2b   : > { %1315 = vst [vmem:[%s10495_s29 + $0x170] sm:$0xff] %v1314_v46  ;;  %1317 = vst [vmem:[%s10495_s29 + $0x178] sm:$0xff] %v1316_v47  ;;  %v1318_v48 = vld [vmem:[%s10490_s28 + $0x300] sm:$0xff]  ;;  %v1320_v49 = vld [vmem:[%s10490_s28 + $0x310] sm:$0xff] }
  0x2c   : > { %v1322_v50 = vld [vmem:[%s10490_s28 + $0x320] sm:$0xff]  ;;  %1319 = vst [vmem:[%s10495_s29 + $0x180] sm:$0xff] %v1318_v48  ;;  %1321 = vst [vmem:[%s10495_s29 + $0x188] sm:$0xff] %v1320_v49  ;;  %v1324_v51 = vld [vmem:[%s10490_s28 + $0x330] sm:$0xff] }
  0x2d   : > { %1323 = vst [vmem:[%s10495_s29 + $0x190] sm:$0xff] %v1322_v50  ;;  %v1326_v52 = vld [vmem:[%s10490_s28 + $0x340] sm:$0xff]  ;;  %v1328_v53 = vld [vmem:[%s10490_s28 + $0x350] sm:$0xff]  ;;  %1325 = vst [vmem:[%s10495_s29 + $0x198] sm:$0xff] %v1324_v51 }
  0x2e   : > { %1327 = vst [vmem:[%s10495_s29 + $0x1a0] sm:$0xff] %v1326_v52  ;;  %1329 = vst [vmem:[%s10495_s29 + $0x1a8] sm:$0xff] %v1328_v53  ;;  %v1330_v54 = vld [vmem:[%s10490_s28 + $0x360] sm:$0xff]  ;;  %v1332_v55 = vld [vmem:[%s10490_s28 + $0x370] sm:$0xff] }
  0x2f   : > { %v1334_v56 = vld [vmem:[%s10490_s28 + $0x380] sm:$0xff]  ;;  %1331 = vst [vmem:[%s10495_s29 + $0x1b0] sm:$0xff] %v1330_v54  ;;  %1333 = vst [vmem:[%s10495_s29 + $0x1b8] sm:$0xff] %v1332_v55  ;;  %v1336_v57 = vld [vmem:[%s10490_s28 + $0x390] sm:$0xff] }
  0x30   : > { %1335 = vst [vmem:[%s10495_s29 + $0x1c0] sm:$0xff] %v1334_v56  ;;  %v1338_v58 = vld [vmem:[%s10490_s28 + $0x3a0] sm:$0xff]  ;;  %v1340_v59 = vld [vmem:[%s10490_s28 + $0x3b0] sm:$0xff]  ;;  %1337 = vst [vmem:[%s10495_s29 + $0x1c8] sm:$0xff] %v1336_v57 }
  0x31   : > { %1339 = vst [vmem:[%s10495_s29 + $0x1d0] sm:$0xff] %v1338_v58  ;;  %1341 = vst [vmem:[%s10495_s29 + $0x1d8] sm:$0xff] %v1340_v59  ;;  %v1342_v60 = vld [vmem:[%s10490_s28 + $0x3c0] sm:$0xff]  ;;  %v1344_v61 = vld [vmem:[%s10490_s28 + $0x3d0] sm:$0xff] }
  0x32   : > { %v1346_v62 = vld [vmem:[%s10490_s28 + $0x3e0] sm:$0xff]  ;;  %1343 = vst [vmem:[%s10495_s29 + $0x1e0] sm:$0xff] %v1342_v60  ;;  %1345 = vst [vmem:[%s10495_s29 + $0x1e8] sm:$0xff] %v1344_v61  ;;  %v1348_v63 = vld [vmem:[%s10490_s28 + $0x3f0] sm:$0xff] }
  0x33   : > { %1347 = vst [vmem:[%s10495_s29 + $0x1f0] sm:$0xff] %v1346_v62  ;;  %v1350_v0 = vld [vmem:[%s10490_s28 + $0x400] sm:$0xff]  ;;  %v1352_v1 = vld [vmem:[%s10490_s28 + $0x410] sm:$0xff]  ;;  %1349 = vst [vmem:[%s10495_s29 + $0x1f8] sm:$0xff] %v1348_v63 }
  0x34   : > { %1351 = vst [vmem:[%s10495_s29 + $0x200] sm:$0xff] %v1350_v0  ;;  %1353 = vst [vmem:[%s10495_s29 + $0x208] sm:$0xff] %v1352_v1  ;;  %v1354_v2 = vld [vmem:[%s10490_s28 + $0x420] sm:$0xff]  ;;  %v1356_v3 = vld [vmem:[%s10490_s28 + $0x430] sm:$0xff] }
  0x35   : > { %v1358_v4 = vld [vmem:[%s10490_s28 + $0x440] sm:$0xff]  ;;  %1355 = vst [vmem:[%s10495_s29 + $0x210] sm:$0xff] %v1354_v2  ;;  %1357 = vst [vmem:[%s10495_s29 + $0x218] sm:$0xff] %v1356_v3  ;;  %v1360_v5 = vld [vmem:[%s10490_s28 + $0x450] sm:$0xff] }
  0x36   : > { %1359 = vst [vmem:[%s10495_s29 + $0x220] sm:$0xff] %v1358_v4  ;;  %v1362_v6 = vld [vmem:[%s10490_s28 + $0x460] sm:$0xff]  ;;  %v1364_v7 = vld [vmem:[%s10490_s28 + $0x470] sm:$0xff]  ;;  %1361 = vst [vmem:[%s10495_s29 + $0x228] sm:$0xff] %v1360_v5 }
  0x37   : > { %1363 = vst [vmem:[%s10495_s29 + $0x230] sm:$0xff] %v1362_v6  ;;  %1365 = vst [vmem:[%s10495_s29 + $0x238] sm:$0xff] %v1364_v7  ;;  %v1366_v8 = vld [vmem:[%s10490_s28 + $0x480] sm:$0xff]  ;;  %v1368_v9 = vld [vmem:[%s10490_s28 + $0x490] sm:$0xff] }
  0x38   : > { %v1370_v10 = vld [vmem:[%s10490_s28 + $0x4a0] sm:$0xff]  ;;  %1367 = vst [vmem:[%s10495_s29 + $0x240] sm:$0xff] %v1366_v8  ;;  %1369 = vst [vmem:[%s10495_s29 + $0x248] sm:$0xff] %v1368_v9  ;;  %v1372_v11 = vld [vmem:[%s10490_s28 + $0x4b0] sm:$0xff] }
  0x39   : > { %1371 = vst [vmem:[%s10495_s29 + $0x250] sm:$0xff] %v1370_v10  ;;  %v1374_v12 = vld [vmem:[%s10490_s28 + $0x4c0] sm:$0xff]  ;;  %v1376_v13 = vld [vmem:[%s10490_s28 + $0x4d0] sm:$0xff]  ;;  %1373 = vst [vmem:[%s10495_s29 + $0x258] sm:$0xff] %v1372_v11 }
  0x3a   : > { %1375 = vst [vmem:[%s10495_s29 + $0x260] sm:$0xff] %v1374_v12  ;;  %1377 = vst [vmem:[%s10495_s29 + $0x268] sm:$0xff] %v1376_v13  ;;  %v1378_v14 = vld [vmem:[%s10490_s28 + $0x4e0] sm:$0xff]  ;;  %v1380_v15 = vld [vmem:[%s10490_s28 + $0x4f0] sm:$0xff] }
  0x3b   : > { %v1382_v16 = vld [vmem:[%s10490_s28 + $0x500] sm:$0xff]  ;;  %1379 = vst [vmem:[%s10495_s29 + $0x270] sm:$0xff] %v1378_v14  ;;  %1381 = vst [vmem:[%s10495_s29 + $0x278] sm:$0xff] %v1380_v15  ;;  %v1384_v17 = vld [vmem:[%s10490_s28 + $0x510] sm:$0xff] }
  0x3c   : > { %1383 = vst [vmem:[%s10495_s29 + $0x280] sm:$0xff] %v1382_v16  ;;  %v1386_v18 = vld [vmem:[%s10490_s28 + $0x520] sm:$0xff]  ;;  %v1388_v19 = vld [vmem:[%s10490_s28 + $0x530] sm:$0xff]  ;;  %1385 = vst [vmem:[%s10495_s29 + $0x288] sm:$0xff] %v1384_v17 }
  0x3d   : > { %1387 = vst [vmem:[%s10495_s29 + $0x290] sm:$0xff] %v1386_v18  ;;  %1389 = vst [vmem:[%s10495_s29 + $0x298] sm:$0xff] %v1388_v19  ;;  %v1390_v20 = vld [vmem:[%s10490_s28 + $0x540] sm:$0xff]  ;;  %v1392_v21 = vld [vmem:[%s10490_s28 + $0x550] sm:$0xff] }
  0x3e   : > { %v1394_v22 = vld [vmem:[%s10490_s28 + $0x560] sm:$0xff]  ;;  %1391 = vst [vmem:[%s10495_s29 + $0x2a0] sm:$0xff] %v1390_v20  ;;  %1393 = vst [vmem:[%s10495_s29 + $0x2a8] sm:$0xff] %v1392_v21  ;;  %v1396_v23 = vld [vmem:[%s10490_s28 + $0x570] sm:$0xff] }
  0x3f   : > { %1395 = vst [vmem:[%s10495_s29 + $0x2b0] sm:$0xff] %v1394_v22  ;;  %v1398_v24 = vld [vmem:[%s10490_s28 + $0x580] sm:$0xff]  ;;  %v1400_v25 = vld [vmem:[%s10490_s28 + $0x590] sm:$0xff]  ;;  %1397 = vst [vmem:[%s10495_s29 + $0x2b8] sm:$0xff] %v1396_v23 }
  0x40   : > { %1399 = vst [vmem:[%s10495_s29 + $0x2c0] sm:$0xff] %v1398_v24  ;;  %1401 = vst [vmem:[%s10495_s29 + $0x2c8] sm:$0xff] %v1400_v25  ;;  %v1402_v26 = vld [vmem:[%s10490_s28 + $0x5a0] sm:$0xff]  ;;  %v1404_v27 = vld [vmem:[%s10490_s28 + $0x5b0] sm:$0xff] }
  0x41   : > { %v1406_v28 = vld [vmem:[%s10490_s28 + $0x5c0] sm:$0xff]  ;;  %1403 = vst [vmem:[%s10495_s29 + $0x2d0] sm:$0xff] %v1402_v26  ;;  %1405 = vst [vmem:[%s10495_s29 + $0x2d8] sm:$0xff] %v1404_v27  ;;  %v1408_v29 = vld [vmem:[%s10490_s28 + $0x5d0] sm:$0xff] }
  0x42   : > { %1407 = vst [vmem:[%s10495_s29 + $0x2e0] sm:$0xff] %v1406_v28  ;;  %v1410_v30 = vld [vmem:[%s10490_s28 + $0x5e0] sm:$0xff]  ;;  %v1412_v31 = vld [vmem:[%s10490_s28 + $0x5f0] sm:$0xff]  ;;  %1409 = vst [vmem:[%s10495_s29 + $0x2e8] sm:$0xff] %v1408_v29 }
  0x43   : > { %1411 = vst [vmem:[%s10495_s29 + $0x2f0] sm:$0xff] %v1410_v30  ;;  %1413 = vst [vmem:[%s10495_s29 + $0x2f8] sm:$0xff] %v1412_v31  ;;  %v1414_v32 = vld [vmem:[%s10490_s28 + $0x600] sm:$0xff]  ;;  %v1416_v33 = vld [vmem:[%s10490_s28 + $0x610] sm:$0xff] }
  0x44   : > { %v1418_v34 = vld [vmem:[%s10490_s28 + $0x620] sm:$0xff]  ;;  %1415 = vst [vmem:[%s10495_s29 + $0x300] sm:$0xff] %v1414_v32  ;;  %1417 = vst [vmem:[%s10495_s29 + $0x308] sm:$0xff] %v1416_v33  ;;  %v1420_v35 = vld [vmem:[%s10490_s28 + $0x630] sm:$0xff] }
  0x45   : > { %1419 = vst [vmem:[%s10495_s29 + $0x310] sm:$0xff] %v1418_v34  ;;  %v1422_v36 = vld [vmem:[%s10490_s28 + $0x640] sm:$0xff]  ;;  %v1424_v37 = vld [vmem:[%s10490_s28 + $0x650] sm:$0xff]  ;;  %1421 = vst [vmem:[%s10495_s29 + $0x318] sm:$0xff] %v1420_v35 }
  0x46   : > { %1423 = vst [vmem:[%s10495_s29 + $0x320] sm:$0xff] %v1422_v36  ;;  %1425 = vst [vmem:[%s10495_s29 + $0x328] sm:$0xff] %v1424_v37  ;;  %v1426_v38 = vld [vmem:[%s10490_s28 + $0x660] sm:$0xff]  ;;  %v1428_v39 = vld [vmem:[%s10490_s28 + $0x670] sm:$0xff] }
  0x47   : > { %v1430_v40 = vld [vmem:[%s10490_s28 + $0x680] sm:$0xff]  ;;  %1427 = vst [vmem:[%s10495_s29 + $0x330] sm:$0xff] %v1426_v38  ;;  %1429 = vst [vmem:[%s10495_s29 + $0x338] sm:$0xff] %v1428_v39  ;;  %v1432_v41 = vld [vmem:[%s10490_s28 + $0x690] sm:$0xff] }
  0x48   : > { %1431 = vst [vmem:[%s10495_s29 + $0x340] sm:$0xff] %v1430_v40  ;;  %v1434_v42 = vld [vmem:[%s10490_s28 + $0x6a0] sm:$0xff]  ;;  %v1436_v43 = vld [vmem:[%s10490_s28 + $0x6b0] sm:$0xff]  ;;  %1433 = vst [vmem:[%s10495_s29 + $0x348] sm:$0xff] %v1432_v41 }
  0x49   : > { %1435 = vst [vmem:[%s10495_s29 + $0x350] sm:$0xff] %v1434_v42  ;;  %1437 = vst [vmem:[%s10495_s29 + $0x358] sm:$0xff] %v1436_v43  ;;  %v1438_v44 = vld [vmem:[%s10490_s28 + $0x6c0] sm:$0xff]  ;;  %v1440_v45 = vld [vmem:[%s10490_s28 + $0x6d0] sm:$0xff] }
  0x4a   : > { %v1442_v46 = vld [vmem:[%s10490_s28 + $0x6e0] sm:$0xff]  ;;  %1439 = vst [vmem:[%s10495_s29 + $0x360] sm:$0xff] %v1438_v44  ;;  %1441 = vst [vmem:[%s10495_s29 + $0x368] sm:$0xff] %v1440_v45  ;;  %v1444_v47 = vld [vmem:[%s10490_s28 + $0x6f0] sm:$0xff] }
  0x4b   : > { %1443 = vst [vmem:[%s10495_s29 + $0x370] sm:$0xff] %v1442_v46  ;;  %v1446_v48 = vld [vmem:[%s10490_s28 + $0x700] sm:$0xff]  ;;  %v1448_v49 = vld [vmem:[%s10490_s28 + $0x710] sm:$0xff]  ;;  %1445 = vst [vmem:[%s10495_s29 + $0x378] sm:$0xff] %v1444_v47 }
  0x4c   : > { %1447 = vst [vmem:[%s10495_s29 + $0x380] sm:$0xff] %v1446_v48  ;;  %1449 = vst [vmem:[%s10495_s29 + $0x388] sm:$0xff] %v1448_v49  ;;  %v1450_v50 = vld [vmem:[%s10490_s28 + $0x720] sm:$0xff]  ;;  %v1452_v51 = vld [vmem:[%s10490_s28 + $0x730] sm:$0xff] }
  0x4d   : > { %v1454_v52 = vld [vmem:[%s10490_s28 + $0x740] sm:$0xff]  ;;  %1451 = vst [vmem:[%s10495_s29 + $0x390] sm:$0xff] %v1450_v50  ;;  %1453 = vst [vmem:[%s10495_s29 + $0x398] sm:$0xff] %v1452_v51  ;;  %v1456_v53 = vld [vmem:[%s10490_s28 + $0x750] sm:$0xff] }
  0x4e   : > { %1455 = vst [vmem:[%s10495_s29 + $0x3a0] sm:$0xff] %v1454_v52  ;;  %v1458_v54 = vld [vmem:[%s10490_s28 + $0x760] sm:$0xff]  ;;  %v1460_v55 = vld [vmem:[%s10490_s28 + $0x770] sm:$0xff]  ;;  %1457 = vst [vmem:[%s10495_s29 + $0x3a8] sm:$0xff] %v1456_v53 }
  0x4f   : > { %1459 = vst [vmem:[%s10495_s29 + $0x3b0] sm:$0xff] %v1458_v54  ;;  %1461 = vst [vmem:[%s10495_s29 + $0x3b8] sm:$0xff] %v1460_v55  ;;  %v1462_v56 = vld [vmem:[%s10490_s28 + $0x780] sm:$0xff]  ;;  %v1464_v57 = vld [vmem:[%s10490_s28 + $0x790] sm:$0xff] }
  0x50   : > { %v1466_v58 = vld [vmem:[%s10490_s28 + $0x7a0] sm:$0xff]  ;;  %1463 = vst [vmem:[%s10495_s29 + $0x3c0] sm:$0xff] %v1462_v56  ;;  %1465 = vst [vmem:[%s10495_s29 + $0x3c8] sm:$0xff] %v1464_v57  ;;  %v1468_v59 = vld [vmem:[%s10490_s28 + $0x7b0] sm:$0xff] }
  0x51   : > { %1467 = vst [vmem:[%s10495_s29 + $0x3d0] sm:$0xff] %v1466_v58  ;;  %v1470_v60 = vld [vmem:[%s10490_s28 + $0x7c0] sm:$0xff]  ;;  %v1472_v61 = vld [vmem:[%s10490_s28 + $0x7d0] sm:$0xff]  ;;  %1469 = vst [vmem:[%s10495_s29 + $0x3d8] sm:$0xff] %v1468_v59 }
  0x52   : > { %1471 = vst [vmem:[%s10495_s29 + $0x3e0] sm:$0xff] %v1470_v60  ;;  %1473 = vst [vmem:[%s10495_s29 + $0x3e8] sm:$0xff] %v1472_v61  ;;  %v1474_v62 = vld [vmem:[%s10490_s28 + $0x7e0] sm:$0xff]  ;;  %v1476_v63 = vld [vmem:[%s10490_s28 + $0x7f0] sm:$0xff] }
  0x53   : > { %v1478_v0 = vld [vmem:[%s10490_s28 + $0x800] sm:$0xff]  ;;  %1475 = vst [vmem:[%s10495_s29 + $0x3f0] sm:$0xff] %v1474_v62  ;;  %1477 = vst [vmem:[%s10495_s29 + $0x3f8] sm:$0xff] %v1476_v63  ;;  %v1480_v1 = vld [vmem:[%s10490_s28 + $0x810] sm:$0xff] }
  0x54   : > { %1479 = vst [vmem:[%s10495_s29 + $0x400] sm:$0xff] %v1478_v0  ;;  %v1482_v2 = vld [vmem:[%s10490_s28 + $0x820] sm:$0xff]  ;;  %v1484_v3 = vld [vmem:[%s10490_s28 + $0x830] sm:$0xff]  ;;  %1481 = vst [vmem:[%s10495_s29 + $0x408] sm:$0xff] %v1480_v1 }
  0x55   : > { %1483 = vst [vmem:[%s10495_s29 + $0x410] sm:$0xff] %v1482_v2  ;;  %1485 = vst [vmem:[%s10495_s29 + $0x418] sm:$0xff] %v1484_v3  ;;  %v1486_v4 = vld [vmem:[%s10490_s28 + $0x840] sm:$0xff]  ;;  %v1488_v5 = vld [vmem:[%s10490_s28 + $0x850] sm:$0xff] }
  0x56   : > { %v1490_v6 = vld [vmem:[%s10490_s28 + $0x860] sm:$0xff]  ;;  %1487 = vst [vmem:[%s10495_s29 + $0x420] sm:$0xff] %v1486_v4  ;;  %1489 = vst [vmem:[%s10495_s29 + $0x428] sm:$0xff] %v1488_v5  ;;  %v1492_v7 = vld [vmem:[%s10490_s28 + $0x870] sm:$0xff] }
  0x57   : > { %1491 = vst [vmem:[%s10495_s29 + $0x430] sm:$0xff] %v1490_v6  ;;  %v1494_v8 = vld [vmem:[%s10490_s28 + $0x880] sm:$0xff]  ;;  %v1496_v9 = vld [vmem:[%s10490_s28 + $0x890] sm:$0xff]  ;;  %1493 = vst [vmem:[%s10495_s29 + $0x438] sm:$0xff] %v1492_v7 }
  0x58   : > { %1495 = vst [vmem:[%s10495_s29 + $0x440] sm:$0xff] %v1494_v8  ;;  %1497 = vst [vmem:[%s10495_s29 + $0x448] sm:$0xff] %v1496_v9  ;;  %v1498_v10 = vld [vmem:[%s10490_s28 + $0x8a0] sm:$0xff]  ;;  %v1500_v11 = vld [vmem:[%s10490_s28 + $0x8b0] sm:$0xff] }
  0x59   : > { %v1502_v12 = vld [vmem:[%s10490_s28 + $0x8c0] sm:$0xff]  ;;  %1499 = vst [vmem:[%s10495_s29 + $0x450] sm:$0xff] %v1498_v10  ;;  %1501 = vst [vmem:[%s10495_s29 + $0x458] sm:$0xff] %v1500_v11  ;;  %v1504_v13 = vld [vmem:[%s10490_s28 + $0x8d0] sm:$0xff] }
  0x5a   : > { %1503 = vst [vmem:[%s10495_s29 + $0x460] sm:$0xff] %v1502_v12  ;;  %v1506_v14 = vld [vmem:[%s10490_s28 + $0x8e0] sm:$0xff]  ;;  %v1508_v15 = vld [vmem:[%s10490_s28 + $0x8f0] sm:$0xff]  ;;  %1505 = vst [vmem:[%s10495_s29 + $0x468] sm:$0xff] %v1504_v13 }
  0x5b   : > { %1507 = vst [vmem:[%s10495_s29 + $0x470] sm:$0xff] %v1506_v14  ;;  %1509 = vst [vmem:[%s10495_s29 + $0x478] sm:$0xff] %v1508_v15  ;;  %v1510_v16 = vld [vmem:[%s10490_s28 + $0x900] sm:$0xff]  ;;  %v1512_v17 = vld [vmem:[%s10490_s28 + $0x910] sm:$0xff] }
  0x5c   : > { %v1514_v18 = vld [vmem:[%s10490_s28 + $0x920] sm:$0xff]  ;;  %1511 = vst [vmem:[%s10495_s29 + $0x480] sm:$0xff] %v1510_v16  ;;  %1513 = vst [vmem:[%s10495_s29 + $0x488] sm:$0xff] %v1512_v17  ;;  %v1516_v19 = vld [vmem:[%s10490_s28 + $0x930] sm:$0xff] }
  0x5d   : > { %1515 = vst [vmem:[%s10495_s29 + $0x490] sm:$0xff] %v1514_v18  ;;  %v1518_v20 = vld [vmem:[%s10490_s28 + $0x940] sm:$0xff]  ;;  %v1520_v21 = vld [vmem:[%s10490_s28 + $0x950] sm:$0xff]  ;;  %1517 = vst [vmem:[%s10495_s29 + $0x498] sm:$0xff] %v1516_v19 }
  0x5e   : > { %1519 = vst [vmem:[%s10495_s29 + $0x4a0] sm:$0xff] %v1518_v20  ;;  %1521 = vst [vmem:[%s10495_s29 + $0x4a8] sm:$0xff] %v1520_v21  ;;  %v1522_v22 = vld [vmem:[%s10490_s28 + $0x960] sm:$0xff]  ;;  %v1524_v23 = vld [vmem:[%s10490_s28 + $0x970] sm:$0xff] }
  0x5f   : > { %v1526_v24 = vld [vmem:[%s10490_s28 + $0x980] sm:$0xff]  ;;  %1523 = vst [vmem:[%s10495_s29 + $0x4b0] sm:$0xff] %v1522_v22  ;;  %1525 = vst [vmem:[%s10495_s29 + $0x4b8] sm:$0xff] %v1524_v23  ;;  %v1528_v25 = vld [vmem:[%s10490_s28 + $0x990] sm:$0xff] }
  0x60   : > { %1527 = vst [vmem:[%s10495_s29 + $0x4c0] sm:$0xff] %v1526_v24  ;;  %v1530_v26 = vld [vmem:[%s10490_s28 + $0x9a0] sm:$0xff]  ;;  %v1532_v27 = vld [vmem:[%s10490_s28 + $0x9b0] sm:$0xff]  ;;  %1529 = vst [vmem:[%s10495_s29 + $0x4c8] sm:$0xff] %v1528_v25 }
  0x61   : > { %1531 = vst [vmem:[%s10495_s29 + $0x4d0] sm:$0xff] %v1530_v26  ;;  %1533 = vst [vmem:[%s10495_s29 + $0x4d8] sm:$0xff] %v1532_v27  ;;  %v1534_v28 = vld [vmem:[%s10490_s28 + $0x9c0] sm:$0xff]  ;;  %v1536_v29 = vld [vmem:[%s10490_s28 + $0x9d0] sm:$0xff] }
  0x62   : > { %v1538_v30 = vld [vmem:[%s10490_s28 + $0x9e0] sm:$0xff]  ;;  %1535 = vst [vmem:[%s10495_s29 + $0x4e0] sm:$0xff] %v1534_v28  ;;  %1537 = vst [vmem:[%s10495_s29 + $0x4e8] sm:$0xff] %v1536_v29  ;;  %v1540_v31 = vld [vmem:[%s10490_s28 + $0x9f0] sm:$0xff] }
  0x63   : > { %1539 = vst [vmem:[%s10495_s29 + $0x4f0] sm:$0xff] %v1538_v30  ;;  %v1542_v32 = vld [vmem:[%s10490_s28 + $0xa00] sm:$0xff]  ;;  %v1544_v33 = vld [vmem:[%s10490_s28 + $0xa10] sm:$0xff]  ;;  %1541 = vst [vmem:[%s10495_s29 + $0x4f8] sm:$0xff] %v1540_v31 }
  0x64   : > { %1543 = vst [vmem:[%s10495_s29 + $0x500] sm:$0xff] %v1542_v32  ;;  %1545 = vst [vmem:[%s10495_s29 + $0x508] sm:$0xff] %v1544_v33  ;;  %v1546_v34 = vld [vmem:[%s10490_s28 + $0xa20] sm:$0xff]  ;;  %v1548_v35 = vld [vmem:[%s10490_s28 + $0xa30] sm:$0xff] }
  0x65   : > { %v1550_v36 = vld [vmem:[%s10490_s28 + $0xa40] sm:$0xff]  ;;  %1547 = vst [vmem:[%s10495_s29 + $0x510] sm:$0xff] %v1546_v34  ;;  %1549 = vst [vmem:[%s10495_s29 + $0x518] sm:$0xff] %v1548_v35  ;;  %v1552_v37 = vld [vmem:[%s10490_s28 + $0xa50] sm:$0xff] }
  0x66   : > { %1551 = vst [vmem:[%s10495_s29 + $0x520] sm:$0xff] %v1550_v36  ;;  %v1554_v38 = vld [vmem:[%s10490_s28 + $0xa60] sm:$0xff]  ;;  %v1556_v39 = vld [vmem:[%s10490_s28 + $0xa70] sm:$0xff]  ;;  %1553 = vst [vmem:[%s10495_s29 + $0x528] sm:$0xff] %v1552_v37 }
  0x67   : > { %1555 = vst [vmem:[%s10495_s29 + $0x530] sm:$0xff] %v1554_v38  ;;  %1557 = vst [vmem:[%s10495_s29 + $0x538] sm:$0xff] %v1556_v39  ;;  %v1558_v40 = vld [vmem:[%s10490_s28 + $0xa80] sm:$0xff]  ;;  %v1560_v41 = vld [vmem:[%s10490_s28 + $0xa90] sm:$0xff] }
  0x68   : > { %v1562_v42 = vld [vmem:[%s10490_s28 + $0xaa0] sm:$0xff]  ;;  %1559 = vst [vmem:[%s10495_s29 + $0x540] sm:$0xff] %v1558_v40  ;;  %1561 = vst [vmem:[%s10495_s29 + $0x548] sm:$0xff] %v1560_v41  ;;  %v1564_v43 = vld [vmem:[%s10490_s28 + $0xab0] sm:$0xff] }
  0x69   : > { %1563 = vst [vmem:[%s10495_s29 + $0x550] sm:$0xff] %v1562_v42  ;;  %v1566_v44 = vld [vmem:[%s10490_s28 + $0xac0] sm:$0xff]  ;;  %v1568_v45 = vld [vmem:[%s10490_s28 + $0xad0] sm:$0xff]  ;;  %1565 = vst [vmem:[%s10495_s29 + $0x558] sm:$0xff] %v1564_v43 }
  0x6a   : > { %1567 = vst [vmem:[%s10495_s29 + $0x560] sm:$0xff] %v1566_v44  ;;  %1569 = vst [vmem:[%s10495_s29 + $0x568] sm:$0xff] %v1568_v45  ;;  %v1570_v46 = vld [vmem:[%s10490_s28 + $0xae0] sm:$0xff]  ;;  %v1572_v47 = vld [vmem:[%s10490_s28 + $0xaf0] sm:$0xff] }
  0x6b   : > { %v1574_v48 = vld [vmem:[%s10490_s28 + $0xb00] sm:$0xff]  ;;  %1571 = vst [vmem:[%s10495_s29 + $0x570] sm:$0xff] %v1570_v46  ;;  %1573 = vst [vmem:[%s10495_s29 + $0x578] sm:$0xff] %v1572_v47  ;;  %v1576_v49 = vld [vmem:[%s10490_s28 + $0xb10] sm:$0xff] }
  0x6c   : > { %1575 = vst [vmem:[%s10495_s29 + $0x580] sm:$0xff] %v1574_v48  ;;  %v1578_v50 = vld [vmem:[%s10490_s28 + $0xb20] sm:$0xff]  ;;  %v1580_v51 = vld [vmem:[%s10490_s28 + $0xb30] sm:$0xff]  ;;  %1577 = vst [vmem:[%s10495_s29 + $0x588] sm:$0xff] %v1576_v49 }
  0x6d   : > { %1579 = vst [vmem:[%s10495_s29 + $0x590] sm:$0xff] %v1578_v50  ;;  %1581 = vst [vmem:[%s10495_s29 + $0x598] sm:$0xff] %v1580_v51  ;;  %v1582_v52 = vld [vmem:[%s10490_s28 + $0xb40] sm:$0xff]  ;;  %v1584_v53 = vld [vmem:[%s10490_s28 + $0xb50] sm:$0xff] }
  0x6e   : > { %v1586_v54 = vld [vmem:[%s10490_s28 + $0xb60] sm:$0xff]  ;;  %1583 = vst [vmem:[%s10495_s29 + $0x5a0] sm:$0xff] %v1582_v52  ;;  %1585 = vst [vmem:[%s10495_s29 + $0x5a8] sm:$0xff] %v1584_v53  ;;  %v1588_v55 = vld [vmem:[%s10490_s28 + $0xb70] sm:$0xff] }
  0x6f   : > { %1587 = vst [vmem:[%s10495_s29 + $0x5b0] sm:$0xff] %v1586_v54  ;;  %v1590_v56 = vld [vmem:[%s10490_s28 + $0xb80] sm:$0xff]  ;;  %v1592_v57 = vld [vmem:[%s10490_s28 + $0xb90] sm:$0xff]  ;;  %1589 = vst [vmem:[%s10495_s29 + $0x5b8] sm:$0xff] %v1588_v55 }
  0x70   : > { %1591 = vst [vmem:[%s10495_s29 + $0x5c0] sm:$0xff] %v1590_v56  ;;  %1593 = vst [vmem:[%s10495_s29 + $0x5c8] sm:$0xff] %v1592_v57  ;;  %v1594_v58 = vld [vmem:[%s10490_s28 + $0xba0] sm:$0xff]  ;;  %v1596_v59 = vld [vmem:[%s10490_s28 + $0xbb0] sm:$0xff] }
  0x71   : > { %v1598_v60 = vld [vmem:[%s10490_s28 + $0xbc0] sm:$0xff]  ;;  %1595 = vst [vmem:[%s10495_s29 + $0x5d0] sm:$0xff] %v1594_v58  ;;  %1597 = vst [vmem:[%s10495_s29 + $0x5d8] sm:$0xff] %v1596_v59  ;;  %v1600_v61 = vld [vmem:[%s10490_s28 + $0xbd0] sm:$0xff] }
  0x72   : > { %1599 = vst [vmem:[%s10495_s29 + $0x5e0] sm:$0xff] %v1598_v60  ;;  %v1602_v62 = vld [vmem:[%s10490_s28 + $0xbe0] sm:$0xff]  ;;  %v1604_v63 = vld [vmem:[%s10490_s28 + $0xbf0] sm:$0xff]  ;;  %1601 = vst [vmem:[%s10495_s29 + $0x5e8] sm:$0xff] %v1600_v61 }
  0x73   : > { %1603 = vst [vmem:[%s10495_s29 + $0x5f0] sm:$0xff] %v1602_v62  ;;  %1605 = vst [vmem:[%s10495_s29 + $0x5f8] sm:$0xff] %v1604_v63  ;;  %v1606_v0 = vld [vmem:[%s10490_s28 + $0xc00] sm:$0xff]  ;;  %v1608_v1 = vld [vmem:[%s10490_s28 + $0xc10] sm:$0xff] }
  0x74   : > { %v1610_v2 = vld [vmem:[%s10490_s28 + $0xc20] sm:$0xff]  ;;  %1607 = vst [vmem:[%s10495_s29 + $0x600] sm:$0xff] %v1606_v0  ;;  %1609 = vst [vmem:[%s10495_s29 + $0x608] sm:$0xff] %v1608_v1  ;;  %v1612_v3 = vld [vmem:[%s10490_s28 + $0xc30] sm:$0xff] }
  0x75   : > { %1611 = vst [vmem:[%s10495_s29 + $0x610] sm:$0xff] %v1610_v2  ;;  %v1614_v4 = vld [vmem:[%s10490_s28 + $0xc40] sm:$0xff]  ;;  %v1616_v5 = vld [vmem:[%s10490_s28 + $0xc50] sm:$0xff]  ;;  %1613 = vst [vmem:[%s10495_s29 + $0x618] sm:$0xff] %v1612_v3 }
  0x76   : > { %1615 = vst [vmem:[%s10495_s29 + $0x620] sm:$0xff] %v1614_v4  ;;  %1617 = vst [vmem:[%s10495_s29 + $0x628] sm:$0xff] %v1616_v5  ;;  %v1618_v6 = vld [vmem:[%s10490_s28 + $0xc60] sm:$0xff]  ;;  %v1620_v7 = vld [vmem:[%s10490_s28 + $0xc70] sm:$0xff] }
  0x77   : > { %v1622_v8 = vld [vmem:[%s10490_s28 + $0xc80] sm:$0xff]  ;;  %1619 = vst [vmem:[%s10495_s29 + $0x630] sm:$0xff] %v1618_v6  ;;  %1621 = vst [vmem:[%s10495_s29 + $0x638] sm:$0xff] %v1620_v7  ;;  %v1624_v9 = vld [vmem:[%s10490_s28 + $0xc90] sm:$0xff] }
  0x78   : > { %1623 = vst [vmem:[%s10495_s29 + $0x640] sm:$0xff] %v1622_v8  ;;  %v1626_v10 = vld [vmem:[%s10490_s28 + $0xca0] sm:$0xff]  ;;  %v1628_v11 = vld [vmem:[%s10490_s28 + $0xcb0] sm:$0xff]  ;;  %1625 = vst [vmem:[%s10495_s29 + $0x648] sm:$0xff] %v1624_v9 }
  0x79   : > { %1627 = vst [vmem:[%s10495_s29 + $0x650] sm:$0xff] %v1626_v10  ;;  %1629 = vst [vmem:[%s10495_s29 + $0x658] sm:$0xff] %v1628_v11  ;;  %v1630_v12 = vld [vmem:[%s10490_s28 + $0xcc0] sm:$0xff]  ;;  %v1632_v13 = vld [vmem:[%s10490_s28 + $0xcd0] sm:$0xff] }
  0x7a   : > { %v1634_v14 = vld [vmem:[%s10490_s28 + $0xce0] sm:$0xff]  ;;  %1631 = vst [vmem:[%s10495_s29 + $0x660] sm:$0xff] %v1630_v12  ;;  %1633 = vst [vmem:[%s10495_s29 + $0x668] sm:$0xff] %v1632_v13  ;;  %v1636_v15 = vld [vmem:[%s10490_s28 + $0xcf0] sm:$0xff] }
  0x7b   : > { %1635 = vst [vmem:[%s10495_s29 + $0x670] sm:$0xff] %v1634_v14  ;;  %v1638_v16 = vld [vmem:[%s10490_s28 + $0xd00] sm:$0xff]  ;;  %v1640_v17 = vld [vmem:[%s10490_s28 + $0xd10] sm:$0xff]  ;;  %1637 = vst [vmem:[%s10495_s29 + $0x678] sm:$0xff] %v1636_v15 }
  0x7c   : > { %1639 = vst [vmem:[%s10495_s29 + $0x680] sm:$0xff] %v1638_v16  ;;  %1641 = vst [vmem:[%s10495_s29 + $0x688] sm:$0xff] %v1640_v17  ;;  %v1642_v18 = vld [vmem:[%s10490_s28 + $0xd20] sm:$0xff]  ;;  %v1644_v19 = vld [vmem:[%s10490_s28 + $0xd30] sm:$0xff] }
  0x7d   : > { %v1646_v20 = vld [vmem:[%s10490_s28 + $0xd40] sm:$0xff]  ;;  %1643 = vst [vmem:[%s10495_s29 + $0x690] sm:$0xff] %v1642_v18  ;;  %1645 = vst [vmem:[%s10495_s29 + $0x698] sm:$0xff] %v1644_v19  ;;  %v1648_v21 = vld [vmem:[%s10490_s28 + $0xd50] sm:$0xff] }
  0x7e   : > { %1647 = vst [vmem:[%s10495_s29 + $0x6a0] sm:$0xff] %v1646_v20  ;;  %v1650_v22 = vld [vmem:[%s10490_s28 + $0xd60] sm:$0xff]  ;;  %v1652_v23 = vld [vmem:[%s10490_s28 + $0xd70] sm:$0xff]  ;;  %1649 = vst [vmem:[%s10495_s29 + $0x6a8] sm:$0xff] %v1648_v21 }
  0x7f   : > { %1651 = vst [vmem:[%s10495_s29 + $0x6b0] sm:$0xff] %v1650_v22  ;;  %1653 = vst [vmem:[%s10495_s29 + $0x6b8] sm:$0xff] %v1652_v23  ;;  %v1654_v24 = vld [vmem:[%s10490_s28 + $0xd80] sm:$0xff]  ;;  %v1656_v25 = vld [vmem:[%s10490_s28 + $0xd90] sm:$0xff] }
  0x80   : > { %v1658_v26 = vld [vmem:[%s10490_s28 + $0xda0] sm:$0xff]  ;;  %1655 = vst [vmem:[%s10495_s29 + $0x6c0] sm:$0xff] %v1654_v24  ;;  %1657 = vst [vmem:[%s10495_s29 + $0x6c8] sm:$0xff] %v1656_v25  ;;  %v1660_v27 = vld [vmem:[%s10490_s28 + $0xdb0] sm:$0xff] }
  0x81   : > { %1659 = vst [vmem:[%s10495_s29 + $0x6d0] sm:$0xff] %v1658_v26  ;;  %v1662_v28 = vld [vmem:[%s10490_s28 + $0xdc0] sm:$0xff]  ;;  %v1664_v29 = vld [vmem:[%s10490_s28 + $0xdd0] sm:$0xff]  ;;  %1661 = vst [vmem:[%s10495_s29 + $0x6d8] sm:$0xff] %v1660_v27 }
  0x82   : > { %1663 = vst [vmem:[%s10495_s29 + $0x6e0] sm:$0xff] %v1662_v28  ;;  %1665 = vst [vmem:[%s10495_s29 + $0x6e8] sm:$0xff] %v1664_v29  ;;  %v1666_v30 = vld [vmem:[%s10490_s28 + $0xde0] sm:$0xff]  ;;  %v1668_v31 = vld [vmem:[%s10490_s28 + $0xdf0] sm:$0xff] }
  0x83   : > { %v1670_v32 = vld [vmem:[%s10490_s28 + $0xe00] sm:$0xff]  ;;  %1667 = vst [vmem:[%s10495_s29 + $0x6f0] sm:$0xff] %v1666_v30  ;;  %1669 = vst [vmem:[%s10495_s29 + $0x6f8] sm:$0xff] %v1668_v31  ;;  %v1672_v33 = vld [vmem:[%s10490_s28 + $0xe10] sm:$0xff] }
  0x84   : > { %1671 = vst [vmem:[%s10495_s29 + $0x700] sm:$0xff] %v1670_v32  ;;  %v1674_v34 = vld [vmem:[%s10490_s28 + $0xe20] sm:$0xff]  ;;  %v1676_v35 = vld [vmem:[%s10490_s28 + $0xe30] sm:$0xff]  ;;  %1673 = vst [vmem:[%s10495_s29 + $0x708] sm:$0xff] %v1672_v33 }
  0x85   : > { %1675 = vst [vmem:[%s10495_s29 + $0x710] sm:$0xff] %v1674_v34  ;;  %1677 = vst [vmem:[%s10495_s29 + $0x718] sm:$0xff] %v1676_v35  ;;  %v1678_v36 = vld [vmem:[%s10490_s28 + $0xe40] sm:$0xff]  ;;  %v1680_v37 = vld [vmem:[%s10490_s28 + $0xe50] sm:$0xff] }
  0x86   : > { %v1682_v38 = vld [vmem:[%s10490_s28 + $0xe60] sm:$0xff]  ;;  %1679 = vst [vmem:[%s10495_s29 + $0x720] sm:$0xff] %v1678_v36  ;;  %1681 = vst [vmem:[%s10495_s29 + $0x728] sm:$0xff] %v1680_v37  ;;  %v1684_v39 = vld [vmem:[%s10490_s28 + $0xe70] sm:$0xff] }
  0x87   : > { %1683 = vst [vmem:[%s10495_s29 + $0x730] sm:$0xff] %v1682_v38  ;;  %v1686_v40 = vld [vmem:[%s10490_s28 + $0xe80] sm:$0xff]  ;;  %v1688_v41 = vld [vmem:[%s10490_s28 + $0xe90] sm:$0xff]  ;;  %1685 = vst [vmem:[%s10495_s29 + $0x738] sm:$0xff] %v1684_v39 }
  0x88   : > { %1687 = vst [vmem:[%s10495_s29 + $0x740] sm:$0xff] %v1686_v40  ;;  %1689 = vst [vmem:[%s10495_s29 + $0x748] sm:$0xff] %v1688_v41  ;;  %v1690_v42 = vld [vmem:[%s10490_s28 + $0xea0] sm:$0xff]  ;;  %v1692_v43 = vld [vmem:[%s10490_s28 + $0xeb0] sm:$0xff] }
  0x89   : > { %v1694_v44 = vld [vmem:[%s10490_s28 + $0xec0] sm:$0xff]  ;;  %1691 = vst [vmem:[%s10495_s29 + $0x750] sm:$0xff] %v1690_v42  ;;  %1693 = vst [vmem:[%s10495_s29 + $0x758] sm:$0xff] %v1692_v43  ;;  %v1696_v45 = vld [vmem:[%s10490_s28 + $0xed0] sm:$0xff] }
  0x8a   : > { %1695 = vst [vmem:[%s10495_s29 + $0x760] sm:$0xff] %v1694_v44  ;;  %v1698_v46 = vld [vmem:[%s10490_s28 + $0xee0] sm:$0xff]  ;;  %v1700_v47 = vld [vmem:[%s10490_s28 + $0xef0] sm:$0xff]  ;;  %1697 = vst [vmem:[%s10495_s29 + $0x768] sm:$0xff] %v1696_v45 }
  0x8b   : > { %1699 = vst [vmem:[%s10495_s29 + $0x770] sm:$0xff] %v1698_v46  ;;  %1701 = vst [vmem:[%s10495_s29 + $0x778] sm:$0xff] %v1700_v47  ;;  %v1702_v48 = vld [vmem:[%s10490_s28 + $0xf00] sm:$0xff]  ;;  %v1704_v49 = vld [vmem:[%s10490_s28 + $0xf10] sm:$0xff] }
  0x8c   : > { %v1706_v50 = vld [vmem:[%s10490_s28 + $0xf20] sm:$0xff]  ;;  %1703 = vst [vmem:[%s10495_s29 + $0x780] sm:$0xff] %v1702_v48  ;;  %1705 = vst [vmem:[%s10495_s29 + $0x788] sm:$0xff] %v1704_v49  ;;  %v1708_v51 = vld [vmem:[%s10490_s28 + $0xf30] sm:$0xff] }
  0x8d   : > { %1707 = vst [vmem:[%s10495_s29 + $0x790] sm:$0xff] %v1706_v50  ;;  %v1710_v52 = vld [vmem:[%s10490_s28 + $0xf40] sm:$0xff]  ;;  %v1712_v53 = vld [vmem:[%s10490_s28 + $0xf50] sm:$0xff]  ;;  %1709 = vst [vmem:[%s10495_s29 + $0x798] sm:$0xff] %v1708_v51 }
  0x8e   : > { %1711 = vst [vmem:[%s10495_s29 + $0x7a0] sm:$0xff] %v1710_v52  ;;  %1713 = vst [vmem:[%s10495_s29 + $0x7a8] sm:$0xff] %v1712_v53  ;;  %v1714_v54 = vld [vmem:[%s10490_s28 + $0xf60] sm:$0xff]  ;;  %v1716_v55 = vld [vmem:[%s10490_s28 + $0xf70] sm:$0xff] }
  0x8f   : > { %v1718_v56 = vld [vmem:[%s10490_s28 + $0xf80] sm:$0xff]  ;;  %1715 = vst [vmem:[%s10495_s29 + $0x7b0] sm:$0xff] %v1714_v54  ;;  %1717 = vst [vmem:[%s10495_s29 + $0x7b8] sm:$0xff] %v1716_v55  ;;  %v1720_v57 = vld [vmem:[%s10490_s28 + $0xf90] sm:$0xff] }
  0x90   : > { %1719 = vst [vmem:[%s10495_s29 + $0x7c0] sm:$0xff] %v1718_v56  ;;  %v1722_v58 = vld [vmem:[%s10490_s28 + $0xfa0] sm:$0xff]  ;;  %v1724_v59 = vld [vmem:[%s10490_s28 + $0xfb0] sm:$0xff]  ;;  %1721 = vst [vmem:[%s10495_s29 + $0x7c8] sm:$0xff] %v1720_v57 }
  0x91   : > { %1723 = vst [vmem:[%s10495_s29 + $0x7d0] sm:$0xff] %v1722_v58  ;;  %1725 = vst [vmem:[%s10495_s29 + $0x7d8] sm:$0xff] %v1724_v59  ;;  %v1726_v60 = vld [vmem:[%s10490_s28 + $0xfc0] sm:$0xff]  ;;  %v1728_v61 = vld [vmem:[%s10490_s28 + $0xfd0] sm:$0xff] }
  0x92   : > { %v1730_v62 = vld [vmem:[%s10490_s28 + $0xfe0] sm:$0xff]  ;;  %1727 = vst [vmem:[%s10495_s29 + $0x7e0] sm:$0xff] %v1726_v60  ;;  %1729 = vst [vmem:[%s10495_s29 + $0x7e8] sm:$0xff] %v1728_v61  ;;  %v1732_v63 = vld [vmem:[%s10490_s28 + $0xff0] sm:$0xff] }
  0x93   : > { %1731 = vst [vmem:[%s10495_s29 + $0x7f0] sm:$0xff] %v1730_v62  ;;  %v1734_v0 = vld [vmem:[%s10490_s28 + $0x1000] sm:$0xff]  ;;  %v1736_v1 = vld [vmem:[%s10490_s28 + $0x1010] sm:$0xff]  ;;  %1733 = vst [vmem:[%s10495_s29 + $0x7f8] sm:$0xff] %v1732_v63 }
  0x94   : > { %1735 = vst [vmem:[%s10495_s29 + $0x800] sm:$0xff] %v1734_v0  ;;  %1737 = vst [vmem:[%s10495_s29 + $0x808] sm:$0xff] %v1736_v1  ;;  %v1738_v2 = vld [vmem:[%s10490_s28 + $0x1020] sm:$0xff]  ;;  %v1740_v3 = vld [vmem:[%s10490_s28 + $0x1030] sm:$0xff] }
  0x95   : > { %v1742_v4 = vld [vmem:[%s10490_s28 + $0x1040] sm:$0xff]  ;;  %1739 = vst [vmem:[%s10495_s29 + $0x810] sm:$0xff] %v1738_v2  ;;  %1741 = vst [vmem:[%s10495_s29 + $0x818] sm:$0xff] %v1740_v3  ;;  %v1744_v5 = vld [vmem:[%s10490_s28 + $0x1050] sm:$0xff] }
  0x96   : > { %1743 = vst [vmem:[%s10495_s29 + $0x820] sm:$0xff] %v1742_v4  ;;  %v1746_v6 = vld [vmem:[%s10490_s28 + $0x1060] sm:$0xff]  ;;  %v1748_v7 = vld [vmem:[%s10490_s28 + $0x1070] sm:$0xff]  ;;  %1745 = vst [vmem:[%s10495_s29 + $0x828] sm:$0xff] %v1744_v5 }
  0x97   : > { %1747 = vst [vmem:[%s10495_s29 + $0x830] sm:$0xff] %v1746_v6  ;;  %1749 = vst [vmem:[%s10495_s29 + $0x838] sm:$0xff] %v1748_v7  ;;  %v1750_v8 = vld [vmem:[%s10490_s28 + $0x1080] sm:$0xff]  ;;  %v1752_v9 = vld [vmem:[%s10490_s28 + $0x1090] sm:$0xff] }
  0x98   : > { %v1754_v10 = vld [vmem:[%s10490_s28 + $0x10a0] sm:$0xff]  ;;  %1751 = vst [vmem:[%s10495_s29 + $0x840] sm:$0xff] %v1750_v8  ;;  %1753 = vst [vmem:[%s10495_s29 + $0x848] sm:$0xff] %v1752_v9  ;;  %v1756_v11 = vld [vmem:[%s10490_s28 + $0x10b0] sm:$0xff] }
  0x99   : > { %1755 = vst [vmem:[%s10495_s29 + $0x850] sm:$0xff] %v1754_v10  ;;  %v1758_v12 = vld [vmem:[%s10490_s28 + $0x10c0] sm:$0xff]  ;;  %v1760_v13 = vld [vmem:[%s10490_s28 + $0x10d0] sm:$0xff]  ;;  %1757 = vst [vmem:[%s10495_s29 + $0x858] sm:$0xff] %v1756_v11 }
  0x9a   : > { %1759 = vst [vmem:[%s10495_s29 + $0x860] sm:$0xff] %v1758_v12  ;;  %1761 = vst [vmem:[%s10495_s29 + $0x868] sm:$0xff] %v1760_v13  ;;  %v1762_v14 = vld [vmem:[%s10490_s28 + $0x10e0] sm:$0xff]  ;;  %v1764_v15 = vld [vmem:[%s10490_s28 + $0x10f0] sm:$0xff] }
  0x9b   : > { %v1766_v16 = vld [vmem:[%s10490_s28 + $0x1100] sm:$0xff]  ;;  %1763 = vst [vmem:[%s10495_s29 + $0x870] sm:$0xff] %v1762_v14  ;;  %1765 = vst [vmem:[%s10495_s29 + $0x878] sm:$0xff] %v1764_v15  ;;  %v1768_v17 = vld [vmem:[%s10490_s28 + $0x1110] sm:$0xff] }
  0x9c   : > { %1767 = vst [vmem:[%s10495_s29 + $0x880] sm:$0xff] %v1766_v16  ;;  %v1770_v18 = vld [vmem:[%s10490_s28 + $0x1120] sm:$0xff]  ;;  %v1772_v19 = vld [vmem:[%s10490_s28 + $0x1130] sm:$0xff]  ;;  %1769 = vst [vmem:[%s10495_s29 + $0x888] sm:$0xff] %v1768_v17 }
  0x9d   : > { %1771 = vst [vmem:[%s10495_s29 + $0x890] sm:$0xff] %v1770_v18  ;;  %1773 = vst [vmem:[%s10495_s29 + $0x898] sm:$0xff] %v1772_v19  ;;  %v1774_v20 = vld [vmem:[%s10490_s28 + $0x1140] sm:$0xff]  ;;  %v1776_v21 = vld [vmem:[%s10490_s28 + $0x1150] sm:$0xff] }
  0x9e   : > { %v1778_v22 = vld [vmem:[%s10490_s28 + $0x1160] sm:$0xff]  ;;  %1775 = vst [vmem:[%s10495_s29 + $0x8a0] sm:$0xff] %v1774_v20  ;;  %1777 = vst [vmem:[%s10495_s29 + $0x8a8] sm:$0xff] %v1776_v21  ;;  %v1780_v23 = vld [vmem:[%s10490_s28 + $0x1170] sm:$0xff] }
  0x9f   : > { %1779 = vst [vmem:[%s10495_s29 + $0x8b0] sm:$0xff] %v1778_v22  ;;  %v1782_v24 = vld [vmem:[%s10490_s28 + $0x1180] sm:$0xff]  ;;  %v1784_v25 = vld [vmem:[%s10490_s28 + $0x1190] sm:$0xff]  ;;  %1781 = vst [vmem:[%s10495_s29 + $0x8b8] sm:$0xff] %v1780_v23 }
  0xa0   : > { %1783 = vst [vmem:[%s10495_s29 + $0x8c0] sm:$0xff] %v1782_v24  ;;  %1785 = vst [vmem:[%s10495_s29 + $0x8c8] sm:$0xff] %v1784_v25  ;;  %v1786_v26 = vld [vmem:[%s10490_s28 + $0x11a0] sm:$0xff]  ;;  %v1788_v27 = vld [vmem:[%s10490_s28 + $0x11b0] sm:$0xff] }
  0xa1   : > { %v1790_v28 = vld [vmem:[%s10490_s28 + $0x11c0] sm:$0xff]  ;;  %1787 = vst [vmem:[%s10495_s29 + $0x8d0] sm:$0xff] %v1786_v26  ;;  %1789 = vst [vmem:[%s10495_s29 + $0x8d8] sm:$0xff] %v1788_v27  ;;  %v1792_v29 = vld [vmem:[%s10490_s28 + $0x11d0] sm:$0xff] }
  0xa2   : > { %1791 = vst [vmem:[%s10495_s29 + $0x8e0] sm:$0xff] %v1790_v28  ;;  %v1794_v30 = vld [vmem:[%s10490_s28 + $0x11e0] sm:$0xff]  ;;  %v1796_v31 = vld [vmem:[%s10490_s28 + $0x11f0] sm:$0xff]  ;;  %1793 = vst [vmem:[%s10495_s29 + $0x8e8] sm:$0xff] %v1792_v29 }
  0xa3   : > { %1795 = vst [vmem:[%s10495_s29 + $0x8f0] sm:$0xff] %v1794_v30  ;;  %1797 = vst [vmem:[%s10495_s29 + $0x8f8] sm:$0xff] %v1796_v31  ;;  %v1798_v32 = vld [vmem:[%s10490_s28 + $0x1200] sm:$0xff]  ;;  %v1800_v33 = vld [vmem:[%s10490_s28 + $0x1210] sm:$0xff] }
  0xa4   : > { %v1802_v34 = vld [vmem:[%s10490_s28 + $0x1220] sm:$0xff]  ;;  %1799 = vst [vmem:[%s10495_s29 + $0x900] sm:$0xff] %v1798_v32  ;;  %1801 = vst [vmem:[%s10495_s29 + $0x908] sm:$0xff] %v1800_v33  ;;  %v1804_v35 = vld [vmem:[%s10490_s28 + $0x1230] sm:$0xff] }
  0xa5   : > { %1803 = vst [vmem:[%s10495_s29 + $0x910] sm:$0xff] %v1802_v34  ;;  %v1806_v36 = vld [vmem:[%s10490_s28 + $0x1240] sm:$0xff]  ;;  %v1808_v37 = vld [vmem:[%s10490_s28 + $0x1250] sm:$0xff]  ;;  %1805 = vst [vmem:[%s10495_s29 + $0x918] sm:$0xff] %v1804_v35 }
  0xa6   : > { %1807 = vst [vmem:[%s10495_s29 + $0x920] sm:$0xff] %v1806_v36  ;;  %1809 = vst [vmem:[%s10495_s29 + $0x928] sm:$0xff] %v1808_v37  ;;  %v1810_v38 = vld [vmem:[%s10490_s28 + $0x1260] sm:$0xff]  ;;  %v1812_v39 = vld [vmem:[%s10490_s28 + $0x1270] sm:$0xff] }
  0xa7   : > { %v1814_v40 = vld [vmem:[%s10490_s28 + $0x1280] sm:$0xff]  ;;  %1811 = vst [vmem:[%s10495_s29 + $0x930] sm:$0xff] %v1810_v38  ;;  %1813 = vst [vmem:[%s10495_s29 + $0x938] sm:$0xff] %v1812_v39  ;;  %v1816_v41 = vld [vmem:[%s10490_s28 + $0x1290] sm:$0xff] }
  0xa8   : > { %1815 = vst [vmem:[%s10495_s29 + $0x940] sm:$0xff] %v1814_v40  ;;  %v1818_v42 = vld [vmem:[%s10490_s28 + $0x12a0] sm:$0xff]  ;;  %v1820_v43 = vld [vmem:[%s10490_s28 + $0x12b0] sm:$0xff]  ;;  %1817 = vst [vmem:[%s10495_s29 + $0x948] sm:$0xff] %v1816_v41 }
  0xa9   : > { %1819 = vst [vmem:[%s10495_s29 + $0x950] sm:$0xff] %v1818_v42  ;;  %1821 = vst [vmem:[%s10495_s29 + $0x958] sm:$0xff] %v1820_v43  ;;  %v1822_v44 = vld [vmem:[%s10490_s28 + $0x12c0] sm:$0xff]  ;;  %v1824_v45 = vld [vmem:[%s10490_s28 + $0x12d0] sm:$0xff] }
  0xaa   : > { %v1826_v46 = vld [vmem:[%s10490_s28 + $0x12e0] sm:$0xff]  ;;  %1823 = vst [vmem:[%s10495_s29 + $0x960] sm:$0xff] %v1822_v44  ;;  %1825 = vst [vmem:[%s10495_s29 + $0x968] sm:$0xff] %v1824_v45  ;;  %v1828_v47 = vld [vmem:[%s10490_s28 + $0x12f0] sm:$0xff] }
  0xab   : > { %1827 = vst [vmem:[%s10495_s29 + $0x970] sm:$0xff] %v1826_v46  ;;  %v1830_v48 = vld [vmem:[%s10490_s28 + $0x1300] sm:$0xff]  ;;  %v1832_v49 = vld [vmem:[%s10490_s28 + $0x1310] sm:$0xff]  ;;  %1829 = vst [vmem:[%s10495_s29 + $0x978] sm:$0xff] %v1828_v47 }
  0xac   : > { %1831 = vst [vmem:[%s10495_s29 + $0x980] sm:$0xff] %v1830_v48  ;;  %1833 = vst [vmem:[%s10495_s29 + $0x988] sm:$0xff] %v1832_v49  ;;  %v1834_v50 = vld [vmem:[%s10490_s28 + $0x1320] sm:$0xff]  ;;  %v1836_v51 = vld [vmem:[%s10490_s28 + $0x1330] sm:$0xff] }
  0xad   : > { %v1838_v52 = vld [vmem:[%s10490_s28 + $0x1340] sm:$0xff]  ;;  %1835 = vst [vmem:[%s10495_s29 + $0x990] sm:$0xff] %v1834_v50  ;;  %1837 = vst [vmem:[%s10495_s29 + $0x998] sm:$0xff] %v1836_v51  ;;  %v1840_v53 = vld [vmem:[%s10490_s28 + $0x1350] sm:$0xff] }
  0xae   : > { %1839 = vst [vmem:[%s10495_s29 + $0x9a0] sm:$0xff] %v1838_v52  ;;  %v1842_v54 = vld [vmem:[%s10490_s28 + $0x1360] sm:$0xff]  ;;  %v1844_v55 = vld [vmem:[%s10490_s28 + $0x1370] sm:$0xff]  ;;  %1841 = vst [vmem:[%s10495_s29 + $0x9a8] sm:$0xff] %v1840_v53 }
  0xaf   : > { %1843 = vst [vmem:[%s10495_s29 + $0x9b0] sm:$0xff] %v1842_v54  ;;  %1845 = vst [vmem:[%s10495_s29 + $0x9b8] sm:$0xff] %v1844_v55  ;;  %v1846_v56 = vld [vmem:[%s10490_s28 + $0x1380] sm:$0xff]  ;;  %v1848_v57 = vld [vmem:[%s10490_s28 + $0x1390] sm:$0xff] }
  0xb0   : > { %v1850_v58 = vld [vmem:[%s10490_s28 + $0x13a0] sm:$0xff]  ;;  %1847 = vst [vmem:[%s10495_s29 + $0x9c0] sm:$0xff] %v1846_v56  ;;  %1849 = vst [vmem:[%s10495_s29 + $0x9c8] sm:$0xff] %v1848_v57  ;;  %v1852_v59 = vld [vmem:[%s10490_s28 + $0x13b0] sm:$0xff] }
  0xb1   : > { %1851 = vst [vmem:[%s10495_s29 + $0x9d0] sm:$0xff] %v1850_v58  ;;  %v1854_v60 = vld [vmem:[%s10490_s28 + $0x13c0] sm:$0xff]  ;;  %v1856_v61 = vld [vmem:[%s10490_s28 + $0x13d0] sm:$0xff]  ;;  %1853 = vst [vmem:[%s10495_s29 + $0x9d8] sm:$0xff] %v1852_v59 }
  0xb2   : > { %1855 = vst [vmem:[%s10495_s29 + $0x9e0] sm:$0xff] %v1854_v60  ;;  %1857 = vst [vmem:[%s10495_s29 + $0x9e8] sm:$0xff] %v1856_v61  ;;  %v1858_v62 = vld [vmem:[%s10490_s28 + $0x13e0] sm:$0xff]  ;;  %v1860_v63 = vld [vmem:[%s10490_s28 + $0x13f0] sm:$0xff] }
  0xb3   : > { %v1862_v0 = vld [vmem:[%s10490_s28 + $0x1400] sm:$0xff]  ;;  %1859 = vst [vmem:[%s10495_s29 + $0x9f0] sm:$0xff] %v1858_v62  ;;  %1861 = vst [vmem:[%s10495_s29 + $0x9f8] sm:$0xff] %v1860_v63  ;;  %v1864_v1 = vld [vmem:[%s10490_s28 + $0x1410] sm:$0xff] }
  0xb4   : > { %1863 = vst [vmem:[%s10495_s29 + $0xa00] sm:$0xff] %v1862_v0  ;;  %v1866_v2 = vld [vmem:[%s10490_s28 + $0x1420] sm:$0xff]  ;;  %v1868_v3 = vld [vmem:[%s10490_s28 + $0x1430] sm:$0xff]  ;;  %1865 = vst [vmem:[%s10495_s29 + $0xa08] sm:$0xff] %v1864_v1 }
  0xb5   : > { %1867 = vst [vmem:[%s10495_s29 + $0xa10] sm:$0xff] %v1866_v2  ;;  %1869 = vst [vmem:[%s10495_s29 + $0xa18] sm:$0xff] %v1868_v3  ;;  %v1870_v4 = vld [vmem:[%s10490_s28 + $0x1440] sm:$0xff]  ;;  %v1872_v5 = vld [vmem:[%s10490_s28 + $0x1450] sm:$0xff] }
  0xb6   : > { %v1874_v6 = vld [vmem:[%s10490_s28 + $0x1460] sm:$0xff]  ;;  %1871 = vst [vmem:[%s10495_s29 + $0xa20] sm:$0xff] %v1870_v4  ;;  %1873 = vst [vmem:[%s10495_s29 + $0xa28] sm:$0xff] %v1872_v5  ;;  %v1876_v7 = vld [vmem:[%s10490_s28 + $0x1470] sm:$0xff] }
  0xb7   : > { %1875 = vst [vmem:[%s10495_s29 + $0xa30] sm:$0xff] %v1874_v6  ;;  %v1878_v8 = vld [vmem:[%s10490_s28 + $0x1480] sm:$0xff]  ;;  %v1880_v9 = vld [vmem:[%s10490_s28 + $0x1490] sm:$0xff]  ;;  %1877 = vst [vmem:[%s10495_s29 + $0xa38] sm:$0xff] %v1876_v7 }
  0xb8   : > { %1879 = vst [vmem:[%s10495_s29 + $0xa40] sm:$0xff] %v1878_v8  ;;  %1881 = vst [vmem:[%s10495_s29 + $0xa48] sm:$0xff] %v1880_v9  ;;  %v1882_v10 = vld [vmem:[%s10490_s28 + $0x14a0] sm:$0xff]  ;;  %v1884_v11 = vld [vmem:[%s10490_s28 + $0x14b0] sm:$0xff] }
  0xb9   : > { %v1886_v12 = vld [vmem:[%s10490_s28 + $0x14c0] sm:$0xff]  ;;  %1883 = vst [vmem:[%s10495_s29 + $0xa50] sm:$0xff] %v1882_v10  ;;  %1885 = vst [vmem:[%s10495_s29 + $0xa58] sm:$0xff] %v1884_v11  ;;  %v1888_v13 = vld [vmem:[%s10490_s28 + $0x14d0] sm:$0xff] }
  0xba   : > { %1887 = vst [vmem:[%s10495_s29 + $0xa60] sm:$0xff] %v1886_v12  ;;  %v1890_v14 = vld [vmem:[%s10490_s28 + $0x14e0] sm:$0xff]  ;;  %v1892_v15 = vld [vmem:[%s10490_s28 + $0x14f0] sm:$0xff]  ;;  %1889 = vst [vmem:[%s10495_s29 + $0xa68] sm:$0xff] %v1888_v13 }
  0xbb   : > { %1891 = vst [vmem:[%s10495_s29 + $0xa70] sm:$0xff] %v1890_v14  ;;  %1893 = vst [vmem:[%s10495_s29 + $0xa78] sm:$0xff] %v1892_v15  ;;  %v1894_v16 = vld [vmem:[%s10490_s28 + $0x1500] sm:$0xff]  ;;  %v1896_v17 = vld [vmem:[%s10490_s28 + $0x1510] sm:$0xff] }
  0xbc   : > { %v1898_v18 = vld [vmem:[%s10490_s28 + $0x1520] sm:$0xff]  ;;  %1895 = vst [vmem:[%s10495_s29 + $0xa80] sm:$0xff] %v1894_v16  ;;  %1897 = vst [vmem:[%s10495_s29 + $0xa88] sm:$0xff] %v1896_v17  ;;  %v1900_v19 = vld [vmem:[%s10490_s28 + $0x1530] sm:$0xff] }
  0xbd   : > { %1899 = vst [vmem:[%s10495_s29 + $0xa90] sm:$0xff] %v1898_v18  ;;  %v1902_v20 = vld [vmem:[%s10490_s28 + $0x1540] sm:$0xff]  ;;  %v1904_v21 = vld [vmem:[%s10490_s28 + $0x1550] sm:$0xff]  ;;  %1901 = vst [vmem:[%s10495_s29 + $0xa98] sm:$0xff] %v1900_v19 }
  0xbe   : > { %1903 = vst [vmem:[%s10495_s29 + $0xaa0] sm:$0xff] %v1902_v20  ;;  %1905 = vst [vmem:[%s10495_s29 + $0xaa8] sm:$0xff] %v1904_v21  ;;  %v1906_v22 = vld [vmem:[%s10490_s28 + $0x1560] sm:$0xff]  ;;  %v1908_v23 = vld [vmem:[%s10490_s28 + $0x1570] sm:$0xff] }
  0xbf   : > { %v1910_v24 = vld [vmem:[%s10490_s28 + $0x1580] sm:$0xff]  ;;  %1907 = vst [vmem:[%s10495_s29 + $0xab0] sm:$0xff] %v1906_v22  ;;  %1909 = vst [vmem:[%s10495_s29 + $0xab8] sm:$0xff] %v1908_v23  ;;  %v1912_v25 = vld [vmem:[%s10490_s28 + $0x1590] sm:$0xff] }
  0xc0   : > { %1911 = vst [vmem:[%s10495_s29 + $0xac0] sm:$0xff] %v1910_v24  ;;  %v1914_v26 = vld [vmem:[%s10490_s28 + $0x15a0] sm:$0xff]  ;;  %v1916_v27 = vld [vmem:[%s10490_s28 + $0x15b0] sm:$0xff]  ;;  %1913 = vst [vmem:[%s10495_s29 + $0xac8] sm:$0xff] %v1912_v25 }
  0xc1   : > { %1915 = vst [vmem:[%s10495_s29 + $0xad0] sm:$0xff] %v1914_v26  ;;  %1917 = vst [vmem:[%s10495_s29 + $0xad8] sm:$0xff] %v1916_v27  ;;  %v1918_v28 = vld [vmem:[%s10490_s28 + $0x15c0] sm:$0xff]  ;;  %v1920_v29 = vld [vmem:[%s10490_s28 + $0x15d0] sm:$0xff] }
  0xc2   : > { %v1922_v30 = vld [vmem:[%s10490_s28 + $0x15e0] sm:$0xff]  ;;  %1919 = vst [vmem:[%s10495_s29 + $0xae0] sm:$0xff] %v1918_v28  ;;  %1921 = vst [vmem:[%s10495_s29 + $0xae8] sm:$0xff] %v1920_v29  ;;  %v1924_v31 = vld [vmem:[%s10490_s28 + $0x15f0] sm:$0xff] }
  0xc3   : > { %1923 = vst [vmem:[%s10495_s29 + $0xaf0] sm:$0xff] %v1922_v30  ;;  %v1926_v32 = vld [vmem:[%s10490_s28 + $0x1600] sm:$0xff]  ;;  %v1928_v33 = vld [vmem:[%s10490_s28 + $0x1610] sm:$0xff]  ;;  %1925 = vst [vmem:[%s10495_s29 + $0xaf8] sm:$0xff] %v1924_v31 }
  0xc4   : > { %1927 = vst [vmem:[%s10495_s29 + $0xb00] sm:$0xff] %v1926_v32  ;;  %1929 = vst [vmem:[%s10495_s29 + $0xb08] sm:$0xff] %v1928_v33  ;;  %v1930_v34 = vld [vmem:[%s10490_s28 + $0x1620] sm:$0xff]  ;;  %v1932_v35 = vld [vmem:[%s10490_s28 + $0x1630] sm:$0xff] }
  0xc5   : > { %v1934_v36 = vld [vmem:[%s10490_s28 + $0x1640] sm:$0xff]  ;;  %1931 = vst [vmem:[%s10495_s29 + $0xb10] sm:$0xff] %v1930_v34  ;;  %1933 = vst [vmem:[%s10495_s29 + $0xb18] sm:$0xff] %v1932_v35  ;;  %v1936_v37 = vld [vmem:[%s10490_s28 + $0x1650] sm:$0xff] }
  0xc6   : > { %1935 = vst [vmem:[%s10495_s29 + $0xb20] sm:$0xff] %v1934_v36  ;;  %v1938_v38 = vld [vmem:[%s10490_s28 + $0x1660] sm:$0xff]  ;;  %v1940_v39 = vld [vmem:[%s10490_s28 + $0x1670] sm:$0xff]  ;;  %1937 = vst [vmem:[%s10495_s29 + $0xb28] sm:$0xff] %v1936_v37 }
  0xc7   : > { %1939 = vst [vmem:[%s10495_s29 + $0xb30] sm:$0xff] %v1938_v38  ;;  %1941 = vst [vmem:[%s10495_s29 + $0xb38] sm:$0xff] %v1940_v39  ;;  %v1942_v40 = vld [vmem:[%s10490_s28 + $0x1680] sm:$0xff]  ;;  %v1944_v41 = vld [vmem:[%s10490_s28 + $0x1690] sm:$0xff] }
  0xc8   : > { %v1946_v42 = vld [vmem:[%s10490_s28 + $0x16a0] sm:$0xff]  ;;  %1943 = vst [vmem:[%s10495_s29 + $0xb40] sm:$0xff] %v1942_v40  ;;  %1945 = vst [vmem:[%s10495_s29 + $0xb48] sm:$0xff] %v1944_v41  ;;  %v1948_v43 = vld [vmem:[%s10490_s28 + $0x16b0] sm:$0xff] }
  0xc9   : > { %1947 = vst [vmem:[%s10495_s29 + $0xb50] sm:$0xff] %v1946_v42  ;;  %v1950_v44 = vld [vmem:[%s10490_s28 + $0x16c0] sm:$0xff]  ;;  %v1952_v45 = vld [vmem:[%s10490_s28 + $0x16d0] sm:$0xff]  ;;  %1949 = vst [vmem:[%s10495_s29 + $0xb58] sm:$0xff] %v1948_v43 }
  0xca   : > { %1951 = vst [vmem:[%s10495_s29 + $0xb60] sm:$0xff] %v1950_v44  ;;  %1953 = vst [vmem:[%s10495_s29 + $0xb68] sm:$0xff] %v1952_v45  ;;  %v1954_v46 = vld [vmem:[%s10490_s28 + $0x16e0] sm:$0xff]  ;;  %v1956_v47 = vld [vmem:[%s10490_s28 + $0x16f0] sm:$0xff] }
  0xcb   : > { %v1958_v48 = vld [vmem:[%s10490_s28 + $0x1700] sm:$0xff]  ;;  %1955 = vst [vmem:[%s10495_s29 + $0xb70] sm:$0xff] %v1954_v46  ;;  %1957 = vst [vmem:[%s10495_s29 + $0xb78] sm:$0xff] %v1956_v47  ;;  %v1960_v49 = vld [vmem:[%s10490_s28 + $0x1710] sm:$0xff] }
  0xcc   : > { %1959 = vst [vmem:[%s10495_s29 + $0xb80] sm:$0xff] %v1958_v48  ;;  %v1962_v50 = vld [vmem:[%s10490_s28 + $0x1720] sm:$0xff]  ;;  %v1964_v51 = vld [vmem:[%s10490_s28 + $0x1730] sm:$0xff]  ;;  %1961 = vst [vmem:[%s10495_s29 + $0xb88] sm:$0xff] %v1960_v49 }
  0xcd   : > { %1963 = vst [vmem:[%s10495_s29 + $0xb90] sm:$0xff] %v1962_v50  ;;  %1965 = vst [vmem:[%s10495_s29 + $0xb98] sm:$0xff] %v1964_v51  ;;  %v1966_v52 = vld [vmem:[%s10490_s28 + $0x1740] sm:$0xff]  ;;  %v1968_v53 = vld [vmem:[%s10490_s28 + $0x1750] sm:$0xff] }
  0xce   : > { %v1970_v54 = vld [vmem:[%s10490_s28 + $0x1760] sm:$0xff]  ;;  %1967 = vst [vmem:[%s10495_s29 + $0xba0] sm:$0xff] %v1966_v52  ;;  %1969 = vst [vmem:[%s10495_s29 + $0xba8] sm:$0xff] %v1968_v53  ;;  %v1972_v55 = vld [vmem:[%s10490_s28 + $0x1770] sm:$0xff] }
  0xcf   : > { %1971 = vst [vmem:[%s10495_s29 + $0xbb0] sm:$0xff] %v1970_v54  ;;  %v1974_v56 = vld [vmem:[%s10490_s28 + $0x1780] sm:$0xff]  ;;  %v1976_v57 = vld [vmem:[%s10490_s28 + $0x1790] sm:$0xff]  ;;  %1973 = vst [vmem:[%s10495_s29 + $0xbb8] sm:$0xff] %v1972_v55 }
  0xd0   : > { %1975 = vst [vmem:[%s10495_s29 + $0xbc0] sm:$0xff] %v1974_v56  ;;  %1977 = vst [vmem:[%s10495_s29 + $0xbc8] sm:$0xff] %v1976_v57  ;;  %v1978_v58 = vld [vmem:[%s10490_s28 + $0x17a0] sm:$0xff]  ;;  %v1980_v59 = vld [vmem:[%s10490_s28 + $0x17b0] sm:$0xff] }
  0xd1   : > { %v1982_v60 = vld [vmem:[%s10490_s28 + $0x17c0] sm:$0xff]  ;;  %1979 = vst [vmem:[%s10495_s29 + $0xbd0] sm:$0xff] %v1978_v58  ;;  %1981 = vst [vmem:[%s10495_s29 + $0xbd8] sm:$0xff] %v1980_v59  ;;  %v1984_v61 = vld [vmem:[%s10490_s28 + $0x17d0] sm:$0xff] }
  0xd2   : > { %1983 = vst [vmem:[%s10495_s29 + $0xbe0] sm:$0xff] %v1982_v60  ;;  %v1986_v62 = vld [vmem:[%s10490_s28 + $0x17e0] sm:$0xff]  ;;  %v1988_v63 = vld [vmem:[%s10490_s28 + $0x17f0] sm:$0xff]  ;;  %1985 = vst [vmem:[%s10495_s29 + $0xbe8] sm:$0xff] %v1984_v61 }
  0xd3   : > { %1987 = vst [vmem:[%s10495_s29 + $0xbf0] sm:$0xff] %v1986_v62  ;;  %1989 = vst [vmem:[%s10495_s29 + $0xbf8] sm:$0xff] %v1988_v63  ;;  %v1990_v0 = vld [vmem:[%s10490_s28 + $0x1800] sm:$0xff]  ;;  %v1992_v1 = vld [vmem:[%s10490_s28 + $0x1810] sm:$0xff] }
  0xd4   : > { %v1994_v2 = vld [vmem:[%s10490_s28 + $0x1820] sm:$0xff]  ;;  %1991 = vst [vmem:[%s10495_s29 + $0xc00] sm:$0xff] %v1990_v0  ;;  %1993 = vst [vmem:[%s10495_s29 + $0xc08] sm:$0xff] %v1992_v1  ;;  %v1996_v3 = vld [vmem:[%s10490_s28 + $0x1830] sm:$0xff] }
  0xd5   : > { %1995 = vst [vmem:[%s10495_s29 + $0xc10] sm:$0xff] %v1994_v2  ;;  %v1998_v4 = vld [vmem:[%s10490_s28 + $0x1840] sm:$0xff]  ;;  %v2000_v5 = vld [vmem:[%s10490_s28 + $0x1850] sm:$0xff]  ;;  %1997 = vst [vmem:[%s10495_s29 + $0xc18] sm:$0xff] %v1996_v3 }
  0xd6   : > { %1999 = vst [vmem:[%s10495_s29 + $0xc20] sm:$0xff] %v1998_v4  ;;  %2001 = vst [vmem:[%s10495_s29 + $0xc28] sm:$0xff] %v2000_v5  ;;  %v2002_v6 = vld [vmem:[%s10490_s28 + $0x1860] sm:$0xff]  ;;  %v2004_v7 = vld [vmem:[%s10490_s28 + $0x1870] sm:$0xff] }
  0xd7   : > { %v2006_v8 = vld [vmem:[%s10490_s28 + $0x1880] sm:$0xff]  ;;  %2003 = vst [vmem:[%s10495_s29 + $0xc30] sm:$0xff] %v2002_v6  ;;  %2005 = vst [vmem:[%s10495_s29 + $0xc38] sm:$0xff] %v2004_v7  ;;  %v2008_v9 = vld [vmem:[%s10490_s28 + $0x1890] sm:$0xff] }
  0xd8   : > { %2007 = vst [vmem:[%s10495_s29 + $0xc40] sm:$0xff] %v2006_v8  ;;  %v2010_v10 = vld [vmem:[%s10490_s28 + $0x18a0] sm:$0xff]  ;;  %v2012_v11 = vld [vmem:[%s10490_s28 + $0x18b0] sm:$0xff]  ;;  %2009 = vst [vmem:[%s10495_s29 + $0xc48] sm:$0xff] %v2008_v9 }
  0xd9   : > { %2011 = vst [vmem:[%s10495_s29 + $0xc50] sm:$0xff] %v2010_v10  ;;  %2013 = vst [vmem:[%s10495_s29 + $0xc58] sm:$0xff] %v2012_v11  ;;  %v2014_v12 = vld [vmem:[%s10490_s28 + $0x18c0] sm:$0xff]  ;;  %v2016_v13 = vld [vmem:[%s10490_s28 + $0x18d0] sm:$0xff] }
  0xda   : > { %v2018_v14 = vld [vmem:[%s10490_s28 + $0x18e0] sm:$0xff]  ;;  %2015 = vst [vmem:[%s10495_s29 + $0xc60] sm:$0xff] %v2014_v12  ;;  %2017 = vst [vmem:[%s10495_s29 + $0xc68] sm:$0xff] %v2016_v13  ;;  %v2020_v15 = vld [vmem:[%s10490_s28 + $0x18f0] sm:$0xff] }
  0xdb   : > { %2019 = vst [vmem:[%s10495_s29 + $0xc70] sm:$0xff] %v2018_v14  ;;  %v2022_v16 = vld [vmem:[%s10490_s28 + $0x1900] sm:$0xff]  ;;  %v2024_v17 = vld [vmem:[%s10490_s28 + $0x1910] sm:$0xff]  ;;  %2021 = vst [vmem:[%s10495_s29 + $0xc78] sm:$0xff] %v2020_v15 }
  0xdc   : > { %2023 = vst [vmem:[%s10495_s29 + $0xc80] sm:$0xff] %v2022_v16  ;;  %2025 = vst [vmem:[%s10495_s29 + $0xc88] sm:$0xff] %v2024_v17  ;;  %v2026_v18 = vld [vmem:[%s10490_s28 + $0x1920] sm:$0xff]  ;;  %v2028_v19 = vld [vmem:[%s10490_s28 + $0x1930] sm:$0xff] }
  0xdd   : > { %v2030_v20 = vld [vmem:[%s10490_s28 + $0x1940] sm:$0xff]  ;;  %2027 = vst [vmem:[%s10495_s29 + $0xc90] sm:$0xff] %v2026_v18  ;;  %2029 = vst [vmem:[%s10495_s29 + $0xc98] sm:$0xff] %v2028_v19  ;;  %v2032_v21 = vld [vmem:[%s10490_s28 + $0x1950] sm:$0xff] }
  0xde   : > { %2031 = vst [vmem:[%s10495_s29 + $0xca0] sm:$0xff] %v2030_v20  ;;  %v2034_v22 = vld [vmem:[%s10490_s28 + $0x1960] sm:$0xff]  ;;  %v2036_v23 = vld [vmem:[%s10490_s28 + $0x1970] sm:$0xff]  ;;  %2033 = vst [vmem:[%s10495_s29 + $0xca8] sm:$0xff] %v2032_v21 }
  0xdf   : > { %2035 = vst [vmem:[%s10495_s29 + $0xcb0] sm:$0xff] %v2034_v22  ;;  %2037 = vst [vmem:[%s10495_s29 + $0xcb8] sm:$0xff] %v2036_v23  ;;  %v2038_v24 = vld [vmem:[%s10490_s28 + $0x1980] sm:$0xff]  ;;  %v2040_v25 = vld [vmem:[%s10490_s28 + $0x1990] sm:$0xff] }
  0xe0   : > { %v2042_v26 = vld [vmem:[%s10490_s28 + $0x19a0] sm:$0xff]  ;;  %2039 = vst [vmem:[%s10495_s29 + $0xcc0] sm:$0xff] %v2038_v24  ;;  %2041 = vst [vmem:[%s10495_s29 + $0xcc8] sm:$0xff] %v2040_v25  ;;  %v2044_v27 = vld [vmem:[%s10490_s28 + $0x19b0] sm:$0xff] }
  0xe1   : > { %2043 = vst [vmem:[%s10495_s29 + $0xcd0] sm:$0xff] %v2042_v26  ;;  %v2046_v28 = vld [vmem:[%s10490_s28 + $0x19c0] sm:$0xff]  ;;  %v2048_v29 = vld [vmem:[%s10490_s28 + $0x19d0] sm:$0xff]  ;;  %2045 = vst [vmem:[%s10495_s29 + $0xcd8] sm:$0xff] %v2044_v27 }
  0xe2   : > { %2047 = vst [vmem:[%s10495_s29 + $0xce0] sm:$0xff] %v2046_v28  ;;  %2049 = vst [vmem:[%s10495_s29 + $0xce8] sm:$0xff] %v2048_v29  ;;  %v2050_v30 = vld [vmem:[%s10490_s28 + $0x19e0] sm:$0xff]  ;;  %v2052_v31 = vld [vmem:[%s10490_s28 + $0x19f0] sm:$0xff] }
  0xe3   : > { %v2054_v32 = vld [vmem:[%s10490_s28 + $0x1a00] sm:$0xff]  ;;  %2051 = vst [vmem:[%s10495_s29 + $0xcf0] sm:$0xff] %v2050_v30  ;;  %2053 = vst [vmem:[%s10495_s29 + $0xcf8] sm:$0xff] %v2052_v31  ;;  %v2056_v33 = vld [vmem:[%s10490_s28 + $0x1a10] sm:$0xff] }
  0xe4   : > { %2055 = vst [vmem:[%s10495_s29 + $0xd00] sm:$0xff] %v2054_v32  ;;  %v2058_v34 = vld [vmem:[%s10490_s28 + $0x1a20] sm:$0xff]  ;;  %v2060_v35 = vld [vmem:[%s10490_s28 + $0x1a30] sm:$0xff]  ;;  %2057 = vst [vmem:[%s10495_s29 + $0xd08] sm:$0xff] %v2056_v33 }
  0xe5   : > { %2059 = vst [vmem:[%s10495_s29 + $0xd10] sm:$0xff] %v2058_v34  ;;  %2061 = vst [vmem:[%s10495_s29 + $0xd18] sm:$0xff] %v2060_v35  ;;  %v2062_v36 = vld [vmem:[%s10490_s28 + $0x1a40] sm:$0xff]  ;;  %v2064_v37 = vld [vmem:[%s10490_s28 + $0x1a50] sm:$0xff] }
  0xe6   : > { %v2066_v38 = vld [vmem:[%s10490_s28 + $0x1a60] sm:$0xff]  ;;  %2063 = vst [vmem:[%s10495_s29 + $0xd20] sm:$0xff] %v2062_v36  ;;  %2065 = vst [vmem:[%s10495_s29 + $0xd28] sm:$0xff] %v2064_v37  ;;  %v2068_v39 = vld [vmem:[%s10490_s28 + $0x1a70] sm:$0xff] }
  0xe7   : > { %2067 = vst [vmem:[%s10495_s29 + $0xd30] sm:$0xff] %v2066_v38  ;;  %v2070_v40 = vld [vmem:[%s10490_s28 + $0x1a80] sm:$0xff]  ;;  %v2072_v41 = vld [vmem:[%s10490_s28 + $0x1a90] sm:$0xff]  ;;  %2069 = vst [vmem:[%s10495_s29 + $0xd38] sm:$0xff] %v2068_v39 }
  0xe8   : > { %2071 = vst [vmem:[%s10495_s29 + $0xd40] sm:$0xff] %v2070_v40  ;;  %2073 = vst [vmem:[%s10495_s29 + $0xd48] sm:$0xff] %v2072_v41  ;;  %v2074_v42 = vld [vmem:[%s10490_s28 + $0x1aa0] sm:$0xff]  ;;  %v2076_v43 = vld [vmem:[%s10490_s28 + $0x1ab0] sm:$0xff] }
  0xe9   : > { %v2078_v44 = vld [vmem:[%s10490_s28 + $0x1ac0] sm:$0xff]  ;;  %2075 = vst [vmem:[%s10495_s29 + $0xd50] sm:$0xff] %v2074_v42  ;;  %2077 = vst [vmem:[%s10495_s29 + $0xd58] sm:$0xff] %v2076_v43  ;;  %v2080_v45 = vld [vmem:[%s10490_s28 + $0x1ad0] sm:$0xff] }
  0xea   : > { %2079 = vst [vmem:[%s10495_s29 + $0xd60] sm:$0xff] %v2078_v44  ;;  %v2082_v46 = vld [vmem:[%s10490_s28 + $0x1ae0] sm:$0xff]  ;;  %v2084_v47 = vld [vmem:[%s10490_s28 + $0x1af0] sm:$0xff]  ;;  %2081 = vst [vmem:[%s10495_s29 + $0xd68] sm:$0xff] %v2080_v45 }
  0xeb   : > { %2083 = vst [vmem:[%s10495_s29 + $0xd70] sm:$0xff] %v2082_v46  ;;  %2085 = vst [vmem:[%s10495_s29 + $0xd78] sm:$0xff] %v2084_v47  ;;  %v2086_v48 = vld [vmem:[%s10490_s28 + $0x1b00] sm:$0xff]  ;;  %v2088_v49 = vld [vmem:[%s10490_s28 + $0x1b10] sm:$0xff] }
  0xec   : > { %v2090_v50 = vld [vmem:[%s10490_s28 + $0x1b20] sm:$0xff]  ;;  %2087 = vst [vmem:[%s10495_s29 + $0xd80] sm:$0xff] %v2086_v48  ;;  %2089 = vst [vmem:[%s10495_s29 + $0xd88] sm:$0xff] %v2088_v49  ;;  %v2092_v51 = vld [vmem:[%s10490_s28 + $0x1b30] sm:$0xff] }
  0xed   : > { %2091 = vst [vmem:[%s10495_s29 + $0xd90] sm:$0xff] %v2090_v50  ;;  %v2094_v52 = vld [vmem:[%s10490_s28 + $0x1b40] sm:$0xff]  ;;  %v2096_v53 = vld [vmem:[%s10490_s28 + $0x1b50] sm:$0xff]  ;;  %2093 = vst [vmem:[%s10495_s29 + $0xd98] sm:$0xff] %v2092_v51 }
  0xee   : > { %2095 = vst [vmem:[%s10495_s29 + $0xda0] sm:$0xff] %v2094_v52  ;;  %2097 = vst [vmem:[%s10495_s29 + $0xda8] sm:$0xff] %v2096_v53  ;;  %v2098_v54 = vld [vmem:[%s10490_s28 + $0x1b60] sm:$0xff]  ;;  %v2100_v55 = vld [vmem:[%s10490_s28 + $0x1b70] sm:$0xff] }
  0xef   : > { %v2102_v56 = vld [vmem:[%s10490_s28 + $0x1b80] sm:$0xff]  ;;  %2099 = vst [vmem:[%s10495_s29 + $0xdb0] sm:$0xff] %v2098_v54  ;;  %2101 = vst [vmem:[%s10495_s29 + $0xdb8] sm:$0xff] %v2100_v55  ;;  %v2104_v57 = vld [vmem:[%s10490_s28 + $0x1b90] sm:$0xff] }
  0xf0   : > { %2103 = vst [vmem:[%s10495_s29 + $0xdc0] sm:$0xff] %v2102_v56  ;;  %v2106_v58 = vld [vmem:[%s10490_s28 + $0x1ba0] sm:$0xff]  ;;  %v2108_v59 = vld [vmem:[%s10490_s28 + $0x1bb0] sm:$0xff]  ;;  %2105 = vst [vmem:[%s10495_s29 + $0xdc8] sm:$0xff] %v2104_v57 }
  0xf1   : > { %2107 = vst [vmem:[%s10495_s29 + $0xdd0] sm:$0xff] %v2106_v58  ;;  %2109 = vst [vmem:[%s10495_s29 + $0xdd8] sm:$0xff] %v2108_v59  ;;  %v2110_v60 = vld [vmem:[%s10490_s28 + $0x1bc0] sm:$0xff]  ;;  %v2112_v61 = vld [vmem:[%s10490_s28 + $0x1bd0] sm:$0xff] }
  0xf2   : > { %v2114_v62 = vld [vmem:[%s10490_s28 + $0x1be0] sm:$0xff]  ;;  %2111 = vst [vmem:[%s10495_s29 + $0xde0] sm:$0xff] %v2110_v60  ;;  %2113 = vst [vmem:[%s10495_s29 + $0xde8] sm:$0xff] %v2112_v61  ;;  %v2116_v63 = vld [vmem:[%s10490_s28 + $0x1bf0] sm:$0xff] }
  0xf3   : > { %2115 = vst [vmem:[%s10495_s29 + $0xdf0] sm:$0xff] %v2114_v62  ;;  %v2118_v0 = vld [vmem:[%s10490_s28 + $0x1c00] sm:$0xff]  ;;  %v2120_v1 = vld [vmem:[%s10490_s28 + $0x1c10] sm:$0xff]  ;;  %2117 = vst [vmem:[%s10495_s29 + $0xdf8] sm:$0xff] %v2116_v63 }
  0xf4   : > { %2119 = vst [vmem:[%s10495_s29 + $0xe00] sm:$0xff] %v2118_v0  ;;  %2121 = vst [vmem:[%s10495_s29 + $0xe08] sm:$0xff] %v2120_v1  ;;  %v2122_v2 = vld [vmem:[%s10490_s28 + $0x1c20] sm:$0xff]  ;;  %v2124_v3 = vld [vmem:[%s10490_s28 + $0x1c30] sm:$0xff] }
  0xf5   : > { %v2126_v4 = vld [vmem:[%s10490_s28 + $0x1c40] sm:$0xff]  ;;  %2123 = vst [vmem:[%s10495_s29 + $0xe10] sm:$0xff] %v2122_v2  ;;  %2125 = vst [vmem:[%s10495_s29 + $0xe18] sm:$0xff] %v2124_v3  ;;  %v2128_v5 = vld [vmem:[%s10490_s28 + $0x1c50] sm:$0xff] }
  0xf6   : > { %2127 = vst [vmem:[%s10495_s29 + $0xe20] sm:$0xff] %v2126_v4  ;;  %v2130_v6 = vld [vmem:[%s10490_s28 + $0x1c60] sm:$0xff]  ;;  %v2132_v7 = vld [vmem:[%s10490_s28 + $0x1c70] sm:$0xff]  ;;  %2129 = vst [vmem:[%s10495_s29 + $0xe28] sm:$0xff] %v2128_v5 }
  0xf7   : > { %2131 = vst [vmem:[%s10495_s29 + $0xe30] sm:$0xff] %v2130_v6  ;;  %2133 = vst [vmem:[%s10495_s29 + $0xe38] sm:$0xff] %v2132_v7  ;;  %v2134_v8 = vld [vmem:[%s10490_s28 + $0x1c80] sm:$0xff]  ;;  %v2136_v9 = vld [vmem:[%s10490_s28 + $0x1c90] sm:$0xff] }
  0xf8   : > { %v2138_v10 = vld [vmem:[%s10490_s28 + $0x1ca0] sm:$0xff]  ;;  %2135 = vst [vmem:[%s10495_s29 + $0xe40] sm:$0xff] %v2134_v8  ;;  %2137 = vst [vmem:[%s10495_s29 + $0xe48] sm:$0xff] %v2136_v9  ;;  %v2140_v11 = vld [vmem:[%s10490_s28 + $0x1cb0] sm:$0xff] }
  0xf9   : > { %2139 = vst [vmem:[%s10495_s29 + $0xe50] sm:$0xff] %v2138_v10  ;;  %v2142_v12 = vld [vmem:[%s10490_s28 + $0x1cc0] sm:$0xff]  ;;  %v2144_v13 = vld [vmem:[%s10490_s28 + $0x1cd0] sm:$0xff]  ;;  %2141 = vst [vmem:[%s10495_s29 + $0xe58] sm:$0xff] %v2140_v11 }
  0xfa   : > { %2143 = vst [vmem:[%s10495_s29 + $0xe60] sm:$0xff] %v2142_v12  ;;  %2145 = vst [vmem:[%s10495_s29 + $0xe68] sm:$0xff] %v2144_v13  ;;  %v2146_v14 = vld [vmem:[%s10490_s28 + $0x1ce0] sm:$0xff]  ;;  %v2148_v15 = vld [vmem:[%s10490_s28 + $0x1cf0] sm:$0xff] }
  0xfb   : > { %v2150_v16 = vld [vmem:[%s10490_s28 + $0x1d00] sm:$0xff]  ;;  %2147 = vst [vmem:[%s10495_s29 + $0xe70] sm:$0xff] %v2146_v14  ;;  %2149 = vst [vmem:[%s10495_s29 + $0xe78] sm:$0xff] %v2148_v15  ;;  %v2152_v17 = vld [vmem:[%s10490_s28 + $0x1d10] sm:$0xff] }
  0xfc   : > { %2151 = vst [vmem:[%s10495_s29 + $0xe80] sm:$0xff] %v2150_v16  ;;  %v2154_v18 = vld [vmem:[%s10490_s28 + $0x1d20] sm:$0xff]  ;;  %v2156_v19 = vld [vmem:[%s10490_s28 + $0x1d30] sm:$0xff]  ;;  %2153 = vst [vmem:[%s10495_s29 + $0xe88] sm:$0xff] %v2152_v17 }
  0xfd   : > { %2155 = vst [vmem:[%s10495_s29 + $0xe90] sm:$0xff] %v2154_v18  ;;  %2157 = vst [vmem:[%s10495_s29 + $0xe98] sm:$0xff] %v2156_v19  ;;  %v2158_v20 = vld [vmem:[%s10490_s28 + $0x1d40] sm:$0xff]  ;;  %v2160_v21 = vld [vmem:[%s10490_s28 + $0x1d50] sm:$0xff] }
  0xfe   : > { %v2162_v22 = vld [vmem:[%s10490_s28 + $0x1d60] sm:$0xff]  ;;  %2159 = vst [vmem:[%s10495_s29 + $0xea0] sm:$0xff] %v2158_v20  ;;  %2161 = vst [vmem:[%s10495_s29 + $0xea8] sm:$0xff] %v2160_v21  ;;  %v2164_v23 = vld [vmem:[%s10490_s28 + $0x1d70] sm:$0xff] }
  0xff   : > { %2163 = vst [vmem:[%s10495_s29 + $0xeb0] sm:$0xff] %v2162_v22  ;;  %v2166_v24 = vld [vmem:[%s10490_s28 + $0x1d80] sm:$0xff]  ;;  %v2168_v25 = vld [vmem:[%s10490_s28 + $0x1d90] sm:$0xff]  ;;  %2165 = vst [vmem:[%s10495_s29 + $0xeb8] sm:$0xff] %v2164_v23 }
 0x100   : > { %2167 = vst [vmem:[%s10495_s29 + $0xec0] sm:$0xff] %v2166_v24  ;;  %2169 = vst [vmem:[%s10495_s29 + $0xec8] sm:$0xff] %v2168_v25  ;;  %v2170_v26 = vld [vmem:[%s10490_s28 + $0x1da0] sm:$0xff]  ;;  %v2172_v27 = vld [vmem:[%s10490_s28 + $0x1db0] sm:$0xff] }
 0x101   : > { %v2174_v28 = vld [vmem:[%s10490_s28 + $0x1dc0] sm:$0xff]  ;;  %2171 = vst [vmem:[%s10495_s29 + $0xed0] sm:$0xff] %v2170_v26  ;;  %2173 = vst [vmem:[%s10495_s29 + $0xed8] sm:$0xff] %v2172_v27  ;;  %v2176_v29 = vld [vmem:[%s10490_s28 + $0x1dd0] sm:$0xff] }
 0x102   : > { %2175 = vst [vmem:[%s10495_s29 + $0xee0] sm:$0xff] %v2174_v28  ;;  %v2178_v30 = vld [vmem:[%s10490_s28 + $0x1de0] sm:$0xff]  ;;  %v2180_v31 = vld [vmem:[%s10490_s28 + $0x1df0] sm:$0xff]  ;;  %2177 = vst [vmem:[%s10495_s29 + $0xee8] sm:$0xff] %v2176_v29 }
 0x103   : > { %2179 = vst [vmem:[%s10495_s29 + $0xef0] sm:$0xff] %v2178_v30  ;;  %2181 = vst [vmem:[%s10495_s29 + $0xef8] sm:$0xff] %v2180_v31  ;;  %v2182_v32 = vld [vmem:[%s10490_s28 + $0x1e00] sm:$0xff]  ;;  %v2184_v33 = vld [vmem:[%s10490_s28 + $0x1e10] sm:$0xff] }
 0x104   : > { %v2186_v34 = vld [vmem:[%s10490_s28 + $0x1e20] sm:$0xff]  ;;  %2183 = vst [vmem:[%s10495_s29 + $0xf00] sm:$0xff] %v2182_v32  ;;  %2185 = vst [vmem:[%s10495_s29 + $0xf08] sm:$0xff] %v2184_v33  ;;  %v2188_v35 = vld [vmem:[%s10490_s28 + $0x1e30] sm:$0xff] }
 0x105   : > { %2187 = vst [vmem:[%s10495_s29 + $0xf10] sm:$0xff] %v2186_v34  ;;  %v2190_v36 = vld [vmem:[%s10490_s28 + $0x1e40] sm:$0xff]  ;;  %v2192_v37 = vld [vmem:[%s10490_s28 + $0x1e50] sm:$0xff]  ;;  %2189 = vst [vmem:[%s10495_s29 + $0xf18] sm:$0xff] %v2188_v35 }
 0x106   : > { %2191 = vst [vmem:[%s10495_s29 + $0xf20] sm:$0xff] %v2190_v36  ;;  %2193 = vst [vmem:[%s10495_s29 + $0xf28] sm:$0xff] %v2192_v37  ;;  %v2194_v38 = vld [vmem:[%s10490_s28 + $0x1e60] sm:$0xff]  ;;  %v2196_v39 = vld [vmem:[%s10490_s28 + $0x1e70] sm:$0xff] }
 0x107   : > { %v2198_v40 = vld [vmem:[%s10490_s28 + $0x1e80] sm:$0xff]  ;;  %2195 = vst [vmem:[%s10495_s29 + $0xf30] sm:$0xff] %v2194_v38  ;;  %2197 = vst [vmem:[%s10495_s29 + $0xf38] sm:$0xff] %v2196_v39  ;;  %v2200_v41 = vld [vmem:[%s10490_s28 + $0x1e90] sm:$0xff] }
 0x108   : > { %2199 = vst [vmem:[%s10495_s29 + $0xf40] sm:$0xff] %v2198_v40  ;;  %v2202_v42 = vld [vmem:[%s10490_s28 + $0x1ea0] sm:$0xff]  ;;  %v2204_v43 = vld [vmem:[%s10490_s28 + $0x1eb0] sm:$0xff]  ;;  %2201 = vst [vmem:[%s10495_s29 + $0xf48] sm:$0xff] %v2200_v41 }
 0x109   : > { %2203 = vst [vmem:[%s10495_s29 + $0xf50] sm:$0xff] %v2202_v42  ;;  %2205 = vst [vmem:[%s10495_s29 + $0xf58] sm:$0xff] %v2204_v43  ;;  %v2206_v44 = vld [vmem:[%s10490_s28 + $0x1ec0] sm:$0xff]  ;;  %v2208_v45 = vld [vmem:[%s10490_s28 + $0x1ed0] sm:$0xff] }
 0x10a   : > { %v2210_v46 = vld [vmem:[%s10490_s28 + $0x1ee0] sm:$0xff]  ;;  %2207 = vst [vmem:[%s10495_s29 + $0xf60] sm:$0xff] %v2206_v44  ;;  %2209 = vst [vmem:[%s10495_s29 + $0xf68] sm:$0xff] %v2208_v45  ;;  %v2212_v47 = vld [vmem:[%s10490_s28 + $0x1ef0] sm:$0xff] }
 0x10b   : > { %2211 = vst [vmem:[%s10495_s29 + $0xf70] sm:$0xff] %v2210_v46  ;;  %v2214_v48 = vld [vmem:[%s10490_s28 + $0x1f00] sm:$0xff]  ;;  %v2216_v49 = vld [vmem:[%s10490_s28 + $0x1f10] sm:$0xff]  ;;  %2213 = vst [vmem:[%s10495_s29 + $0xf78] sm:$0xff] %v2212_v47 }
 0x10c   : > { %2215 = vst [vmem:[%s10495_s29 + $0xf80] sm:$0xff] %v2214_v48  ;;  %2217 = vst [vmem:[%s10495_s29 + $0xf88] sm:$0xff] %v2216_v49  ;;  %v2218_v50 = vld [vmem:[%s10490_s28 + $0x1f20] sm:$0xff]  ;;  %v2220_v51 = vld [vmem:[%s10490_s28 + $0x1f30] sm:$0xff] }
 0x10d   : > { %v2222_v52 = vld [vmem:[%s10490_s28 + $0x1f40] sm:$0xff]  ;;  %2219 = vst [vmem:[%s10495_s29 + $0xf90] sm:$0xff] %v2218_v50  ;;  %2221 = vst [vmem:[%s10495_s29 + $0xf98] sm:$0xff] %v2220_v51  ;;  %v2224_v53 = vld [vmem:[%s10490_s28 + $0x1f50] sm:$0xff] }
 0x10e   : > { %2223 = vst [vmem:[%s10495_s29 + $0xfa0] sm:$0xff] %v2222_v52  ;;  %v2226_v54 = vld [vmem:[%s10490_s28 + $0x1f60] sm:$0xff]  ;;  %v2228_v55 = vld [vmem:[%s10490_s28 + $0x1f70] sm:$0xff]  ;;  %2225 = vst [vmem:[%s10495_s29 + $0xfa8] sm:$0xff] %v2224_v53 }
 0x10f   : > { %2227 = vst [vmem:[%s10495_s29 + $0xfb0] sm:$0xff] %v2226_v54  ;;  %2229 = vst [vmem:[%s10495_s29 + $0xfb8] sm:$0xff] %v2228_v55  ;;  %v2230_v56 = vld [vmem:[%s10490_s28 + $0x1f80] sm:$0xff]  ;;  %v2232_v57 = vld [vmem:[%s10490_s28 + $0x1f90] sm:$0xff] }
 0x110   : > { %v2234_v58 = vld [vmem:[%s10490_s28 + $0x1fa0] sm:$0xff]  ;;  %2231 = vst [vmem:[%s10495_s29 + $0xfc0] sm:$0xff] %v2230_v56  ;;  %2233 = vst [vmem:[%s10495_s29 + $0xfc8] sm:$0xff] %v2232_v57  ;;  %v2236_v59 = vld [vmem:[%s10490_s28 + $0x1fb0] sm:$0xff] }
 0x111   : > { %2235 = vst [vmem:[%s10495_s29 + $0xfd0] sm:$0xff] %v2234_v58  ;;  %v2238_v60 = vld [vmem:[%s10490_s28 + $0x1fc0] sm:$0xff]  ;;  %v2240_v61 = vld [vmem:[%s10490_s28 + $0x1fd0] sm:$0xff]  ;;  %2237 = vst [vmem:[%s10495_s29 + $0xfd8] sm:$0xff] %v2236_v59 }
 0x112   : > { %2239 = vst [vmem:[%s10495_s29 + $0xfe0] sm:$0xff] %v2238_v60  ;;  %2241 = vst [vmem:[%s10495_s29 + $0xfe8] sm:$0xff] %v2240_v61  ;;  %v2242_v62 = vld [vmem:[%s10490_s28 + $0x1fe0] sm:$0xff]  ;;  %v2244_v63 = vld [vmem:[%s10490_s28 + $0x1ff0] sm:$0xff] }
 0x113   : > { %2243 = vst [vmem:[%s10495_s29 + $0xff0] sm:$0xff] %v2242_v62  ;;  %2245 = vst [vmem:[%s10495_s29 + $0xff8] sm:$0xff] %v2244_v63 }
 0x114 PF: > { %p8975_p8 = scmp.ge.s32.totalorder %s10420_s16, 1  ;;  %p4335_p9 = scmp.lt.s32.totalorder %s10420_s16, 3 }
 0x116   : > { %p4336_p10 = pnand %p8975_p8, %p4335_p9 }
 0x118   : > { %4339 = sbr.rel (%p4336_p10) target bundleno = 1034 (0x40a), region = 76 }
 0x11d   : > { %s11521_s30 = sand.u32 1, %s10404_s12   ;;  %v11526_v0 = vld [vmem:[%s12673_s0] sm:$0xff]  ;;  %v11536_v2 = vld [vmem:[%s12673_s0 + $0x8] sm:$0xff]  ;;  %s9572_s9 = sshll.u32 (%p10477_p6), %s10412_s14, 4 }
 0x11e   : > { %v11531_v1 = vld [vmem:[%s12673_s0 + $0x80] sm:$0xff]  ;;  %s8976_s10 = sshll.u32 %s11521_s30, 12  ;;  %v11546_v5 = vld [vmem:[%s12673_s0 + $0x88] sm:$0xff]  ;;  %s8978_s7 = sshll.u32 %s11521_s30, 5 }
 0x11f   : > { %v8979_v3 = vcombine.low %v11526_v0, %v11531_v1  ;;  %v8980_v4 = vcombine.high %v11526_v0, %v11531_v1  ;;  %v8981_v6 = vcombine.low %v11536_v2, %v11546_v5  ;;  %v8982_v7 = vcombine.high %v11536_v2, %v11546_v5  ;;  %s11552_s18 = scalar_lea.vmem [#allocation2], %s8976_s10  ;;  %s8758_s12 = scalar_lea.vmem (%p10477_p6), %s12675_s2, %s9572_s9 }
 0x120   : > { %v9614_v8 = vld [vmem:[%s11552_s18 + $0x74] ss:$8 sps:$4 sm:$0xff]   ;;  %v9618_v10 = vld [vmem:[%s11552_s18 + $0x70] ss:$8 sps:$4 sm:$0xff]   ;;  %v9620_v12 = vld [vmem:[%s11552_s18 + $0x64] ss:$8 sps:$4 sm:$0xff]  }
 0x121   : > { %7874 = vmatprep.mubr.bf16.mxu0 %v8980_v4  ;;  %v9616_v9 = vld [vmem:[%s11552_s18 + $0x174] ss:$8 sps:$4 sm:$0xff]   ;;  %7927 = vmatprep.mubr.bf16.mxu1 %v8982_v7  ;;  %v9619_v11 = vld [vmem:[%s11552_s18 + $0x170] ss:$8 sps:$4 sm:$0xff]   ;;  %v9622_v13 = vld [vmem:[%s11552_s18 + $0x164] ss:$8 sps:$4 sm:$0xff]  }
 0x122   : > { %7842 = vmatprep.subr.bf16.mxu0 %v9614_v8  ;;  %7895 = vmatprep.subr.bf16.mxu1 %v9616_v9  ;;  %v9624_v14 = vld [vmem:[%s11552_s18 + $0x60] ss:$8 sps:$4 sm:$0xff]   ;;  %v9626_v16 = vld [vmem:[%s11552_s18 + $0x54] ss:$8 sps:$4 sm:$0xff]   ;;  %v9630_v18 = vld [vmem:[%s11552_s18 + $0x50] ss:$8 sps:$4 sm:$0xff]  }
 0x123   : > { %7843 = vmatpush1.bf16.msra.mxu0 %v9618_v10  ;;  %7896 = vmatpush1.bf16.msra.mxu1 %v9619_v11  ;;  %v9625_v15 = vld [vmem:[%s11552_s18 + $0x160] ss:$8 sps:$4 sm:$0xff]   ;;  %v9628_v17 = vld [vmem:[%s11552_s18 + $0x154] ss:$8 sps:$4 sm:$0xff]   ;;  %v9631_v19 = vld [vmem:[%s11552_s18 + $0x150] ss:$8 sps:$4 sm:$0xff]  }
 0x124   : > { %7844 = vmatprep.subr.bf16.mxu0 %v9620_v12  ;;  %7897 = vmatprep.subr.bf16.mxu1 %v9622_v13  ;;  %v9632_v20 = vld [vmem:[%s11552_s18 + $0x44] ss:$8 sps:$4 sm:$0xff]   ;;  %v9636_v22 = vld [vmem:[%s11552_s18 + $0x40] ss:$8 sps:$4 sm:$0xff]   ;;  %v9638_v24 = vld [vmem:[%s11552_s18 + $0x34] ss:$8 sps:$4 sm:$0xff]  }
 0x125   : > { %v9634_v21 = vld [vmem:[%s11552_s18 + $0x144] ss:$8 sps:$4 sm:$0xff]   ;;  %v9637_v23 = vld [vmem:[%s11552_s18 + $0x140] ss:$8 sps:$4 sm:$0xff]   ;;  %v9640_v25 = vld [vmem:[%s11552_s18 + $0x134] ss:$8 sps:$4 sm:$0xff]  }
 0x126   : > { %v9642_v26 = vld [vmem:[%s11552_s18 + $0x30] ss:$8 sps:$4 sm:$0xff]   ;;  %v9644_v28 = vld [vmem:[%s11552_s18 + $0x24] ss:$8 sps:$4 sm:$0xff]   ;;  %v9648_v30 = vld [vmem:[%s11552_s18 + $0x20] ss:$8 sps:$4 sm:$0xff]  }
 0x127   : > { %7845 = vmatpush1.bf16.msra.mxu0 %v9624_v14  ;;  %7898 = vmatpush1.bf16.msra.mxu1 %v9625_v15  ;;  %v9643_v27 = vld [vmem:[%s11552_s18 + $0x130] ss:$8 sps:$4 sm:$0xff]   ;;  %v9646_v29 = vld [vmem:[%s11552_s18 + $0x124] ss:$8 sps:$4 sm:$0xff]   ;;  %v9649_v31 = vld [vmem:[%s11552_s18 + $0x120] ss:$8 sps:$4 sm:$0xff]  }
 0x128   : > { %7846 = vmatprep.subr.bf16.mxu0 %v9626_v16  ;;  %7899 = vmatprep.subr.bf16.mxu1 %v9628_v17  ;;  %v9650_v32 = vld [vmem:[%s11552_s18 + $0x14] ss:$8 sps:$4 sm:$0xff]   ;;  %v9654_v34 = vld [vmem:[%s11552_s18 + $0x10] ss:$8 sps:$4 sm:$0xff]   ;;  %v9656_v36 = vld [vmem:[%s11552_s18 + $0x4] ss:$8 sps:$4 sm:$0xff]  }
 0x129   : > { %v9652_v33 = vld [vmem:[%s11552_s18 + $0x114] ss:$8 sps:$4 sm:$0xff]   ;;  %v9655_v35 = vld [vmem:[%s11552_s18 + $0x110] ss:$8 sps:$4 sm:$0xff]   ;;  %v9658_v37 = vld [vmem:[%s11552_s18 + $0x104] ss:$8 sps:$4 sm:$0xff]  }
 0x12a   : > { %v9660_v38 = vld [vmem:[%s11552_s18] ss:$8 sps:$4 sm:$0xff]   ;;  %v9662_v40 = vld [vmem:[%s11552_s18 + $0xf4] ss:$8 sps:$4 sm:$0xff]   ;;  %v9666_v42 = vld [vmem:[%s11552_s18 + $0xf0] ss:$8 sps:$4 sm:$0xff]  }
 0x12b   : > { %7847 = vmatpush1.bf16.msra.mxu0 %v9630_v18  ;;  %7900 = vmatpush1.bf16.msra.mxu1 %v9631_v19  ;;  %v9661_v39 = vld [vmem:[%s11552_s18 + $0x100] ss:$8 sps:$4 sm:$0xff]   ;;  %v9664_v41 = vld [vmem:[%s11552_s18 + $0x1f4] ss:$8 sps:$4 sm:$0xff]   ;;  %v9667_v43 = vld [vmem:[%s11552_s18 + $0x1f0] ss:$8 sps:$4 sm:$0xff]  }
 0x12c   : > { %7848 = vmatprep.subr.bf16.mxu0 %v9632_v20  ;;  %7901 = vmatprep.subr.bf16.mxu1 %v9634_v21  ;;  %v9668_v44 = vld [vmem:[%s11552_s18 + $0xe4] ss:$8 sps:$4 sm:$0xff]   ;;  %v9672_v46 = vld [vmem:[%s11552_s18 + $0xe0] ss:$8 sps:$4 sm:$0xff]   ;;  %v9674_v48 = vld [vmem:[%s11552_s18 + $0xd4] ss:$8 sps:$4 sm:$0xff]  }
 0x12d   : > { %v9670_v45 = vld [vmem:[%s11552_s18 + $0x1e4] ss:$8 sps:$4 sm:$0xff]   ;;  %v9673_v47 = vld [vmem:[%s11552_s18 + $0x1e0] ss:$8 sps:$4 sm:$0xff]   ;;  %v9676_v49 = vld [vmem:[%s11552_s18 + $0x1d4] ss:$8 sps:$4 sm:$0xff]  }
 0x12e   : > { %v9678_v50 = vld [vmem:[%s11552_s18 + $0xd0] ss:$8 sps:$4 sm:$0xff]   ;;  %v9680_v52 = vld [vmem:[%s11552_s18 + $0xc4] ss:$8 sps:$4 sm:$0xff]   ;;  %v9684_v54 = vld [vmem:[%s11552_s18 + $0xc0] ss:$8 sps:$4 sm:$0xff]  }
 0x12f   : > { %7849 = vmatpush1.bf16.msra.mxu0 %v9636_v22  ;;  %7902 = vmatpush1.bf16.msra.mxu1 %v9637_v23  ;;  %v9679_v51 = vld [vmem:[%s11552_s18 + $0x1d0] ss:$8 sps:$4 sm:$0xff]   ;;  %v9682_v53 = vld [vmem:[%s11552_s18 + $0x1c4] ss:$8 sps:$4 sm:$0xff]   ;;  %v9685_v55 = vld [vmem:[%s11552_s18 + $0x1c0] ss:$8 sps:$4 sm:$0xff]  }
 0x130   : > { %7850 = vmatprep.subr.bf16.mxu0 %v9638_v24  ;;  %7903 = vmatprep.subr.bf16.mxu1 %v9640_v25  ;;  %v9686_v56 = vld [vmem:[%s11552_s18 + $0xb4] ss:$8 sps:$4 sm:$0xff]   ;;  %v9690_v58 = vld [vmem:[%s11552_s18 + $0xb0] ss:$8 sps:$4 sm:$0xff]   ;;  %v9692_v60 = vld [vmem:[%s11552_s18 + $0xa4] ss:$8 sps:$4 sm:$0xff]  }
 0x131   : > { %v9688_v57 = vld [vmem:[%s11552_s18 + $0x1b4] ss:$8 sps:$4 sm:$0xff]   ;;  %v9691_v59 = vld [vmem:[%s11552_s18 + $0x1b0] ss:$8 sps:$4 sm:$0xff]   ;;  %v9694_v61 = vld [vmem:[%s11552_s18 + $0x1a4] ss:$8 sps:$4 sm:$0xff]  }
 0x132   : > { %v9696_v62 = vld [vmem:[%s11552_s18 + $0xa0] ss:$8 sps:$4 sm:$0xff]   ;;  %v9698_v4 = vld [vmem:[%s11552_s18 + $0x94] ss:$8 sps:$4 sm:$0xff]   ;;  %v9702_v8 = vld [vmem:[%s11552_s18 + $0x90] ss:$8 sps:$4 sm:$0xff]  }
 0x133   : > { %7851 = vmatpush1.bf16.msra.mxu0 %v9642_v26  ;;  %7904 = vmatpush1.bf16.msra.mxu1 %v9643_v27  ;;  %v9697_v63 = vld [vmem:[%s11552_s18 + $0x1a0] ss:$8 sps:$4 sm:$0xff]   ;;  %v9700_v7 = vld [vmem:[%s11552_s18 + $0x194] ss:$8 sps:$4 sm:$0xff]   ;;  %v9703_v9 = vld [vmem:[%s11552_s18 + $0x190] ss:$8 sps:$4 sm:$0xff]  }
 0x134   : > { %7852 = vmatprep.subr.bf16.mxu0 %v9644_v28  ;;  %7905 = vmatprep.subr.bf16.mxu1 %v9646_v29  ;;  %v9704_v10 = vld [vmem:[%s11552_s18 + $0x84] ss:$8 sps:$4 sm:$0xff]   ;;  %v9708_v12 = vld [vmem:[%s11552_s18 + $0x80] ss:$8 sps:$4 sm:$0xff]   ;;  %v9712_v14 = vld [vmem:[%s11552_s18 + $0x274] ss:$8 sps:$4 sm:$0xff]  }
 0x135   : > { %v9706_v11 = vld [vmem:[%s11552_s18 + $0x184] ss:$8 sps:$4 sm:$0xff]   ;;  %v9709_v13 = vld [vmem:[%s11552_s18 + $0x180] ss:$8 sps:$4 sm:$0xff]   ;;  %v9715_v15 = vld [vmem:[%s11552_s18 + $0x374] ss:$8 sps:$4 sm:$0xff]  }
 0x136   : > { %v4418_v16 = vld [vmem:[%s12673_s0 + $0x100] sm:$0xff]  ;;  %v4419_v18 = vld [vmem:[%s12673_s0 + $0x108] sm:$0xff]  ;;  %v9710_v20 = vld [vmem:[%s11552_s18 + $0x270] ss:$8 sps:$4 sm:$0xff]  }
 0x137   : > { %7853 = vmatpush1.bf16.msra.mxu0 %v9648_v30  ;;  %7906 = vmatpush1.bf16.msra.mxu1 %v9649_v31  ;;  %v4434_v17 = vld [vmem:[%s12673_s0 + $0x180] sm:$0xff]  ;;  %v4435_v19 = vld [vmem:[%s12673_s0 + $0x188] sm:$0xff]  ;;  %v9713_v21 = vld [vmem:[%s11552_s18 + $0x370] ss:$8 sps:$4 sm:$0xff]  }
 0x138   : > { %7854 = vmatprep.subr.bf16.mxu0 %v9650_v32  ;;  %7907 = vmatprep.subr.bf16.mxu1 %v9652_v33  ;;  %v9718_v22 = vld [vmem:[%s11552_s18 + $0x264] ss:$8 sps:$4 sm:$0xff]   ;;  %v9012_v24 = vcombine.high %v4418_v16, %v4434_v17  ;;  %v9014_v25 = vcombine.high %v4419_v18, %v4435_v19  ;;  %v9716_v26 = vld [vmem:[%s11552_s18 + $0x260] ss:$8 sps:$4 sm:$0xff]   ;;  %v9724_v28 = vld [vmem:[%s11552_s18 + $0x254] ss:$8 sps:$4 sm:$0xff]   ;;  %v9013_v2 = vcombine.low %v4419_v18, %v4435_v19 }
 0x139   : > { %v9721_v23 = vld [vmem:[%s11552_s18 + $0x364] ss:$8 sps:$4 sm:$0xff]   ;;  %v9719_v27 = vld [vmem:[%s11552_s18 + $0x360] ss:$8 sps:$4 sm:$0xff]   ;;  %v9727_v29 = vld [vmem:[%s11552_s18 + $0x354] ss:$8 sps:$4 sm:$0xff]  }
 0x13a   : > { %v9722_v0 = vld [vmem:[%s11552_s18 + $0x250] ss:$8 sps:$4 sm:$0xff]   ;;  %v9730_v5 = vld [vmem:[%s11552_s18 + $0x244] ss:$8 sps:$4 sm:$0xff]   ;;  %v9728_v30 = vld [vmem:[%s11552_s18 + $0x240] ss:$8 sps:$4 sm:$0xff]  }
 0x13b   : > { %7855 = vmatpush1.bf16.msra.mxu0 %v9654_v34  ;;  %7908 = vmatpush1.bf16.msra.mxu1 %v9655_v35  ;;  %v9725_v1 = vld [vmem:[%s11552_s18 + $0x350] ss:$8 sps:$4 sm:$0xff]   ;;  %v9731_v31 = vld [vmem:[%s11552_s18 + $0x340] ss:$8 sps:$4 sm:$0xff]   ;;  %v9736_v32 = vld [vmem:[%s11552_s18 + $0x234] ss:$8 sps:$4 sm:$0xff]  }
 0x13c   : > { %7856 = vmatprep.subr.bf16.mxu0 %v9656_v36  ;;  %7909 = vmatprep.subr.bf16.mxu1 %v9658_v37  ;;  %v9739_v33 = vld [vmem:[%s11552_s18 + $0x334] ss:$8 sps:$4 sm:$0xff]   ;;  %v9734_v34 = vld [vmem:[%s11552_s18 + $0x230] ss:$8 sps:$4 sm:$0xff]   ;;  %v9742_v36 = vld [vmem:[%s11552_s18 + $0x224] ss:$8 sps:$4 sm:$0xff]  }
 0x13d   : > { %v9737_v35 = vld [vmem:[%s11552_s18 + $0x330] ss:$8 sps:$4 sm:$0xff]   ;;  %v9745_v37 = vld [vmem:[%s11552_s18 + $0x324] ss:$8 sps:$4 sm:$0xff]   ;;  %v9788_v18 = vld [vmem:[%s11552_s18 + $0x2a0] ss:$8 sps:$4 sm:$0xff]  }
 0x13e   : > { %v9791_v19 = vld [vmem:[%s11552_s18 + $0x3a0] ss:$8 sps:$4 sm:$0xff]  }
 0x13f   : > { %7857 = vmatpush1.bf16.msra.mxu0 %v9660_v38  ;;  %7910 = vmatpush1.bf16.msra.mxu1 %v9661_v39  ;;  %v11661_v38 = vld [vmem:[%s12673_s0 + $0x10] sm:$0xff]  ;;  %v9740_v39 = vld [vmem:[%s11552_s18 + $0x220] ss:$8 sps:$4 sm:$0xff]  }
 0x140   : > { %7858 = vmatprep.subr.bf16.mxu0 %v9662_v40  ;;  %7911 = vmatprep.subr.bf16.mxu1 %v9664_v41  ;;  %v9743_v40 = vld [vmem:[%s11552_s18 + $0x320] ss:$8 sps:$4 sm:$0xff]   ;;  %v9748_v41 = vld [vmem:[%s11552_s18 + $0x214] ss:$8 sps:$4 sm:$0xff]  }
 0x143   : > { %7859 = vmatpush2.bf16.msra.mxu0 %v9666_v42  ;;  %7912 = vmatpush2.bf16.msra.mxu1 %v9667_v43  ;;  %v9751_v42 = vld [vmem:[%s11552_s18 + $0x314] ss:$8 sps:$4 sm:$0xff]  }
 0x144   : > { %7860 = vmatprep.subr.bf16.mxu0 %v9668_v44  ;;  %7913 = vmatprep.subr.bf16.mxu1 %v9670_v45  ;;  %v11670_v43 = vld [vmem:[%s12673_s0 + $0x90] sm:$0xff]  ;;  %v11675_v44 = vld [vmem:[%s12673_s0 + $0x18] sm:$0xff] }
 0x145   : > { %v8984_v45 = vcombine.high %v11661_v38, %v11670_v43 }
 0x147   : > { %7861 = vmatpush2.bf16.msra.mxu0 %v9672_v46  ;;  %7914 = vmatpush2.bf16.msra.mxu1 %v9673_v47  ;;  %v11682_v46 = vld [vmem:[%s12673_s0 + $0x98] sm:$0xff] }
 0x148   : > { %7862 = vmatprep.subr.bf16.mxu0 %v9674_v48  ;;  %7915 = vmatprep.subr.bf16.mxu1 %v9676_v49  ;;  %v9746_v47 = vld [vmem:[%s11552_s18 + $0x210] ss:$8 sps:$4 sm:$0xff]   ;;  %v8986_v48 = vcombine.high %v11675_v44, %v11682_v46 }
 0x149   : > { %v9749_v49 = vld [vmem:[%s11552_s18 + $0x310] ss:$8 sps:$4 sm:$0xff]  }
 0x14b   : > { %7863 = vmatpush2.bf16.msra.mxu0 %v9678_v50  ;;  %7916 = vmatpush2.bf16.msra.mxu1 %v9679_v51  ;;  %v9754_v50 = vld [vmem:[%s11552_s18 + $0x204] ss:$8 sps:$4 sm:$0xff]  }
 0x14c   : > { %7864 = vmatprep.subr.bf16.mxu0 %v9680_v52  ;;  %7917 = vmatprep.subr.bf16.mxu1 %v9682_v53  ;;  %v9757_v51 = vld [vmem:[%s11552_s18 + $0x304] ss:$8 sps:$4 sm:$0xff]   ;;  %v9752_v52 = vld [vmem:[%s11552_s18 + $0x200] ss:$8 sps:$4 sm:$0xff]  }
 0x14d   : > { %v9755_v53 = vld [vmem:[%s11552_s18 + $0x300] ss:$8 sps:$4 sm:$0xff]  }
 0x14f   : > { %7865 = vmatpush2.bf16.msra.mxu0 %v9684_v54  ;;  %7918 = vmatpush2.bf16.msra.mxu1 %v9685_v55  ;;  %v9760_v54 = vld [vmem:[%s11552_s18 + $0x2f4] ss:$8 sps:$4 sm:$0xff]  }
 0x150   : > { %7866 = vmatprep.subr.bf16.mxu0 %v9686_v56  ;;  %7919 = vmatprep.subr.bf16.mxu1 %v9688_v57  ;;  %v9763_v55 = vld [vmem:[%s11552_s18 + $0x3f4] ss:$8 sps:$4 sm:$0xff]   ;;  %v9758_v56 = vld [vmem:[%s11552_s18 + $0x2f0] ss:$8 sps:$4 sm:$0xff]  }
 0x151   : > { %v9761_v57 = vld [vmem:[%s11552_s18 + $0x3f0] ss:$8 sps:$4 sm:$0xff]  }
 0x153   : > { %7867 = vmatpush2.bf16.msra.mxu0 %v9690_v58  ;;  %7920 = vmatpush2.bf16.msra.mxu1 %v9691_v59  ;;  %v9766_v58 = vld [vmem:[%s11552_s18 + $0x2e4] ss:$8 sps:$4 sm:$0xff]  }
 0x154   : > { %7868 = vmatprep.subr.bf16.mxu0 %v9692_v60  ;;  %7921 = vmatprep.subr.bf16.mxu1 %v9694_v61  ;;  %v9769_v59 = vld [vmem:[%s11552_s18 + $0x3e4] ss:$8 sps:$4 sm:$0xff]   ;;  %v9764_v60 = vld [vmem:[%s11552_s18 + $0x2e0] ss:$8 sps:$4 sm:$0xff]  }
 0x155   : > { %v9767_v61 = vld [vmem:[%s11552_s18 + $0x3e0] ss:$8 sps:$4 sm:$0xff]  }
 0x157   : > { %7869 = vmatpush2.bf16.msra.mxu0 %v9696_v62  ;;  %7922 = vmatpush2.bf16.msra.mxu1 %v9697_v63  ;;  %v9772_v62 = vld [vmem:[%s11552_s18 + $0x2d4] ss:$8 sps:$4 sm:$0xff]  }
 0x158   : > { %7870 = vmatprep.subr.bf16.mxu0 %v9698_v4  ;;  %7923 = vmatprep.subr.bf16.mxu1 %v9700_v7  ;;  %v9775_v63 = vld [vmem:[%s11552_s18 + $0x3d4] ss:$8 sps:$4 sm:$0xff]   ;;  %v9770_v4 = vld [vmem:[%s11552_s18 + $0x2d0] ss:$8 sps:$4 sm:$0xff]  }
 0x159   : > { %v9773_v7 = vld [vmem:[%s11552_s18 + $0x3d0] ss:$8 sps:$4 sm:$0xff]  }
 0x15b   : > { %7871 = vmatpush2.bf16.msra.mxu0 %v9702_v8  ;;  %7924 = vmatpush2.bf16.msra.mxu1 %v9703_v9  ;;  %v9778_v8 = vld [vmem:[%s11552_s18 + $0x2c4] ss:$8 sps:$4 sm:$0xff]  }
 0x15c   : > { %7872 = vmatprep.subr.bf16.mxu0 %v9704_v10  ;;  %7925 = vmatprep.subr.bf16.mxu1 %v9706_v11  ;;  %v9781_v9 = vld [vmem:[%s11552_s18 + $0x3c4] ss:$8 sps:$4 sm:$0xff]   ;;  %v9776_v10 = vld [vmem:[%s11552_s18 + $0x2c0] ss:$8 sps:$4 sm:$0xff]  }
 0x15d   : > { %v9779_v11 = vld [vmem:[%s11552_s18 + $0x3c0] ss:$8 sps:$4 sm:$0xff]  }
 0x15f   : > { %7873 = vmatpush2.bf16.msra.mxu0 %v9708_v12  ;;  %7926 = vmatpush2.bf16.msra.mxu1 %v9709_v13  ;;  %v9784_v12 = vld [vmem:[%s11552_s18 + $0x2b4] ss:$8 sps:$4 sm:$0xff]  }
 0x160   : > { %7948 = vmatprep.subr.bf16.mxu0 %v9712_v14  ;;  %8001 = vmatprep.subr.bf16.mxu1 %v9715_v15  ;;  %v9787_v13 = vld [vmem:[%s11552_s18 + $0x3b4] ss:$8 sps:$4 sm:$0xff]   ;;  %v9782_v14 = vld [vmem:[%s11552_s18 + $0x2b0] ss:$8 sps:$4 sm:$0xff]  }
 0x161   : > { %v9785_v15 = vld [vmem:[%s11552_s18 + $0x3b0] ss:$8 sps:$4 sm:$0xff]  }
 0x162   : > { %7875 = vmatmul.mubr.bf16.vlgmr.msra.gmra.mxu0 %v8979_v3  ;;  %7928 = vmatmul.mubr.bf16.vlgmr.msra.gmra.mxu1 %v8981_v6  ;;  %v9011_v3 = vcombine.low %v4418_v16, %v4434_v17  ;;  %v9733_v6 = vld [vmem:[%s11552_s18 + $0x344] ss:$8 sps:$4 sm:$0xff]  }
 0x163   : > { %7949 = vmatpush1.bf16.msra.mxu0 %v9710_v20  ;;  %8002 = vmatpush1.bf16.msra.mxu1 %v9713_v21  ;;  %v9790_v16 = vld [vmem:[%s11552_s18 + $0x2a4] ss:$8 sps:$4 sm:$0xff]   ;;  %v9796_v20 = vld [vmem:[%s11552_s18 + $0x294] ss:$8 sps:$4 sm:$0xff]  }
 0x164   : > { %7950 = vmatprep.subr.bf16.mxu0 %v9718_v22  ;;  %8003 = vmatprep.subr.bf16.mxu1 %v9721_v23  ;;  %v9793_v17 = vld [vmem:[%s11552_s18 + $0x3a4] ss:$8 sps:$4 sm:$0xff]   ;;  %v9799_v21 = vld [vmem:[%s11552_s18 + $0x394] ss:$8 sps:$4 sm:$0xff]   ;;  %v9794_v22 = vld [vmem:[%s11552_s18 + $0x290] ss:$8 sps:$4 sm:$0xff]  }
 0x165   : > { %7884 = vmatprep.mubr.bf16.mxu0 %v9012_v24  ;;  %7937 = vmatprep.mubr.bf16.mxu1 %v9014_v25  ;;  %v9797_v23 = vld [vmem:[%s11552_s18 + $0x390] ss:$8 sps:$4 sm:$0xff]   ;;  %v9802_v24 = vld [vmem:[%s11552_s18 + $0x284] ss:$8 sps:$4 sm:$0xff]  }
 0x166   : > { %v9805_v25 = vld [vmem:[%s11552_s18 + $0x384] ss:$8 sps:$4 sm:$0xff]  }
 0x167   : > { %7951 = vmatpush1.bf16.msra.mxu0 %v9716_v26  ;;  %8004 = vmatpush1.bf16.msra.mxu1 %v9719_v27  ;;  %v9800_v26 = vld [vmem:[%s11552_s18 + $0x280] ss:$8 sps:$4 sm:$0xff]  }
 0x168   : > { %7952 = vmatprep.subr.bf16.mxu0 %v9724_v28  ;;  %8005 = vmatprep.subr.bf16.mxu1 %v9727_v29  ;;  %v9803_v27 = vld [vmem:[%s11552_s18 + $0x380] ss:$8 sps:$4 sm:$0xff]   ;;  %v9808_v28 = vld [vmem:[%s11552_s18 + $0x474] ss:$8 sps:$4 sm:$0xff]  }
 0x169   : > { %v9811_v29 = vld [vmem:[%s11552_s18 + $0x574] ss:$8 sps:$4 sm:$0xff]  }
 0x16a   : > { %7885 = vmatmul.mubr.bf16.gmra.mxu0 %v9011_v3  ;;  %7938 = vmatmul.mubr.bf16.gmra.mxu1 %v9013_v2  ;;  %v4436_v3 = vld [vmem:[%s12673_s0 + $0x190] sm:$0xff]  ;;  %v8983_v2 = vcombine.low %v11661_v38, %v11670_v43 }
 0x16b   : > { %7953 = vmatpush1.bf16.msra.mxu0 %v9722_v0  ;;  %8006 = vmatpush1.bf16.msra.mxu1 %v9725_v1  ;;  %v4420_v0 = vld [vmem:[%s12673_s0 + $0x110] sm:$0xff] }
 0x16c   : > { %7954 = vmatprep.subr.bf16.mxu0 %v9730_v5  ;;  %8007 = vmatprep.subr.bf16.mxu1 %v9733_v6  ;;  %v9806_v1 = vld [vmem:[%s11552_s18 + $0x470] ss:$8 sps:$4 sm:$0xff]   ;;  %v8985_v5 = vcombine.low %v11675_v44, %v11682_v46  ;;  %v9820_v38 = vld [vmem:[%s11552_s18 + $0x454] ss:$8 sps:$4 sm:$0xff]   ;;  %v11763_v44 = vld [vmem:[%s12673_s0 + $0x28] sm:$0xff] }
 0x16d   : > { %7980 = vmatprep.mubr.bf16.mxu0 %v8984_v45  ;;  %8033 = vmatprep.mubr.bf16.mxu1 %v8986_v48  ;;  %v4421_v6 = vld [vmem:[%s12673_s0 + $0x118] sm:$0xff]  ;;  %v11768_v45 = vld [vmem:[%s12673_s0 + $0xa8] sm:$0xff] }
 0x16e   : > { %v9818_v46 = vld [vmem:[%s11552_s18 + $0x450] ss:$8 sps:$4 sm:$0xff]   ;;  %v9826_v48 = vld [vmem:[%s11552_s18 + $0x444] ss:$8 sps:$4 sm:$0xff]  }
 0x16f   : > { %7955 = vmatpush1.bf16.msra.mxu0 %v9728_v30  ;;  %8008 = vmatpush1.bf16.msra.mxu1 %v9731_v31  ;;  %v4437_v30 = vld [vmem:[%s12673_s0 + $0x198] sm:$0xff] }
 0x170   : > { %7956 = vmatprep.subr.bf16.mxu0 %v9736_v32  ;;  %8009 = vmatprep.subr.bf16.mxu1 %v9739_v33  ;;  %v9809_v31 = vld [vmem:[%s11552_s18 + $0x570] ss:$8 sps:$4 sm:$0xff]   ;;  %v9814_v32 = vld [vmem:[%s11552_s18 + $0x464] ss:$8 sps:$4 sm:$0xff]   ;;  %v9017_v43 = vcombine.low %v4421_v6, %v4437_v30 }
 0x171   : > { %v9817_v33 = vld [vmem:[%s11552_s18 + $0x564] ss:$8 sps:$4 sm:$0xff]  }
 0x173   : > { %7957 = vmatpush1.bf16.msra.mxu0 %v9734_v34  ;;  %8010 = vmatpush1.bf16.msra.mxu1 %v9737_v35  ;;  %v9016_v34 = vcombine.high %v4420_v0, %v4436_v3  ;;  %v9018_v35 = vcombine.high %v4421_v6, %v4437_v30  ;;  %v9887_v6 = vld [vmem:[%s11552_s18 + $0x5a0] ss:$8 sps:$4 sm:$0xff]   ;;  %v9892_v30 = vld [vmem:[%s11552_s18 + $0x494] ss:$8 sps:$4 sm:$0xff]  }
 0x174   : > { %7958 = vmatprep.subr.bf16.mxu0 %v9742_v36  ;;  %8011 = vmatprep.subr.bf16.mxu1 %v9745_v37  ;;  %v9812_v36 = vld [vmem:[%s11552_s18 + $0x460] ss:$8 sps:$4 sm:$0xff]  }
 0x175   : > { %v9815_v37 = vld [vmem:[%s11552_s18 + $0x560] ss:$8 sps:$4 sm:$0xff]  }
 0x177   : > { %7959 = vmatpush1.bf16.msra.mxu0 %v9740_v39  ;;  %8012 = vmatpush1.bf16.msra.mxu1 %v9743_v40  ;;  %v9823_v39 = vld [vmem:[%s11552_s18 + $0x554] ss:$8 sps:$4 sm:$0xff]   ;;  %v11753_v40 = vld [vmem:[%s12673_s0 + $0x20] sm:$0xff] }
 0x178   : > { %7960 = vmatprep.subr.bf16.mxu0 %v9748_v41  ;;  %8013 = vmatprep.subr.bf16.mxu1 %v9751_v42  ;;  %v11758_v41 = vld [vmem:[%s12673_s0 + $0xa0] sm:$0xff]  ;;  %v9015_v42 = vcombine.low %v4420_v0, %v4436_v3  ;;  %v9878_v0 = vld [vmem:[%s11552_s18 + $0x4b0] ss:$8 sps:$4 sm:$0xff]  }
 0x179   : > { %v9886_v3 = vld [vmem:[%s11552_s18 + $0x4a4] ss:$8 sps:$4 sm:$0xff]  }
 0x17b   : > { %7961 = vmatpush1.bf16.msra.mxu0 %v9746_v47  ;;  %8014 = vmatpush1.bf16.msra.mxu1 %v9749_v49  ;;  %v9821_v47 = vld [vmem:[%s11552_s18 + $0x550] ss:$8 sps:$4 sm:$0xff]   ;;  %v9829_v49 = vld [vmem:[%s11552_s18 + $0x544] ss:$8 sps:$4 sm:$0xff]  }
 0x17c   : > { %7962 = vmatprep.subr.bf16.mxu0 %v9754_v50  ;;  %8015 = vmatprep.subr.bf16.mxu1 %v9757_v51  ;;  %v8988_v50 = vcombine.high %v11753_v40, %v11758_v41  ;;  %v8990_v51 = vcombine.high %v11763_v44, %v11768_v45 }
 0x17f   : > { %7963 = vmatpush1.bf16.msra.mxu0 %v9752_v52  ;;  %8016 = vmatpush1.bf16.msra.mxu1 %v9755_v53  ;;  %v9824_v52 = vld [vmem:[%s11552_s18 + $0x440] ss:$8 sps:$4 sm:$0xff]  }
 0x180   : > { %7964 = vmatprep.subr.bf16.mxu0 %v9760_v54  ;;  %8017 = vmatprep.subr.bf16.mxu1 %v9763_v55  ;;  %v9827_v53 = vld [vmem:[%s11552_s18 + $0x540] ss:$8 sps:$4 sm:$0xff]   ;;  %v9832_v54 = vld [vmem:[%s11552_s18 + $0x434] ss:$8 sps:$4 sm:$0xff]  }
 0x181   : > { %v9835_v55 = vld [vmem:[%s11552_s18 + $0x534] ss:$8 sps:$4 sm:$0xff]  }
 0x183   : > { %7965 = vmatpush2.bf16.msra.mxu0 %v9758_v56  ;;  %8018 = vmatpush2.bf16.msra.mxu1 %v9761_v57  ;;  %v9830_v56 = vld [vmem:[%s11552_s18 + $0x430] ss:$8 sps:$4 sm:$0xff]  }
 0x184   : > { %7966 = vmatprep.subr.bf16.mxu0 %v9766_v58  ;;  %8019 = vmatprep.subr.bf16.mxu1 %v9769_v59  ;;  %v9833_v57 = vld [vmem:[%s11552_s18 + $0x530] ss:$8 sps:$4 sm:$0xff]   ;;  %v9838_v58 = vld [vmem:[%s11552_s18 + $0x424] ss:$8 sps:$4 sm:$0xff]  }
 0x185   : > { %v9841_v59 = vld [vmem:[%s11552_s18 + $0x524] ss:$8 sps:$4 sm:$0xff]  }
 0x187   : > { %7967 = vmatpush2.bf16.msra.mxu0 %v9764_v60  ;;  %8020 = vmatpush2.bf16.msra.mxu1 %v9767_v61  ;;  %v9836_v60 = vld [vmem:[%s11552_s18 + $0x420] ss:$8 sps:$4 sm:$0xff]  }
 0x188   : > { %7968 = vmatprep.subr.bf16.mxu0 %v9772_v62  ;;  %8021 = vmatprep.subr.bf16.mxu1 %v9775_v63  ;;  %v9839_v61 = vld [vmem:[%s11552_s18 + $0x520] ss:$8 sps:$4 sm:$0xff]   ;;  %v9844_v62 = vld [vmem:[%s11552_s18 + $0x414] ss:$8 sps:$4 sm:$0xff]  }
 0x189   : > { %v9847_v63 = vld [vmem:[%s11552_s18 + $0x514] ss:$8 sps:$4 sm:$0xff]  }
 0x18b   : > { %7969 = vmatpush2.bf16.msra.mxu0 %v9770_v4  ;;  %8022 = vmatpush2.bf16.msra.mxu1 %v9773_v7  ;;  %v9842_v4 = vld [vmem:[%s11552_s18 + $0x410] ss:$8 sps:$4 sm:$0xff]  }
 0x18c   : > { %7970 = vmatprep.subr.bf16.mxu0 %v9778_v8  ;;  %8023 = vmatprep.subr.bf16.mxu1 %v9781_v9  ;;  %v9845_v7 = vld [vmem:[%s11552_s18 + $0x510] ss:$8 sps:$4 sm:$0xff]   ;;  %v9850_v8 = vld [vmem:[%s11552_s18 + $0x404] ss:$8 sps:$4 sm:$0xff]  }
 0x18d   : > { %v9853_v9 = vld [vmem:[%s11552_s18 + $0x504] ss:$8 sps:$4 sm:$0xff]  }
 0x18f   : > { %7971 = vmatpush2.bf16.msra.mxu0 %v9776_v10  ;;  %8024 = vmatpush2.bf16.msra.mxu1 %v9779_v11  ;;  %v9848_v10 = vld [vmem:[%s11552_s18 + $0x400] ss:$8 sps:$4 sm:$0xff]  }
 0x190   : > { %7972 = vmatprep.subr.bf16.mxu0 %v9784_v12  ;;  %8025 = vmatprep.subr.bf16.mxu1 %v9787_v13  ;;  %v9851_v11 = vld [vmem:[%s11552_s18 + $0x500] ss:$8 sps:$4 sm:$0xff]   ;;  %v9856_v12 = vld [vmem:[%s11552_s18 + $0x4f4] ss:$8 sps:$4 sm:$0xff]  }
 0x191   : > { %v9859_v13 = vld [vmem:[%s11552_s18 + $0x5f4] ss:$8 sps:$4 sm:$0xff]  }
 0x193   : > { %7973 = vmatpush2.bf16.msra.mxu0 %v9782_v14  ;;  %8026 = vmatpush2.bf16.msra.mxu1 %v9785_v15  ;;  %v9854_v14 = vld [vmem:[%s11552_s18 + $0x4f0] ss:$8 sps:$4 sm:$0xff]  }
 0x194   : > { %7974 = vmatprep.subr.bf16.mxu0 %v9790_v16  ;;  %8027 = vmatprep.subr.bf16.mxu1 %v9793_v17  ;;  %v9857_v15 = vld [vmem:[%s11552_s18 + $0x5f0] ss:$8 sps:$4 sm:$0xff]   ;;  %v9862_v16 = vld [vmem:[%s11552_s18 + $0x4e4] ss:$8 sps:$4 sm:$0xff]  }
 0x195   : > { %v9865_v17 = vld [vmem:[%s11552_s18 + $0x5e4] ss:$8 sps:$4 sm:$0xff]  }
 0x197   : > { %7975 = vmatpush2.bf16.msra.mxu0 %v9788_v18  ;;  %8028 = vmatpush2.bf16.msra.mxu1 %v9791_v19  ;;  %v9860_v18 = vld [vmem:[%s11552_s18 + $0x4e0] ss:$8 sps:$4 sm:$0xff]  }
 0x198   : > { %7976 = vmatprep.subr.bf16.mxu0 %v9796_v20  ;;  %8029 = vmatprep.subr.bf16.mxu1 %v9799_v21  ;;  %v9863_v19 = vld [vmem:[%s11552_s18 + $0x5e0] ss:$8 sps:$4 sm:$0xff]   ;;  %v9868_v20 = vld [vmem:[%s11552_s18 + $0x4d4] ss:$8 sps:$4 sm:$0xff]  }
 0x199   : > { %v9871_v21 = vld [vmem:[%s11552_s18 + $0x5d4] ss:$8 sps:$4 sm:$0xff]  }
 0x19b   : > { %7977 = vmatpush2.bf16.msra.mxu0 %v9794_v22  ;;  %8030 = vmatpush2.bf16.msra.mxu1 %v9797_v23  ;;  %v9866_v22 = vld [vmem:[%s11552_s18 + $0x4d0] ss:$8 sps:$4 sm:$0xff]  }
 0x19c   : > { %7978 = vmatprep.subr.bf16.mxu0 %v9802_v24  ;;  %8031 = vmatprep.subr.bf16.mxu1 %v9805_v25  ;;  %v9869_v23 = vld [vmem:[%s11552_s18 + $0x5d0] ss:$8 sps:$4 sm:$0xff]   ;;  %v9874_v24 = vld [vmem:[%s11552_s18 + $0x4c4] ss:$8 sps:$4 sm:$0xff]  }
 0x19d   : > { %v9877_v25 = vld [vmem:[%s11552_s18 + $0x5c4] ss:$8 sps:$4 sm:$0xff]  }
 0x19f   : > { %7979 = vmatpush2.bf16.msra.mxu0 %v9800_v26  ;;  %8032 = vmatpush2.bf16.msra.mxu1 %v9803_v27  ;;  %v9872_v26 = vld [vmem:[%s11552_s18 + $0x4c0] ss:$8 sps:$4 sm:$0xff]  }
 0x1a0   : > { %8054 = vmatprep.subr.bf16.mxu0 %v9808_v28  ;;  %8107 = vmatprep.subr.bf16.mxu1 %v9811_v29  ;;  %v9875_v27 = vld [vmem:[%s11552_s18 + $0x5c0] ss:$8 sps:$4 sm:$0xff]   ;;  %v9880_v28 = vld [vmem:[%s11552_s18 + $0x4b4] ss:$8 sps:$4 sm:$0xff]  }
 0x1a1   : > { %v9883_v29 = vld [vmem:[%s11552_s18 + $0x5b4] ss:$8 sps:$4 sm:$0xff]  }
 0x1a2   : > { %7981 = vmatmul.mubr.bf16.vlgmr.msra.gmra.mxu0 %v8983_v2  ;;  %8034 = vmatmul.mubr.bf16.vlgmr.msra.gmra.mxu1 %v8985_v5  ;;  %v9889_v2 = vld [vmem:[%s11552_s18 + $0x5a4] ss:$8 sps:$4 sm:$0xff]   ;;  %v9884_v5 = vld [vmem:[%s11552_s18 + $0x4a0] ss:$8 sps:$4 sm:$0xff]  }
 0x1a3   : > { %8055 = vmatpush1.bf16.msra.mxu0 %v9806_v1  ;;  %8108 = vmatpush1.bf16.msra.mxu1 %v9809_v31  ;;  %v9881_v1 = vld [vmem:[%s11552_s18 + $0x5b0] ss:$8 sps:$4 sm:$0xff]   ;;  %v9895_v31 = vld [vmem:[%s11552_s18 + $0x594] ss:$8 sps:$4 sm:$0xff]  }
 0x1a4   : > { %8056 = vmatprep.subr.bf16.mxu0 %v9814_v32  ;;  %8109 = vmatprep.subr.bf16.mxu1 %v9817_v33  ;;  %v9890_v32 = vld [vmem:[%s11552_s18 + $0x490] ss:$8 sps:$4 sm:$0xff]  }
 0x1a5   : > { %7990 = vmatprep.mubr.bf16.mxu0 %v9016_v34  ;;  %8043 = vmatprep.mubr.bf16.mxu1 %v9018_v35  ;;  %v9893_v33 = vld [vmem:[%s11552_s18 + $0x590] ss:$8 sps:$4 sm:$0xff]   ;;  %v9898_v34 = vld [vmem:[%s11552_s18 + $0x484] ss:$8 sps:$4 sm:$0xff]  }
 0x1a6   : > { %v9901_v35 = vld [vmem:[%s11552_s18 + $0x584] ss:$8 sps:$4 sm:$0xff]  }
 0x1a7   : > { %8057 = vmatpush1.bf16.msra.mxu0 %v9812_v36  ;;  %8110 = vmatpush1.bf16.msra.mxu1 %v9815_v37  ;;  %v9896_v36 = vld [vmem:[%s11552_s18 + $0x480] ss:$8 sps:$4 sm:$0xff]  }
 0x1a8   : > { %8058 = vmatprep.subr.bf16.mxu0 %v9820_v38  ;;  %8111 = vmatprep.subr.bf16.mxu1 %v9823_v39  ;;  %v9899_v37 = vld [vmem:[%s11552_s18 + $0x580] ss:$8 sps:$4 sm:$0xff]   ;;  %v9904_v38 = vld [vmem:[%s11552_s18 + $0x674] ss:$8 sps:$4 sm:$0xff]  }
 0x1a9   : > { %v9907_v39 = vld [vmem:[%s11552_s18 + $0x774] ss:$8 sps:$4 sm:$0xff]  }
 0x1aa   : > { %7991 = vmatmul.mubr.bf16.gmra.mxu0 %v9015_v42  ;;  %8044 = vmatmul.mubr.bf16.gmra.mxu1 %v9017_v43  ;;  %v4422_v42 = vld [vmem:[%s12673_s0 + $0x120] sm:$0xff]  ;;  %v9902_v43 = vld [vmem:[%s11552_s18 + $0x670] ss:$8 sps:$4 sm:$0xff]  }
 0x1ab   : > { %8059 = vmatpush1.bf16.msra.mxu0 %v9818_v46  ;;  %8112 = vmatpush1.bf16.msra.mxu1 %v9821_v47  ;;  %v4438_v46 = vld [vmem:[%s12673_s0 + $0x1a0] sm:$0xff]  ;;  %v8987_v47 = vcombine.low %v11753_v40, %v11758_v41 }
 0x1ac   : > { %8060 = vmatprep.subr.bf16.mxu0 %v9826_v48  ;;  %8113 = vmatprep.subr.bf16.mxu1 %v9829_v49  ;;  %v8989_v48 = vcombine.low %v11763_v44, %v11768_v45  ;;  %v4423_v49 = vld [vmem:[%s12673_s0 + $0x128] sm:$0xff]  ;;  %v9020_v41 = vcombine.high %v4422_v42, %v4438_v46 }
 0x1ad   : > { %8086 = vmatprep.mubr.bf16.mxu0 %v8988_v50  ;;  %8139 = vmatprep.mubr.bf16.mxu1 %v8990_v51  ;;  %v4439_v50 = vld [vmem:[%s12673_s0 + $0x1a8] sm:$0xff]  ;;  %v9905_v51 = vld [vmem:[%s11552_s18 + $0x770] ss:$8 sps:$4 sm:$0xff]  }
 0x1ae   : > { %v9913_v40 = vld [vmem:[%s11552_s18 + $0x764] ss:$8 sps:$4 sm:$0xff]   ;;  %v9022_v44 = vcombine.high %v4423_v49, %v4439_v50  ;;  %v9908_v45 = vld [vmem:[%s11552_s18 + $0x660] ss:$8 sps:$4 sm:$0xff]  }
 0x1af   : > { %8061 = vmatpush1.bf16.msra.mxu0 %v9824_v52  ;;  %8114 = vmatpush1.bf16.msra.mxu1 %v9827_v53  ;;  %v9910_v52 = vld [vmem:[%s11552_s18 + $0x664] ss:$8 sps:$4 sm:$0xff]   ;;  %v9911_v53 = vld [vmem:[%s11552_s18 + $0x760] ss:$8 sps:$4 sm:$0xff]  }
 0x1b0   : > { %8062 = vmatprep.subr.bf16.mxu0 %v9832_v54  ;;  %8115 = vmatprep.subr.bf16.mxu1 %v9835_v55  ;;  %v9916_v54 = vld [vmem:[%s11552_s18 + $0x654] ss:$8 sps:$4 sm:$0xff]  }
 0x1b1   : > { %v9919_v55 = vld [vmem:[%s11552_s18 + $0x754] ss:$8 sps:$4 sm:$0xff]  }
 0x1b3   : > { %8063 = vmatpush1.bf16.msra.mxu0 %v9830_v56  ;;  %8116 = vmatpush1.bf16.msra.mxu1 %v9833_v57  ;;  %v11857_v56 = vld [vmem:[%s12673_s0 + $0x30] sm:$0xff] }
 0x1b4   : > { %8064 = vmatprep.subr.bf16.mxu0 %v9838_v58  ;;  %8117 = vmatprep.subr.bf16.mxu1 %v9841_v59  ;;  %v9914_v57 = vld [vmem:[%s11552_s18 + $0x650] ss:$8 sps:$4 sm:$0xff]   ;;  %v9019_v59 = vcombine.low %v4422_v42, %v4438_v46  ;;  %v9982_v46 = vld [vmem:[%s11552_s18 + $0x6a4] ss:$8 sps:$4 sm:$0xff]  }
 0x1b5   : > { %v11863_v58 = vld [vmem:[%s12673_s0 + $0xb0] sm:$0xff] }
 0x1b6   : > { %v9974_v42 = vld [vmem:[%s11552_s18 + $0x6b0] ss:$8 sps:$4 sm:$0xff]  }
 0x1b7   : > { %8065 = vmatpush1.bf16.msra.mxu0 %v9836_v60  ;;  %8118 = vmatpush1.bf16.msra.mxu1 %v9839_v61  ;;  %v9021_v60 = vcombine.low %v4423_v49, %v4439_v50  ;;  %v11868_v61 = vld [vmem:[%s12673_s0 + $0x38] sm:$0xff]  ;;  %v9983_v49 = vld [vmem:[%s11552_s18 + $0x7a0] ss:$8 sps:$4 sm:$0xff]  }
 0x1b8   : > { %8066 = vmatprep.subr.bf16.mxu0 %v9844_v62  ;;  %8119 = vmatprep.subr.bf16.mxu1 %v9847_v63  ;;  %v11873_v62 = vld [vmem:[%s12673_s0 + $0xb8] sm:$0xff] }
 0x1b9   : > { %v9917_v63 = vld [vmem:[%s11552_s18 + $0x750] ss:$8 sps:$4 sm:$0xff]   ;;  %v9988_v50 = vld [vmem:[%s11552_s18 + $0x694] ss:$8 sps:$4 sm:$0xff]  }
 0x1bb   : > { %8067 = vmatpush1.bf16.msra.mxu0 %v9842_v4  ;;  %8120 = vmatpush1.bf16.msra.mxu1 %v9845_v7  ;;  %v9922_v4 = vld [vmem:[%s11552_s18 + $0x644] ss:$8 sps:$4 sm:$0xff]  }
 0x1bc   : > { %8068 = vmatprep.subr.bf16.mxu0 %v9850_v8  ;;  %8121 = vmatprep.subr.bf16.mxu1 %v9853_v9  ;;  %v9925_v7 = vld [vmem:[%s11552_s18 + $0x744] ss:$8 sps:$4 sm:$0xff]   ;;  %v8992_v8 = vcombine.high %v11857_v56, %v11863_v58  ;;  %v8994_v9 = vcombine.high %v11868_v61, %v11873_v62 }
 0x1bf   : > { %8069 = vmatpush1.bf16.msra.mxu0 %v9848_v10  ;;  %8122 = vmatpush1.bf16.msra.mxu1 %v9851_v11  ;;  %v9920_v10 = vld [vmem:[%s11552_s18 + $0x640] ss:$8 sps:$4 sm:$0xff]  }
 0x1c0   : > { %8070 = vmatprep.subr.bf16.mxu0 %v9856_v12  ;;  %8123 = vmatprep.subr.bf16.mxu1 %v9859_v13  ;;  %v9923_v11 = vld [vmem:[%s11552_s18 + $0x740] ss:$8 sps:$4 sm:$0xff]   ;;  %v9928_v12 = vld [vmem:[%s11552_s18 + $0x634] ss:$8 sps:$4 sm:$0xff]  }
 0x1c1   : > { %v9931_v13 = vld [vmem:[%s11552_s18 + $0x734] ss:$8 sps:$4 sm:$0xff]  }
 0x1c3   : > { %8071 = vmatpush2.bf16.msra.mxu0 %v9854_v14  ;;  %8124 = vmatpush2.bf16.msra.mxu1 %v9857_v15  ;;  %v9926_v14 = vld [vmem:[%s11552_s18 + $0x630] ss:$8 sps:$4 sm:$0xff]  }
 0x1c4   : > { %8072 = vmatprep.subr.bf16.mxu0 %v9862_v16  ;;  %8125 = vmatprep.subr.bf16.mxu1 %v9865_v17  ;;  %v9929_v15 = vld [vmem:[%s11552_s18 + $0x730] ss:$8 sps:$4 sm:$0xff]   ;;  %v9934_v16 = vld [vmem:[%s11552_s18 + $0x624] ss:$8 sps:$4 sm:$0xff]  }
 0x1c5   : > { %v9937_v17 = vld [vmem:[%s11552_s18 + $0x724] ss:$8 sps:$4 sm:$0xff]  }
 0x1c7   : > { %8073 = vmatpush2.bf16.msra.mxu0 %v9860_v18  ;;  %8126 = vmatpush2.bf16.msra.mxu1 %v9863_v19  ;;  %v9932_v18 = vld [vmem:[%s11552_s18 + $0x620] ss:$8 sps:$4 sm:$0xff]  }
 0x1c8   : > { %8074 = vmatprep.subr.bf16.mxu0 %v9868_v20  ;;  %8127 = vmatprep.subr.bf16.mxu1 %v9871_v21  ;;  %v9935_v19 = vld [vmem:[%s11552_s18 + $0x720] ss:$8 sps:$4 sm:$0xff]   ;;  %v9940_v20 = vld [vmem:[%s11552_s18 + $0x614] ss:$8 sps:$4 sm:$0xff]  }
 0x1c9   : > { %v9943_v21 = vld [vmem:[%s11552_s18 + $0x714] ss:$8 sps:$4 sm:$0xff]  }
 0x1cb   : > { %8075 = vmatpush2.bf16.msra.mxu0 %v9866_v22  ;;  %8128 = vmatpush2.bf16.msra.mxu1 %v9869_v23  ;;  %v9938_v22 = vld [vmem:[%s11552_s18 + $0x610] ss:$8 sps:$4 sm:$0xff]  }
 0x1cc   : > { %8076 = vmatprep.subr.bf16.mxu0 %v9874_v24  ;;  %8129 = vmatprep.subr.bf16.mxu1 %v9877_v25  ;;  %v9941_v23 = vld [vmem:[%s11552_s18 + $0x710] ss:$8 sps:$4 sm:$0xff]   ;;  %v9946_v24 = vld [vmem:[%s11552_s18 + $0x604] ss:$8 sps:$4 sm:$0xff]  }
 0x1cd   : > { %v9949_v25 = vld [vmem:[%s11552_s18 + $0x704] ss:$8 sps:$4 sm:$0xff]  }
 0x1cf   : > { %8077 = vmatpush2.bf16.msra.mxu0 %v9872_v26  ;;  %8130 = vmatpush2.bf16.msra.mxu1 %v9875_v27  ;;  %v9944_v26 = vld [vmem:[%s11552_s18 + $0x600] ss:$8 sps:$4 sm:$0xff]  }
 0x1d0   : > { %8078 = vmatprep.subr.bf16.mxu0 %v9880_v28  ;;  %8131 = vmatprep.subr.bf16.mxu1 %v9883_v29  ;;  %v9947_v27 = vld [vmem:[%s11552_s18 + $0x700] ss:$8 sps:$4 sm:$0xff]   ;;  %v9952_v28 = vld [vmem:[%s11552_s18 + $0x6f4] ss:$8 sps:$4 sm:$0xff]  }
 0x1d1   : > { %v9955_v29 = vld [vmem:[%s11552_s18 + $0x7f4] ss:$8 sps:$4 sm:$0xff]  }
 0x1d3   : > { %8079 = vmatpush2.bf16.msra.mxu0 %v9878_v0  ;;  %8132 = vmatpush2.bf16.msra.mxu1 %v9881_v1  ;;  %v9950_v0 = vld [vmem:[%s11552_s18 + $0x6f0] ss:$8 sps:$4 sm:$0xff]  }
 0x1d4   : > { %8080 = vmatprep.subr.bf16.mxu0 %v9886_v3  ;;  %8133 = vmatprep.subr.bf16.mxu1 %v9889_v2  ;;  %v9953_v1 = vld [vmem:[%s11552_s18 + $0x7f0] ss:$8 sps:$4 sm:$0xff]   ;;  %v9958_v3 = vld [vmem:[%s11552_s18 + $0x6e4] ss:$8 sps:$4 sm:$0xff]  }
 0x1d5   : > { %v9961_v2 = vld [vmem:[%s11552_s18 + $0x7e4] ss:$8 sps:$4 sm:$0xff]  }
 0x1d7   : > { %8081 = vmatpush2.bf16.msra.mxu0 %v9884_v5  ;;  %8134 = vmatpush2.bf16.msra.mxu1 %v9887_v6  ;;  %v9956_v5 = vld [vmem:[%s11552_s18 + $0x6e0] ss:$8 sps:$4 sm:$0xff]  }
 0x1d8   : > { %8082 = vmatprep.subr.bf16.mxu0 %v9892_v30  ;;  %8135 = vmatprep.subr.bf16.mxu1 %v9895_v31  ;;  %v9959_v6 = vld [vmem:[%s11552_s18 + $0x7e0] ss:$8 sps:$4 sm:$0xff]   ;;  %v9964_v30 = vld [vmem:[%s11552_s18 + $0x6d4] ss:$8 sps:$4 sm:$0xff]  }
 0x1d9   : > { %v9967_v31 = vld [vmem:[%s11552_s18 + $0x7d4] ss:$8 sps:$4 sm:$0xff]  }
 0x1db   : > { %8083 = vmatpush2.bf16.msra.mxu0 %v9890_v32  ;;  %8136 = vmatpush2.bf16.msra.mxu1 %v9893_v33  ;;  %v9962_v32 = vld [vmem:[%s11552_s18 + $0x6d0] ss:$8 sps:$4 sm:$0xff]  }
 0x1dc   : > { %8084 = vmatprep.subr.bf16.mxu0 %v9898_v34  ;;  %8137 = vmatprep.subr.bf16.mxu1 %v9901_v35  ;;  %v9965_v33 = vld [vmem:[%s11552_s18 + $0x7d0] ss:$8 sps:$4 sm:$0xff]   ;;  %v9970_v34 = vld [vmem:[%s11552_s18 + $0x6c4] ss:$8 sps:$4 sm:$0xff]  }
 0x1dd   : > { %v9973_v35 = vld [vmem:[%s11552_s18 + $0x7c4] ss:$8 sps:$4 sm:$0xff]  }
 0x1df   : > { %8085 = vmatpush2.bf16.msra.mxu0 %v9896_v36  ;;  %8138 = vmatpush2.bf16.msra.mxu1 %v9899_v37  ;;  %v9968_v36 = vld [vmem:[%s11552_s18 + $0x6c0] ss:$8 sps:$4 sm:$0xff]  }
 0x1e0   : > { %8160 = vmatprep.subr.bf16.mxu0 %v9904_v38  ;;  %8213 = vmatprep.subr.bf16.mxu1 %v9907_v39  ;;  %v9971_v37 = vld [vmem:[%s11552_s18 + $0x7c0] ss:$8 sps:$4 sm:$0xff]   ;;  %v9976_v38 = vld [vmem:[%s11552_s18 + $0x6b4] ss:$8 sps:$4 sm:$0xff]  }
 0x1e1   : > { %v9979_v39 = vld [vmem:[%s11552_s18 + $0x7b4] ss:$8 sps:$4 sm:$0xff]  }
 0x1e2   : > { %8087 = vmatmul.mubr.bf16.vlgmr.msra.gmra.mxu0 %v8987_v47  ;;  %8140 = vmatmul.mubr.bf16.vlgmr.msra.gmra.mxu1 %v8989_v48  ;;  %v9985_v47 = vld [vmem:[%s11552_s18 + $0x7a4] ss:$8 sps:$4 sm:$0xff]   ;;  %v9980_v48 = vld [vmem:[%s11552_s18 + $0x6a0] ss:$8 sps:$4 sm:$0xff]  }
 0x1e3   : > { %8161 = vmatpush1.bf16.msra.mxu0 %v9902_v43  ;;  %8214 = vmatpush1.bf16.msra.mxu1 %v9905_v51  ;;  %v9977_v43 = vld [vmem:[%s11552_s18 + $0x7b0] ss:$8 sps:$4 sm:$0xff]   ;;  %v9991_v51 = vld [vmem:[%s11552_s18 + $0x794] ss:$8 sps:$4 sm:$0xff]  }
 0x1e4   : > { %8162 = vmatprep.subr.bf16.mxu0 %v9910_v52  ;;  %8215 = vmatprep.subr.bf16.mxu1 %v9913_v40  ;;  %v9986_v52 = vld [vmem:[%s11552_s18 + $0x690] ss:$8 sps:$4 sm:$0xff]  }
 0x1e5   : > { %8096 = vmatprep.mubr.bf16.mxu0 %v9020_v41  ;;  %8149 = vmatprep.mubr.bf16.mxu1 %v9022_v44  ;;  %v9989_v40 = vld [vmem:[%s11552_s18 + $0x790] ss:$8 sps:$4 sm:$0xff]   ;;  %v9994_v41 = vld [vmem:[%s11552_s18 + $0x684] ss:$8 sps:$4 sm:$0xff]  }
 0x1e6   : > { %v9997_v44 = vld [vmem:[%s11552_s18 + $0x784] ss:$8 sps:$4 sm:$0xff]  }
 0x1e7   : > { %8163 = vmatpush1.bf16.msra.mxu0 %v9908_v45  ;;  %8216 = vmatpush1.bf16.msra.mxu1 %v9911_v53  ;;  %v9992_v45 = vld [vmem:[%s11552_s18 + $0x680] ss:$8 sps:$4 sm:$0xff]  }
 0x1e8   : > { %8164 = vmatprep.subr.bf16.mxu0 %v9916_v54  ;;  %8217 = vmatprep.subr.bf16.mxu1 %v9919_v55  ;;  %v9995_v53 = vld [vmem:[%s11552_s18 + $0x780] ss:$8 sps:$4 sm:$0xff]   ;;  %v10000_v54 = vld [vmem:[%s11552_s18 + $0x874] ss:$8 sps:$4 sm:$0xff]  }
 0x1e9   : > { %v10003_v55 = vld [vmem:[%s11552_s18 + $0x974] ss:$8 sps:$4 sm:$0xff]  }
 0x1ea   : > { %8097 = vmatmul.mubr.bf16.gmra.mxu0 %v9019_v59  ;;  %8150 = vmatmul.mubr.bf16.gmra.mxu1 %v9021_v60  ;;  %v9998_v59 = vld [vmem:[%s11552_s18 + $0x870] ss:$8 sps:$4 sm:$0xff]  }
 0x1eb   : > { %8165 = vmatpush1.bf16.msra.mxu0 %v9914_v57  ;;  %8218 = vmatpush1.bf16.msra.mxu1 %v9917_v63  ;;  %v4424_v57 = vld [vmem:[%s12673_s0 + $0x130] sm:$0xff]  ;;  %v8991_v63 = vcombine.low %v11857_v56, %v11863_v58  ;;  %v10009_v56 = vld [vmem:[%s11552_s18 + $0x964] ss:$8 sps:$4 sm:$0xff]  }
 0x1ec   : > { %8166 = vmatprep.subr.bf16.mxu0 %v9922_v4  ;;  %8219 = vmatprep.subr.bf16.mxu1 %v9925_v7  ;;  %v4440_v60 = vld [vmem:[%s12673_s0 + $0x1b0] sm:$0xff]  ;;  %v8993_v4 = vcombine.low %v11868_v61, %v11873_v62  ;;  %v4425_v7 = vld [vmem:[%s12673_s0 + $0x138] sm:$0xff] }
 0x1ed   : > { %8192 = vmatprep.mubr.bf16.mxu0 %v8992_v8  ;;  %8245 = vmatprep.mubr.bf16.mxu1 %v8994_v9  ;;  %v4441_v8 = vld [vmem:[%s12673_s0 + $0x1b8] sm:$0xff]  ;;  %v9024_v58 = vcombine.high %v4424_v57, %v4440_v60 }
 0x1ee   : > { %v10001_v9 = vld [vmem:[%s11552_s18 + $0x970] ss:$8 sps:$4 sm:$0xff]   ;;  %v9026_v61 = vcombine.high %v4425_v7, %v4441_v8 }
 0x1ef   : > { %8167 = vmatpush1.bf16.msra.mxu0 %v9920_v10  ;;  %8220 = vmatpush1.bf16.msra.mxu1 %v9923_v11  ;;  %v10006_v10 = vld [vmem:[%s11552_s18 + $0x864] ss:$8 sps:$4 sm:$0xff]  }
 0x1f0   : > { %8168 = vmatprep.subr.bf16.mxu0 %v9928_v12  ;;  %8221 = vmatprep.subr.bf16.mxu1 %v9931_v13  ;;  %v10004_v12 = vld [vmem:[%s11552_s18 + $0x860] ss:$8 sps:$4 sm:$0xff]  }
 0x1f1   : > { %v10007_v13 = vld [vmem:[%s11552_s18 + $0x960] ss:$8 sps:$4 sm:$0xff]  }
 0x1f3   : > { %8169 = vmatpush1.bf16.msra.mxu0 %v9926_v14  ;;  %8222 = vmatpush1.bf16.msra.mxu1 %v9929_v15  ;;  %v10012_v15 = vld [vmem:[%s11552_s18 + $0x854] ss:$8 sps:$4 sm:$0xff]  }
 0x1f4   : > { %8170 = vmatprep.subr.bf16.mxu0 %v9934_v16  ;;  %8223 = vmatprep.subr.bf16.mxu1 %v9937_v17  ;;  %v10015_v16 = vld [vmem:[%s11552_s18 + $0x954] ss:$8 sps:$4 sm:$0xff]  }
 0x1f7   : > { %8171 = vmatpush1.bf16.msra.mxu0 %v9932_v18  ;;  %8224 = vmatpush1.bf16.msra.mxu1 %v9935_v19  ;;  %v11963_v19 = vld [vmem:[%s12673_s0 + $0x40] sm:$0xff] }
 0x1f8   : > { %8172 = vmatprep.subr.bf16.mxu0 %v9940_v20  ;;  %8225 = vmatprep.subr.bf16.mxu1 %v9943_v21  ;;  %v10010_v21 = vld [vmem:[%s11552_s18 + $0x850] ss:$8 sps:$4 sm:$0xff]  }
 0x1fb   : > { %8173 = vmatpush1.bf16.msra.mxu0 %v9938_v22  ;;  %8226 = vmatpush1.bf16.msra.mxu1 %v9941_v23  ;;  %v11971_v22 = vld [vmem:[%s12673_s0 + $0xc0] sm:$0xff] }
 0x1fc   : > { %8174 = vmatprep.subr.bf16.mxu0 %v9946_v24  ;;  %8227 = vmatprep.subr.bf16.mxu1 %v9949_v25  ;;  %v9023_v25 = vcombine.low %v4424_v57, %v4440_v60  ;;  %v10034_v57 = vld [vmem:[%s11552_s18 + $0x810] ss:$8 sps:$4 sm:$0xff]   ;;  %v10042_v60 = vld [vmem:[%s11552_s18 + $0x804] ss:$8 sps:$4 sm:$0xff]  }
 0x1ff   : > { %8175 = vmatpush1.bf16.msra.mxu0 %v9944_v26  ;;  %8228 = vmatpush1.bf16.msra.mxu1 %v9947_v27  ;;  %v9025_v26 = vcombine.low %v4425_v7, %v4441_v8  ;;  %v11976_v27 = vld [vmem:[%s12673_s0 + $0x48] sm:$0xff]  ;;  %v10048_v8 = vld [vmem:[%s11552_s18 + $0x8f4] ss:$8 sps:$4 sm:$0xff]  }
 0x200   : > { %8176 = vmatprep.subr.bf16.mxu0 %v9952_v28  ;;  %8229 = vmatprep.subr.bf16.mxu1 %v9955_v29  ;;  %v11981_v28 = vld [vmem:[%s12673_s0 + $0xc8] sm:$0xff] }
 0x201   : > { %v10043_v7 = vld [vmem:[%s11552_s18 + $0x900] ss:$8 sps:$4 sm:$0xff]  }
 0x203   : > { %8177 = vmatpush2.bf16.msra.mxu0 %v9950_v0  ;;  %8230 = vmatpush2.bf16.msra.mxu1 %v9953_v1  ;;  %v10013_v0 = vld [vmem:[%s11552_s18 + $0x950] ss:$8 sps:$4 sm:$0xff]   ;;  %v10018_v1 = vld [vmem:[%s11552_s18 + $0x844] ss:$8 sps:$4 sm:$0xff]  }
 0x204   : > { %8178 = vmatprep.subr.bf16.mxu0 %v9958_v3  ;;  %8231 = vmatprep.subr.bf16.mxu1 %v9961_v2 }
 0x207   : > { %8179 = vmatpush2.bf16.msra.mxu0 %v9956_v5  ;;  %8232 = vmatpush2.bf16.msra.mxu1 %v9959_v6  ;;  %v10021_v5 = vld [vmem:[%s11552_s18 + $0x944] ss:$8 sps:$4 sm:$0xff]  }
 0x208   : > { %8180 = vmatprep.subr.bf16.mxu0 %v9964_v30  ;;  %8233 = vmatprep.subr.bf16.mxu1 %v9967_v31  ;;  %v8996_v30 = vcombine.high %v11963_v19, %v11971_v22  ;;  %v8998_v31 = vcombine.high %v11976_v27, %v11981_v28 }
 0x20b   : > { %8181 = vmatpush2.bf16.msra.mxu0 %v9962_v32  ;;  %8234 = vmatpush2.bf16.msra.mxu1 %v9965_v33  ;;  %v10016_v32 = vld [vmem:[%s11552_s18 + $0x840] ss:$8 sps:$4 sm:$0xff]  }
 0x20c   : > { %8182 = vmatprep.subr.bf16.mxu0 %v9970_v34  ;;  %8235 = vmatprep.subr.bf16.mxu1 %v9973_v35  ;;  %v10019_v35 = vld [vmem:[%s11552_s18 + $0x940] ss:$8 sps:$4 sm:$0xff]  }
 0x20f   : > { %8183 = vmatpush2.bf16.msra.mxu0 %v9968_v36  ;;  %8236 = vmatpush2.bf16.msra.mxu1 %v9971_v37  ;;  %v10024_v36 = vld [vmem:[%s11552_s18 + $0x834] ss:$8 sps:$4 sm:$0xff]  }
 0x210   : > { %8184 = vmatprep.subr.bf16.mxu0 %v9976_v38  ;;  %8237 = vmatprep.subr.bf16.mxu1 %v9979_v39  ;;  %v10027_v38 = vld [vmem:[%s11552_s18 + $0x934] ss:$8 sps:$4 sm:$0xff]  }
 0x213   : > { %8185 = vmatpush2.bf16.msra.mxu0 %v9974_v42  ;;  %8238 = vmatpush2.bf16.msra.mxu1 %v9977_v43 }
 0x214   : > { %8186 = vmatprep.subr.bf16.mxu0 %v9982_v46  ;;  %8239 = vmatprep.subr.bf16.mxu1 %v9985_v47 }
 0x217   : > { %8187 = vmatpush2.bf16.msra.mxu0 %v9980_v48  ;;  %8240 = vmatpush2.bf16.msra.mxu1 %v9983_v49  ;;  %v10022_v48 = vld [vmem:[%s11552_s18 + $0x830] ss:$8 sps:$4 sm:$0xff]  }
 0x218   : > { %8188 = vmatprep.subr.bf16.mxu0 %v9988_v50  ;;  %8241 = vmatprep.subr.bf16.mxu1 %v9991_v51  ;;  %v10025_v49 = vld [vmem:[%s11552_s18 + $0x930] ss:$8 sps:$4 sm:$0xff]   ;;  %v10030_v51 = vld [vmem:[%s11552_s18 + $0x824] ss:$8 sps:$4 sm:$0xff]  }
 0x21b   : > { %8189 = vmatpush2.bf16.msra.mxu0 %v9986_v52  ;;  %8242 = vmatpush2.bf16.msra.mxu1 %v9989_v40  ;;  %v10033_v52 = vld [vmem:[%s11552_s18 + $0x924] ss:$8 sps:$4 sm:$0xff]  }
 0x21c   : > { %8190 = vmatprep.subr.bf16.mxu0 %v9994_v41  ;;  %8243 = vmatprep.subr.bf16.mxu1 %v9997_v44 }
 0x21f   : > { %8191 = vmatpush2.bf16.msra.mxu0 %v9992_v45  ;;  %8244 = vmatpush2.bf16.msra.mxu1 %v9995_v53  ;;  %v10028_v45 = vld [vmem:[%s11552_s18 + $0x820] ss:$8 sps:$4 sm:$0xff]  }
 0x220   : > { %8266 = vmatprep.subr.bf16.mxu0 %v10000_v54  ;;  %8319 = vmatprep.subr.bf16.mxu1 %v10003_v55  ;;  %v10031_v53 = vld [vmem:[%s11552_s18 + $0x920] ss:$8 sps:$4 sm:$0xff]   ;;  %v10036_v54 = vld [vmem:[%s11552_s18 + $0x814] ss:$8 sps:$4 sm:$0xff]  }
 0x221   : > { %v10039_v55 = vld [vmem:[%s11552_s18 + $0x914] ss:$8 sps:$4 sm:$0xff]  }
 0x222   : > { %v7876_v62 = vpop.f32.mrf.mxu0  ;;  %v7929_v11 = vpop.f32.mrf.mxu1  ;;  %8193 = vmatmul.mubr.bf16.vlgmr.msra.gmra.mxu0 %v8991_v63  ;;  %8246 = vmatmul.mubr.bf16.vlgmr.msra.gmra.mxu1 %v8993_v4  ;;  %v10045_v63 = vld [vmem:[%s11552_s18 + $0x904] ss:$8 sps:$4 sm:$0xff]   ;;  %v10040_v4 = vld [vmem:[%s11552_s18 + $0x800] ss:$8 sps:$4 sm:$0xff]  }
 0x223   : > { %v11956_v14 = vadd.f32 %v7929_v11, %v7876_v62  ;;  %8267 = vmatpush1.bf16.msra.mxu0 %v9998_v59  ;;  %8320 = vmatpush1.bf16.msra.mxu1 %v10001_v9  ;;  %v10037_v59 = vld [vmem:[%s11552_s18 + $0x910] ss:$8 sps:$4 sm:$0xff]   ;;  %v10051_v9 = vld [vmem:[%s11552_s18 + $0x9f4] ss:$8 sps:$4 sm:$0xff]   ;;  %v10052_v62 = vld [vmem:[%s11552_s18 + $0x8e0] ss:$8 sps:$4 sm:$0xff]  }
 0x224   : > { %v7878_v17 = vpop.f32.mrf.mxu0  ;;  %v7931_v18 = vpop.f32.mrf.mxu1  ;;  %8268 = vmatprep.subr.bf16.mxu0 %v10006_v10  ;;  %8321 = vmatprep.subr.bf16.mxu1 %v10009_v56  ;;  %v10046_v10 = vld [vmem:[%s11552_s18 + $0x8f0] ss:$8 sps:$4 sm:$0xff]   ;;  %v10055_v11 = vld [vmem:[%s11552_s18 + $0x9e0] ss:$8 sps:$4 sm:$0xff]  }
 0x225   : > { %v11965_v20 = vadd.f32 %v7931_v18, %v7878_v17  ;;  %8202 = vmatprep.mubr.bf16.mxu0 %v9024_v58  ;;  %8255 = vmatprep.mubr.bf16.mxu1 %v9026_v61  ;;  %v10049_v56 = vld [vmem:[%s11552_s18 + $0x9f0] ss:$8 sps:$4 sm:$0xff]   ;;  %v10054_v58 = vld [vmem:[%s11552_s18 + $0x8e4] ss:$8 sps:$4 sm:$0xff]  }
 0x226   : > { %v7880_v23 = vpop.f32.mrf.mxu0  ;;  %v7933_v24 = vpop.f32.mrf.mxu1  ;;  %v10057_v61 = vld [vmem:[%s11552_s18 + $0x9e4] ss:$8 sps:$4 sm:$0xff]  }
 0x227   : > { %v11983_v29 = vadd.f32 %v7933_v24, %v7880_v23  ;;  %8269 = vmatpush1.bf16.msra.mxu0 %v10004_v12  ;;  %8322 = vmatpush1.bf16.msra.mxu1 %v10007_v13  ;;  %v10060_v12 = vld [vmem:[%s11552_s18 + $0x8d4] ss:$8 sps:$4 sm:$0xff]   ;;  %v10066_v17 = vld [vmem:[%s11552_s18 + $0x8c4] ss:$8 sps:$4 sm:$0xff]   ;;  %v10067_v23 = vld [vmem:[%s11552_s18 + $0x9c0] ss:$8 sps:$4 sm:$0xff]  }
 0x228   : > { %v7882_v3 = vpop.f32.mrf.mxu0  ;;  %v7935_v2 = vpop.f32.mrf.mxu1  ;;  %8270 = vmatprep.subr.bf16.mxu0 %v10012_v15  ;;  %8323 = vmatprep.subr.bf16.mxu1 %v10015_v16  ;;  %v10063_v13 = vld [vmem:[%s11552_s18 + $0x9d4] ss:$8 sps:$4 sm:$0xff]   ;;  %v10058_v15 = vld [vmem:[%s11552_s18 + $0x8d0] ss:$8 sps:$4 sm:$0xff]   ;;  %v10069_v18 = vld [vmem:[%s11552_s18 + $0x9c4] ss:$8 sps:$4 sm:$0xff]  }
 0x229   : > { %v11988_v6 = vadd.f32 %v7935_v2, %v7882_v3  ;;  %v10061_v16 = vld [vmem:[%s11552_s18 + $0x9d0] ss:$8 sps:$4 sm:$0xff]   ;;  %v10072_v24 = vld [vmem:[%s11552_s18 + $0x8b4] ss:$8 sps:$4 sm:$0xff]   ;;  %v10081_v3 = vld [vmem:[%s11552_s18 + $0x9a4] ss:$8 sps:$4 sm:$0xff]  }
 0x22a   : > { %8203 = vmatmul.mubr.bf16.gmra.mxu0 %v9023_v25  ;;  %8256 = vmatmul.mubr.bf16.gmra.mxu1 %v9025_v26  ;;  %v7886_v33 = vpop.f32.mrf.mxu0  ;;  %v7939_v34 = vpop.f32.mrf.mxu1  ;;  %v10075_v25 = vld [vmem:[%s11552_s18 + $0x9b4] ss:$8 sps:$4 sm:$0xff]   ;;  %v10070_v26 = vld [vmem:[%s11552_s18 + $0x8b0] ss:$8 sps:$4 sm:$0xff]   ;;  %v10076_v2 = vld [vmem:[%s11552_s18 + $0x8a0] ss:$8 sps:$4 sm:$0xff]  }
 0x22b   : > { %8271 = vmatpush1.bf16.msra.mxu0 %v10010_v21  ;;  %8324 = vmatpush1.bf16.msra.mxu1 %v10013_v0  ;;  %v11997_v37 = vadd.f32 %v7939_v34, %v7886_v33  ;;  %v10064_v21 = vld [vmem:[%s11552_s18 + $0x8c0] ss:$8 sps:$4 sm:$0xff]   ;;  %v10073_v0 = vld [vmem:[%s11552_s18 + $0x9b0] ss:$8 sps:$4 sm:$0xff]   ;;  %v10090_v34 = vld [vmem:[%s11552_s18 + $0x884] ss:$8 sps:$4 sm:$0xff]  }
 0x22c   : > { %8272 = vmatprep.subr.bf16.mxu0 %v10018_v1  ;;  %8325 = vmatprep.subr.bf16.mxu1 %v10021_v5  ;;  %v7888_v39 = vpop.f32.mrf.mxu0  ;;  %v7941_v42 = vpop.f32.mrf.mxu1  ;;  %v10078_v1 = vld [vmem:[%s11552_s18 + $0x8a4] ss:$8 sps:$4 sm:$0xff]   ;;  %v10079_v5 = vld [vmem:[%s11552_s18 + $0x9a0] ss:$8 sps:$4 sm:$0xff]   ;;  %v10085_v33 = vld [vmem:[%s11552_s18 + $0x990] ss:$8 sps:$4 sm:$0xff]  }
 0x22d   : > { %v12000_v43 = vadd.f32 %v7941_v42, %v7888_v39  ;;  %8298 = vmatprep.mubr.bf16.mxu0 %v8996_v30  ;;  %8351 = vmatprep.mubr.bf16.mxu1 %v8998_v31  ;;  %v10084_v30 = vld [vmem:[%s11552_s18 + $0x894] ss:$8 sps:$4 sm:$0xff]  }
 0x22e   : > { %v7890_v46 = vpop.f32.mrf.mxu0  ;;  %v7943_v47 = vpop.f32.mrf.mxu1  ;;  %v10087_v31 = vld [vmem:[%s11552_s18 + $0x994] ss:$8 sps:$4 sm:$0xff]  }
 0x22f   : > { %8273 = vmatpush1.bf16.msra.mxu0 %v10016_v32  ;;  %8326 = vmatpush1.bf16.msra.mxu1 %v10019_v35  ;;  %v12004_v50 = vadd.f32 %v7943_v47, %v7890_v46  ;;  %v10082_v32 = vld [vmem:[%s11552_s18 + $0x890] ss:$8 sps:$4 sm:$0xff]   ;;  %v10093_v35 = vld [vmem:[%s11552_s18 + $0x984] ss:$8 sps:$4 sm:$0xff]   ;;  %v10096_v39 = vld [vmem:[%s11552_s18 + $0xa74] ss:$8 sps:$4 sm:$0xff]  }
 0x230   : > { %8274 = vmatprep.subr.bf16.mxu0 %v10024_v36  ;;  %8327 = vmatprep.subr.bf16.mxu1 %v10027_v38  ;;  %v7892_v40 = vpop.f32.mrf.mxu0  ;;  %v7945_v41 = vpop.f32.mrf.mxu1  ;;  %v10088_v36 = vld [vmem:[%s11552_s18 + $0x880] ss:$8 sps:$4 sm:$0xff]   ;;  %v10099_v42 = vld [vmem:[%s11552_s18 + $0xb74] ss:$8 sps:$4 sm:$0xff]   ;;  %v10094_v47 = vld [vmem:[%s11552_s18 + $0xa70] ss:$8 sps:$4 sm:$0xff]  }
 0x231   : > { %v12008_v44 = vadd.f32 %v7945_v41, %v7892_v40  ;;  %v10091_v38 = vld [vmem:[%s11552_s18 + $0x980] ss:$8 sps:$4 sm:$0xff]   ;;  %v10097_v41 = vld [vmem:[%s11552_s18 + $0xb70] ss:$8 sps:$4 sm:$0xff]  }
 0x232   : > { %v4426_v46 = vld [vmem:[%s12673_s0 + $0x140] sm:$0xff]  ;;  %v4443_v40 = vld [vmem:[%s12673_s0 + $0x1c8] sm:$0xff] }
 0x233   : > { %8275 = vmatpush1.bf16.msra.mxu0 %v10022_v48  ;;  %8328 = vmatpush1.bf16.msra.mxu1 %v10025_v49  ;;  %v8995_v48 = vcombine.low %v11963_v19, %v11971_v22  ;;  %v8997_v49 = vcombine.low %v11976_v27, %v11981_v28  ;;  %v10102_v19 = vld [vmem:[%s11552_s18 + $0xa64] ss:$8 sps:$4 sm:$0xff]   ;;  %v10100_v27 = vld [vmem:[%s11552_s18 + $0xa60] ss:$8 sps:$4 sm:$0xff]  }
 0x234   : > { %8276 = vmatprep.subr.bf16.mxu0 %v10030_v51  ;;  %8329 = vmatprep.subr.bf16.mxu1 %v10033_v52  ;;  %v4442_v51 = vld [vmem:[%s12673_s0 + $0x1c0] sm:$0xff]  ;;  %v4427_v52 = vld [vmem:[%s12673_s0 + $0x148] sm:$0xff] }
 0x235   : > { %v10105_v22 = vld [vmem:[%s11552_s18 + $0xb64] ss:$8 sps:$4 sm:$0xff]   ;;  %v10103_v28 = vld [vmem:[%s11552_s18 + $0xb60] ss:$8 sps:$4 sm:$0xff]  }
 0x237   : > { %8277 = vmatpush1.bf16.msra.mxu0 %v10028_v45  ;;  %8330 = vmatpush1.bf16.msra.mxu1 %v10031_v53  ;;  %v9028_v45 = vcombine.high %v4426_v46, %v4442_v51  ;;  %v9030_v53 = vcombine.high %v4427_v52, %v4443_v40 }
 0x238   : > { %8278 = vmatprep.subr.bf16.mxu0 %v10036_v54  ;;  %8331 = vmatprep.subr.bf16.mxu1 %v10039_v55 }
 0x23b   : > { %8279 = vmatpush1.bf16.msra.mxu0 %v10034_v57  ;;  %8332 = vmatpush1.bf16.msra.mxu1 %v10037_v59 }
 0x23c   : > { %8280 = vmatprep.subr.bf16.mxu0 %v10042_v60  ;;  %8333 = vmatprep.subr.bf16.mxu1 %v10045_v63  ;;  %v10108_v63 = vld [vmem:[%s11552_s18 + $0xa54] ss:$8 sps:$4 sm:$0xff]  }
 0x23f   : > { %8281 = vmatpush1.bf16.msra.mxu0 %v10040_v4  ;;  %8334 = vmatpush1.bf16.msra.mxu1 %v10043_v7  ;;  %v10111_v4 = vld [vmem:[%s11552_s18 + $0xb54] ss:$8 sps:$4 sm:$0xff]  }
 0x240   : > { %8282 = vmatprep.subr.bf16.mxu0 %v10048_v8  ;;  %8335 = vmatprep.subr.bf16.mxu1 %v10051_v9  ;;  %v10106_v9 = vld [vmem:[%s11552_s18 + $0xa50] ss:$8 sps:$4 sm:$0xff]  }
 0x243   : > { %8283 = vmatpush2.bf16.msra.mxu0 %v10046_v10  ;;  %8336 = vmatpush2.bf16.msra.mxu1 %v10049_v56  ;;  %v10109_v10 = vld [vmem:[%s11552_s18 + $0xb50] ss:$8 sps:$4 sm:$0xff]  }
 0x244   : > { %8284 = vmatprep.subr.bf16.mxu0 %v10054_v58  ;;  %8337 = vmatprep.subr.bf16.mxu1 %v10057_v61  ;;  %v12092_v56 = vld [vmem:[%s12673_s0 + $0xd0] sm:$0xff] }
 0x247   : > { %8285 = vmatpush2.bf16.msra.mxu0 %v10052_v62  ;;  %8338 = vmatpush2.bf16.msra.mxu1 %v10055_v11  ;;  %v9027_v62 = vcombine.low %v4426_v46, %v4442_v51  ;;  %v12097_v11 = vld [vmem:[%s12673_s0 + $0x58] sm:$0xff] }
 0x248   : > { %8286 = vmatprep.subr.bf16.mxu0 %v10060_v12  ;;  %8339 = vmatprep.subr.bf16.mxu1 %v10063_v13  ;;  %v12102_v12 = vld [vmem:[%s12673_s0 + $0xd8] sm:$0xff] }
 0x24b   : > { %8287 = vmatpush2.bf16.msra.mxu0 %v10058_v15  ;;  %8340 = vmatpush2.bf16.msra.mxu1 %v10061_v16 }
 0x24c   : > { %8288 = vmatprep.subr.bf16.mxu0 %v10066_v17  ;;  %8341 = vmatprep.subr.bf16.mxu1 %v10069_v18  ;;  %v10114_v18 = vld [vmem:[%s11552_s18 + $0xa44] ss:$8 sps:$4 sm:$0xff]  }
 0x24f   : > { %8289 = vmatpush2.bf16.msra.mxu0 %v10064_v21  ;;  %8342 = vmatpush2.bf16.msra.mxu1 %v10067_v23  ;;  %v10117_v21 = vld [vmem:[%s11552_s18 + $0xb44] ss:$8 sps:$4 sm:$0xff]  }
 0x250   : > { %8290 = vmatprep.subr.bf16.mxu0 %v10072_v24  ;;  %8343 = vmatprep.subr.bf16.mxu1 %v10075_v25  ;;  %v10112_v25 = vld [vmem:[%s11552_s18 + $0xa40] ss:$8 sps:$4 sm:$0xff]  }
 0x253   : > { %8291 = vmatpush2.bf16.msra.mxu0 %v10070_v26  ;;  %8344 = vmatpush2.bf16.msra.mxu1 %v10073_v0  ;;  %v10115_v26 = vld [vmem:[%s11552_s18 + $0xb40] ss:$8 sps:$4 sm:$0xff]  }
 0x254   : > { %8292 = vmatprep.subr.bf16.mxu0 %v10078_v1  ;;  %8345 = vmatprep.subr.bf16.mxu1 %v10081_v3 }
 0x257   : > { %8293 = vmatpush2.bf16.msra.mxu0 %v10076_v2  ;;  %8346 = vmatpush2.bf16.msra.mxu1 %v10079_v5 }
 0x258   : > { %8294 = vmatprep.subr.bf16.mxu0 %v10084_v30  ;;  %8347 = vmatprep.subr.bf16.mxu1 %v10087_v31  ;;  %v10120_v31 = vld [vmem:[%s11552_s18 + $0xa34] ss:$8 sps:$4 sm:$0xff]  }
 0x25b   : > { %8295 = vmatpush2.bf16.msra.mxu0 %v10082_v32  ;;  %8348 = vmatpush2.bf16.msra.mxu1 %v10085_v33  ;;  %v10123_v32 = vld [vmem:[%s11552_s18 + $0xb34] ss:$8 sps:$4 sm:$0xff]  }
 0x25c   : > { %8296 = vmatprep.subr.bf16.mxu0 %v10090_v34  ;;  %8349 = vmatprep.subr.bf16.mxu1 %v10093_v35  ;;  %v10118_v35 = vld [vmem:[%s11552_s18 + $0xa30] ss:$8 sps:$4 sm:$0xff]  }
 0x25f   : > { %8297 = vmatpush2.bf16.msra.mxu0 %v10088_v36  ;;  %8350 = vmatpush2.bf16.msra.mxu1 %v10091_v38  ;;  %v10121_v36 = vld [vmem:[%s11552_s18 + $0xb30] ss:$8 sps:$4 sm:$0xff]  }
 0x260   : > { %8372 = vmatprep.subr.bf16.mxu0 %v10096_v39  ;;  %8425 = vmatprep.subr.bf16.mxu1 %v10099_v42 }
 0x262   : > { %v7982_v54 = vpop.f32.mrf.mxu0  ;;  %v8035_v55 = vpop.f32.mrf.mxu1  ;;  %8299 = vmatmul.mubr.bf16.vlgmr.msra.gmra.mxu0 %v8995_v48  ;;  %8352 = vmatmul.mubr.bf16.vlgmr.msra.gmra.mxu1 %v8997_v49  ;;  %v10129_v48 = vld [vmem:[%s11552_s18 + $0xb24] ss:$8 sps:$4 sm:$0xff]  }
 0x263   : > { %v7983_v57 = vadd.f32 %v7982_v54, %v11956_v14  ;;  %8373 = vmatpush1.bf16.msra.mxu0 %v10094_v47  ;;  %8426 = vmatpush1.bf16.msra.mxu1 %v10097_v41  ;;  %v12087_v14 = vld [vmem:[%s12673_s0 + $0x50] sm:$0xff]  ;;  %v10126_v47 = vld [vmem:[%s11552_s18 + $0xa24] ss:$8 sps:$4 sm:$0xff]  }
 0x264   : > { %v7984_v59 = vpop.f32.mrf.mxu0  ;;  %v8037_v60 = vpop.f32.mrf.mxu1  ;;  %8374 = vmatprep.subr.bf16.mxu0 %v10102_v19  ;;  %8427 = vmatprep.subr.bf16.mxu1 %v10105_v22  ;;  %v9000_v0 = vcombine.high %v12087_v14, %v12092_v56  ;;  %v10132_v41 = vld [vmem:[%s11552_s18 + $0xa14] ss:$8 sps:$4 sm:$0xff]   ;;  %v10133_v22 = vld [vmem:[%s11552_s18 + $0xb10] ss:$8 sps:$4 sm:$0xff]  }
 0x265   : > { %v12079_v7 = vadd.f32 %v8035_v55, %v7983_v57  ;;  %v7985_v8 = vadd.f32 %v7984_v59, %v11965_v20  ;;  %8308 = vmatprep.mubr.bf16.mxu0 %v9028_v45  ;;  %8361 = vmatprep.mubr.bf16.mxu1 %v9030_v53  ;;  %v9029_v20 = vcombine.low %v4427_v52, %v4443_v40  ;;  %v10124_v52 = vld [vmem:[%s11552_s18 + $0xa20] ss:$8 sps:$4 sm:$0xff]   ;;  %v10135_v19 = vld [vmem:[%s11552_s18 + $0xb14] ss:$8 sps:$4 sm:$0xff]   ;;  %v10142_v57 = vld [vmem:[%s11552_s18 + $0xaf0] ss:$8 sps:$4 sm:$0xff]  }
 0x266   : > { %v7986_v58 = vpop.f32.mrf.mxu0  ;;  %v8039_v61 = vpop.f32.mrf.mxu1  ;;  %v10127_v40 = vld [vmem:[%s11552_s18 + $0xb20] ss:$8 sps:$4 sm:$0xff]   ;;  %v10144_v54 = vld [vmem:[%s11552_s18 + $0xaf4] ss:$8 sps:$4 sm:$0xff]   ;;  %v10145_v59 = vld [vmem:[%s11552_s18 + $0xbf0] ss:$8 sps:$4 sm:$0xff]  }
 0x267   : > { %v12104_v13 = vadd.f32 %v8037_v60, %v7985_v8  ;;  %v7987_v15 = vadd.f32 %v7986_v58, %v11983_v29  ;;  %8375 = vmatpush1.bf16.msra.mxu0 %v10100_v27  ;;  %8428 = vmatpush1.bf16.msra.mxu1 %v10103_v28  ;;  %v9002_v29 = vcombine.high %v12097_v11, %v12102_v12  ;;  %v10138_v27 = vld [vmem:[%s11552_s18 + $0xa04] ss:$8 sps:$4 sm:$0xff]   ;;  %v10136_v45 = vld [vmem:[%s11552_s18 + $0xa00] ss:$8 sps:$4 sm:$0xff]   ;;  %v10147_v55 = vld [vmem:[%s11552_s18 + $0xbf4] ss:$8 sps:$4 sm:$0xff]  }
 0x268   : > { %v7988_v16 = vpop.f32.mrf.mxu0  ;;  %v8041_v17 = vpop.f32.mrf.mxu1  ;;  %8376 = vmatprep.subr.bf16.mxu0 %v10108_v63  ;;  %8429 = vmatprep.subr.bf16.mxu1 %v10111_v4  ;;  %v10141_v28 = vld [vmem:[%s11552_s18 + $0xb04] ss:$8 sps:$4 sm:$0xff]   ;;  %v10139_v53 = vld [vmem:[%s11552_s18 + $0xb00] ss:$8 sps:$4 sm:$0xff]   ;;  %v10154_v58 = vld [vmem:[%s11552_s18 + $0xad0] ss:$8 sps:$4 sm:$0xff]  }
 0x269   : > { %v12109_v23 = vadd.f32 %v8039_v61, %v7987_v15  ;;  %v7989_v24 = vadd.f32 %v7988_v16, %v11988_v6  ;;  %v10150_v60 = vld [vmem:[%s11552_s18 + $0xae4] ss:$8 sps:$4 sm:$0xff]   ;;  %v10148_v4 = vld [vmem:[%s11552_s18 + $0xae0] ss:$8 sps:$4 sm:$0xff]   ;;  %v10157_v61 = vld [vmem:[%s11552_s18 + $0xbd0] ss:$8 sps:$4 sm:$0xff]  }
 0x26a   : > { %v7992_v1 = vpop.f32.mrf.mxu0  ;;  %8309 = vmatmul.mubr.bf16.gmra.mxu0 %v9027_v62  ;;  %v8045_v3 = vpop.f32.mrf.mxu1  ;;  %8362 = vmatmul.mubr.bf16.gmra.mxu1 %v9029_v20  ;;  %v10153_v63 = vld [vmem:[%s11552_s18 + $0xbe4] ss:$8 sps:$4 sm:$0xff]   ;;  %v10151_v8 = vld [vmem:[%s11552_s18 + $0xbe0] ss:$8 sps:$4 sm:$0xff]  }
 0x26b   : > { %v12118_v2 = vadd.f32 %v8041_v17, %v7989_v24  ;;  %v7993_v6 = vadd.f32 %v7992_v1, %v11997_v37  ;;  %8377 = vmatpush1.bf16.msra.mxu0 %v10106_v9  ;;  %8430 = vmatpush1.bf16.msra.mxu1 %v10109_v10  ;;  %v10156_v9 = vld [vmem:[%s11552_s18 + $0xad4] ss:$8 sps:$4 sm:$0xff]   ;;  %v10162_v62 = vld [vmem:[%s11552_s18 + $0xac4] ss:$8 sps:$4 sm:$0xff]   ;;  %v10160_v15 = vld [vmem:[%s11552_s18 + $0xac0] ss:$8 sps:$4 sm:$0xff]  }
 0x26c   : > { %v7994_v5 = vpop.f32.mrf.mxu0  ;;  %v8047_v30 = vpop.f32.mrf.mxu1  ;;  %8378 = vmatprep.subr.bf16.mxu0 %v10114_v18  ;;  %8431 = vmatprep.subr.bf16.mxu1 %v10117_v21  ;;  %v10159_v10 = vld [vmem:[%s11552_s18 + $0xbd4] ss:$8 sps:$4 sm:$0xff]   ;;  %v10165_v20 = vld [vmem:[%s11552_s18 + $0xbc4] ss:$8 sps:$4 sm:$0xff]   ;;  %v10163_v16 = vld [vmem:[%s11552_s18 + $0xbc0] ss:$8 sps:$4 sm:$0xff]  }
 0x26d   : > { %v7995_v33 = vadd.f32 %v7994_v5, %v12000_v43  ;;  %v12124_v34 = vadd.f32 %v8045_v3, %v7993_v6  ;;  %8404 = vmatprep.mubr.bf16.mxu0 %v9000_v0  ;;  %8457 = vmatprep.mubr.bf16.mxu1 %v9002_v29  ;;  %v10168_v17 = vld [vmem:[%s11552_s18 + $0xab4] ss:$8 sps:$4 sm:$0xff]   ;;  %v10166_v21 = vld [vmem:[%s11552_s18 + $0xab0] ss:$8 sps:$4 sm:$0xff]   ;;  %v10172_v0 = vld [vmem:[%s11552_s18 + $0xaa0] ss:$8 sps:$4 sm:$0xff]  }
 0x26e   : > { %v7996_v38 = vpop.f32.mrf.mxu0  ;;  %v8049_v37 = vpop.f32.mrf.mxu1  ;;  %v10171_v18 = vld [vmem:[%s11552_s18 + $0xbb4] ss:$8 sps:$4 sm:$0xff]   ;;  %v10169_v24 = vld [vmem:[%s11552_s18 + $0xbb0] ss:$8 sps:$4 sm:$0xff]   ;;  %v10175_v29 = vld [vmem:[%s11552_s18 + $0xba0] ss:$8 sps:$4 sm:$0xff]  }
 0x26f   : > { %v7997_v39 = vadd.f32 %v7996_v38, %v12004_v50  ;;  %v12129_v42 = vadd.f32 %v8047_v30, %v7995_v33  ;;  %8379 = vmatpush1.bf16.msra.mxu0 %v10112_v25  ;;  %8432 = vmatpush1.bf16.msra.mxu1 %v10115_v26  ;;  %v10174_v25 = vld [vmem:[%s11552_s18 + $0xaa4] ss:$8 sps:$4 sm:$0xff]   ;;  %v10180_v1 = vld [vmem:[%s11552_s18 + $0xa94] ss:$8 sps:$4 sm:$0xff]   ;;  %v10178_v6 = vld [vmem:[%s11552_s18 + $0xa90] ss:$8 sps:$4 sm:$0xff]  }
 0x270   : > { %v7998_v43 = vpop.f32.mrf.mxu0  ;;  %v8051_v46 = vpop.f32.mrf.mxu1  ;;  %8380 = vmatprep.subr.bf16.mxu0 %v10120_v31  ;;  %8433 = vmatprep.subr.bf16.mxu1 %v10123_v32  ;;  %v10177_v26 = vld [vmem:[%s11552_s18 + $0xba4] ss:$8 sps:$4 sm:$0xff]   ;;  %v10183_v3 = vld [vmem:[%s11552_s18 + $0xb94] ss:$8 sps:$4 sm:$0xff]   ;;  %v10181_v5 = vld [vmem:[%s11552_s18 + $0xb90] ss:$8 sps:$4 sm:$0xff]  }
 0x271   : > { %v7999_v49 = vadd.f32 %v7998_v43, %v12008_v44  ;;  %v12134_v51 = vadd.f32 %v8049_v37, %v7997_v39  ;;  %v10130_v44 = vld [vmem:[%s11552_s18 + $0xa10] ss:$8 sps:$4 sm:$0xff]   ;;  %v10186_v30 = vld [vmem:[%s11552_s18 + $0xa84] ss:$8 sps:$4 sm:$0xff]   ;;  %v10184_v32 = vld [vmem:[%s11552_s18 + $0xa80] ss:$8 sps:$4 sm:$0xff]   ;;  %v8999_v37 = vcombine.low %v12087_v14, %v12092_v56  ;;  %v9001_v39 = vcombine.low %v12097_v11, %v12102_v12 }
 0x272   : > { %v10189_v31 = vld [vmem:[%s11552_s18 + $0xb84] ss:$8 sps:$4 sm:$0xff]   ;;  %v10187_v33 = vld [vmem:[%s11552_s18 + $0xb80] ss:$8 sps:$4 sm:$0xff]   ;;  %v4428_v38 = vld [vmem:[%s12673_s0 + $0x150] sm:$0xff] }
 0x273   : > { %v12136_v50 = vadd.f32 %v8051_v46, %v7999_v49  ;;  %8381 = vmatpush1.bf16.msra.mxu0 %v10118_v35  ;;  %8434 = vmatpush1.bf16.msra.mxu1 %v10121_v36  ;;  %v10192_v35 = vld [vmem:[%s11552_s18 + $0xc74] ss:$8 sps:$4 sm:$0xff]   ;;  %v10190_v14 = vld [vmem:[%s11552_s18 + $0xc70] ss:$8 sps:$4 sm:$0xff]   ;;  %v10198_v11 = vld [vmem:[%s11552_s18 + $0xc64] ss:$8 sps:$4 sm:$0xff]  }
 0x274   : > { %8382 = vmatprep.subr.bf16.mxu0 %v10126_v47  ;;  %8435 = vmatprep.subr.bf16.mxu1 %v10129_v48  ;;  %v10195_v36 = vld [vmem:[%s11552_s18 + $0xd74] ss:$8 sps:$4 sm:$0xff]   ;;  %v10193_v56 = vld [vmem:[%s11552_s18 + $0xd70] ss:$8 sps:$4 sm:$0xff]   ;;  %v10201_v12 = vld [vmem:[%s11552_s18 + $0xd64] ss:$8 sps:$4 sm:$0xff]  }
 0x275   : > { %v4444_v43 = vld [vmem:[%s12673_s0 + $0x1d0] sm:$0xff]  ;;  %v4429_v46 = vld [vmem:[%s12673_s0 + $0x158] sm:$0xff] }
 0x276   : > { %v4445_v47 = vld [vmem:[%s12673_s0 + $0x1d8] sm:$0xff]  ;;  %v9032_v48 = vcombine.high %v4428_v38, %v4444_v43 }
 0x277   : > { %8383 = vmatpush1.bf16.msra.mxu0 %v10124_v52  ;;  %8436 = vmatpush1.bf16.msra.mxu1 %v10127_v40  ;;  %v9034_v49 = vcombine.high %v4429_v46, %v4445_v47  ;;  %v10196_v52 = vld [vmem:[%s11552_s18 + $0xc60] ss:$8 sps:$4 sm:$0xff]  }
 0x278   : > { %8384 = vmatprep.subr.bf16.mxu0 %v10132_v41  ;;  %8437 = vmatprep.subr.bf16.mxu1 %v10135_v19  ;;  %v10199_v40 = vld [vmem:[%s11552_s18 + $0xd60] ss:$8 sps:$4 sm:$0xff]   ;;  %v10204_v41 = vld [vmem:[%s11552_s18 + $0xc54] ss:$8 sps:$4 sm:$0xff]  }
 0x279   : > { %v10207_v19 = vld [vmem:[%s11552_s18 + $0xd54] ss:$8 sps:$4 sm:$0xff]  }
 0x27b   : > { %8385 = vmatpush1.bf16.msra.mxu0 %v10130_v44  ;;  %8438 = vmatpush1.bf16.msra.mxu1 %v10133_v22  ;;  %v12209_v44 = vld [vmem:[%s12673_s0 + $0x60] sm:$0xff]  ;;  %v9031_v22 = vcombine.low %v4428_v38, %v4444_v43  ;;  %v10250_v38 = vld [vmem:[%s11552_s18 + $0xcd0] ss:$8 sps:$4 sm:$0xff]  }
 0x27c   : > { %8386 = vmatprep.subr.bf16.mxu0 %v10138_v27  ;;  %8439 = vmatprep.subr.bf16.mxu1 %v10141_v28  ;;  %v9033_v27 = vcombine.low %v4429_v46, %v4445_v47  ;;  %v12214_v28 = vld [vmem:[%s12673_s0 + $0xe0] sm:$0xff] }
 0x27d   : > { %v10261_v43 = vld [vmem:[%s11552_s18 + $0xdc4] ss:$8 sps:$4 sm:$0xff]   ;;  %v10256_v46 = vld [vmem:[%s11552_s18 + $0xcc0] ss:$8 sps:$4 sm:$0xff]  }
 0x27e   : > { %v10259_v47 = vld [vmem:[%s11552_s18 + $0xdc0] ss:$8 sps:$4 sm:$0xff]  }
 0x27f   : > { %8387 = vmatpush1.bf16.msra.mxu0 %v10136_v45  ;;  %8440 = vmatpush1.bf16.msra.mxu1 %v10139_v53  ;;  %v12219_v45 = vld [vmem:[%s12673_s0 + $0x68] sm:$0xff] }
 0x280   : > { %8388 = vmatprep.subr.bf16.mxu0 %v10144_v54  ;;  %8441 = vmatprep.subr.bf16.mxu1 %v10147_v55  ;;  %v12224_v53 = vld [vmem:[%s12673_s0 + $0xe8] sm:$0xff]  ;;  %v10202_v54 = vld [vmem:[%s11552_s18 + $0xc50] ss:$8 sps:$4 sm:$0xff]  }
 0x281   : > { %v10205_v55 = vld [vmem:[%s11552_s18 + $0xd50] ss:$8 sps:$4 sm:$0xff]  }
 0x283   : > { %8389 = vmatpush2.bf16.msra.mxu0 %v10142_v57  ;;  %8442 = vmatpush2.bf16.msra.mxu1 %v10145_v59  ;;  %v10210_v57 = vld [vmem:[%s11552_s18 + $0xc44] ss:$8 sps:$4 sm:$0xff]  }
 0x284   : > { %8390 = vmatprep.subr.bf16.mxu0 %v10150_v60  ;;  %8443 = vmatprep.subr.bf16.mxu1 %v10153_v63  ;;  %v10213_v59 = vld [vmem:[%s11552_s18 + $0xd44] ss:$8 sps:$4 sm:$0xff]   ;;  %v9004_v60 = vcombine.high %v12209_v44, %v12214_v28  ;;  %v9006_v63 = vcombine.high %v12219_v45, %v12224_v53 }
 0x287   : > { %8391 = vmatpush2.bf16.msra.mxu0 %v10148_v4  ;;  %8444 = vmatpush2.bf16.msra.mxu1 %v10151_v8  ;;  %v10208_v4 = vld [vmem:[%s11552_s18 + $0xc40] ss:$8 sps:$4 sm:$0xff]  }
 0x288   : > { %8392 = vmatprep.subr.bf16.mxu0 %v10156_v9  ;;  %8445 = vmatprep.subr.bf16.mxu1 %v10159_v10  ;;  %v10211_v8 = vld [vmem:[%s11552_s18 + $0xd40] ss:$8 sps:$4 sm:$0xff]   ;;  %v10216_v9 = vld [vmem:[%s11552_s18 + $0xc34] ss:$8 sps:$4 sm:$0xff]  }
 0x289   : > { %v10219_v10 = vld [vmem:[%s11552_s18 + $0xd34] ss:$8 sps:$4 sm:$0xff]  }
 0x28b   : > { %8393 = vmatpush2.bf16.msra.mxu0 %v10154_v58  ;;  %8446 = vmatpush2.bf16.msra.mxu1 %v10157_v61  ;;  %v10214_v58 = vld [vmem:[%s11552_s18 + $0xc30] ss:$8 sps:$4 sm:$0xff]  }
 0x28c   : > { %8394 = vmatprep.subr.bf16.mxu0 %v10162_v62  ;;  %8447 = vmatprep.subr.bf16.mxu1 %v10165_v20  ;;  %v10217_v61 = vld [vmem:[%s11552_s18 + $0xd30] ss:$8 sps:$4 sm:$0xff]   ;;  %v10222_v62 = vld [vmem:[%s11552_s18 + $0xc24] ss:$8 sps:$4 sm:$0xff]  }
 0x28d   : > { %v10225_v20 = vld [vmem:[%s11552_s18 + $0xd24] ss:$8 sps:$4 sm:$0xff]  }
 0x28f   : > { %8395 = vmatpush2.bf16.msra.mxu0 %v10160_v15  ;;  %8448 = vmatpush2.bf16.msra.mxu1 %v10163_v16  ;;  %v10220_v15 = vld [vmem:[%s11552_s18 + $0xc20] ss:$8 sps:$4 sm:$0xff]  }
 0x290   : > { %8396 = vmatprep.subr.bf16.mxu0 %v10168_v17  ;;  %8449 = vmatprep.subr.bf16.mxu1 %v10171_v18  ;;  %v10223_v16 = vld [vmem:[%s11552_s18 + $0xd20] ss:$8 sps:$4 sm:$0xff]   ;;  %v10228_v17 = vld [vmem:[%s11552_s18 + $0xc14] ss:$8 sps:$4 sm:$0xff]  }
 0x291   : > { %v10231_v18 = vld [vmem:[%s11552_s18 + $0xd14] ss:$8 sps:$4 sm:$0xff]  }
 0x293   : > { %8397 = vmatpush2.bf16.msra.mxu0 %v10166_v21  ;;  %8450 = vmatpush2.bf16.msra.mxu1 %v10169_v24  ;;  %v10226_v21 = vld [vmem:[%s11552_s18 + $0xc10] ss:$8 sps:$4 sm:$0xff]  }
 0x294   : > { %8398 = vmatprep.subr.bf16.mxu0 %v10174_v25  ;;  %8451 = vmatprep.subr.bf16.mxu1 %v10177_v26  ;;  %v10229_v24 = vld [vmem:[%s11552_s18 + $0xd10] ss:$8 sps:$4 sm:$0xff]   ;;  %v10234_v25 = vld [vmem:[%s11552_s18 + $0xc04] ss:$8 sps:$4 sm:$0xff]  }
 0x295   : > { %v10237_v26 = vld [vmem:[%s11552_s18 + $0xd04] ss:$8 sps:$4 sm:$0xff]  }
 0x297   : > { %8399 = vmatpush2.bf16.msra.mxu0 %v10172_v0  ;;  %8452 = vmatpush2.bf16.msra.mxu1 %v10175_v29  ;;  %v10232_v0 = vld [vmem:[%s11552_s18 + $0xc00] ss:$8 sps:$4 sm:$0xff]  }
 0x298   : > { %8400 = vmatprep.subr.bf16.mxu0 %v10180_v1  ;;  %8453 = vmatprep.subr.bf16.mxu1 %v10183_v3  ;;  %v10235_v29 = vld [vmem:[%s11552_s18 + $0xd00] ss:$8 sps:$4 sm:$0xff]   ;;  %v10240_v1 = vld [vmem:[%s11552_s18 + $0xcf4] ss:$8 sps:$4 sm:$0xff]  }
 0x299   : > { %v10243_v3 = vld [vmem:[%s11552_s18 + $0xdf4] ss:$8 sps:$4 sm:$0xff]  }
 0x29b   : > { %8401 = vmatpush2.bf16.msra.mxu0 %v10178_v6  ;;  %8454 = vmatpush2.bf16.msra.mxu1 %v10181_v5  ;;  %v10238_v6 = vld [vmem:[%s11552_s18 + $0xcf0] ss:$8 sps:$4 sm:$0xff]  }
 0x29c   : > { %8402 = vmatprep.subr.bf16.mxu0 %v10186_v30  ;;  %8455 = vmatprep.subr.bf16.mxu1 %v10189_v31  ;;  %v10241_v5 = vld [vmem:[%s11552_s18 + $0xdf0] ss:$8 sps:$4 sm:$0xff]   ;;  %v10246_v30 = vld [vmem:[%s11552_s18 + $0xce4] ss:$8 sps:$4 sm:$0xff]  }
 0x29d   : > { %v10249_v31 = vld [vmem:[%s11552_s18 + $0xde4] ss:$8 sps:$4 sm:$0xff]  }
 0x29f   : > { %8403 = vmatpush2.bf16.msra.mxu0 %v10184_v32  ;;  %8456 = vmatpush2.bf16.msra.mxu1 %v10187_v33  ;;  %v10244_v32 = vld [vmem:[%s11552_s18 + $0xce0] ss:$8 sps:$4 sm:$0xff]  }
 0x2a0   : > { %8478 = vmatprep.subr.bf16.mxu0 %v10192_v35  ;;  %8531 = vmatprep.subr.bf16.mxu1 %v10195_v36  ;;  %v10247_v33 = vld [vmem:[%s11552_s18 + $0xde0] ss:$8 sps:$4 sm:$0xff]   ;;  %v10252_v35 = vld [vmem:[%s11552_s18 + $0xcd4] ss:$8 sps:$4 sm:$0xff]  }
 0x2a1   : > { %v10255_v36 = vld [vmem:[%s11552_s18 + $0xdd4] ss:$8 sps:$4 sm:$0xff]  }
 0x2a2   : > { %8405 = vmatmul.mubr.bf16.vlgmr.msra.gmra.mxu0 %v8999_v37  ;;  %8458 = vmatmul.mubr.bf16.vlgmr.msra.gmra.mxu1 %v9001_v39  ;;  %v10253_v37 = vld [vmem:[%s11552_s18 + $0xdd0] ss:$8 sps:$4 sm:$0xff]   ;;  %v10258_v39 = vld [vmem:[%s11552_s18 + $0xcc4] ss:$8 sps:$4 sm:$0xff]  }
 0x2a3   : > { %8479 = vmatpush1.bf16.msra.mxu0 %v10190_v14  ;;  %8532 = vmatpush1.bf16.msra.mxu1 %v10193_v56  ;;  %v10264_v14 = vld [vmem:[%s11552_s18 + $0xcb4] ss:$8 sps:$4 sm:$0xff]  }
 0x2a4   : > { %8480 = vmatprep.subr.bf16.mxu0 %v10198_v11  ;;  %8533 = vmatprep.subr.bf16.mxu1 %v10201_v12  ;;  %v10267_v56 = vld [vmem:[%s11552_s18 + $0xdb4] ss:$8 sps:$4 sm:$0xff]   ;;  %v10262_v11 = vld [vmem:[%s11552_s18 + $0xcb0] ss:$8 sps:$4 sm:$0xff]  }
 0x2a5   : > { %8414 = vmatprep.mubr.bf16.mxu0 %v9032_v48  ;;  %8467 = vmatprep.mubr.bf16.mxu1 %v9034_v49  ;;  %v10265_v12 = vld [vmem:[%s11552_s18 + $0xdb0] ss:$8 sps:$4 sm:$0xff]   ;;  %v10270_v48 = vld [vmem:[%s11552_s18 + $0xca4] ss:$8 sps:$4 sm:$0xff]  }
 0x2a6   : > { %v10273_v49 = vld [vmem:[%s11552_s18 + $0xda4] ss:$8 sps:$4 sm:$0xff]  }
 0x2a7   : > { %8481 = vmatpush1.bf16.msra.mxu0 %v10196_v52  ;;  %8534 = vmatpush1.bf16.msra.mxu1 %v10199_v40  ;;  %v10268_v52 = vld [vmem:[%s11552_s18 + $0xca0] ss:$8 sps:$4 sm:$0xff]  }
 0x2a8   : > { %8482 = vmatprep.subr.bf16.mxu0 %v10204_v41  ;;  %8535 = vmatprep.subr.bf16.mxu1 %v10207_v19  ;;  %v10271_v40 = vld [vmem:[%s11552_s18 + $0xda0] ss:$8 sps:$4 sm:$0xff]   ;;  %v10276_v41 = vld [vmem:[%s11552_s18 + $0xc94] ss:$8 sps:$4 sm:$0xff]  }
 0x2a9   : > { %v10279_v19 = vld [vmem:[%s11552_s18 + $0xd94] ss:$8 sps:$4 sm:$0xff]  }
 0x2aa   : > { %8415 = vmatmul.mubr.bf16.gmra.mxu0 %v9031_v22  ;;  %8468 = vmatmul.mubr.bf16.gmra.mxu1 %v9033_v27  ;;  %v10274_v22 = vld [vmem:[%s11552_s18 + $0xc90] ss:$8 sps:$4 sm:$0xff]  }
 0x2ab   : > { %8483 = vmatpush1.bf16.msra.mxu0 %v10202_v54  ;;  %8536 = vmatpush1.bf16.msra.mxu1 %v10205_v55  ;;  %v10277_v27 = vld [vmem:[%s11552_s18 + $0xd90] ss:$8 sps:$4 sm:$0xff]   ;;  %v10282_v54 = vld [vmem:[%s11552_s18 + $0xc84] ss:$8 sps:$4 sm:$0xff]  }
 0x2ac   : > { %8484 = vmatprep.subr.bf16.mxu0 %v10210_v57  ;;  %8537 = vmatprep.subr.bf16.mxu1 %v10213_v59  ;;  %v10285_v55 = vld [vmem:[%s11552_s18 + $0xd84] ss:$8 sps:$4 sm:$0xff]   ;;  %v10280_v57 = vld [vmem:[%s11552_s18 + $0xc80] ss:$8 sps:$4 sm:$0xff]  }
 0x2ad   : > { %8510 = vmatprep.mubr.bf16.mxu0 %v9004_v60  ;;  %8563 = vmatprep.mubr.bf16.mxu1 %v9006_v63  ;;  %v10283_v59 = vld [vmem:[%s11552_s18 + $0xd80] ss:$8 sps:$4 sm:$0xff]   ;;  %v10288_v60 = vld [vmem:[%s11552_s18 + $0xe74] ss:$8 sps:$4 sm:$0xff]  }
 0x2ae   : > { %v10291_v63 = vld [vmem:[%s11552_s18 + $0xf74] ss:$8 sps:$4 sm:$0xff]  }
 0x2af   : > { %8485 = vmatpush1.bf16.msra.mxu0 %v10208_v4  ;;  %8538 = vmatpush1.bf16.msra.mxu1 %v10211_v8  ;;  %v4430_v4 = vld [vmem:[%s12673_s0 + $0x160] sm:$0xff]  ;;  %v9003_v8 = vcombine.low %v12209_v44, %v12214_v28  ;;  %v10286_v44 = vld [vmem:[%s11552_s18 + $0xe70] ss:$8 sps:$4 sm:$0xff]  }
 0x2b0   : > { %8486 = vmatprep.subr.bf16.mxu0 %v10216_v9  ;;  %8539 = vmatprep.subr.bf16.mxu1 %v10219_v10  ;;  %v9005_v9 = vcombine.low %v12219_v45, %v12224_v53  ;;  %v4446_v10 = vld [vmem:[%s12673_s0 + $0x1e0] sm:$0xff]  ;;  %v10289_v28 = vld [vmem:[%s11552_s18 + $0xf70] ss:$8 sps:$4 sm:$0xff]  }
 0x2b1   : > { %v10294_v45 = vld [vmem:[%s11552_s18 + $0xe64] ss:$8 sps:$4 sm:$0xff]  }
 0x2b2   : > { %v10297_v53 = vld [vmem:[%s11552_s18 + $0xf64] ss:$8 sps:$4 sm:$0xff]  }
 0x2b3   : > { %8487 = vmatpush1.bf16.msra.mxu0 %v10214_v58  ;;  %8540 = vmatpush1.bf16.msra.mxu1 %v10217_v61  ;;  %v4431_v58 = vld [vmem:[%s12673_s0 + $0x168] sm:$0xff] }
 0x2b4   : > { %8488 = vmatprep.subr.bf16.mxu0 %v10222_v62  ;;  %8541 = vmatprep.subr.bf16.mxu1 %v10225_v20  ;;  %v4447_v61 = vld [vmem:[%s12673_s0 + $0x1e8] sm:$0xff]  ;;  %v9036_v62 = vcombine.high %v4430_v4, %v4446_v10 }
 0x2b5   : > { %v9038_v20 = vcombine.high %v4431_v58, %v4447_v61 }
 0x2b7   : > { %8489 = vmatpush1.bf16.msra.mxu0 %v10220_v15  ;;  %8542 = vmatpush1.bf16.msra.mxu1 %v10223_v16  ;;  %v10292_v15 = vld [vmem:[%s11552_s18 + $0xe60] ss:$8 sps:$4 sm:$0xff]  }
 0x2b8   : > { %8490 = vmatprep.subr.bf16.mxu0 %v10228_v17  ;;  %8543 = vmatprep.subr.bf16.mxu1 %v10231_v18  ;;  %v10295_v16 = vld [vmem:[%s11552_s18 + $0xf60] ss:$8 sps:$4 sm:$0xff]   ;;  %v10300_v17 = vld [vmem:[%s11552_s18 + $0xe54] ss:$8 sps:$4 sm:$0xff]  }
 0x2b9   : > { %v10303_v18 = vld [vmem:[%s11552_s18 + $0xf54] ss:$8 sps:$4 sm:$0xff]  }
 0x2bb   : > { %8491 = vmatpush1.bf16.msra.mxu0 %v10226_v21  ;;  %8544 = vmatpush1.bf16.msra.mxu1 %v10229_v24  ;;  %v12313_v21 = vld [vmem:[%s12673_s0 + $0x70] sm:$0xff]  ;;  %v9035_v24 = vcombine.low %v4430_v4, %v4446_v10  ;;  %v10357_v10 = vld [vmem:[%s11552_s18 + $0xfc4] ss:$8 sps:$4 sm:$0xff]  }
 0x2bc   : > { %8492 = vmatprep.subr.bf16.mxu0 %v10234_v25  ;;  %8545 = vmatprep.subr.bf16.mxu1 %v10237_v26  ;;  %v9037_v25 = vcombine.low %v4431_v58, %v4447_v61  ;;  %v12318_v26 = vld [vmem:[%s12673_s0 + $0xf0] sm:$0xff]  ;;  %v10352_v58 = vld [vmem:[%s11552_s18 + $0xec0] ss:$8 sps:$4 sm:$0xff]  }
 0x2bd   : > { %v10346_v4 = vld [vmem:[%s11552_s18 + $0xed0] ss:$8 sps:$4 sm:$0xff]   ;;  %v10355_v61 = vld [vmem:[%s11552_s18 + $0xfc0] ss:$8 sps:$4 sm:$0xff]  }
 0x2bf   : > { %8493 = vmatpush1.bf16.msra.mxu0 %v10232_v0  ;;  %8546 = vmatpush1.bf16.msra.mxu1 %v10235_v29  ;;  %v12323_v0 = vld [vmem:[%s12673_s0 + $0x78] sm:$0xff] }
 0x2c0   : > { %8494 = vmatprep.subr.bf16.mxu0 %v10240_v1  ;;  %8547 = vmatprep.subr.bf16.mxu1 %v10243_v3  ;;  %v12328_v29 = vld [vmem:[%s12673_s0 + $0xf8] sm:$0xff] }
 0x2c1   : > { %v10298_v1 = vld [vmem:[%s11552_s18 + $0xe50] ss:$8 sps:$4 sm:$0xff]  }
 0x2c2   : > { %v10301_v3 = vld [vmem:[%s11552_s18 + $0xf50] ss:$8 sps:$4 sm:$0xff]  }
 0x2c3   : > { %8495 = vmatpush2.bf16.msra.mxu0 %v10238_v6  ;;  %8548 = vmatpush2.bf16.msra.mxu1 %v10241_v5  ;;  %v10306_v6 = vld [vmem:[%s11552_s18 + $0xe44] ss:$8 sps:$4 sm:$0xff]  }
 0x2c4   : > { %8496 = vmatprep.subr.bf16.mxu0 %v10246_v30  ;;  %8549 = vmatprep.subr.bf16.mxu1 %v10249_v31  ;;  %v10309_v5 = vld [vmem:[%s11552_s18 + $0xf44] ss:$8 sps:$4 sm:$0xff]   ;;  %v9008_v30 = vcombine.high %v12313_v21, %v12318_v26  ;;  %v9010_v31 = vcombine.high %v12323_v0, %v12328_v29 }
 0x2c7   : > { %8497 = vmatpush2.bf16.msra.mxu0 %v10244_v32  ;;  %8550 = vmatpush2.bf16.msra.mxu1 %v10247_v33  ;;  %v10304_v32 = vld [vmem:[%s11552_s18 + $0xe40] ss:$8 sps:$4 sm:$0xff]  }
 0x2c8   : > { %8498 = vmatprep.subr.bf16.mxu0 %v10252_v35  ;;  %8551 = vmatprep.subr.bf16.mxu1 %v10255_v36  ;;  %v10307_v33 = vld [vmem:[%s11552_s18 + $0xf40] ss:$8 sps:$4 sm:$0xff]   ;;  %v10312_v35 = vld [vmem:[%s11552_s18 + $0xe34] ss:$8 sps:$4 sm:$0xff]  }
 0x2c9   : > { %v10315_v36 = vld [vmem:[%s11552_s18 + $0xf34] ss:$8 sps:$4 sm:$0xff]  }
 0x2cb   : > { %8499 = vmatpush2.bf16.msra.mxu0 %v10250_v38  ;;  %8552 = vmatpush2.bf16.msra.mxu1 %v10253_v37  ;;  %v10310_v38 = vld [vmem:[%s11552_s18 + $0xe30] ss:$8 sps:$4 sm:$0xff]  }
 0x2cc   : > { %8500 = vmatprep.subr.bf16.mxu0 %v10258_v39  ;;  %8553 = vmatprep.subr.bf16.mxu1 %v10261_v43  ;;  %v10313_v37 = vld [vmem:[%s11552_s18 + $0xf30] ss:$8 sps:$4 sm:$0xff]   ;;  %v10318_v39 = vld [vmem:[%s11552_s18 + $0xe24] ss:$8 sps:$4 sm:$0xff]  }
 0x2cd   : > { %v10321_v43 = vld [vmem:[%s11552_s18 + $0xf24] ss:$8 sps:$4 sm:$0xff]  }
 0x2cf   : > { %8501 = vmatpush2.bf16.msra.mxu0 %v10256_v46  ;;  %8554 = vmatpush2.bf16.msra.mxu1 %v10259_v47  ;;  %v10316_v46 = vld [vmem:[%s11552_s18 + $0xe20] ss:$8 sps:$4 sm:$0xff]  }
 0x2d0   : > { %8502 = vmatprep.subr.bf16.mxu0 %v10264_v14  ;;  %8555 = vmatprep.subr.bf16.mxu1 %v10267_v56  ;;  %v10319_v47 = vld [vmem:[%s11552_s18 + $0xf20] ss:$8 sps:$4 sm:$0xff]   ;;  %v10324_v14 = vld [vmem:[%s11552_s18 + $0xe14] ss:$8 sps:$4 sm:$0xff]  }
 0x2d1   : > { %v10327_v56 = vld [vmem:[%s11552_s18 + $0xf14] ss:$8 sps:$4 sm:$0xff]  }
 0x2d3   : > { %8503 = vmatpush2.bf16.msra.mxu0 %v10262_v11  ;;  %8556 = vmatpush2.bf16.msra.mxu1 %v10265_v12  ;;  %v10322_v11 = vld [vmem:[%s11552_s18 + $0xe10] ss:$8 sps:$4 sm:$0xff]  }
 0x2d4   : > { %8504 = vmatprep.subr.bf16.mxu0 %v10270_v48  ;;  %8557 = vmatprep.subr.bf16.mxu1 %v10273_v49  ;;  %v10325_v12 = vld [vmem:[%s11552_s18 + $0xf10] ss:$8 sps:$4 sm:$0xff]   ;;  %v10330_v48 = vld [vmem:[%s11552_s18 + $0xe04] ss:$8 sps:$4 sm:$0xff]  }
 0x2d5   : > { %v10333_v49 = vld [vmem:[%s11552_s18 + $0xf04] ss:$8 sps:$4 sm:$0xff]  }
 0x2d7   : > { %8505 = vmatpush2.bf16.msra.mxu0 %v10268_v52  ;;  %8558 = vmatpush2.bf16.msra.mxu1 %v10271_v40  ;;  %v10328_v52 = vld [vmem:[%s11552_s18 + $0xe00] ss:$8 sps:$4 sm:$0xff]  }
 0x2d8   : > { %8506 = vmatprep.subr.bf16.mxu0 %v10276_v41  ;;  %8559 = vmatprep.subr.bf16.mxu1 %v10279_v19  ;;  %v10331_v40 = vld [vmem:[%s11552_s18 + $0xf00] ss:$8 sps:$4 sm:$0xff]   ;;  %v10336_v41 = vld [vmem:[%s11552_s18 + $0xef4] ss:$8 sps:$4 sm:$0xff]  }
 0x2d9   : > { %v10339_v19 = vld [vmem:[%s11552_s18 + $0xff4] ss:$8 sps:$4 sm:$0xff]  }
 0x2db   : > { %8507 = vmatpush2.bf16.msra.mxu0 %v10274_v22  ;;  %8560 = vmatpush2.bf16.msra.mxu1 %v10277_v27  ;;  %v10334_v22 = vld [vmem:[%s11552_s18 + $0xef0] ss:$8 sps:$4 sm:$0xff]  }
 0x2dc   : > { %8508 = vmatprep.subr.bf16.mxu0 %v10282_v54  ;;  %8561 = vmatprep.subr.bf16.mxu1 %v10285_v55  ;;  %v10337_v27 = vld [vmem:[%s11552_s18 + $0xff0] ss:$8 sps:$4 sm:$0xff]   ;;  %v10342_v54 = vld [vmem:[%s11552_s18 + $0xee4] ss:$8 sps:$4 sm:$0xff]  }
 0x2dd   : > { %v10345_v55 = vld [vmem:[%s11552_s18 + $0xfe4] ss:$8 sps:$4 sm:$0xff]  }
 0x2df   : > { %8509 = vmatpush2.bf16.msra.mxu0 %v10280_v57  ;;  %8562 = vmatpush2.bf16.msra.mxu1 %v10283_v59  ;;  %v10340_v57 = vld [vmem:[%s11552_s18 + $0xee0] ss:$8 sps:$4 sm:$0xff]  }
 0x2e0   : > { %8584 = vmatprep.subr.bf16.mxu0 %v10288_v60  ;;  %8637 = vmatprep.subr.bf16.mxu1 %v10291_v63  ;;  %v10343_v59 = vld [vmem:[%s11552_s18 + $0xfe0] ss:$8 sps:$4 sm:$0xff]   ;;  %v10348_v60 = vld [vmem:[%s11552_s18 + $0xed4] ss:$8 sps:$4 sm:$0xff]  }
 0x2e1   : > { %v10351_v63 = vld [vmem:[%s11552_s18 + $0xfd4] ss:$8 sps:$4 sm:$0xff]  }
 0x2e2   : > { %8511 = vmatmul.mubr.bf16.vlgmr.msra.gmra.mxu0 %v9003_v8  ;;  %8564 = vmatmul.mubr.bf16.vlgmr.msra.gmra.mxu1 %v9005_v9  ;;  %v10349_v8 = vld [vmem:[%s11552_s18 + $0xfd0] ss:$8 sps:$4 sm:$0xff]   ;;  %v10354_v9 = vld [vmem:[%s11552_s18 + $0xec4] ss:$8 sps:$4 sm:$0xff]  }
 0x2e3   : > { %8585 = vmatpush1.bf16.msra.mxu0 %v10286_v44  ;;  %8638 = vmatpush1.bf16.msra.mxu1 %v10289_v28  ;;  %v10360_v44 = vld [vmem:[%s11552_s18 + $0xeb4] ss:$8 sps:$4 sm:$0xff]  }
 0x2e4   : > { %8586 = vmatprep.subr.bf16.mxu0 %v10294_v45  ;;  %8639 = vmatprep.subr.bf16.mxu1 %v10297_v53  ;;  %v10363_v28 = vld [vmem:[%s11552_s18 + $0xfb4] ss:$8 sps:$4 sm:$0xff]   ;;  %v10358_v45 = vld [vmem:[%s11552_s18 + $0xeb0] ss:$8 sps:$4 sm:$0xff]  }
 0x2e5   : > { %8520 = vmatprep.mubr.bf16.mxu0 %v9036_v62  ;;  %8573 = vmatprep.mubr.bf16.mxu1 %v9038_v20  ;;  %v10361_v53 = vld [vmem:[%s11552_s18 + $0xfb0] ss:$8 sps:$4 sm:$0xff]   ;;  %v10366_v62 = vld [vmem:[%s11552_s18 + $0xea4] ss:$8 sps:$4 sm:$0xff]  }
 0x2e6   : > { %v10369_v20 = vld [vmem:[%s11552_s18 + $0xfa4] ss:$8 sps:$4 sm:$0xff]  }
 0x2e7   : > { %8587 = vmatpush1.bf16.msra.mxu0 %v10292_v15  ;;  %8640 = vmatpush1.bf16.msra.mxu1 %v10295_v16  ;;  %v10364_v15 = vld [vmem:[%s11552_s18 + $0xea0] ss:$8 sps:$4 sm:$0xff]  }
 0x2e8   : > { %8588 = vmatprep.subr.bf16.mxu0 %v10300_v17  ;;  %8641 = vmatprep.subr.bf16.mxu1 %v10303_v18  ;;  %v10367_v16 = vld [vmem:[%s11552_s18 + $0xfa0] ss:$8 sps:$4 sm:$0xff]   ;;  %v10372_v17 = vld [vmem:[%s11552_s18 + $0xe94] ss:$8 sps:$4 sm:$0xff]  }
 0x2e9   : > { %v10375_v18 = vld [vmem:[%s11552_s18 + $0xf94] ss:$8 sps:$4 sm:$0xff]  }
 0x2ea   : > { %8521 = vmatmul.mubr.bf16.gmra.mxu0 %v9035_v24  ;;  %8574 = vmatmul.mubr.bf16.gmra.mxu1 %v9037_v25  ;;  %v10370_v24 = vld [vmem:[%s11552_s18 + $0xe90] ss:$8 sps:$4 sm:$0xff]  }
 0x2eb   : > { %8589 = vmatpush1.bf16.msra.mxu0 %v10298_v1  ;;  %8642 = vmatpush1.bf16.msra.mxu1 %v10301_v3  ;;  %v10373_v25 = vld [vmem:[%s11552_s18 + $0xf90] ss:$8 sps:$4 sm:$0xff]   ;;  %v10378_v1 = vld [vmem:[%s11552_s18 + $0xe84] ss:$8 sps:$4 sm:$0xff]  }
 0x2ec   : > { %8590 = vmatprep.subr.bf16.mxu0 %v10306_v6  ;;  %8643 = vmatprep.subr.bf16.mxu1 %v10309_v5  ;;  %v10381_v3 = vld [vmem:[%s11552_s18 + $0xf84] ss:$8 sps:$4 sm:$0xff]   ;;  %v10376_v6 = vld [vmem:[%s11552_s18 + $0xe80] ss:$8 sps:$4 sm:$0xff]  }
 0x2ed   : > { %8616 = vmatprep.mubr.bf16.mxu0 %v9008_v30  ;;  %8669 = vmatprep.mubr.bf16.mxu1 %v9010_v31  ;;  %v10379_v5 = vld [vmem:[%s11552_s18 + $0xf80] ss:$8 sps:$4 sm:$0xff]   ;;  %v4432_v30 = vld [vmem:[%s12673_s0 + $0x170] sm:$0xff]  ;;  %s8977_s18 = sshll.u32 %s11521_s30, 6  ;;  %s12622_s30 = scalar_lea.vmem [#allocation4], %s8978_s7 }
 0x2ee   : > { %v4448_v31 = vld [vmem:[%s12673_s0 + $0x1f0] sm:$0xff]  ;;  %s12617_s8 = scalar_lea.vmem [#allocation3], %s8977_s18 }
 0x2ef   : > { %8591 = vmatpush1.bf16.msra.mxu0 %v10304_v32  ;;  %8644 = vmatpush1.bf16.msra.mxu1 %v10307_v33  ;;  %v4433_v32 = vld [vmem:[%s12673_s0 + $0x178] sm:$0xff] }
 0x2f0   : > { %8592 = vmatprep.subr.bf16.mxu0 %v10312_v35  ;;  %8645 = vmatprep.subr.bf16.mxu1 %v10315_v36  ;;  %v4449_v33 = vld [vmem:[%s12673_s0 + $0x1f8] sm:$0xff]  ;;  %v9007_v35 = vcombine.low %v12313_v21, %v12318_v26  ;;  %v9009_v36 = vcombine.low %v12323_v0, %v12328_v29  ;;  %v12410_v26 = vpop.f32.mrf.mxu1 }
 0x2f2   : > { %v12414_v29 = vpop.f32.mrf.mxu1 }
 0x2f3   : > { %8593 = vmatpush1.bf16.msra.mxu0 %v10310_v38  ;;  %8646 = vmatpush1.bf16.msra.mxu1 %v10313_v37  ;;  %v9040_v38 = vcombine.high %v4432_v30, %v4448_v31  ;;  %v9042_v37 = vcombine.high %v4433_v32, %v4449_v33 }
 0x2f4   : > { %8594 = vmatprep.subr.bf16.mxu0 %v10318_v39  ;;  %8647 = vmatprep.subr.bf16.mxu1 %v10321_v43  ;;  %v9039_v39 = vcombine.low %v4432_v30, %v4448_v31  ;;  %v9041_v43 = vcombine.low %v4433_v32, %v4449_v33 }
 0x2f7   : > { %8595 = vmatpush1.bf16.msra.mxu0 %v10316_v46  ;;  %8648 = vmatpush1.bf16.msra.mxu1 %v10319_v47  ;;  %v12404_v46 = vpop.f32.mrf.mxu0 }
 0x2f8   : > { %8596 = vmatprep.subr.bf16.mxu0 %v10324_v14  ;;  %8649 = vmatprep.subr.bf16.mxu1 %v10327_v56  ;;  %v12418_v56 = vpop.f32.mrf.mxu1 }
 0x2f9   : > { %v12406_v47 = vpop.f32.mrf.mxu0 }
 0x2fb   : > { %8597 = vmatpush1.bf16.msra.mxu0 %v10322_v11  ;;  %8650 = vmatpush1.bf16.msra.mxu1 %v10325_v12  ;;  %v12408_v21 = vpop.f32.mrf.mxu0  ;;  %v12422_v12 = vpop.f32.mrf.mxu1 }
 0x2fc   : > { %8598 = vmatprep.subr.bf16.mxu0 %v10330_v48  ;;  %8651 = vmatprep.subr.bf16.mxu1 %v10333_v49 }
 0x2fd   : > { %v12412_v0 = vpop.f32.mrf.mxu0  ;;  %v12424_v48 = vpop.f32.mrf.mxu1 }
 0x2ff   : > { %8599 = vmatpush1.bf16.msra.mxu0 %v10328_v52  ;;  %8652 = vmatpush1.bf16.msra.mxu1 %v10331_v40  ;;  %v12416_v14 = vpop.f32.mrf.mxu0  ;;  %v12428_v52 = vpop.f32.mrf.mxu1 }
 0x300   : > { %8600 = vmatprep.subr.bf16.mxu0 %v10336_v41  ;;  %8653 = vmatprep.subr.bf16.mxu1 %v10339_v19 }
 0x301   : > { %v12420_v11 = vpop.f32.mrf.mxu0  ;;  %v12432_v19 = vpop.f32.mrf.mxu1 }
 0x303   : > { %8601 = vmatpush2.bf16.msra.mxu0 %v10334_v22  ;;  %8654 = vmatpush2.bf16.msra.mxu1 %v10337_v27  ;;  %v12426_v49 = vpop.f32.mrf.mxu0  ;;  %v12434_v27 = vpop.f32.mrf.mxu1 }
 0x304   : > { %8602 = vmatprep.subr.bf16.mxu0 %v10342_v54  ;;  %8655 = vmatprep.subr.bf16.mxu1 %v10345_v55 }
 0x305   : > { %v12430_v40 = vpop.f32.mrf.mxu0  ;;  %v12436_v54 = vpop.f32.mrf.mxu1 }
 0x307   : > { %8603 = vmatpush2.bf16.msra.mxu0 %v10340_v57  ;;  %8656 = vmatpush2.bf16.msra.mxu1 %v10343_v59  ;;  %v8194_v41 = vpop.f32.mrf.mxu0  ;;  %v12440_v57 = vpop.f32.mrf.mxu1 }
 0x308   : > { %8604 = vmatprep.subr.bf16.mxu0 %v10348_v60  ;;  %8657 = vmatprep.subr.bf16.mxu1 %v10351_v63 }
 0x309   : > { %v8196_v22 = vpop.f32.mrf.mxu0  ;;  %v12444_v60 = vpop.f32.mrf.mxu1 }
 0x30b   : > { %8605 = vmatpush2.bf16.msra.mxu0 %v10346_v4  ;;  %8658 = vmatpush2.bf16.msra.mxu1 %v10349_v8  ;;  %v12438_v55 = vpop.f32.mrf.mxu0  ;;  %v12448_v4 = vpop.f32.mrf.mxu1 }
 0x30c   : > { %8606 = vmatprep.subr.bf16.mxu0 %v10354_v9  ;;  %8659 = vmatprep.subr.bf16.mxu1 %v10357_v10 }
 0x30d   : > { %v12442_v59 = vpop.f32.mrf.mxu0  ;;  %v12452_v9 = vpop.f32.mrf.mxu1 }
 0x30f   : > { %8607 = vmatpush2.bf16.msra.mxu0 %v10352_v58  ;;  %8660 = vmatpush2.bf16.msra.mxu1 %v10355_v61  ;;  %v12446_v63 = vpop.f32.mrf.mxu0  ;;  %v12456_v58 = vpop.f32.mrf.mxu1 }
 0x310   : > { %8608 = vmatprep.subr.bf16.mxu0 %v10360_v44  ;;  %8661 = vmatprep.subr.bf16.mxu1 %v10363_v28 }
 0x311   : > { %v12450_v8 = vpop.f32.mrf.mxu0  ;;  %v12460_v44 = vpop.f32.mrf.mxu1 }
 0x313   : > { %8609 = vmatpush2.bf16.msra.mxu0 %v10358_v45  ;;  %8662 = vmatpush2.bf16.msra.mxu1 %v10361_v53  ;;  %v12454_v10 = vpop.f32.mrf.mxu0  ;;  %v12462_v45 = vpop.f32.mrf.mxu1 }
 0x314   : > { %8610 = vmatprep.subr.bf16.mxu0 %v10366_v62  ;;  %8663 = vmatprep.subr.bf16.mxu1 %v10369_v20 }
 0x315   : > { %v12458_v61 = vpop.f32.mrf.mxu0 }
 0x317   : > { %8611 = vmatpush2.bf16.msra.mxu0 %v10364_v15  ;;  %8664 = vmatpush2.bf16.msra.mxu1 %v10367_v16 }
 0x318   : > { %8612 = vmatprep.subr.bf16.mxu0 %v10372_v17  ;;  %8665 = vmatprep.subr.bf16.mxu1 %v10375_v18 }
 0x31b   : > { %8613 = vmatpush2.bf16.msra.mxu0 %v10370_v24  ;;  %8666 = vmatpush2.bf16.msra.mxu1 %v10373_v25 }
 0x31c   : > { %8614 = vmatprep.subr.bf16.mxu0 %v10378_v1  ;;  %8667 = vmatprep.subr.bf16.mxu1 %v10381_v3 }
 0x31f   : > { %8615 = vmatpush2.bf16.msra.mxu0 %v10376_v6  ;;  %8668 = vmatpush2.bf16.msra.mxu1 %v10379_v5 }
 0x322   : > { %8617 = vmatmul.mubr.bf16.vlgmr.msra.gmra.mxu0 %v9007_v35  ;;  %8670 = vmatmul.mubr.bf16.vlgmr.msra.gmra.mxu1 %v9009_v36  ;;  %v8300_v28 = vpop.f32.mrf.mxu0  ;;  %v12464_v62 = vpop.f32.mrf.mxu1 }
 0x323   : > { %8626 = vmatprep.mubr.bf16.mxu0 %v9040_v38  ;;  %8679 = vmatprep.mubr.bf16.mxu1 %v9042_v37 }
 0x324   : > { %v8302_v53 = vpop.f32.mrf.mxu0  ;;  %v12468_v15 = vpop.f32.mrf.mxu1 }
 0x326   : > { %v12466_v20 = vpop.f32.mrf.mxu0  ;;  %v12472_v17 = vpop.f32.mrf.mxu1 }
 0x328   : > { %v12470_v16 = vpop.f32.mrf.mxu0  ;;  %v12476_v24 = vpop.f32.mrf.mxu1 }
 0x32a   : > { %8627 = vmatmul.mubr.bf16.gmra.mxu0 %v9039_v39  ;;  %8680 = vmatmul.mubr.bf16.gmra.mxu1 %v9041_v43  ;;  %v12474_v18 = vpop.f32.mrf.mxu0  ;;  %v12480_v1 = vpop.f32.mrf.mxu1 }
 0x32b   : > { %12679 = vst [vmem:[#allocation6_spill] sm:$0xff] %v12480_v1 }
 0x32c   : > { %v12478_v25 = vpop.f32.mrf.mxu0  ;;  %v12484_v6 = vpop.f32.mrf.mxu1 }
 0x32d   : > { %12678 = vst [vmem:[#allocation5_spill] sm:$0xff] %v12478_v25  ;;  %12681 = vst [vmem:[#allocation8_spill] sm:$0xff] %v12484_v6 }
 0x32e   : > { %v12482_v3 = vpop.f32.mrf.mxu0  ;;  %v12488_v30 = vpop.f32.mrf.mxu1 }
 0x32f   : > { %12680 = vst [vmem:[#allocation7_spill] sm:$0xff] %v12482_v3  ;;  %12683 = vst [vmem:[#allocation10_spill] sm:$0xff] %v12488_v30 }
 0x330   : > { %v12486_v5 = vpop.f32.mrf.mxu0  ;;  %v12490_v32 = vpop.f32.mrf.mxu1 }
 0x331   : > { %12682 = vst [vmem:[#allocation9_spill] sm:$0xff] %v12486_v5  ;;  %12684 = vst [vmem:[#allocation11_spill] sm:$0xff] %v12490_v32 }
 0x362   : > { %v8406_v31 = vpop.f32.mrf.mxu0  ;;  %v12492_v33 = vpop.f32.mrf.mxu1 }
 0x364   : > { %v12494_v35 = vpop.f32.mrf.mxu0  ;;  %v12496_v36 = vpop.f32.mrf.mxu1 }
 0x365   : > { %12685 = vst [vmem:[#allocation12_spill] sm:$0xff] %v12496_v36 }
 0x366   : > { %v12498_v38 = vpop.f32.mrf.mxu0  ;;  %v12500_v37 = vpop.f32.mrf.mxu1 }
 0x367   : > { %12686 = vst [vmem:[#allocation13_spill] sm:$0xff] %v12500_v37 }
 0x368   : > { %v12502_v39 = vpop.f32.mrf.mxu0  ;;  %v12504_v43 = vpop.f32.mrf.mxu1 }
 0x369   : > { %12687 = vst [vmem:[#allocation14_spill] sm:$0xff] %v12504_v43  ;;  %v8089_v43 = vadd.f32 %v12404_v46, %v12079_v7  ;;  %v8099_v46 = vadd.f32 %v12416_v14, %v12124_v34  ;;  %v8103_v34 = vadd.f32 %v12426_v49, %v12134_v51 }
 0x36a   : > { %v12506_v6 = vpop.f32.mrf.mxu0  ;;  %v12508_v30 = vpop.f32.mrf.mxu1 }
 0x36b   : > { %12688 = vst [vmem:[#allocation15_spill] sm:$0xff] %v12506_v6  ;;  %12689 = vst [vmem:[#allocation16_spill] sm:$0xff] %v12508_v30  ;;  %v8091_v30 = vadd.f32 %v12406_v47, %v12104_v13  ;;  %v8156_v51 = vadd.f32 %v12432_v19, %v8103_v34 }
 0x36c   : > { %v12510_v5 = vpop.f32.mrf.mxu0  ;;  %v12512_v32 = vpop.f32.mrf.mxu1 }
 0x36d   : > { %12690 = vst [vmem:[#allocation17_spill] sm:$0xff] %v12510_v5  ;;  %12691 = vst [vmem:[#allocation18_spill] sm:$0xff] %v12512_v32  ;;  %v8142_v32 = vadd.f32 %v12410_v26, %v8089_v43  ;;  %v12699_v43 = vld [vmem:[#allocation7_spill] sm:$0xff] }
 0x36e   : > { %v12514_v3 = vpop.f32.mrf.mxu0  ;;  %v12516_v1 = vpop.f32.mrf.mxu1 }
 0x36f   : > { %12692 = vst [vmem:[#allocation19_spill] sm:$0xff] %v12514_v3  ;;  %12693 = vst [vmem:[#allocation20_spill] sm:$0xff] %v12516_v1  ;;  %v8093_v1 = vadd.f32 %v12408_v21, %v12109_v23  ;;  %v8095_v3 = vadd.f32 %v12412_v0, %v12118_v2  ;;  %v8195_v7 = vadd.f32 %v8194_v41, %v8142_v32 }
 0x370   : > { %v12518_v36 = vpop.f32.mrf.mxu0  ;;  %v12520_v25 = vpop.f32.mrf.mxu1  ;;  %v8101_v2 = vadd.f32 %v12420_v11, %v12129_v42  ;;  %v8152_v0 = vadd.f32 %v12424_v48, %v8099_v46  ;;  %v12700_v46 = vld [vmem:[#allocation12_spill] sm:$0xff] }
 0x371   : > { %12694 = vst [vmem:[#allocation21_spill] sm:$0xff] %v12518_v36  ;;  %12695 = vst [vmem:[#allocation22_spill] sm:$0xff] %v12520_v25  ;;  %v8144_v25 = vadd.f32 %v12414_v29, %v8091_v30  ;;  %v8146_v13 = vadd.f32 %v12418_v56, %v8093_v1  ;;  %v8148_v23 = vadd.f32 %v12422_v12, %v8095_v3 }
 0x372   : > { %v8248_v21 = vadd.f32 %v12436_v54, %v8195_v7  ;;  %v8105_v12 = vadd.f32 %v12430_v40, %v12136_v50  ;;  %v8205_v54 = vadd.f32 %v12446_v63, %v8152_v0  ;;  %v8154_v48 = vadd.f32 %v12428_v52, %v8101_v2  ;;  %v12705_v0 = vld [vmem:[#allocation10_spill] sm:$0xff] }
 0x373   : > { %v8197_v47 = vadd.f32 %v8196_v22, %v8144_v25  ;;  %v8199_v29 = vadd.f32 %v12438_v55, %v8146_v13  ;;  %v8201_v41 = vadd.f32 %v12442_v59, %v8148_v23  ;;  %v12701_v13 = vld [vmem:[#allocation9_spill] sm:$0xff] }
 0x374   : > { %v8301_v22 = vadd.f32 %v8300_v28, %v8248_v21  ;;  %v8158_v40 = vadd.f32 %v12434_v27, %v8105_v12  ;;  %v8207_v63 = vadd.f32 %v12450_v8, %v8154_v48  ;;  %v8209_v28 = vadd.f32 %v12454_v10, %v8156_v51  ;;  %v12703_v23 = vld [vmem:[#allocation13_spill] sm:$0xff] }
 0x375   : > { %v8250_v56 = vadd.f32 %v12440_v57, %v8197_v47  ;;  %v8252_v42 = vadd.f32 %v12444_v60, %v8199_v29  ;;  %v8254_v57 = vadd.f32 %v12448_v4, %v8201_v41  ;;  %v8258_v60 = vadd.f32 %v12452_v9, %v8205_v54  ;;  %v12702_v47 = vld [vmem:[#allocation15_spill] sm:$0xff]  ;;  %v12704_v29 = vld [vmem:[#allocation8_spill] sm:$0xff]  ;;  %v12709_v48 = vld [vmem:[#allocation17_spill] sm:$0xff] }
 0x376   : > { %v8354_v59 = vadd.f32 %v12464_v62, %v8301_v22  ;;  %v8211_v1 = vadd.f32 %v12458_v61, %v8158_v40  ;;  %v8260_v9 = vadd.f32 %v12456_v58, %v8207_v63  ;;  %v8262_v10 = vadd.f32 %v12460_v44, %v8209_v28  ;;  %v12706_v22 = vld [vmem:[#allocation14_spill] sm:$0xff] }
 0x377   : > { %v8303_v11 = vadd.f32 %v8302_v53, %v8250_v56  ;;  %v8305_v50 = vadd.f32 %v12466_v20, %v8252_v42  ;;  %v8307_v19 = vadd.f32 %v12470_v16, %v8254_v57  ;;  %v8311_v4 = vadd.f32 %v12474_v18, %v8258_v60  ;;  %v12697_v18 = vld [vmem:[#allocation5_spill] sm:$0xff]  ;;  %v12708_v42 = vld [vmem:[#allocation11_spill] sm:$0xff]  ;;  %v12710_v57 = vld [vmem:[#allocation16_spill] sm:$0xff] }
 0x378   : > { %v8407_v53 = vadd.f32 %v8406_v31, %v8354_v59  ;;  %v8264_v61 = vadd.f32 %v12462_v45, %v8211_v1  ;;  %v8313_v30 = vadd.f32 %v12697_v18, %v8260_v9  ;;  %v12698_v31 = vld [vmem:[#allocation6_spill] sm:$0xff] }
 0x379   : > { %v8356_v52 = vadd.f32 %v12468_v15, %v8303_v11  ;;  %v8358_v27 = vadd.f32 %v12472_v17, %v8305_v50  ;;  %v8360_v20 = vadd.f32 %v12476_v24, %v8307_v19  ;;  %v8364_v32 = vadd.f32 %v12698_v31, %v8311_v4  ;;  %v12712_v19 = vld [vmem:[#allocation21_spill] sm:$0xff] }
 0x37a   : > { %v8460_v15 = vadd.f32 %v12492_v33, %v8407_v53  ;;  %v8315_v17 = vadd.f32 %v12699_v43, %v8262_v10  ;;  %v8317_v33 = vadd.f32 %v12701_v13, %v8264_v61  ;;  %v8366_v2 = vadd.f32 %v12704_v29, %v8313_v30  ;;  %v12713_v10 = vld [vmem:[#allocation18_spill] sm:$0xff] }
 0x37b   : > { %v8409_v8 = vadd.f32 %v12494_v35, %v8356_v52  ;;  %v8411_v16 = vadd.f32 %v12498_v38, %v8358_v27  ;;  %v8413_v44 = vadd.f32 %v12502_v39, %v8360_v20  ;;  %v8417_v38 = vadd.f32 %v12702_v47, %v8364_v32 }
 0x37c   : > { %v8368_v34 = vadd.f32 %v12705_v0, %v8315_v17  ;;  %v8370_v11 = vadd.f32 %v12708_v42, %v8317_v33  ;;  %v8419_v51 = vadd.f32 %v12709_v48, %v8366_v2 }
 0x37d   : > { %v8462_v58 = vadd.f32 %v12700_v46, %v8409_v8  ;;  %v8464_v45 = vadd.f32 %v12703_v23, %v8411_v16  ;;  %v8466_v12 = vadd.f32 %v12706_v22, %v8413_v44  ;;  %v8470_v59 = vadd.f32 %v12710_v57, %v8417_v38 }
 0x37e   : > { %v8423_v53 = vadd.f32 %v12712_v19, %v8370_v11  ;;  %v8472_v20 = vadd.f32 %v12713_v10, %v8419_v51 }
 0x3a2   : > { %v12522_v37 = vpop.f32.mrf.mxu0  ;;  %v12526_v6 = vpop.f32.mrf.mxu1 }
 0x3a3   : > { %12696 = vst [vmem:[#allocation23_spill] sm:$0xff] %v12526_v6  ;;  %v8513_v24 = vadd.f32 %v12522_v37, %v8460_v15  ;;  %v12714_v15 = vld [vmem:[#allocation20_spill] sm:$0xff] }
 0x3a4   : > { %v12530_v5 = vpop.f32.mrf.mxu0  ;;  %v12535_v36 = vpop.f32.mrf.mxu1 }
 0x3a5   : > { %v8515_v21 = vadd.f32 %v12530_v5, %v8462_v58  ;;  %v12711_v5 = vld [vmem:[#allocation19_spill] sm:$0xff] }
 0x3a6   : > { %v12542_v6 = vpop.f32.mrf.mxu0  ;;  %v12545_v26 = vpop.f32.mrf.mxu1  ;;  %v8421_v50 = vadd.f32 %v12711_v5, %v8368_v34 }
 0x3a7   : > { %v8517_v37 = vadd.f32 %v12542_v6, %v8464_v45  ;;  %v8568_v60 = vadd.f32 %v12535_v36, %v8515_v21 }
 0x3a8   : > { %v8518_v14 = vpop.f32.mrf.mxu0  ;;  %v12560_v55 = vpop.f32.mrf.mxu1  ;;  %v8474_v16 = vadd.f32 %v12714_v15, %v8421_v50 }
 0x3a9   : > { %v8519_v28 = vadd.f32 %v8518_v14, %v8466_v12  ;;  %v8570_v6 = vadd.f32 %v12545_v26, %v8517_v37 }
 0x3aa   : > { %v8522_v49 = vpop.f32.mrf.mxu0  ;;  %v12565_v25 = vpop.f32.mrf.mxu1  ;;  %v12707_v54 = vld [vmem:[#allocation23_spill] sm:$0xff] }
 0x3ab   : > { %v8566_v39 = vadd.f32 %v12707_v54, %v8513_v24  ;;  %v8523_v1 = vadd.f32 %v8522_v49, %v8470_v59  ;;  %v8572_v36 = vadd.f32 %v12560_v55, %v8519_v28  ;;  %v12715_v49 = vld [vmem:[#allocation22_spill] sm:$0xff] }
 0x3ac   : > { %v8524_v62 = vpop.f32.mrf.mxu0  ;;  %v12578_v3 = vpop.f32.mrf.mxu1  ;;  %v8476_v32 = vadd.f32 %v12715_v49, %v8423_v53 }
 0x3ad   : > { %v8525_v43 = vadd.f32 %v8524_v62, %v8472_v20  ;;  %v8576_v26 = vadd.f32 %v12565_v25, %v8523_v1 }
 0x3ae   : > { %v8526_v7 = vpop.f32.mrf.mxu0  ;;  %v8579_v35 = vpop.f32.mrf.mxu1 }
 0x3af   : > { %v8527_v17 = vadd.f32 %v8526_v7, %v8474_v16  ;;  %v8578_v7 = vadd.f32 %v12578_v3, %v8525_v43 }
 0x3b0   : > { %v8528_v56 = vpop.f32.mrf.mxu0  ;;  %v8581_v41 = vpop.f32.mrf.mxu1 }
 0x3b1   : > { %v8529_v47 = vadd.f32 %v8528_v56, %v8476_v32  ;;  %v8580_v21 = vadd.f32 %v8579_v35, %v8527_v17 }
 0x3b3   : > { %v8582_v37 = vadd.f32 %v8581_v41, %v8529_v47 }
 0x3e2   : > { %v8618_v40 = vpop.f32.mrf.mxu0  ;;  %v8671_v63 = vpop.f32.mrf.mxu1 }
 0x3e3   : > { %v8619_v52 = vadd.f32 %v8618_v40, %v8566_v39 }
 0x3e4   : > { %v8620_v4 = vpop.f32.mrf.mxu0  ;;  %v8673_v27 = vpop.f32.mrf.mxu1 }
 0x3e5   : > { %v8672_v8 = vadd.f32 %v8671_v63, %v8619_v52  ;;  %v8621_v9 = vadd.f32 %v8620_v4, %v8568_v60 }
 0x3e6   : > { %v8622_v61 = vpop.f32.mrf.mxu0  ;;  %v8675_v18 = vpop.f32.mrf.mxu1 }
 0x3e7   : > { %v8690_v14 = vmul.f32 0.2, %v8672_v8  ;;  %v8674_v30 = vadd.f32 %v8673_v27, %v8621_v9  ;;  %v8623_v31 = vadd.f32 %v8622_v61, %v8570_v6 }
 0x3e8   : > { %v8624_v46 = vpop.f32.mrf.mxu0  ;;  %v8677_v58 = vpop.f32.mrf.mxu1 }
 0x3e9   : > { %v8698_v44 = vmax.f32 %v8672_v8, %v8690_v14  ;;  %v8691_v24 = vmul.f32 0.2, %v8674_v30  ;;  %v8676_v13 = vadd.f32 %v8675_v18, %v8623_v31  ;;  %v8625_v33 = vadd.f32 %v8624_v46, %v8572_v36 }
 0x3ea   : > { %v8628_v38 = vpop.f32.mrf.mxu0  ;;  %v8681_v23 = vpop.f32.mrf.mxu1 }
 0x3eb   : > { %8706 = vst [vmem:[%s12617_s8] sm:$0xff] %v8698_v44  ;;  %v8699_v55 = vmax.f32 %v8674_v30, %v8691_v24  ;;  %v8692_v62 = vmul.f32 0.2, %v8676_v13  ;;  %v8678_v45 = vadd.f32 %v8677_v58, %v8625_v33  ;;  %v8629_v25 = vadd.f32 %v8628_v38, %v8576_v26 }
 0x3ec   : > { %v8630_v29 = vpop.f32.mrf.mxu0  ;;  %v8683_v2 = vpop.f32.mrf.mxu1 }
 0x3ed   : > { %8707 = vst [vmem:[%s12617_s8 + $0x8] sm:$0xff] %v8699_v55  ;;  %v9568_v0 = vpack.c.bf16 %v8699_v55, %v8698_v44  ;;  %v8700_v34 = vmax.f32 %v8676_v13, %v8692_v62  ;;  %v8693_v56 = vmul.f32 0.2, %v8678_v45  ;;  %v8682_v22 = vadd.f32 %v8681_v23, %v8629_v25 }
 0x3ee   : > { %v8631_v12 = vadd.f32 %v8630_v29, %v8578_v7  ;;  %v8632_v54 = vpop.f32.mrf.mxu0  ;;  %v8685_v39 = vpop.f32.mrf.mxu1 }
 0x3ef   : > { %8738 = vst [vmem:[%s12622_s30] sm:$0xff] %v9568_v0  ;;  %8708 = vst [vmem:[%s12617_s8 + $0x10] sm:$0xff] %v8700_v34  ;;  %v8701_v3 = vmax.f32 %v8678_v45, %v8693_v56  ;;  %v8694_v35 = vmul.f32 0.2, %v8682_v22  ;;  %v8633_v42 = vadd.f32 %v8632_v54, %v8580_v21 }
 0x3f0   : > { %v8684_v11 = vadd.f32 %v8683_v2, %v8631_v12  ;;  %v8634_v48 = vpop.f32.mrf.mxu0  ;;  %v8687_v50 = vpop.f32.mrf.mxu1 }
 0x3f1   : > { %8709 = vst [vmem:[%s12617_s8 + $0x18] sm:$0xff] %v8701_v3  ;;  %v9569_v51 = vpack.c.bf16 %v8701_v3, %v8700_v34  ;;  %v8702_v57 = vmax.f32 %v8682_v22, %v8694_v35  ;;  %v8686_v59 = vadd.f32 %v8685_v39, %v8633_v42  ;;  %v8635_v41 = vadd.f32 %v8634_v48, %v8582_v37 }
 0x3f2   : > { %v8695_v5 = vmul.f32 0.2, %v8684_v11  ;;  %v8771_v4 = vld [vmem:[%s12617_s8] sm:$0xff] (%p10477_p6) }
 0x3f3   : > { %8739 = vst [vmem:[%s12622_s30 + $0x8] sm:$0xff] %v9569_v51  ;;  %8710 = vst [vmem:[%s12617_s8 + $0x20] sm:$0xff] %v8702_v57  ;;  %v8696_v40 = vmul.f32 0.2, %v8686_v59  ;;  %v8688_v63 = vadd.f32 %v8687_v50, %v8635_v41 }
 0x3f4   : > { %v8703_v60 = vmax.f32 %v8684_v11, %v8695_v5  ;;  %v8773_v27 = vld [vmem:[%s12617_s8 + $0x8] sm:$0xff] (%p10477_p6)  ;;  %8772 = vst [vmem:[%s8758_s12] sm:$0xff] (%p10477_p6), %v8771_v4 }
 0x3f5   : > { %v8704_v28 = vmax.f32 %v8686_v59, %v8696_v40  ;;  %v8697_v52 = vmul.f32 0.2, %v8688_v63  ;;  %8774 = vst [vmem:[%s8758_s12 + $0x8] sm:$0xff] (%p10477_p6), %v8773_v27 }
 0x3f6   : > { %8711 = vst [vmem:[%s12617_s8 + $0x28] sm:$0xff] %v8703_v60  ;;  %v9570_v19 = vpack.c.bf16 %v8703_v60, %v8702_v57  ;;  %v8775_v6 = vld [vmem:[%s12617_s8 + $0x10] sm:$0xff] (%p10477_p6) }
 0x3f7   : > { %8712 = vst [vmem:[%s12617_s8 + $0x30] sm:$0xff] %v8704_v28  ;;  %v8705_v53 = vmax.f32 %v8688_v63, %v8697_v52  ;;  %8752 = sbr.rel (!%p10477_p6) target bundleno = 1026 (0x402), region = 84  ;;  %8776 = vst [vmem:[%s8758_s12 + $0x20] sm:$0xff] (%p10477_p6), %v8775_v6 }
 0x3f8   : > { %8740 = vst [vmem:[%s12622_s30 + $0x10] sm:$0xff] %v9570_v19  ;;  %v8777_v8 = vld [vmem:[%s12617_s8 + $0x18] sm:$0xff] (%p10477_p6) }
 0x3f9   : > { %8713 = vst [vmem:[%s12617_s8 + $0x38] sm:$0xff] %v8705_v53  ;;  %v9571_v1 = vpack.c.bf16 %v8705_v53, %v8704_v28  ;;  %8778 = vst [vmem:[%s8758_s12 + $0x28] sm:$0xff] (%p10477_p6), %v8777_v8 }
 0x3fa   : > { %v8779_v9 = vld [vmem:[%s12617_s8 + $0x20] sm:$0xff] (%p10477_p6) }
 0x3fb   : > { %8741 = vst [vmem:[%s12622_s30 + $0x18] sm:$0xff] %v9571_v1  ;;  %8780 = vst [vmem:[%s8758_s12 + $0x40] sm:$0xff] (%p10477_p6), %v8779_v9 }
 0x3fd   : > { %v8781_v10 = vld [vmem:[%s12617_s8 + $0x28] sm:$0xff] }
 0x3fe   : > { %8782 = vst [vmem:[%s8758_s12 + $0x48] sm:$0xff] %v8781_v10  ;;  %v8783_v20 = vld [vmem:[%s12617_s8 + $0x30] sm:$0xff] }
 0x3ff   : > { %8784 = vst [vmem:[%s8758_s12 + $0x60] sm:$0xff] %v8783_v20 }
 0x400   : > { %v8785_v15 = vld [vmem:[%s12617_s8 + $0x38] sm:$0xff] }
 0x401   : > { %8786 = vst [vmem:[%s8758_s12 + $0x68] sm:$0xff] %v8785_v15 }
 0x402 PF: > { %8792 = sbr.rel (!%p10477_p6) target bundleno = 1034 (0x40a), region = 107  ;;  %s9573_s19 = sshll.u32 (%p10477_p6), %s10412_s14, 3  ;;  %v8833_v16 = vld [vmem:[%s12622_s30] sm:$0xff] (%p10477_p6)  ;;  %v8835_v61 = vld [vmem:[%s12622_s30 + $0x8] sm:$0xff] (%p10477_p6) }
 0x403   : > { %s8798_s24 = scalar_lea.vmem (%p10477_p6), %s12676_s3, %s9573_s19 }
 0x404   : > { %8834 = vst [vmem:[%s8798_s24] sm:$0xff] (%p10477_p6), %v8833_v16  ;;  %8836 = vst [vmem:[%s8798_s24 + $0x10] sm:$0xff] (%p10477_p6), %v8835_v61 }
 0x405   : > { %v8837_v18 = vld [vmem:[%s12622_s30 + $0x10] sm:$0xff] (%p10477_p6) }
 0x406   : > { %8838 = vst [vmem:[%s8798_s24 + $0x20] sm:$0xff] (%p10477_p6), %v8837_v18 }
 0x408   : > { %v8839_v36 = vld [vmem:[%s12622_s30 + $0x18] sm:$0xff] }
 0x409   : > { %8840 = vst [vmem:[%s8798_s24 + $0x30] sm:$0xff] %v8839_v36 }
 0x40a PF: > { %s14_s16 = sadd.s32 1, %s10420_s16   ;;  %s12716_s12 = smov %s10408_s13 }
 0x40b   : > { %p11_p11 = scmp.ge.s32.totalorder %s14_s16, 4   ;;  %s12717_s13 = smov %s10482_s22 }
 0x40c   : > { %s12718_s14 = smov %s10416_s15  ;;  %s12719_s15 = smov %s12721_s17 }
 0x40d   :  { %13 = sbr.rel (!%p11_p11) target bundleno = 3 (0x3), region = 197 }

// kernel: discriminator_forward.9
= control target key start
LH: loop header
LB: loop body
LE: loop exit
PB: predicated region body
PF: predicated region fallthrough
CT: control target
= control target key end

     0   :  { %s9658_s1 = inlined_call_operand.vmem [shape: bf16[8192,128], index: 1, kind: input, shape index: {}]   ;;  %s9659_s0 = inlined_call_operand.vmem [shape: bf16[16,8192], index: 0, kind: input, shape index: {}]   ;;  %s9660_s2 = inlined_call_operand.vmem [shape: f32[16,128], index: 2, kind: output, shape index: {0}]   ;;  %s9661_s3 = inlined_call_operand.vmem [shape: f32[16,128], index: 3, kind: output, shape index: {1}]  }
   0x1   :  { %v7108_v0 = vld [vmem:[%s9658_s1 + $0x78] sm:$0xff]   ;;  %v7112_v4 = vld [vmem:[%s9658_s1 + $0x70] sm:$0xff]   ;;  %v7116_v8 = vld [vmem:[%s9658_s1 + $0x68] sm:$0xff]  }
   0x2   :  { %v7109_v1 = vld [vmem:[%s9658_s1 + $0xf8] sm:$0xff]   ;;  %6404 = vmatprep.subr.bf16.mxu0 %v7108_v0  ;;  %v7113_v5 = vld [vmem:[%s9658_s1 + $0xf0] sm:$0xff]   ;;  %v7117_v9 = vld [vmem:[%s9658_s1 + $0xe8] sm:$0xff]  }
   0x3   :  { %v7110_v2 = vld [vmem:[%s9658_s1 + $0x38] sm:$0xff]   ;;  %6426 = vmatprep.subr.bf16.mxu1 %v7109_v1  ;;  %v7114_v6 = vld [vmem:[%s9658_s1 + $0x30] sm:$0xff]   ;;  %v7118_v10 = vld [vmem:[%s9658_s1 + $0x28] sm:$0xff]  }
   0x4   :  { %v7111_v3 = vld [vmem:[%s9658_s1 + $0xb8] sm:$0xff]   ;;  %6405 = vmatpush3.bf16.msra.mxu0 %v7110_v2  ;;  %v7115_v7 = vld [vmem:[%s9658_s1 + $0xb0] sm:$0xff]   ;;  %v7119_v11 = vld [vmem:[%s9658_s1 + $0xa8] sm:$0xff]  }
   0x5   :  { %6427 = vmatpush3.bf16.msra.mxu1 %v7111_v3  ;;  %6406 = vmatprep.subr.bf16.mxu0 %v7112_v4  ;;  %v7120_v12 = vld [vmem:[%s9658_s1 + $0x60] sm:$0xff]   ;;  %v7124_v16 = vld [vmem:[%s9658_s1 + $0x58] sm:$0xff]   ;;  %v7128_v20 = vld [vmem:[%s9658_s1 + $0x50] sm:$0xff]  }
   0x6   :  { %6428 = vmatprep.subr.bf16.mxu1 %v7113_v5  ;;  %v7121_v13 = vld [vmem:[%s9658_s1 + $0xe0] sm:$0xff]   ;;  %v7125_v17 = vld [vmem:[%s9658_s1 + $0xd8] sm:$0xff]   ;;  %v7129_v21 = vld [vmem:[%s9658_s1 + $0xd0] sm:$0xff]  }
   0x7   :  { %v7122_v14 = vld [vmem:[%s9658_s1 + $0x20] sm:$0xff]   ;;  %v7126_v18 = vld [vmem:[%s9658_s1 + $0x18] sm:$0xff]   ;;  %v7130_v22 = vld [vmem:[%s9658_s1 + $0x10] sm:$0xff]  }
   0x8   :  { %6407 = vmatpush3.bf16.msra.mxu0 %v7114_v6  ;;  %v7123_v15 = vld [vmem:[%s9658_s1 + $0xa0] sm:$0xff]   ;;  %v7127_v19 = vld [vmem:[%s9658_s1 + $0x98] sm:$0xff]   ;;  %v7131_v23 = vld [vmem:[%s9658_s1 + $0x90] sm:$0xff]  }
   0x9   :  { %6429 = vmatpush3.bf16.msra.mxu1 %v7115_v7  ;;  %6408 = vmatprep.subr.bf16.mxu0 %v7116_v8  ;;  %v7132_v24 = vld [vmem:[%s9658_s1 + $0x48] sm:$0xff]   ;;  %v7136_v28 = vld [vmem:[%s9658_s1 + $0x40] sm:$0xff]   ;;  %v7140_v40 = vld [vmem:[%s9658_s1 + $0x178] sm:$0xff]  }
   0xa   :  { %6430 = vmatprep.subr.bf16.mxu1 %v7117_v9  ;;  %v7133_v25 = vld [vmem:[%s9658_s1 + $0xc8] sm:$0xff]   ;;  %v7137_v29 = vld [vmem:[%s9658_s1 + $0xc0] sm:$0xff]   ;;  %v7141_v41 = vld [vmem:[%s9658_s1 + $0x1f8] sm:$0xff]  }
   0xb   :  { %v7134_v26 = vld [vmem:[%s9658_s1 + $0x8] sm:$0xff]   ;;  %v7138_v30 = vld [vmem:[%s9658_s1] sm:$0xff]   ;;  %v7142_v42 = vld [vmem:[%s9658_s1 + $0x138] sm:$0xff]  }
   0xc   :  { %6409 = vmatpush3.bf16.msra.mxu0 %v7118_v10  ;;  %v7135_v27 = vld [vmem:[%s9658_s1 + $0x88] sm:$0xff]   ;;  %v7139_v31 = vld [vmem:[%s9658_s1 + $0x80] sm:$0xff]   ;;  %v7143_v43 = vld [vmem:[%s9658_s1 + $0x1b8] sm:$0xff]  }
   0xd   :  { %6431 = vmatpush3.bf16.msra.mxu1 %v7119_v11  ;;  %6410 = vmatprep.subr.bf16.mxu0 %v7120_v12  ;;  %v14_v32 = vld [vmem:[%s9659_s0] sm:$0xff]  ;;  %v15_v34 = vld [vmem:[%s9659_s0 + $0x8] sm:$0xff]  ;;  %v7144_v44 = vld [vmem:[%s9658_s1 + $0x170] sm:$0xff]  }
   0xe   :  { %6432 = vmatprep.subr.bf16.mxu1 %v7121_v13  ;;  %v46_v33 = vld [vmem:[%s9659_s0 + $0x100] sm:$0xff]  ;;  %v47_v37 = vld [vmem:[%s9659_s0 + $0x108] sm:$0xff]  ;;  %v7145_v45 = vld [vmem:[%s9658_s1 + $0x1f0] sm:$0xff]  }
   0xf   :  { %v5828_v35 = vcombine.low %v14_v32, %v46_v33  ;;  %v5829_v36 = vcombine.high %v14_v32, %v46_v33  ;;  %v5830_v38 = vcombine.low %v15_v34, %v47_v37  ;;  %v5831_v39 = vcombine.high %v15_v34, %v47_v37  ;;  %v7146_v46 = vld [vmem:[%s9658_s1 + $0x130] sm:$0xff]   ;;  %v7148_v48 = vld [vmem:[%s9658_s1 + $0x168] sm:$0xff]   ;;  %v7152_v52 = vld [vmem:[%s9658_s1 + $0x160] sm:$0xff]  }
  0x10   :  { %6411 = vmatpush3.bf16.msra.mxu0 %v7122_v14  ;;  %v7147_v47 = vld [vmem:[%s9658_s1 + $0x1b0] sm:$0xff]   ;;  %v7149_v49 = vld [vmem:[%s9658_s1 + $0x1e8] sm:$0xff]   ;;  %v7153_v53 = vld [vmem:[%s9658_s1 + $0x1e0] sm:$0xff]  }
  0x11   :  { %6433 = vmatpush3.bf16.msra.mxu1 %v7123_v15  ;;  %6412 = vmatprep.subr.bf16.mxu0 %v7124_v16  ;;  %v7150_v50 = vld [vmem:[%s9658_s1 + $0x128] sm:$0xff]   ;;  %v7154_v54 = vld [vmem:[%s9658_s1 + $0x120] sm:$0xff]   ;;  %v7156_v56 = vld [vmem:[%s9658_s1 + $0x158] sm:$0xff]  }
  0x12   :  { %6434 = vmatprep.subr.bf16.mxu1 %v7125_v17  ;;  %4526 = vmatprep.mubr.bf16.mxu0 %v5829_v36  ;;  %v7151_v51 = vld [vmem:[%s9658_s1 + $0x1a8] sm:$0xff]   ;;  %v7155_v55 = vld [vmem:[%s9658_s1 + $0x1a0] sm:$0xff]   ;;  %v7157_v57 = vld [vmem:[%s9658_s1 + $0x1d8] sm:$0xff]  }
  0x13   :  { %4567 = vmatprep.mubr.bf16.mxu1 %v5831_v39  ;;  %v7158_v58 = vld [vmem:[%s9658_s1 + $0x118] sm:$0xff]   ;;  %v7160_v60 = vld [vmem:[%s9658_s1 + $0x150] sm:$0xff]   ;;  %v7164_v0 = vld [vmem:[%s9658_s1 + $0x148] sm:$0xff]  }
  0x14   :  { %6413 = vmatpush3.bf16.msra.mxu0 %v7126_v18  ;;  %v7159_v59 = vld [vmem:[%s9658_s1 + $0x198] sm:$0xff]   ;;  %v7161_v61 = vld [vmem:[%s9658_s1 + $0x1d0] sm:$0xff]   ;;  %v7165_v1 = vld [vmem:[%s9658_s1 + $0x1c8] sm:$0xff]  }
  0x15   :  { %6435 = vmatpush3.bf16.msra.mxu1 %v7127_v19  ;;  %6414 = vmatprep.subr.bf16.mxu0 %v7128_v20  ;;  %v7162_v62 = vld [vmem:[%s9658_s1 + $0x110] sm:$0xff]   ;;  %v7166_v2 = vld [vmem:[%s9658_s1 + $0x108] sm:$0xff]   ;;  %v7168_v4 = vld [vmem:[%s9658_s1 + $0x140] sm:$0xff]  }
  0x16   :  { %6436 = vmatprep.subr.bf16.mxu1 %v7129_v21  ;;  %v7163_v63 = vld [vmem:[%s9658_s1 + $0x190] sm:$0xff]   ;;  %v7167_v3 = vld [vmem:[%s9658_s1 + $0x188] sm:$0xff]   ;;  %v7169_v5 = vld [vmem:[%s9658_s1 + $0x1c0] sm:$0xff]  }
  0x17   :  { %v7170_v6 = vld [vmem:[%s9658_s1 + $0x100] sm:$0xff]   ;;  %v16_v8 = vld [vmem:[%s9659_s0 + $0x10] sm:$0xff]  ;;  %v17_v12 = vld [vmem:[%s9659_s0 + $0x18] sm:$0xff] }
  0x18   :  { %6415 = vmatpush3.bf16.msra.mxu0 %v7130_v22  ;;  %v7171_v7 = vld [vmem:[%s9658_s1 + $0x180] sm:$0xff]   ;;  %v48_v9 = vld [vmem:[%s9659_s0 + $0x110] sm:$0xff]  ;;  %v49_v13 = vld [vmem:[%s9659_s0 + $0x118] sm:$0xff] }
  0x19   :  { %6437 = vmatpush3.bf16.msra.mxu1 %v7131_v23  ;;  %6416 = vmatprep.subr.bf16.mxu0 %v7132_v24  ;;  %v5832_v10 = vcombine.low %v16_v8, %v48_v9  ;;  %v5833_v11 = vcombine.high %v16_v8, %v48_v9  ;;  %v5834_v14 = vcombine.low %v17_v12, %v49_v13  ;;  %v7172_v16 = vld [vmem:[%s9658_s1 + $0x278] sm:$0xff]   ;;  %v7176_v20 = vld [vmem:[%s9658_s1 + $0x270] sm:$0xff]   ;;  %v7180_v24 = vld [vmem:[%s9658_s1 + $0x268] sm:$0xff]  }
  0x1a   :  { %6438 = vmatprep.subr.bf16.mxu1 %v7133_v25  ;;  %v5835_v15 = vcombine.high %v17_v12, %v49_v13  ;;  %v7173_v17 = vld [vmem:[%s9658_s1 + $0x2f8] sm:$0xff]   ;;  %v7177_v21 = vld [vmem:[%s9658_s1 + $0x2f0] sm:$0xff]   ;;  %v7181_v25 = vld [vmem:[%s9658_s1 + $0x2e8] sm:$0xff]  }
  0x1b   :  { %v7174_v18 = vld [vmem:[%s9658_s1 + $0x238] sm:$0xff]   ;;  %v7178_v22 = vld [vmem:[%s9658_s1 + $0x230] sm:$0xff]  }
  0x1c   :  { %6417 = vmatpush3.bf16.msra.mxu0 %v7134_v26  ;;  %v7175_v19 = vld [vmem:[%s9658_s1 + $0x2b8] sm:$0xff]   ;;  %v7179_v23 = vld [vmem:[%s9658_s1 + $0x2b0] sm:$0xff]   ;;  %v7182_v26 = vld [vmem:[%s9658_s1 + $0x228] sm:$0xff]  }
  0x1d   :  { %6439 = vmatpush3.bf16.msra.mxu1 %v7135_v27  ;;  %6418 = vmatprep.subr.bf16.mxu0 %v7136_v28  ;;  %v7183_v27 = vld [vmem:[%s9658_s1 + $0x2a8] sm:$0xff]   ;;  %v7184_v28 = vld [vmem:[%s9658_s1 + $0x260] sm:$0xff]   ;;  %v7188_v32 = vld [vmem:[%s9658_s1 + $0x258] sm:$0xff]  }
  0x1e   :  { %6440 = vmatprep.subr.bf16.mxu1 %v7137_v29  ;;  %v7185_v29 = vld [vmem:[%s9658_s1 + $0x2e0] sm:$0xff]   ;;  %v7189_v33 = vld [vmem:[%s9658_s1 + $0x2d8] sm:$0xff]   ;;  %v7192_v36 = vld [vmem:[%s9658_s1 + $0x250] sm:$0xff]  }
  0x1f   :  { %v7190_v34 = vld [vmem:[%s9658_s1 + $0x218] sm:$0xff]   ;;  %v7193_v37 = vld [vmem:[%s9658_s1 + $0x2d0] sm:$0xff]  }
  0x20   :  { %6419 = vmatpush3.bf16.msra.mxu0 %v7138_v30  ;;  %v7186_v30 = vld [vmem:[%s9658_s1 + $0x220] sm:$0xff]   ;;  %v7195_v39 = vld [vmem:[%s9658_s1 + $0x290] sm:$0xff]   ;;  %v7220_v8 = vld [vmem:[%s9658_s1 + $0x358] sm:$0xff]  }
  0x21   :  { %6441 = vmatpush3.bf16.msra.mxu1 %v7139_v31  ;;  %6448 = vmatprep.subr.bf16.mxu0 %v7140_v40  ;;  %v7187_v31 = vld [vmem:[%s9658_s1 + $0x2a0] sm:$0xff]   ;;  %v7196_v40 = vld [vmem:[%s9658_s1 + $0x248] sm:$0xff]   ;;  %v7221_v9 = vld [vmem:[%s9658_s1 + $0x3d8] sm:$0xff]  }
  0x22   :  { %6470 = vmatprep.subr.bf16.mxu1 %v7141_v41  ;;  %v7197_v41 = vld [vmem:[%s9658_s1 + $0x2c8] sm:$0xff]   ;;  %v7224_v12 = vld [vmem:[%s9658_s1 + $0x350] sm:$0xff]  }
  0x23   :  { %4527 = vmatmul.mubr.bf16.vlgmr.msra.gmra.mxu0 %v5828_v35  ;;  %v7191_v35 = vld [vmem:[%s9658_s1 + $0x298] sm:$0xff]   ;;  %v7225_v13 = vld [vmem:[%s9658_s1 + $0x3d0] sm:$0xff]  }
  0x24   :  { %4568 = vmatmul.mubr.bf16.vlgmr.msra.gmra.mxu1 %v5830_v38  ;;  %6449 = vmatpush3.bf16.msra.mxu0 %v7142_v42  ;;  %v7194_v38 = vld [vmem:[%s9658_s1 + $0x210] sm:$0xff]   ;;  %v7198_v42 = vld [vmem:[%s9658_s1 + $0x208] sm:$0xff]  }
  0x25   :  { %6471 = vmatpush3.bf16.msra.mxu1 %v7143_v43  ;;  %6450 = vmatprep.subr.bf16.mxu0 %v7144_v44  ;;  %v7199_v43 = vld [vmem:[%s9658_s1 + $0x288] sm:$0xff]   ;;  %v7200_v44 = vld [vmem:[%s9658_s1 + $0x240] sm:$0xff]  }
  0x26   :  { %6472 = vmatprep.subr.bf16.mxu1 %v7145_v45  ;;  %4608 = vmatprep.mubr.bf16.mxu0 %v5833_v11  ;;  %v7201_v45 = vld [vmem:[%s9658_s1 + $0x2c0] sm:$0xff]   ;;  %v7223_v11 = vld [vmem:[%s9658_s1 + $0x398] sm:$0xff]  }
  0x27   :  { %4649 = vmatprep.mubr.bf16.mxu1 %v5835_v15  ;;  %v7227_v15 = vld [vmem:[%s9658_s1 + $0x390] sm:$0xff]  }
  0x28   :  { %6451 = vmatpush3.bf16.msra.mxu0 %v7146_v46  ;;  %v7202_v46 = vld [vmem:[%s9658_s1 + $0x200] sm:$0xff]  }
  0x29   :  { %6473 = vmatpush3.bf16.msra.mxu1 %v7147_v47  ;;  %6452 = vmatprep.subr.bf16.mxu0 %v7148_v48  ;;  %v7203_v47 = vld [vmem:[%s9658_s1 + $0x280] sm:$0xff]  }
  0x2a   :  { %6474 = vmatprep.subr.bf16.mxu1 %v7149_v49  ;;  %v18_v48 = vld [vmem:[%s9659_s0 + $0x20] sm:$0xff] }
  0x2b   :  { %v50_v49 = vld [vmem:[%s9659_s0 + $0x120] sm:$0xff] }
  0x2c   :  { %6453 = vmatpush3.bf16.msra.mxu0 %v7150_v50  ;;  %v19_v50 = vld [vmem:[%s9659_s0 + $0x28] sm:$0xff] }
  0x2d   :  { %6475 = vmatpush3.bf16.msra.mxu1 %v7151_v51  ;;  %6454 = vmatprep.subr.bf16.mxu0 %v7152_v52  ;;  %v51_v51 = vld [vmem:[%s9659_s0 + $0x128] sm:$0xff]  ;;  %v5836_v52 = vcombine.low %v18_v48, %v50_v49 }
  0x2e   :  { %6476 = vmatprep.subr.bf16.mxu1 %v7153_v53  ;;  %v5837_v53 = vcombine.high %v18_v48, %v50_v49  ;;  %v7252_v48 = vld [vmem:[%s9658_s1 + $0x458] sm:$0xff]  }
  0x2f   :  { %v7253_v49 = vld [vmem:[%s9658_s1 + $0x4d8] sm:$0xff]  }
  0x30   :  { %6455 = vmatpush3.bf16.msra.mxu0 %v7154_v54  ;;  %v5838_v54 = vcombine.low %v19_v50, %v51_v51 }
  0x31   :  { %6477 = vmatpush3.bf16.msra.mxu1 %v7155_v55  ;;  %6456 = vmatprep.subr.bf16.mxu0 %v7156_v56  ;;  %v5839_v55 = vcombine.high %v19_v50, %v51_v51  ;;  %v7204_v56 = vld [vmem:[%s9658_s1 + $0x378] sm:$0xff]  }
  0x32   :  { %6478 = vmatprep.subr.bf16.mxu1 %v7157_v57  ;;  %v7205_v57 = vld [vmem:[%s9658_s1 + $0x3f8] sm:$0xff]  }
  0x33   :  { %v7254_v50 = vld [vmem:[%s9658_s1 + $0x418] sm:$0xff]  }
  0x34   :  { %6457 = vmatpush3.bf16.msra.mxu0 %v7158_v58  ;;  %v7206_v58 = vld [vmem:[%s9658_s1 + $0x338] sm:$0xff]  }
  0x35   :  { %6479 = vmatpush3.bf16.msra.mxu1 %v7159_v59  ;;  %6458 = vmatprep.subr.bf16.mxu0 %v7160_v60  ;;  %v7207_v59 = vld [vmem:[%s9658_s1 + $0x3b8] sm:$0xff]   ;;  %v7208_v60 = vld [vmem:[%s9658_s1 + $0x370] sm:$0xff]  }
  0x36   :  { %6480 = vmatprep.subr.bf16.mxu1 %v7161_v61  ;;  %v7209_v61 = vld [vmem:[%s9658_s1 + $0x3f0] sm:$0xff]   ;;  %v7255_v51 = vld [vmem:[%s9658_s1 + $0x498] sm:$0xff]  }
  0x38   :  { %6459 = vmatpush3.bf16.msra.mxu0 %v7162_v62  ;;  %v7210_v62 = vld [vmem:[%s9658_s1 + $0x330] sm:$0xff]  }
  0x39   :  { %6481 = vmatpush3.bf16.msra.mxu1 %v7163_v63  ;;  %6460 = vmatprep.subr.bf16.mxu0 %v7164_v0  ;;  %v7211_v63 = vld [vmem:[%s9658_s1 + $0x3b0] sm:$0xff]   ;;  %v7212_v0 = vld [vmem:[%s9658_s1 + $0x368] sm:$0xff]  }
  0x3a   :  { %6482 = vmatprep.subr.bf16.mxu1 %v7165_v1  ;;  %v7213_v1 = vld [vmem:[%s9658_s1 + $0x3e8] sm:$0xff]  }
  0x3c   :  { %6461 = vmatpush3.bf16.msra.mxu0 %v7166_v2  ;;  %v7214_v2 = vld [vmem:[%s9658_s1 + $0x328] sm:$0xff]  }
  0x3d   :  { %6483 = vmatpush3.bf16.msra.mxu1 %v7167_v3  ;;  %6462 = vmatprep.subr.bf16.mxu0 %v7168_v4  ;;  %v7215_v3 = vld [vmem:[%s9658_s1 + $0x3a8] sm:$0xff]   ;;  %v7216_v4 = vld [vmem:[%s9658_s1 + $0x360] sm:$0xff]  }
  0x3e   :  { %6484 = vmatprep.subr.bf16.mxu1 %v7169_v5  ;;  %v7217_v5 = vld [vmem:[%s9658_s1 + $0x3e0] sm:$0xff]  }
  0x40   :  { %6463 = vmatpush3.bf16.msra.mxu0 %v7170_v6  ;;  %v7218_v6 = vld [vmem:[%s9658_s1 + $0x320] sm:$0xff]  }
  0x41   :  { %6485 = vmatpush3.bf16.msra.mxu1 %v7171_v7  ;;  %6492 = vmatprep.subr.bf16.mxu0 %v7172_v16  ;;  %v7219_v7 = vld [vmem:[%s9658_s1 + $0x3a0] sm:$0xff]   ;;  %v7228_v16 = vld [vmem:[%s9658_s1 + $0x348] sm:$0xff]  }
  0x42   :  { %6514 = vmatprep.subr.bf16.mxu1 %v7173_v17  ;;  %v7229_v17 = vld [vmem:[%s9658_s1 + $0x3c8] sm:$0xff]  }
  0x43   :  { %4609 = vmatmul.mubr.bf16.vlgmr.msra.gmra.mxu0 %v5832_v10  ;;  %v7222_v10 = vld [vmem:[%s9658_s1 + $0x318] sm:$0xff]  }
  0x44   :  { %4650 = vmatmul.mubr.bf16.vlgmr.msra.gmra.mxu1 %v5834_v14  ;;  %6493 = vmatpush3.bf16.msra.mxu0 %v7174_v18  ;;  %v7226_v14 = vld [vmem:[%s9658_s1 + $0x310] sm:$0xff]   ;;  %v7230_v18 = vld [vmem:[%s9658_s1 + $0x308] sm:$0xff]  }
  0x45   :  { %6515 = vmatpush3.bf16.msra.mxu1 %v7175_v19  ;;  %6494 = vmatprep.subr.bf16.mxu0 %v7176_v20  ;;  %v7231_v19 = vld [vmem:[%s9658_s1 + $0x388] sm:$0xff]   ;;  %v7232_v20 = vld [vmem:[%s9658_s1 + $0x340] sm:$0xff]  }
  0x46   :  { %6516 = vmatprep.subr.bf16.mxu1 %v7177_v21  ;;  %4690 = vmatprep.mubr.bf16.mxu0 %v5837_v53  ;;  %v7233_v21 = vld [vmem:[%s9658_s1 + $0x3c0] sm:$0xff]   ;;  %v7257_v53 = vld [vmem:[%s9658_s1 + $0x4d0] sm:$0xff]  }
  0x47   :  { %4731 = vmatprep.mubr.bf16.mxu1 %v5839_v55  ;;  %v7259_v55 = vld [vmem:[%s9658_s1 + $0x490] sm:$0xff]  }
  0x48   :  { %6495 = vmatpush3.bf16.msra.mxu0 %v7178_v22  ;;  %v7234_v22 = vld [vmem:[%s9658_s1 + $0x300] sm:$0xff]  }
  0x49   :  { %6517 = vmatpush3.bf16.msra.mxu1 %v7179_v23  ;;  %6496 = vmatprep.subr.bf16.mxu0 %v7180_v24  ;;  %v7235_v23 = vld [vmem:[%s9658_s1 + $0x380] sm:$0xff]   ;;  %v20_v24 = vld [vmem:[%s9659_s0 + $0x30] sm:$0xff] }
  0x4a   :  { %6518 = vmatprep.subr.bf16.mxu1 %v7181_v25  ;;  %v52_v25 = vld [vmem:[%s9659_s0 + $0x130] sm:$0xff] }
  0x4c   :  { %6497 = vmatpush3.bf16.msra.mxu0 %v7182_v26  ;;  %v21_v26 = vld [vmem:[%s9659_s0 + $0x38] sm:$0xff] }
  0x4d   :  { %6519 = vmatpush3.bf16.msra.mxu1 %v7183_v27  ;;  %6498 = vmatprep.subr.bf16.mxu0 %v7184_v28  ;;  %v5840_v27 = vcombine.low %v20_v24, %v52_v25  ;;  %v5841_v28 = vcombine.high %v20_v24, %v52_v25  ;;  %v7284_v24 = vld [vmem:[%s9658_s1 + $0x558] sm:$0xff]  }
  0x4e   :  { %6520 = vmatprep.subr.bf16.mxu1 %v7185_v29  ;;  %v53_v29 = vld [vmem:[%s9659_s0 + $0x138] sm:$0xff] }
  0x4f   :  { %v7285_v25 = vld [vmem:[%s9658_s1 + $0x5d8] sm:$0xff]  }
  0x50   :  { %6499 = vmatpush3.bf16.msra.mxu0 %v7186_v30  ;;  %v5842_v30 = vcombine.low %v21_v26, %v53_v29 }
  0x51   :  { %6521 = vmatpush3.bf16.msra.mxu1 %v7187_v31  ;;  %6500 = vmatprep.subr.bf16.mxu0 %v7188_v32  ;;  %v5843_v31 = vcombine.high %v21_v26, %v53_v29  ;;  %v7236_v32 = vld [vmem:[%s9658_s1 + $0x478] sm:$0xff]   ;;  %v7289_v29 = vld [vmem:[%s9658_s1 + $0x5d0] sm:$0xff]  }
  0x52   :  { %6522 = vmatprep.subr.bf16.mxu1 %v7189_v33  ;;  %v7237_v33 = vld [vmem:[%s9658_s1 + $0x4f8] sm:$0xff]  }
  0x53   :  { %v7286_v26 = vld [vmem:[%s9658_s1 + $0x518] sm:$0xff]  }
  0x54   :  { %6501 = vmatpush3.bf16.msra.mxu0 %v7190_v34  ;;  %v7238_v34 = vld [vmem:[%s9658_s1 + $0x438] sm:$0xff]  }
  0x55   :  { %6523 = vmatpush3.bf16.msra.mxu1 %v7191_v35  ;;  %6502 = vmatprep.subr.bf16.mxu0 %v7192_v36  ;;  %v7239_v35 = vld [vmem:[%s9658_s1 + $0x4b8] sm:$0xff]   ;;  %v7240_v36 = vld [vmem:[%s9658_s1 + $0x470] sm:$0xff]  }
  0x56   :  { %6524 = vmatprep.subr.bf16.mxu1 %v7193_v37  ;;  %v7241_v37 = vld [vmem:[%s9658_s1 + $0x4f0] sm:$0xff]  }
  0x58   :  { %6503 = vmatpush3.bf16.msra.mxu0 %v7194_v38  ;;  %v7242_v38 = vld [vmem:[%s9658_s1 + $0x430] sm:$0xff]  }
  0x59   :  { %6525 = vmatpush3.bf16.msra.mxu1 %v7195_v39  ;;  %6504 = vmatprep.subr.bf16.mxu0 %v7196_v40  ;;  %v7243_v39 = vld [vmem:[%s9658_s1 + $0x4b0] sm:$0xff]   ;;  %v7244_v40 = vld [vmem:[%s9658_s1 + $0x468] sm:$0xff]  }
  0x5a   :  { %6526 = vmatprep.subr.bf16.mxu1 %v7197_v41  ;;  %v7245_v41 = vld [vmem:[%s9658_s1 + $0x4e8] sm:$0xff]  }
  0x5c   :  { %6505 = vmatpush3.bf16.msra.mxu0 %v7198_v42  ;;  %v7246_v42 = vld [vmem:[%s9658_s1 + $0x428] sm:$0xff]  }
  0x5d   :  { %6527 = vmatpush3.bf16.msra.mxu1 %v7199_v43  ;;  %6506 = vmatprep.subr.bf16.mxu0 %v7200_v44  ;;  %v7247_v43 = vld [vmem:[%s9658_s1 + $0x4a8] sm:$0xff]   ;;  %v7248_v44 = vld [vmem:[%s9658_s1 + $0x460] sm:$0xff]  }
  0x5e   :  { %6528 = vmatprep.subr.bf16.mxu1 %v7201_v45  ;;  %v7249_v45 = vld [vmem:[%s9658_s1 + $0x4e0] sm:$0xff]  }
  0x60   :  { %6507 = vmatpush3.bf16.msra.mxu0 %v7202_v46  ;;  %v7250_v46 = vld [vmem:[%s9658_s1 + $0x420] sm:$0xff]  }
  0x61   :  { %6529 = vmatpush3.bf16.msra.mxu1 %v7203_v47  ;;  %6536 = vmatprep.subr.bf16.mxu0 %v7204_v56  ;;  %v7251_v47 = vld [vmem:[%s9658_s1 + $0x4a0] sm:$0xff]   ;;  %v7260_v56 = vld [vmem:[%s9658_s1 + $0x448] sm:$0xff]  }
  0x62   :  { %6558 = vmatprep.subr.bf16.mxu1 %v7205_v57  ;;  %v7261_v57 = vld [vmem:[%s9658_s1 + $0x4c8] sm:$0xff]  }
  0x63   :  { %4691 = vmatmul.mubr.bf16.vlgmr.msra.gmra.mxu0 %v5836_v52  ;;  %v7256_v52 = vld [vmem:[%s9658_s1 + $0x450] sm:$0xff]  }
  0x64   :  { %4732 = vmatmul.mubr.bf16.vlgmr.msra.gmra.mxu1 %v5838_v54  ;;  %6537 = vmatpush3.bf16.msra.mxu0 %v7206_v58  ;;  %v7258_v54 = vld [vmem:[%s9658_s1 + $0x410] sm:$0xff]   ;;  %v7262_v58 = vld [vmem:[%s9658_s1 + $0x408] sm:$0xff]  }
  0x65   :  { %6559 = vmatpush3.bf16.msra.mxu1 %v7207_v59  ;;  %6538 = vmatprep.subr.bf16.mxu0 %v7208_v60  ;;  %v7263_v59 = vld [vmem:[%s9658_s1 + $0x488] sm:$0xff]   ;;  %v7264_v60 = vld [vmem:[%s9658_s1 + $0x440] sm:$0xff]  }
  0x66   :  { %6560 = vmatprep.subr.bf16.mxu1 %v7209_v61  ;;  %4772 = vmatprep.mubr.bf16.mxu0 %v5841_v28  ;;  %v7265_v61 = vld [vmem:[%s9658_s1 + $0x4c0] sm:$0xff]   ;;  %v7288_v28 = vld [vmem:[%s9658_s1 + $0x550] sm:$0xff]  }
  0x67   :  { %4813 = vmatprep.mubr.bf16.mxu1 %v5843_v31  ;;  %v7291_v31 = vld [vmem:[%s9658_s1 + $0x590] sm:$0xff]  }
  0x68   :  { %6539 = vmatpush3.bf16.msra.mxu0 %v7210_v62  ;;  %v7266_v62 = vld [vmem:[%s9658_s1 + $0x400] sm:$0xff]  }
  0x69   :  { %6561 = vmatpush3.bf16.msra.mxu1 %v7211_v63  ;;  %6540 = vmatprep.subr.bf16.mxu0 %v7212_v0  ;;  %v7267_v63 = vld [vmem:[%s9658_s1 + $0x480] sm:$0xff]  }
  0x6a   :  { %6562 = vmatprep.subr.bf16.mxu1 %v7213_v1  ;;  %v22_v0 = vld [vmem:[%s9659_s0 + $0x40] sm:$0xff] }
  0x6b   :  { %v54_v1 = vld [vmem:[%s9659_s0 + $0x140] sm:$0xff] }
  0x6c   :  { %6541 = vmatpush3.bf16.msra.mxu0 %v7214_v2  ;;  %v5844_v2 = vcombine.low %v22_v0, %v54_v1 }
  0x6d   :  { %6563 = vmatpush3.bf16.msra.mxu1 %v7215_v3  ;;  %6542 = vmatprep.subr.bf16.mxu0 %v7216_v4  ;;  %v5845_v3 = vcombine.high %v22_v0, %v54_v1  ;;  %v23_v4 = vld [vmem:[%s9659_s0 + $0x48] sm:$0xff]  ;;  %v7316_v0 = vld [vmem:[%s9658_s1 + $0x658] sm:$0xff]  }
  0x6e   :  { %6564 = vmatprep.subr.bf16.mxu1 %v7217_v5  ;;  %v55_v5 = vld [vmem:[%s9659_s0 + $0x148] sm:$0xff]  ;;  %v7317_v1 = vld [vmem:[%s9658_s1 + $0x6d8] sm:$0xff]  }
  0x70   :  { %6543 = vmatpush3.bf16.msra.mxu0 %v7218_v6  ;;  %v5846_v6 = vcombine.low %v23_v4, %v55_v5 }
  0x71   :  { %6565 = vmatpush3.bf16.msra.mxu1 %v7219_v7  ;;  %6544 = vmatprep.subr.bf16.mxu0 %v7220_v8  ;;  %v5847_v7 = vcombine.high %v23_v4, %v55_v5  ;;  %v7268_v8 = vld [vmem:[%s9658_s1 + $0x578] sm:$0xff]   ;;  %v7320_v4 = vld [vmem:[%s9658_s1 + $0x650] sm:$0xff]  }
  0x72   :  { %6566 = vmatprep.subr.bf16.mxu1 %v7221_v9  ;;  %v7269_v9 = vld [vmem:[%s9658_s1 + $0x5f8] sm:$0xff]   ;;  %v7321_v5 = vld [vmem:[%s9658_s1 + $0x6d0] sm:$0xff]  }
  0x74   :  { %6545 = vmatpush3.bf16.msra.mxu0 %v7222_v10  ;;  %v7270_v10 = vld [vmem:[%s9658_s1 + $0x538] sm:$0xff]  }
  0x75   :  { %6567 = vmatpush3.bf16.msra.mxu1 %v7223_v11  ;;  %6546 = vmatprep.subr.bf16.mxu0 %v7224_v12  ;;  %v7271_v11 = vld [vmem:[%s9658_s1 + $0x5b8] sm:$0xff]   ;;  %v7272_v12 = vld [vmem:[%s9658_s1 + $0x570] sm:$0xff]  }
  0x76   :  { %6568 = vmatprep.subr.bf16.mxu1 %v7225_v13  ;;  %v7273_v13 = vld [vmem:[%s9658_s1 + $0x5f0] sm:$0xff]  }
  0x78   :  { %6547 = vmatpush3.bf16.msra.mxu0 %v7226_v14  ;;  %v7274_v14 = vld [vmem:[%s9658_s1 + $0x530] sm:$0xff]  }
  0x79   :  { %6569 = vmatpush3.bf16.msra.mxu1 %v7227_v15  ;;  %6548 = vmatprep.subr.bf16.mxu0 %v7228_v16  ;;  %v7275_v15 = vld [vmem:[%s9658_s1 + $0x5b0] sm:$0xff]   ;;  %v7276_v16 = vld [vmem:[%s9658_s1 + $0x568] sm:$0xff]  }
  0x7a   :  { %6570 = vmatprep.subr.bf16.mxu1 %v7229_v17  ;;  %v7277_v17 = vld [vmem:[%s9658_s1 + $0x5e8] sm:$0xff]  }
  0x7c   :  { %6549 = vmatpush3.bf16.msra.mxu0 %v7230_v18  ;;  %v7278_v18 = vld [vmem:[%s9658_s1 + $0x528] sm:$0xff]  }
  0x7d   :  { %6571 = vmatpush3.bf16.msra.mxu1 %v7231_v19  ;;  %6550 = vmatprep.subr.bf16.mxu0 %v7232_v20  ;;  %v7279_v19 = vld [vmem:[%s9658_s1 + $0x5a8] sm:$0xff]   ;;  %v7280_v20 = vld [vmem:[%s9658_s1 + $0x560] sm:$0xff]  }
  0x7e   :  { %6572 = vmatprep.subr.bf16.mxu1 %v7233_v21  ;;  %v7281_v21 = vld [vmem:[%s9658_s1 + $0x5e0] sm:$0xff]  }
  0x80   :  { %6551 = vmatpush3.bf16.msra.mxu0 %v7234_v22  ;;  %v7282_v22 = vld [vmem:[%s9658_s1 + $0x520] sm:$0xff]  }
  0x81   :  { %6573 = vmatpush3.bf16.msra.mxu1 %v7235_v23  ;;  %6580 = vmatprep.subr.bf16.mxu0 %v7236_v32  ;;  %v7283_v23 = vld [vmem:[%s9658_s1 + $0x5a0] sm:$0xff]   ;;  %v7292_v32 = vld [vmem:[%s9658_s1 + $0x548] sm:$0xff]  }
  0x82   :  { %6602 = vmatprep.subr.bf16.mxu1 %v7237_v33  ;;  %v7293_v33 = vld [vmem:[%s9658_s1 + $0x5c8] sm:$0xff]  }
  0x83   :  { %4773 = vmatmul.mubr.bf16.vlgmr.msra.gmra.mxu0 %v5840_v27  ;;  %v7287_v27 = vld [vmem:[%s9658_s1 + $0x598] sm:$0xff]  }
  0x84   :  { %4814 = vmatmul.mubr.bf16.vlgmr.msra.gmra.mxu1 %v5842_v30  ;;  %6581 = vmatpush3.bf16.msra.mxu0 %v7238_v34  ;;  %v7290_v30 = vld [vmem:[%s9658_s1 + $0x510] sm:$0xff]   ;;  %v7294_v34 = vld [vmem:[%s9658_s1 + $0x508] sm:$0xff]  }
  0x85   :  { %6603 = vmatpush3.bf16.msra.mxu1 %v7239_v35  ;;  %6582 = vmatprep.subr.bf16.mxu0 %v7240_v36  ;;  %v7295_v35 = vld [vmem:[%s9658_s1 + $0x588] sm:$0xff]   ;;  %v7296_v36 = vld [vmem:[%s9658_s1 + $0x540] sm:$0xff]  }
  0x86   :  { %6604 = vmatprep.subr.bf16.mxu1 %v7241_v37  ;;  %4854 = vmatprep.mubr.bf16.mxu0 %v5845_v3  ;;  %v7297_v37 = vld [vmem:[%s9658_s1 + $0x5c0] sm:$0xff]   ;;  %v7319_v3 = vld [vmem:[%s9658_s1 + $0x698] sm:$0xff]  }
  0x87   :  { %4895 = vmatprep.mubr.bf16.mxu1 %v5847_v7  ;;  %v7323_v7 = vld [vmem:[%s9658_s1 + $0x690] sm:$0xff]  }
  0x88   :  { %6583 = vmatpush3.bf16.msra.mxu0 %v7242_v38  ;;  %v7298_v38 = vld [vmem:[%s9658_s1 + $0x500] sm:$0xff]  }
  0x89   :  { %6605 = vmatpush3.bf16.msra.mxu1 %v7243_v39  ;;  %6584 = vmatprep.subr.bf16.mxu0 %v7244_v40  ;;  %v7299_v39 = vld [vmem:[%s9658_s1 + $0x580] sm:$0xff]   ;;  %v24_v40 = vld [vmem:[%s9659_s0 + $0x50] sm:$0xff] }
  0x8a   :  { %6606 = vmatprep.subr.bf16.mxu1 %v7245_v41  ;;  %v56_v41 = vld [vmem:[%s9659_s0 + $0x150] sm:$0xff] }
  0x8c   :  { %6585 = vmatpush3.bf16.msra.mxu0 %v7246_v42  ;;  %v25_v42 = vld [vmem:[%s9659_s0 + $0x58] sm:$0xff] }
  0x8d   :  { %6607 = vmatpush3.bf16.msra.mxu1 %v7247_v43  ;;  %6586 = vmatprep.subr.bf16.mxu0 %v7248_v44  ;;  %v57_v43 = vld [vmem:[%s9659_s0 + $0x158] sm:$0xff]  ;;  %v5848_v44 = vcombine.low %v24_v40, %v56_v41 }
  0x8e   :  { %6608 = vmatprep.subr.bf16.mxu1 %v7249_v45  ;;  %v5849_v45 = vcombine.high %v24_v40, %v56_v41  ;;  %v7348_v40 = vld [vmem:[%s9658_s1 + $0x758] sm:$0xff]  }
  0x8f   :  { %v7349_v41 = vld [vmem:[%s9658_s1 + $0x7d8] sm:$0xff]  }
  0x90   :  { %6587 = vmatpush3.bf16.msra.mxu0 %v7250_v46  ;;  %v5850_v46 = vcombine.low %v25_v42, %v57_v43 }
  0x91   :  { %6609 = vmatpush3.bf16.msra.mxu1 %v7251_v47  ;;  %6588 = vmatprep.subr.bf16.mxu0 %v7252_v48  ;;  %v5851_v47 = vcombine.high %v25_v42, %v57_v43  ;;  %v7300_v48 = vld [vmem:[%s9658_s1 + $0x678] sm:$0xff]  }
  0x92   :  { %6610 = vmatprep.subr.bf16.mxu1 %v7253_v49  ;;  %v7301_v49 = vld [vmem:[%s9658_s1 + $0x6f8] sm:$0xff]  }
  0x93   :  { %v7350_v42 = vld [vmem:[%s9658_s1 + $0x718] sm:$0xff]  }
  0x94   :  { %6589 = vmatpush3.bf16.msra.mxu0 %v7254_v50  ;;  %v7302_v50 = vld [vmem:[%s9658_s1 + $0x638] sm:$0xff]  }
  0x95   :  { %6611 = vmatpush3.bf16.msra.mxu1 %v7255_v51  ;;  %6590 = vmatprep.subr.bf16.mxu0 %v7256_v52  ;;  %v7303_v51 = vld [vmem:[%s9658_s1 + $0x6b8] sm:$0xff]   ;;  %v7304_v52 = vld [vmem:[%s9658_s1 + $0x670] sm:$0xff]  }
  0x96   :  { %6612 = vmatprep.subr.bf16.mxu1 %v7257_v53  ;;  %v7305_v53 = vld [vmem:[%s9658_s1 + $0x6f0] sm:$0xff]   ;;  %v7351_v43 = vld [vmem:[%s9658_s1 + $0x798] sm:$0xff]  }
  0x98   :  { %6591 = vmatpush3.bf16.msra.mxu0 %v7258_v54  ;;  %v7306_v54 = vld [vmem:[%s9658_s1 + $0x630] sm:$0xff]  }
  0x99   :  { %6613 = vmatpush3.bf16.msra.mxu1 %v7259_v55  ;;  %6592 = vmatprep.subr.bf16.mxu0 %v7260_v56  ;;  %v7307_v55 = vld [vmem:[%s9658_s1 + $0x6b0] sm:$0xff]   ;;  %v7308_v56 = vld [vmem:[%s9658_s1 + $0x668] sm:$0xff]  }
  0x9a   :  { %6614 = vmatprep.subr.bf16.mxu1 %v7261_v57  ;;  %v7309_v57 = vld [vmem:[%s9658_s1 + $0x6e8] sm:$0xff]  }
  0x9c   :  { %6593 = vmatpush3.bf16.msra.mxu0 %v7262_v58  ;;  %v7310_v58 = vld [vmem:[%s9658_s1 + $0x628] sm:$0xff]  }
  0x9d   :  { %6615 = vmatpush3.bf16.msra.mxu1 %v7263_v59  ;;  %6594 = vmatprep.subr.bf16.mxu0 %v7264_v60  ;;  %v7311_v59 = vld [vmem:[%s9658_s1 + $0x6a8] sm:$0xff]   ;;  %v7312_v60 = vld [vmem:[%s9658_s1 + $0x660] sm:$0xff]  }
  0x9e   :  { %6616 = vmatprep.subr.bf16.mxu1 %v7265_v61  ;;  %v7313_v61 = vld [vmem:[%s9658_s1 + $0x6e0] sm:$0xff]  }
  0xa0   :  { %6595 = vmatpush3.bf16.msra.mxu0 %v7266_v62  ;;  %v7314_v62 = vld [vmem:[%s9658_s1 + $0x620] sm:$0xff]  }
  0xa1   :  { %6617 = vmatpush3.bf16.msra.mxu1 %v7267_v63  ;;  %6624 = vmatprep.subr.bf16.mxu0 %v7268_v8  ;;  %v7315_v63 = vld [vmem:[%s9658_s1 + $0x6a0] sm:$0xff]   ;;  %v7324_v8 = vld [vmem:[%s9658_s1 + $0x648] sm:$0xff]  }
  0xa2   :  { %6646 = vmatprep.subr.bf16.mxu1 %v7269_v9  ;;  %v7325_v9 = vld [vmem:[%s9658_s1 + $0x6c8] sm:$0xff]  }
  0xa3   :  { %4855 = vmatmul.mubr.bf16.vlgmr.msra.gmra.mxu0 %v5844_v2  ;;  %v7318_v2 = vld [vmem:[%s9658_s1 + $0x618] sm:$0xff]  }
  0xa4   :  { %4896 = vmatmul.mubr.bf16.vlgmr.msra.gmra.mxu1 %v5846_v6  ;;  %6625 = vmatpush3.bf16.msra.mxu0 %v7270_v10  ;;  %v7322_v6 = vld [vmem:[%s9658_s1 + $0x610] sm:$0xff]   ;;  %v7326_v10 = vld [vmem:[%s9658_s1 + $0x608] sm:$0xff]  }
  0xa5   :  { %6647 = vmatpush3.bf16.msra.mxu1 %v7271_v11  ;;  %6626 = vmatprep.subr.bf16.mxu0 %v7272_v12  ;;  %v7327_v11 = vld [vmem:[%s9658_s1 + $0x688] sm:$0xff]   ;;  %v7328_v12 = vld [vmem:[%s9658_s1 + $0x640] sm:$0xff]  }
  0xa6   :  { %6648 = vmatprep.subr.bf16.mxu1 %v7273_v13  ;;  %4936 = vmatprep.mubr.bf16.mxu0 %v5849_v45  ;;  %v7329_v13 = vld [vmem:[%s9658_s1 + $0x6c0] sm:$0xff]   ;;  %v7353_v45 = vld [vmem:[%s9658_s1 + $0x7d0] sm:$0xff]  }
  0xa7   :  { %4977 = vmatprep.mubr.bf16.mxu1 %v5851_v47  ;;  %v7355_v47 = vld [vmem:[%s9658_s1 + $0x790] sm:$0xff]  }
  0xa8   :  { %6627 = vmatpush3.bf16.msra.mxu0 %v7274_v14  ;;  %v7330_v14 = vld [vmem:[%s9658_s1 + $0x600] sm:$0xff]  }
  0xa9   :  { %6649 = vmatpush3.bf16.msra.mxu1 %v7275_v15  ;;  %6628 = vmatprep.subr.bf16.mxu0 %v7276_v16  ;;  %v7331_v15 = vld [vmem:[%s9658_s1 + $0x680] sm:$0xff]  }
  0xaa   :  { %6650 = vmatprep.subr.bf16.mxu1 %v7277_v17  ;;  %v26_v16 = vld [vmem:[%s9659_s0 + $0x60] sm:$0xff] }
  0xab   :  { %v58_v17 = vld [vmem:[%s9659_s0 + $0x160] sm:$0xff] }
  0xac   :  { %6629 = vmatpush3.bf16.msra.mxu0 %v7278_v18  ;;  %v27_v18 = vld [vmem:[%s9659_s0 + $0x68] sm:$0xff] }
  0xad   :  { %6651 = vmatpush3.bf16.msra.mxu1 %v7279_v19  ;;  %6630 = vmatprep.subr.bf16.mxu0 %v7280_v20  ;;  %v5852_v19 = vcombine.low %v26_v16, %v58_v17  ;;  %v5853_v20 = vcombine.high %v26_v16, %v58_v17  ;;  %v7380_v16 = vld [vmem:[%s9658_s1 + $0x858] sm:$0xff]  }
  0xae   :  { %6652 = vmatprep.subr.bf16.mxu1 %v7281_v21  ;;  %v59_v21 = vld [vmem:[%s9659_s0 + $0x168] sm:$0xff]  ;;  %v7381_v17 = vld [vmem:[%s9658_s1 + $0x8d8] sm:$0xff]  }
  0xb0   :  { %6631 = vmatpush3.bf16.msra.mxu0 %v7282_v22  ;;  %v5854_v22 = vcombine.low %v27_v18, %v59_v21 }
  0xb1   :  { %6653 = vmatpush3.bf16.msra.mxu1 %v7283_v23  ;;  %6632 = vmatprep.subr.bf16.mxu0 %v7284_v24  ;;  %v5855_v23 = vcombine.high %v27_v18, %v59_v21  ;;  %v7332_v24 = vld [vmem:[%s9658_s1 + $0x778] sm:$0xff]   ;;  %v7385_v21 = vld [vmem:[%s9658_s1 + $0x8d0] sm:$0xff]  }
  0xb2   :  { %6654 = vmatprep.subr.bf16.mxu1 %v7285_v25  ;;  %v7333_v25 = vld [vmem:[%s9658_s1 + $0x7f8] sm:$0xff]  }
  0xb3   :  { %v7382_v18 = vld [vmem:[%s9658_s1 + $0x818] sm:$0xff]  }
  0xb4   :  { %6633 = vmatpush3.bf16.msra.mxu0 %v7286_v26  ;;  %v7334_v26 = vld [vmem:[%s9658_s1 + $0x738] sm:$0xff]  }
  0xb5   :  { %6655 = vmatpush3.bf16.msra.mxu1 %v7287_v27  ;;  %6634 = vmatprep.subr.bf16.mxu0 %v7288_v28  ;;  %v7335_v27 = vld [vmem:[%s9658_s1 + $0x7b8] sm:$0xff]   ;;  %v7336_v28 = vld [vmem:[%s9658_s1 + $0x770] sm:$0xff]  }
  0xb6   :  { %6656 = vmatprep.subr.bf16.mxu1 %v7289_v29  ;;  %v7337_v29 = vld [vmem:[%s9658_s1 + $0x7f0] sm:$0xff]  }
  0xb8   :  { %6635 = vmatpush3.bf16.msra.mxu0 %v7290_v30  ;;  %v7338_v30 = vld [vmem:[%s9658_s1 + $0x730] sm:$0xff]  }
  0xb9   :  { %6657 = vmatpush3.bf16.msra.mxu1 %v7291_v31  ;;  %6636 = vmatprep.subr.bf16.mxu0 %v7292_v32  ;;  %v7339_v31 = vld [vmem:[%s9658_s1 + $0x7b0] sm:$0xff]   ;;  %v7340_v32 = vld [vmem:[%s9658_s1 + $0x768] sm:$0xff]  }
  0xba   :  { %6658 = vmatprep.subr.bf16.mxu1 %v7293_v33  ;;  %v7341_v33 = vld [vmem:[%s9658_s1 + $0x7e8] sm:$0xff]  }
  0xbc   :  { %6637 = vmatpush3.bf16.msra.mxu0 %v7294_v34  ;;  %v7342_v34 = vld [vmem:[%s9658_s1 + $0x728] sm:$0xff]  }
  0xbd   :  { %6659 = vmatpush3.bf16.msra.mxu1 %v7295_v35  ;;  %6638 = vmatprep.subr.bf16.mxu0 %v7296_v36  ;;  %v7343_v35 = vld [vmem:[%s9658_s1 + $0x7a8] sm:$0xff]   ;;  %v7344_v36 = vld [vmem:[%s9658_s1 + $0x760] sm:$0xff]  }
  0xbe   :  { %6660 = vmatprep.subr.bf16.mxu1 %v7297_v37  ;;  %v7345_v37 = vld [vmem:[%s9658_s1 + $0x7e0] sm:$0xff]  }
  0xc0   :  { %6639 = vmatpush3.bf16.msra.mxu0 %v7298_v38  ;;  %v7346_v38 = vld [vmem:[%s9658_s1 + $0x720] sm:$0xff]  }
  0xc1   :  { %6661 = vmatpush3.bf16.msra.mxu1 %v7299_v39  ;;  %6668 = vmatprep.subr.bf16.mxu0 %v7300_v48  ;;  %v7347_v39 = vld [vmem:[%s9658_s1 + $0x7a0] sm:$0xff]   ;;  %v7356_v48 = vld [vmem:[%s9658_s1 + $0x748] sm:$0xff]  }
  0xc2   :  { %6690 = vmatprep.subr.bf16.mxu1 %v7301_v49  ;;  %v7357_v49 = vld [vmem:[%s9658_s1 + $0x7c8] sm:$0xff]  }
  0xc3   :  { %4937 = vmatmul.mubr.bf16.vlgmr.msra.gmra.mxu0 %v5848_v44  ;;  %v7352_v44 = vld [vmem:[%s9658_s1 + $0x750] sm:$0xff]  }
  0xc4   :  { %4978 = vmatmul.mubr.bf16.vlgmr.msra.gmra.mxu1 %v5850_v46  ;;  %6669 = vmatpush3.bf16.msra.mxu0 %v7302_v50  ;;  %v7354_v46 = vld [vmem:[%s9658_s1 + $0x710] sm:$0xff]   ;;  %v7358_v50 = vld [vmem:[%s9658_s1 + $0x708] sm:$0xff]  }
  0xc5   :  { %6691 = vmatpush3.bf16.msra.mxu1 %v7303_v51  ;;  %6670 = vmatprep.subr.bf16.mxu0 %v7304_v52  ;;  %v7359_v51 = vld [vmem:[%s9658_s1 + $0x788] sm:$0xff]   ;;  %v7360_v52 = vld [vmem:[%s9658_s1 + $0x740] sm:$0xff]  }
  0xc6   :  { %6692 = vmatprep.subr.bf16.mxu1 %v7305_v53  ;;  %5018 = vmatprep.mubr.bf16.mxu0 %v5853_v20  ;;  %v7361_v53 = vld [vmem:[%s9658_s1 + $0x7c0] sm:$0xff]   ;;  %v7384_v20 = vld [vmem:[%s9658_s1 + $0x850] sm:$0xff]  }
  0xc7   :  { %5059 = vmatprep.mubr.bf16.mxu1 %v5855_v23  ;;  %v7387_v23 = vld [vmem:[%s9658_s1 + $0x890] sm:$0xff]  }
  0xc8   :  { %6671 = vmatpush3.bf16.msra.mxu0 %v7306_v54  ;;  %v7362_v54 = vld [vmem:[%s9658_s1 + $0x700] sm:$0xff]  }
  0xc9   :  { %6693 = vmatpush3.bf16.msra.mxu1 %v7307_v55  ;;  %6672 = vmatprep.subr.bf16.mxu0 %v7308_v56  ;;  %v7363_v55 = vld [vmem:[%s9658_s1 + $0x780] sm:$0xff]   ;;  %v28_v56 = vld [vmem:[%s9659_s0 + $0x70] sm:$0xff] }
  0xca   :  { %6694 = vmatprep.subr.bf16.mxu1 %v7309_v57  ;;  %v60_v57 = vld [vmem:[%s9659_s0 + $0x170] sm:$0xff] }
  0xcc   :  { %6673 = vmatpush3.bf16.msra.mxu0 %v7310_v58  ;;  %v5856_v58 = vcombine.low %v28_v56, %v60_v57 }
  0xcd   :  { %6695 = vmatpush3.bf16.msra.mxu1 %v7311_v59  ;;  %6674 = vmatprep.subr.bf16.mxu0 %v7312_v60  ;;  %v5857_v59 = vcombine.high %v28_v56, %v60_v57  ;;  %v29_v60 = vld [vmem:[%s9659_s0 + $0x78] sm:$0xff] }
  0xce   :  { %6696 = vmatprep.subr.bf16.mxu1 %v7313_v61  ;;  %v61_v61 = vld [vmem:[%s9659_s0 + $0x178] sm:$0xff] }
  0xcf   :  { %v7412_v56 = vld [vmem:[%s9658_s1 + $0x958] sm:$0xff]  }
  0xd0   :  { %6675 = vmatpush3.bf16.msra.mxu0 %v7314_v62  ;;  %v5858_v62 = vcombine.low %v29_v60, %v61_v61  ;;  %v7413_v57 = vld [vmem:[%s9658_s1 + $0x9d8] sm:$0xff]  }
  0xd1   :  { %6697 = vmatpush3.bf16.msra.mxu1 %v7315_v63  ;;  %6676 = vmatprep.subr.bf16.mxu0 %v7316_v0  ;;  %v5859_v63 = vcombine.high %v29_v60, %v61_v61  ;;  %v7364_v0 = vld [vmem:[%s9658_s1 + $0x878] sm:$0xff]   ;;  %v7416_v60 = vld [vmem:[%s9658_s1 + $0x950] sm:$0xff]  }
  0xd2   :  { %6698 = vmatprep.subr.bf16.mxu1 %v7317_v1  ;;  %v7365_v1 = vld [vmem:[%s9658_s1 + $0x8f8] sm:$0xff]   ;;  %v7417_v61 = vld [vmem:[%s9658_s1 + $0x9d0] sm:$0xff]  }
  0xd4   :  { %6677 = vmatpush3.bf16.msra.mxu0 %v7318_v2  ;;  %v7366_v2 = vld [vmem:[%s9658_s1 + $0x838] sm:$0xff]  }
  0xd5   :  { %6699 = vmatpush3.bf16.msra.mxu1 %v7319_v3  ;;  %6678 = vmatprep.subr.bf16.mxu0 %v7320_v4  ;;  %v7367_v3 = vld [vmem:[%s9658_s1 + $0x8b8] sm:$0xff]   ;;  %v7368_v4 = vld [vmem:[%s9658_s1 + $0x870] sm:$0xff]  }
  0xd6   :  { %6700 = vmatprep.subr.bf16.mxu1 %v7321_v5  ;;  %v7369_v5 = vld [vmem:[%s9658_s1 + $0x8f0] sm:$0xff]  }
  0xd8   :  { %6679 = vmatpush3.bf16.msra.mxu0 %v7322_v6  ;;  %v7370_v6 = vld [vmem:[%s9658_s1 + $0x830] sm:$0xff]  }
  0xd9   :  { %6701 = vmatpush3.bf16.msra.mxu1 %v7323_v7  ;;  %6680 = vmatprep.subr.bf16.mxu0 %v7324_v8  ;;  %v7371_v7 = vld [vmem:[%s9658_s1 + $0x8b0] sm:$0xff]   ;;  %v7372_v8 = vld [vmem:[%s9658_s1 + $0x868] sm:$0xff]  }
  0xda   :  { %6702 = vmatprep.subr.bf16.mxu1 %v7325_v9  ;;  %v7373_v9 = vld [vmem:[%s9658_s1 + $0x8e8] sm:$0xff]  }
  0xdc   :  { %6681 = vmatpush3.bf16.msra.mxu0 %v7326_v10  ;;  %v7374_v10 = vld [vmem:[%s9658_s1 + $0x828] sm:$0xff]  }
  0xdd   :  { %6703 = vmatpush3.bf16.msra.mxu1 %v7327_v11  ;;  %6682 = vmatprep.subr.bf16.mxu0 %v7328_v12  ;;  %v7375_v11 = vld [vmem:[%s9658_s1 + $0x8a8] sm:$0xff]   ;;  %v7376_v12 = vld [vmem:[%s9658_s1 + $0x860] sm:$0xff]  }
  0xde   :  { %6704 = vmatprep.subr.bf16.mxu1 %v7329_v13  ;;  %v7377_v13 = vld [vmem:[%s9658_s1 + $0x8e0] sm:$0xff]  }
  0xe0   :  { %6683 = vmatpush3.bf16.msra.mxu0 %v7330_v14  ;;  %v7378_v14 = vld [vmem:[%s9658_s1 + $0x820] sm:$0xff]  }
  0xe1   :  { %6705 = vmatpush3.bf16.msra.mxu1 %v7331_v15  ;;  %6712 = vmatprep.subr.bf16.mxu0 %v7332_v24  ;;  %v7379_v15 = vld [vmem:[%s9658_s1 + $0x8a0] sm:$0xff]   ;;  %v7388_v24 = vld [vmem:[%s9658_s1 + $0x848] sm:$0xff]  }
  0xe2   :  { %6734 = vmatprep.subr.bf16.mxu1 %v7333_v25  ;;  %v7389_v25 = vld [vmem:[%s9658_s1 + $0x8c8] sm:$0xff]  }
  0xe3   :  { %5019 = vmatmul.mubr.bf16.vlgmr.msra.gmra.mxu0 %v5852_v19  ;;  %v7383_v19 = vld [vmem:[%s9658_s1 + $0x898] sm:$0xff]  }
  0xe4   :  { %5060 = vmatmul.mubr.bf16.vlgmr.msra.gmra.mxu1 %v5854_v22  ;;  %6713 = vmatpush3.bf16.msra.mxu0 %v7334_v26  ;;  %v7386_v22 = vld [vmem:[%s9658_s1 + $0x810] sm:$0xff]   ;;  %v7390_v26 = vld [vmem:[%s9658_s1 + $0x808] sm:$0xff]  }
  0xe5   :  { %6735 = vmatpush3.bf16.msra.mxu1 %v7335_v27  ;;  %6714 = vmatprep.subr.bf16.mxu0 %v7336_v28  ;;  %v7391_v27 = vld [vmem:[%s9658_s1 + $0x888] sm:$0xff]   ;;  %v7392_v28 = vld [vmem:[%s9658_s1 + $0x840] sm:$0xff]  }
  0xe6   :  { %6736 = vmatprep.subr.bf16.mxu1 %v7337_v29  ;;  %5100 = vmatprep.mubr.bf16.mxu0 %v5857_v59  ;;  %v7393_v29 = vld [vmem:[%s9658_s1 + $0x8c0] sm:$0xff]   ;;  %v7415_v59 = vld [vmem:[%s9658_s1 + $0x998] sm:$0xff]  }
  0xe7   :  { %5141 = vmatprep.mubr.bf16.mxu1 %v5859_v63  ;;  %v7419_v63 = vld [vmem:[%s9658_s1 + $0x990] sm:$0xff]  }
  0xe8   :  { %6715 = vmatpush3.bf16.msra.mxu0 %v7338_v30  ;;  %v7394_v30 = vld [vmem:[%s9658_s1 + $0x800] sm:$0xff]  }
  0xe9   :  { %6737 = vmatpush3.bf16.msra.mxu1 %v7339_v31  ;;  %6716 = vmatprep.subr.bf16.mxu0 %v7340_v32  ;;  %v7395_v31 = vld [vmem:[%s9658_s1 + $0x880] sm:$0xff]  }
  0xea   :  { %6738 = vmatprep.subr.bf16.mxu1 %v7341_v33  ;;  %v30_v32 = vld [vmem:[%s9659_s0 + $0x80] sm:$0xff] }
  0xeb   :  { %v62_v33 = vld [vmem:[%s9659_s0 + $0x180] sm:$0xff] }
  0xec   :  { %6717 = vmatpush3.bf16.msra.mxu0 %v7342_v34  ;;  %v31_v34 = vld [vmem:[%s9659_s0 + $0x88] sm:$0xff] }
  0xed   :  { %6739 = vmatpush3.bf16.msra.mxu1 %v7343_v35  ;;  %6718 = vmatprep.subr.bf16.mxu0 %v7344_v36  ;;  %v63_v35 = vld [vmem:[%s9659_s0 + $0x188] sm:$0xff]  ;;  %v5860_v36 = vcombine.low %v30_v32, %v62_v33 }
  0xee   :  { %6740 = vmatprep.subr.bf16.mxu1 %v7345_v37  ;;  %v5861_v37 = vcombine.high %v30_v32, %v62_v33  ;;  %v7444_v32 = vld [vmem:[%s9658_s1 + $0xa58] sm:$0xff]  }
  0xef   :  { %v7445_v33 = vld [vmem:[%s9658_s1 + $0xad8] sm:$0xff]  }
  0xf0   :  { %6719 = vmatpush3.bf16.msra.mxu0 %v7346_v38  ;;  %v5862_v38 = vcombine.low %v31_v34, %v63_v35 }
  0xf1   :  { %6741 = vmatpush3.bf16.msra.mxu1 %v7347_v39  ;;  %6720 = vmatprep.subr.bf16.mxu0 %v7348_v40  ;;  %v5863_v39 = vcombine.high %v31_v34, %v63_v35  ;;  %v7396_v40 = vld [vmem:[%s9658_s1 + $0x978] sm:$0xff]  }
  0xf2   :  { %6742 = vmatprep.subr.bf16.mxu1 %v7349_v41  ;;  %v7397_v41 = vld [vmem:[%s9658_s1 + $0x9f8] sm:$0xff]  }
  0xf3   :  { %v7446_v34 = vld [vmem:[%s9658_s1 + $0xa18] sm:$0xff]  }
  0xf4   :  { %6721 = vmatpush3.bf16.msra.mxu0 %v7350_v42  ;;  %v7398_v42 = vld [vmem:[%s9658_s1 + $0x938] sm:$0xff]  }
  0xf5   :  { %6743 = vmatpush3.bf16.msra.mxu1 %v7351_v43  ;;  %6722 = vmatprep.subr.bf16.mxu0 %v7352_v44  ;;  %v7399_v43 = vld [vmem:[%s9658_s1 + $0x9b8] sm:$0xff]   ;;  %v7400_v44 = vld [vmem:[%s9658_s1 + $0x970] sm:$0xff]  }
  0xf6   :  { %6744 = vmatprep.subr.bf16.mxu1 %v7353_v45  ;;  %v7401_v45 = vld [vmem:[%s9658_s1 + $0x9f0] sm:$0xff]   ;;  %v7447_v35 = vld [vmem:[%s9658_s1 + $0xa98] sm:$0xff]  }
  0xf8   :  { %6723 = vmatpush3.bf16.msra.mxu0 %v7354_v46  ;;  %v7402_v46 = vld [vmem:[%s9658_s1 + $0x930] sm:$0xff]  }
  0xf9   :  { %6745 = vmatpush3.bf16.msra.mxu1 %v7355_v47  ;;  %6724 = vmatprep.subr.bf16.mxu0 %v7356_v48  ;;  %v7403_v47 = vld [vmem:[%s9658_s1 + $0x9b0] sm:$0xff]   ;;  %v7404_v48 = vld [vmem:[%s9658_s1 + $0x968] sm:$0xff]  }
  0xfa   :  { %6746 = vmatprep.subr.bf16.mxu1 %v7357_v49  ;;  %v7405_v49 = vld [vmem:[%s9658_s1 + $0x9e8] sm:$0xff]  }
  0xfc   :  { %6725 = vmatpush3.bf16.msra.mxu0 %v7358_v50  ;;  %v7406_v50 = vld [vmem:[%s9658_s1 + $0x928] sm:$0xff]  }
  0xfd   :  { %6747 = vmatpush3.bf16.msra.mxu1 %v7359_v51  ;;  %6726 = vmatprep.subr.bf16.mxu0 %v7360_v52  ;;  %v7407_v51 = vld [vmem:[%s9658_s1 + $0x9a8] sm:$0xff]   ;;  %v7408_v52 = vld [vmem:[%s9658_s1 + $0x960] sm:$0xff]  }
  0xfe   :  { %6748 = vmatprep.subr.bf16.mxu1 %v7361_v53  ;;  %v7409_v53 = vld [vmem:[%s9658_s1 + $0x9e0] sm:$0xff]  }
 0x100   :  { %6727 = vmatpush3.bf16.msra.mxu0 %v7362_v54  ;;  %v7410_v54 = vld [vmem:[%s9658_s1 + $0x920] sm:$0xff]  }
 0x101   :  { %6749 = vmatpush3.bf16.msra.mxu1 %v7363_v55  ;;  %6756 = vmatprep.subr.bf16.mxu0 %v7364_v0  ;;  %v7411_v55 = vld [vmem:[%s9658_s1 + $0x9a0] sm:$0xff]   ;;  %v7420_v0 = vld [vmem:[%s9658_s1 + $0x948] sm:$0xff]  }
 0x102   :  { %6778 = vmatprep.subr.bf16.mxu1 %v7365_v1  ;;  %v7421_v1 = vld [vmem:[%s9658_s1 + $0x9c8] sm:$0xff]  }
 0x103   :  { %5101 = vmatmul.mubr.bf16.vlgmr.msra.gmra.mxu0 %v5856_v58  ;;  %v7414_v58 = vld [vmem:[%s9658_s1 + $0x918] sm:$0xff]  }
 0x104   :  { %5142 = vmatmul.mubr.bf16.vlgmr.msra.gmra.mxu1 %v5858_v62  ;;  %6757 = vmatpush3.bf16.msra.mxu0 %v7366_v2  ;;  %v7418_v62 = vld [vmem:[%s9658_s1 + $0x910] sm:$0xff]   ;;  %v7422_v2 = vld [vmem:[%s9658_s1 + $0x908] sm:$0xff]  }
 0x105   :  { %6779 = vmatpush3.bf16.msra.mxu1 %v7367_v3  ;;  %6758 = vmatprep.subr.bf16.mxu0 %v7368_v4  ;;  %v7423_v3 = vld [vmem:[%s9658_s1 + $0x988] sm:$0xff]   ;;  %v7424_v4 = vld [vmem:[%s9658_s1 + $0x940] sm:$0xff]  }
 0x106   :  { %6780 = vmatprep.subr.bf16.mxu1 %v7369_v5  ;;  %5182 = vmatprep.mubr.bf16.mxu0 %v5861_v37  ;;  %v7425_v5 = vld [vmem:[%s9658_s1 + $0x9c0] sm:$0xff]   ;;  %v7449_v37 = vld [vmem:[%s9658_s1 + $0xad0] sm:$0xff]  }
 0x107   :  { %5223 = vmatprep.mubr.bf16.mxu1 %v5863_v39  ;;  %v7451_v39 = vld [vmem:[%s9658_s1 + $0xa90] sm:$0xff]  }
 0x108   :  { %6759 = vmatpush3.bf16.msra.mxu0 %v7370_v6  ;;  %v7426_v6 = vld [vmem:[%s9658_s1 + $0x900] sm:$0xff]  }
 0x109   :  { %6781 = vmatpush3.bf16.msra.mxu1 %v7371_v7  ;;  %6760 = vmatprep.subr.bf16.mxu0 %v7372_v8  ;;  %v7427_v7 = vld [vmem:[%s9658_s1 + $0x980] sm:$0xff]   ;;  %v32_v8 = vld [vmem:[%s9659_s0 + $0x90] sm:$0xff] }
 0x10a   :  { %6782 = vmatprep.subr.bf16.mxu1 %v7373_v9  ;;  %v64_v9 = vld [vmem:[%s9659_s0 + $0x190] sm:$0xff] }
 0x10c   :  { %6761 = vmatpush3.bf16.msra.mxu0 %v7374_v10  ;;  %v33_v10 = vld [vmem:[%s9659_s0 + $0x98] sm:$0xff] }
 0x10d   :  { %6783 = vmatpush3.bf16.msra.mxu1 %v7375_v11  ;;  %6762 = vmatprep.subr.bf16.mxu0 %v7376_v12  ;;  %v5864_v11 = vcombine.low %v32_v8, %v64_v9  ;;  %v5865_v12 = vcombine.high %v32_v8, %v64_v9  ;;  %v7476_v8 = vld [vmem:[%s9658_s1 + $0xb58] sm:$0xff]  }
 0x10e   :  { %6784 = vmatprep.subr.bf16.mxu1 %v7377_v13  ;;  %v65_v13 = vld [vmem:[%s9659_s0 + $0x198] sm:$0xff] }
 0x10f   :  { %v7477_v9 = vld [vmem:[%s9658_s1 + $0xbd8] sm:$0xff]  }
 0x110   :  { %6763 = vmatpush3.bf16.msra.mxu0 %v7378_v14  ;;  %v5866_v14 = vcombine.low %v33_v10, %v65_v13 }
 0x111   :  { %6785 = vmatpush3.bf16.msra.mxu1 %v7379_v15  ;;  %6764 = vmatprep.subr.bf16.mxu0 %v7380_v16  ;;  %v5867_v15 = vcombine.high %v33_v10, %v65_v13  ;;  %v7428_v16 = vld [vmem:[%s9658_s1 + $0xa78] sm:$0xff]   ;;  %v7481_v13 = vld [vmem:[%s9658_s1 + $0xbd0] sm:$0xff]  }
 0x112   :  { %6786 = vmatprep.subr.bf16.mxu1 %v7381_v17  ;;  %v7429_v17 = vld [vmem:[%s9658_s1 + $0xaf8] sm:$0xff]  }
 0x113   :  { %v7478_v10 = vld [vmem:[%s9658_s1 + $0xb18] sm:$0xff]  }
 0x114   :  { %6765 = vmatpush3.bf16.msra.mxu0 %v7382_v18  ;;  %v7430_v18 = vld [vmem:[%s9658_s1 + $0xa38] sm:$0xff]  }
 0x115   :  { %6787 = vmatpush3.bf16.msra.mxu1 %v7383_v19  ;;  %6766 = vmatprep.subr.bf16.mxu0 %v7384_v20  ;;  %v7431_v19 = vld [vmem:[%s9658_s1 + $0xab8] sm:$0xff]   ;;  %v7432_v20 = vld [vmem:[%s9658_s1 + $0xa70] sm:$0xff]  }
 0x116   :  { %6788 = vmatprep.subr.bf16.mxu1 %v7385_v21  ;;  %v7433_v21 = vld [vmem:[%s9658_s1 + $0xaf0] sm:$0xff]  }
 0x118   :  { %6767 = vmatpush3.bf16.msra.mxu0 %v7386_v22  ;;  %v7434_v22 = vld [vmem:[%s9658_s1 + $0xa30] sm:$0xff]  }
 0x119   :  { %6789 = vmatpush3.bf16.msra.mxu1 %v7387_v23  ;;  %6768 = vmatprep.subr.bf16.mxu0 %v7388_v24  ;;  %v7435_v23 = vld [vmem:[%s9658_s1 + $0xab0] sm:$0xff]   ;;  %v7436_v24 = vld [vmem:[%s9658_s1 + $0xa68] sm:$0xff]  }
 0x11a   :  { %6790 = vmatprep.subr.bf16.mxu1 %v7389_v25  ;;  %v7437_v25 = vld [vmem:[%s9658_s1 + $0xae8] sm:$0xff]  }
 0x11c   :  { %6769 = vmatpush3.bf16.msra.mxu0 %v7390_v26  ;;  %v7438_v26 = vld [vmem:[%s9658_s1 + $0xa28] sm:$0xff]  }
 0x11d   :  { %6791 = vmatpush3.bf16.msra.mxu1 %v7391_v27  ;;  %6770 = vmatprep.subr.bf16.mxu0 %v7392_v28  ;;  %v7439_v27 = vld [vmem:[%s9658_s1 + $0xaa8] sm:$0xff]   ;;  %v7440_v28 = vld [vmem:[%s9658_s1 + $0xa60] sm:$0xff]  }
 0x11e   :  { %6792 = vmatprep.subr.bf16.mxu1 %v7393_v29  ;;  %v7441_v29 = vld [vmem:[%s9658_s1 + $0xae0] sm:$0xff]  }
 0x120   :  { %6771 = vmatpush3.bf16.msra.mxu0 %v7394_v30  ;;  %v7442_v30 = vld [vmem:[%s9658_s1 + $0xa20] sm:$0xff]  }
 0x121   :  { %6793 = vmatpush3.bf16.msra.mxu1 %v7395_v31  ;;  %6800 = vmatprep.subr.bf16.mxu0 %v7396_v40  ;;  %v7443_v31 = vld [vmem:[%s9658_s1 + $0xaa0] sm:$0xff]   ;;  %v7452_v40 = vld [vmem:[%s9658_s1 + $0xa48] sm:$0xff]  }
 0x122   :  { %6822 = vmatprep.subr.bf16.mxu1 %v7397_v41  ;;  %v7453_v41 = vld [vmem:[%s9658_s1 + $0xac8] sm:$0xff]  }
 0x123   :  { %5183 = vmatmul.mubr.bf16.vlgmr.msra.gmra.mxu0 %v5860_v36  ;;  %v7448_v36 = vld [vmem:[%s9658_s1 + $0xa50] sm:$0xff]  }
 0x124   :  { %5224 = vmatmul.mubr.bf16.vlgmr.msra.gmra.mxu1 %v5862_v38  ;;  %6801 = vmatpush3.bf16.msra.mxu0 %v7398_v42  ;;  %v7450_v38 = vld [vmem:[%s9658_s1 + $0xa10] sm:$0xff]   ;;  %v7454_v42 = vld [vmem:[%s9658_s1 + $0xa08] sm:$0xff]  }
 0x125   :  { %6823 = vmatpush3.bf16.msra.mxu1 %v7399_v43  ;;  %6802 = vmatprep.subr.bf16.mxu0 %v7400_v44  ;;  %v7455_v43 = vld [vmem:[%s9658_s1 + $0xa88] sm:$0xff]   ;;  %v7456_v44 = vld [vmem:[%s9658_s1 + $0xa40] sm:$0xff]  }
 0x126   :  { %6824 = vmatprep.subr.bf16.mxu1 %v7401_v45  ;;  %5264 = vmatprep.mubr.bf16.mxu0 %v5865_v12  ;;  %v7457_v45 = vld [vmem:[%s9658_s1 + $0xac0] sm:$0xff]   ;;  %v7480_v12 = vld [vmem:[%s9658_s1 + $0xb50] sm:$0xff]  }
 0x127   :  { %5305 = vmatprep.mubr.bf16.mxu1 %v5867_v15  ;;  %v7483_v15 = vld [vmem:[%s9658_s1 + $0xb90] sm:$0xff]  }
 0x128   :  { %6803 = vmatpush3.bf16.msra.mxu0 %v7402_v46  ;;  %v7458_v46 = vld [vmem:[%s9658_s1 + $0xa00] sm:$0xff]  }
 0x129   :  { %6825 = vmatpush3.bf16.msra.mxu1 %v7403_v47  ;;  %6804 = vmatprep.subr.bf16.mxu0 %v7404_v48  ;;  %v7459_v47 = vld [vmem:[%s9658_s1 + $0xa80] sm:$0xff]  }
 0x12a   :  { %6826 = vmatprep.subr.bf16.mxu1 %v7405_v49  ;;  %v34_v48 = vld [vmem:[%s9659_s0 + $0xa0] sm:$0xff] }
 0x12b   :  { %v66_v49 = vld [vmem:[%s9659_s0 + $0x1a0] sm:$0xff] }
 0x12c   :  { %6805 = vmatpush3.bf16.msra.mxu0 %v7406_v50  ;;  %v5868_v50 = vcombine.low %v34_v48, %v66_v49 }
 0x12d   :  { %6827 = vmatpush3.bf16.msra.mxu1 %v7407_v51  ;;  %6806 = vmatprep.subr.bf16.mxu0 %v7408_v52  ;;  %v5869_v51 = vcombine.high %v34_v48, %v66_v49  ;;  %v35_v52 = vld [vmem:[%s9659_s0 + $0xa8] sm:$0xff]  ;;  %v7508_v48 = vld [vmem:[%s9658_s1 + $0xc58] sm:$0xff]  }
 0x12e   :  { %6828 = vmatprep.subr.bf16.mxu1 %v7409_v53  ;;  %v67_v53 = vld [vmem:[%s9659_s0 + $0x1a8] sm:$0xff]  ;;  %v7509_v49 = vld [vmem:[%s9658_s1 + $0xcd8] sm:$0xff]  }
 0x130   :  { %6807 = vmatpush3.bf16.msra.mxu0 %v7410_v54  ;;  %v5870_v54 = vcombine.low %v35_v52, %v67_v53 }
 0x131   :  { %6829 = vmatpush3.bf16.msra.mxu1 %v7411_v55  ;;  %6808 = vmatprep.subr.bf16.mxu0 %v7412_v56  ;;  %v5871_v55 = vcombine.high %v35_v52, %v67_v53  ;;  %v7460_v56 = vld [vmem:[%s9658_s1 + $0xb78] sm:$0xff]   ;;  %v7512_v52 = vld [vmem:[%s9658_s1 + $0xc50] sm:$0xff]  }
 0x132   :  { %6830 = vmatprep.subr.bf16.mxu1 %v7413_v57  ;;  %v7461_v57 = vld [vmem:[%s9658_s1 + $0xbf8] sm:$0xff]   ;;  %v7513_v53 = vld [vmem:[%s9658_s1 + $0xcd0] sm:$0xff]  }
 0x134   :  { %6809 = vmatpush3.bf16.msra.mxu0 %v7414_v58  ;;  %v7462_v58 = vld [vmem:[%s9658_s1 + $0xb38] sm:$0xff]  }
 0x135   :  { %6831 = vmatpush3.bf16.msra.mxu1 %v7415_v59  ;;  %6810 = vmatprep.subr.bf16.mxu0 %v7416_v60  ;;  %v7463_v59 = vld [vmem:[%s9658_s1 + $0xbb8] sm:$0xff]   ;;  %v7464_v60 = vld [vmem:[%s9658_s1 + $0xb70] sm:$0xff]  }
 0x136   :  { %6832 = vmatprep.subr.bf16.mxu1 %v7417_v61  ;;  %v7465_v61 = vld [vmem:[%s9658_s1 + $0xbf0] sm:$0xff]  }
 0x138   :  { %6811 = vmatpush3.bf16.msra.mxu0 %v7418_v62  ;;  %v7466_v62 = vld [vmem:[%s9658_s1 + $0xb30] sm:$0xff]  }
 0x139   :  { %6833 = vmatpush3.bf16.msra.mxu1 %v7419_v63  ;;  %6812 = vmatprep.subr.bf16.mxu0 %v7420_v0  ;;  %v7467_v63 = vld [vmem:[%s9658_s1 + $0xbb0] sm:$0xff]   ;;  %v7468_v0 = vld [vmem:[%s9658_s1 + $0xb68] sm:$0xff]  }
 0x13a   :  { %6834 = vmatprep.subr.bf16.mxu1 %v7421_v1  ;;  %v7469_v1 = vld [vmem:[%s9658_s1 + $0xbe8] sm:$0xff]  }
 0x13c   :  { %6813 = vmatpush3.bf16.msra.mxu0 %v7422_v2  ;;  %v7470_v2 = vld [vmem:[%s9658_s1 + $0xb28] sm:$0xff]  }
 0x13d   :  { %6835 = vmatpush3.bf16.msra.mxu1 %v7423_v3  ;;  %6814 = vmatprep.subr.bf16.mxu0 %v7424_v4  ;;  %v7471_v3 = vld [vmem:[%s9658_s1 + $0xba8] sm:$0xff]   ;;  %v7472_v4 = vld [vmem:[%s9658_s1 + $0xb60] sm:$0xff]  }
 0x13e   :  { %6836 = vmatprep.subr.bf16.mxu1 %v7425_v5  ;;  %v7473_v5 = vld [vmem:[%s9658_s1 + $0xbe0] sm:$0xff]  }
 0x140   :  { %6815 = vmatpush3.bf16.msra.mxu0 %v7426_v6  ;;  %v7474_v6 = vld [vmem:[%s9658_s1 + $0xb20] sm:$0xff]  }
 0x141   :  { %6837 = vmatpush3.bf16.msra.mxu1 %v7427_v7  ;;  %6844 = vmatprep.subr.bf16.mxu0 %v7428_v16  ;;  %v7475_v7 = vld [vmem:[%s9658_s1 + $0xba0] sm:$0xff]   ;;  %v7484_v16 = vld [vmem:[%s9658_s1 + $0xb48] sm:$0xff]  }
 0x142   :  { %6866 = vmatprep.subr.bf16.mxu1 %v7429_v17  ;;  %v7485_v17 = vld [vmem:[%s9658_s1 + $0xbc8] sm:$0xff]  }
 0x143   :  { %5265 = vmatmul.mubr.bf16.vlgmr.msra.gmra.mxu0 %v5864_v11  ;;  %v7479_v11 = vld [vmem:[%s9658_s1 + $0xb98] sm:$0xff]  }
 0x144   :  { %5306 = vmatmul.mubr.bf16.vlgmr.msra.gmra.mxu1 %v5866_v14  ;;  %6845 = vmatpush3.bf16.msra.mxu0 %v7430_v18  ;;  %v7482_v14 = vld [vmem:[%s9658_s1 + $0xb10] sm:$0xff]   ;;  %v7486_v18 = vld [vmem:[%s9658_s1 + $0xb08] sm:$0xff]  }
 0x145   :  { %6867 = vmatpush3.bf16.msra.mxu1 %v7431_v19  ;;  %6846 = vmatprep.subr.bf16.mxu0 %v7432_v20  ;;  %v7487_v19 = vld [vmem:[%s9658_s1 + $0xb88] sm:$0xff]   ;;  %v7488_v20 = vld [vmem:[%s9658_s1 + $0xb40] sm:$0xff]  }
 0x146   :  { %6868 = vmatprep.subr.bf16.mxu1 %v7433_v21  ;;  %5346 = vmatprep.mubr.bf16.mxu0 %v5869_v51  ;;  %v7489_v21 = vld [vmem:[%s9658_s1 + $0xbc0] sm:$0xff]   ;;  %v7511_v51 = vld [vmem:[%s9658_s1 + $0xc98] sm:$0xff]  }
 0x147   :  { %5387 = vmatprep.mubr.bf16.mxu1 %v5871_v55  ;;  %v7515_v55 = vld [vmem:[%s9658_s1 + $0xc90] sm:$0xff]  }
 0x148   :  { %6847 = vmatpush3.bf16.msra.mxu0 %v7434_v22  ;;  %v7490_v22 = vld [vmem:[%s9658_s1 + $0xb00] sm:$0xff]  }
 0x149   :  { %6869 = vmatpush3.bf16.msra.mxu1 %v7435_v23  ;;  %6848 = vmatprep.subr.bf16.mxu0 %v7436_v24  ;;  %v7491_v23 = vld [vmem:[%s9658_s1 + $0xb80] sm:$0xff]   ;;  %v36_v24 = vld [vmem:[%s9659_s0 + $0xb0] sm:$0xff] }
 0x14a   :  { %6870 = vmatprep.subr.bf16.mxu1 %v7437_v25  ;;  %v68_v25 = vld [vmem:[%s9659_s0 + $0x1b0] sm:$0xff] }
 0x14c   :  { %6849 = vmatpush3.bf16.msra.mxu0 %v7438_v26  ;;  %v37_v26 = vld [vmem:[%s9659_s0 + $0xb8] sm:$0xff] }
 0x14d   :  { %6871 = vmatpush3.bf16.msra.mxu1 %v7439_v27  ;;  %6850 = vmatprep.subr.bf16.mxu0 %v7440_v28  ;;  %v69_v27 = vld [vmem:[%s9659_s0 + $0x1b8] sm:$0xff]  ;;  %v5872_v28 = vcombine.low %v36_v24, %v68_v25 }
 0x14e   :  { %6872 = vmatprep.subr.bf16.mxu1 %v7441_v29  ;;  %v5873_v29 = vcombine.high %v36_v24, %v68_v25  ;;  %v7540_v24 = vld [vmem:[%s9658_s1 + $0xd58] sm:$0xff]  }
 0x14f   :  { %v7541_v25 = vld [vmem:[%s9658_s1 + $0xdd8] sm:$0xff]  }
 0x150   :  { %6851 = vmatpush3.bf16.msra.mxu0 %v7442_v30  ;;  %v5874_v30 = vcombine.low %v37_v26, %v69_v27 }
 0x151   :  { %6873 = vmatpush3.bf16.msra.mxu1 %v7443_v31  ;;  %6852 = vmatprep.subr.bf16.mxu0 %v7444_v32  ;;  %v5875_v31 = vcombine.high %v37_v26, %v69_v27  ;;  %v7492_v32 = vld [vmem:[%s9658_s1 + $0xc78] sm:$0xff]  }
 0x152   :  { %6874 = vmatprep.subr.bf16.mxu1 %v7445_v33  ;;  %v7493_v33 = vld [vmem:[%s9658_s1 + $0xcf8] sm:$0xff]  }
 0x153   :  { %v7542_v26 = vld [vmem:[%s9658_s1 + $0xd18] sm:$0xff]  }
 0x154   :  { %6853 = vmatpush3.bf16.msra.mxu0 %v7446_v34  ;;  %v7494_v34 = vld [vmem:[%s9658_s1 + $0xc38] sm:$0xff]  }
 0x155   :  { %6875 = vmatpush3.bf16.msra.mxu1 %v7447_v35  ;;  %6854 = vmatprep.subr.bf16.mxu0 %v7448_v36  ;;  %v7495_v35 = vld [vmem:[%s9658_s1 + $0xcb8] sm:$0xff]   ;;  %v7496_v36 = vld [vmem:[%s9658_s1 + $0xc70] sm:$0xff]  }
 0x156   :  { %6876 = vmatprep.subr.bf16.mxu1 %v7449_v37  ;;  %v7497_v37 = vld [vmem:[%s9658_s1 + $0xcf0] sm:$0xff]   ;;  %v7543_v27 = vld [vmem:[%s9658_s1 + $0xd98] sm:$0xff]  }
 0x158   :  { %6855 = vmatpush3.bf16.msra.mxu0 %v7450_v38  ;;  %v7498_v38 = vld [vmem:[%s9658_s1 + $0xc30] sm:$0xff]  }
 0x159   :  { %6877 = vmatpush3.bf16.msra.mxu1 %v7451_v39  ;;  %6856 = vmatprep.subr.bf16.mxu0 %v7452_v40  ;;  %v7499_v39 = vld [vmem:[%s9658_s1 + $0xcb0] sm:$0xff]   ;;  %v7500_v40 = vld [vmem:[%s9658_s1 + $0xc68] sm:$0xff]  }
 0x15a   :  { %6878 = vmatprep.subr.bf16.mxu1 %v7453_v41  ;;  %v7501_v41 = vld [vmem:[%s9658_s1 + $0xce8] sm:$0xff]  }
 0x15c   :  { %6857 = vmatpush3.bf16.msra.mxu0 %v7454_v42  ;;  %v7502_v42 = vld [vmem:[%s9658_s1 + $0xc28] sm:$0xff]  }
 0x15d   :  { %6879 = vmatpush3.bf16.msra.mxu1 %v7455_v43  ;;  %6858 = vmatprep.subr.bf16.mxu0 %v7456_v44  ;;  %v7503_v43 = vld [vmem:[%s9658_s1 + $0xca8] sm:$0xff]   ;;  %v7504_v44 = vld [vmem:[%s9658_s1 + $0xc60] sm:$0xff]  }
 0x15e   :  { %6880 = vmatprep.subr.bf16.mxu1 %v7457_v45  ;;  %v7505_v45 = vld [vmem:[%s9658_s1 + $0xce0] sm:$0xff]  }
 0x160   :  { %6859 = vmatpush3.bf16.msra.mxu0 %v7458_v46  ;;  %v7506_v46 = vld [vmem:[%s9658_s1 + $0xc20] sm:$0xff]  }
 0x161   :  { %6881 = vmatpush3.bf16.msra.mxu1 %v7459_v47  ;;  %6888 = vmatprep.subr.bf16.mxu0 %v7460_v56  ;;  %v7507_v47 = vld [vmem:[%s9658_s1 + $0xca0] sm:$0xff]   ;;  %v7516_v56 = vld [vmem:[%s9658_s1 + $0xc48] sm:$0xff]  }
 0x162   :  { %6910 = vmatprep.subr.bf16.mxu1 %v7461_v57  ;;  %v7517_v57 = vld [vmem:[%s9658_s1 + $0xcc8] sm:$0xff]  }
 0x163   :  { %5347 = vmatmul.mubr.bf16.vlgmr.msra.gmra.mxu0 %v5868_v50  ;;  %v7510_v50 = vld [vmem:[%s9658_s1 + $0xc18] sm:$0xff]  }
 0x164   :  { %5388 = vmatmul.mubr.bf16.vlgmr.msra.gmra.mxu1 %v5870_v54  ;;  %6889 = vmatpush3.bf16.msra.mxu0 %v7462_v58  ;;  %v7514_v54 = vld [vmem:[%s9658_s1 + $0xc10] sm:$0xff]   ;;  %v7518_v58 = vld [vmem:[%s9658_s1 + $0xc08] sm:$0xff]  }
 0x165   :  { %6911 = vmatpush3.bf16.msra.mxu1 %v7463_v59  ;;  %6890 = vmatprep.subr.bf16.mxu0 %v7464_v60  ;;  %v7519_v59 = vld [vmem:[%s9658_s1 + $0xc88] sm:$0xff]   ;;  %v7520_v60 = vld [vmem:[%s9658_s1 + $0xc40] sm:$0xff]  }
 0x166   :  { %6912 = vmatprep.subr.bf16.mxu1 %v7465_v61  ;;  %5428 = vmatprep.mubr.bf16.mxu0 %v5873_v29  ;;  %v7521_v61 = vld [vmem:[%s9658_s1 + $0xcc0] sm:$0xff]   ;;  %v7545_v29 = vld [vmem:[%s9658_s1 + $0xdd0] sm:$0xff]  }
 0x167   :  { %5469 = vmatprep.mubr.bf16.mxu1 %v5875_v31  ;;  %v7547_v31 = vld [vmem:[%s9658_s1 + $0xd90] sm:$0xff]  }
 0x168   :  { %6891 = vmatpush3.bf16.msra.mxu0 %v7466_v62  ;;  %v7522_v62 = vld [vmem:[%s9658_s1 + $0xc00] sm:$0xff]  }
 0x169   :  { %6913 = vmatpush3.bf16.msra.mxu1 %v7467_v63  ;;  %6892 = vmatprep.subr.bf16.mxu0 %v7468_v0  ;;  %v7523_v63 = vld [vmem:[%s9658_s1 + $0xc80] sm:$0xff]  }
 0x16a   :  { %6914 = vmatprep.subr.bf16.mxu1 %v7469_v1  ;;  %v38_v0 = vld [vmem:[%s9659_s0 + $0xc0] sm:$0xff] }
 0x16b   :  { %v70_v1 = vld [vmem:[%s9659_s0 + $0x1c0] sm:$0xff] }
 0x16c   :  { %6893 = vmatpush3.bf16.msra.mxu0 %v7470_v2  ;;  %v39_v2 = vld [vmem:[%s9659_s0 + $0xc8] sm:$0xff] }
 0x16d   :  { %6915 = vmatpush3.bf16.msra.mxu1 %v7471_v3  ;;  %6894 = vmatprep.subr.bf16.mxu0 %v7472_v4  ;;  %v5876_v3 = vcombine.low %v38_v0, %v70_v1  ;;  %v5877_v4 = vcombine.high %v38_v0, %v70_v1  ;;  %v7572_v0 = vld [vmem:[%s9658_s1 + $0xe58] sm:$0xff]  }
 0x16e   :  { %6916 = vmatprep.subr.bf16.mxu1 %v7473_v5  ;;  %v71_v5 = vld [vmem:[%s9659_s0 + $0x1c8] sm:$0xff]  ;;  %v7573_v1 = vld [vmem:[%s9658_s1 + $0xed8] sm:$0xff]  }
 0x170   :  { %6895 = vmatpush3.bf16.msra.mxu0 %v7474_v6  ;;  %v5878_v6 = vcombine.low %v39_v2, %v71_v5 }
 0x171   :  { %6917 = vmatpush3.bf16.msra.mxu1 %v7475_v7  ;;  %6896 = vmatprep.subr.bf16.mxu0 %v7476_v8  ;;  %v5879_v7 = vcombine.high %v39_v2, %v71_v5  ;;  %v7524_v8 = vld [vmem:[%s9658_s1 + $0xd78] sm:$0xff]   ;;  %v7577_v5 = vld [vmem:[%s9658_s1 + $0xed0] sm:$0xff]  }
 0x172   :  { %6918 = vmatprep.subr.bf16.mxu1 %v7477_v9  ;;  %v7525_v9 = vld [vmem:[%s9658_s1 + $0xdf8] sm:$0xff]  }
 0x173   :  { %v7574_v2 = vld [vmem:[%s9658_s1 + $0xe18] sm:$0xff]  }
 0x174   :  { %6897 = vmatpush3.bf16.msra.mxu0 %v7478_v10  ;;  %v7526_v10 = vld [vmem:[%s9658_s1 + $0xd38] sm:$0xff]  }
 0x175   :  { %6919 = vmatpush3.bf16.msra.mxu1 %v7479_v11  ;;  %6898 = vmatprep.subr.bf16.mxu0 %v7480_v12  ;;  %v7527_v11 = vld [vmem:[%s9658_s1 + $0xdb8] sm:$0xff]   ;;  %v7528_v12 = vld [vmem:[%s9658_s1 + $0xd70] sm:$0xff]  }
 0x176   :  { %6920 = vmatprep.subr.bf16.mxu1 %v7481_v13  ;;  %v7529_v13 = vld [vmem:[%s9658_s1 + $0xdf0] sm:$0xff]  }
 0x178   :  { %6899 = vmatpush3.bf16.msra.mxu0 %v7482_v14  ;;  %v7530_v14 = vld [vmem:[%s9658_s1 + $0xd30] sm:$0xff]  }
 0x179   :  { %6921 = vmatpush3.bf16.msra.mxu1 %v7483_v15  ;;  %6900 = vmatprep.subr.bf16.mxu0 %v7484_v16  ;;  %v7531_v15 = vld [vmem:[%s9658_s1 + $0xdb0] sm:$0xff]   ;;  %v7532_v16 = vld [vmem:[%s9658_s1 + $0xd68] sm:$0xff]  }
 0x17a   :  { %6922 = vmatprep.subr.bf16.mxu1 %v7485_v17  ;;  %v7533_v17 = vld [vmem:[%s9658_s1 + $0xde8] sm:$0xff]  }
 0x17c   :  { %6901 = vmatpush3.bf16.msra.mxu0 %v7486_v18  ;;  %v7534_v18 = vld [vmem:[%s9658_s1 + $0xd28] sm:$0xff]  }
 0x17d   :  { %6923 = vmatpush3.bf16.msra.mxu1 %v7487_v19  ;;  %6902 = vmatprep.subr.bf16.mxu0 %v7488_v20  ;;  %v7535_v19 = vld [vmem:[%s9658_s1 + $0xda8] sm:$0xff]   ;;  %v7536_v20 = vld [vmem:[%s9658_s1 + $0xd60] sm:$0xff]  }
 0x17e   :  { %6924 = vmatprep.subr.bf16.mxu1 %v7489_v21  ;;  %v7537_v21 = vld [vmem:[%s9658_s1 + $0xde0] sm:$0xff]  }
 0x180   :  { %6903 = vmatpush3.bf16.msra.mxu0 %v7490_v22  ;;  %v7538_v22 = vld [vmem:[%s9658_s1 + $0xd20] sm:$0xff]  }
 0x181   :  { %6925 = vmatpush3.bf16.msra.mxu1 %v7491_v23  ;;  %6932 = vmatprep.subr.bf16.mxu0 %v7492_v32  ;;  %v7539_v23 = vld [vmem:[%s9658_s1 + $0xda0] sm:$0xff]   ;;  %v7548_v32 = vld [vmem:[%s9658_s1 + $0xd48] sm:$0xff]  }
 0x182   :  { %6954 = vmatprep.subr.bf16.mxu1 %v7493_v33  ;;  %v7549_v33 = vld [vmem:[%s9658_s1 + $0xdc8] sm:$0xff]  }
 0x183   :  { %5429 = vmatmul.mubr.bf16.vlgmr.msra.gmra.mxu0 %v5872_v28  ;;  %v7544_v28 = vld [vmem:[%s9658_s1 + $0xd50] sm:$0xff]  }
 0x184   :  { %5470 = vmatmul.mubr.bf16.vlgmr.msra.gmra.mxu1 %v5874_v30  ;;  %6933 = vmatpush3.bf16.msra.mxu0 %v7494_v34  ;;  %v7546_v30 = vld [vmem:[%s9658_s1 + $0xd10] sm:$0xff]   ;;  %v7550_v34 = vld [vmem:[%s9658_s1 + $0xd08] sm:$0xff]  }
 0x185   :  { %6955 = vmatpush3.bf16.msra.mxu1 %v7495_v35  ;;  %6934 = vmatprep.subr.bf16.mxu0 %v7496_v36  ;;  %v7551_v35 = vld [vmem:[%s9658_s1 + $0xd88] sm:$0xff]   ;;  %v7552_v36 = vld [vmem:[%s9658_s1 + $0xd40] sm:$0xff]  }
 0x186   :  { %6956 = vmatprep.subr.bf16.mxu1 %v7497_v37  ;;  %5510 = vmatprep.mubr.bf16.mxu0 %v5877_v4  ;;  %v7553_v37 = vld [vmem:[%s9658_s1 + $0xdc0] sm:$0xff]   ;;  %v7576_v4 = vld [vmem:[%s9658_s1 + $0xe50] sm:$0xff]  }
 0x187   :  { %5551 = vmatprep.mubr.bf16.mxu1 %v5879_v7  ;;  %v7579_v7 = vld [vmem:[%s9658_s1 + $0xe90] sm:$0xff]  }
 0x188   :  { %6935 = vmatpush3.bf16.msra.mxu0 %v7498_v38  ;;  %v7554_v38 = vld [vmem:[%s9658_s1 + $0xd00] sm:$0xff]  }
 0x189   :  { %6957 = vmatpush3.bf16.msra.mxu1 %v7499_v39  ;;  %6936 = vmatprep.subr.bf16.mxu0 %v7500_v40  ;;  %v7555_v39 = vld [vmem:[%s9658_s1 + $0xd80] sm:$0xff]   ;;  %v40_v40 = vld [vmem:[%s9659_s0 + $0xd0] sm:$0xff] }
 0x18a   :  { %6958 = vmatprep.subr.bf16.mxu1 %v7501_v41  ;;  %v72_v41 = vld [vmem:[%s9659_s0 + $0x1d0] sm:$0xff] }
 0x18c   :  { %6937 = vmatpush3.bf16.msra.mxu0 %v7502_v42  ;;  %v5880_v42 = vcombine.low %v40_v40, %v72_v41 }
 0x18d   :  { %6959 = vmatpush3.bf16.msra.mxu1 %v7503_v43  ;;  %6938 = vmatprep.subr.bf16.mxu0 %v7504_v44  ;;  %v5881_v43 = vcombine.high %v40_v40, %v72_v41  ;;  %v41_v44 = vld [vmem:[%s9659_s0 + $0xd8] sm:$0xff]  ;;  %v9316_v40 = vpop.f32.mrf.mxu0 }
 0x18e   :  { %6960 = vmatprep.subr.bf16.mxu1 %v7505_v45  ;;  %v73_v45 = vld [vmem:[%s9659_s0 + $0x1d8] sm:$0xff] }
 0x18f   :  { %v7604_v41 = vld [vmem:[%s9658_s1 + $0xf58] sm:$0xff]  }
 0x190   :  { %6939 = vmatpush3.bf16.msra.mxu0 %v7506_v46  ;;  %v5882_v46 = vcombine.low %v41_v44, %v73_v45 }
 0x191   :  { %6961 = vmatpush3.bf16.msra.mxu1 %v7507_v47  ;;  %6940 = vmatprep.subr.bf16.mxu0 %v7508_v48  ;;  %v5883_v47 = vcombine.high %v41_v44, %v73_v45  ;;  %v7556_v48 = vld [vmem:[%s9658_s1 + $0xe78] sm:$0xff]   ;;  %v9327_v44 = vpop.f32.mrf.mxu1 }
 0x192   :  { %6962 = vmatprep.subr.bf16.mxu1 %v7509_v49  ;;  %v7557_v49 = vld [vmem:[%s9658_s1 + $0xef8] sm:$0xff]  }
 0x193   :  { %v7607_v45 = vld [vmem:[%s9658_s1 + $0xf98] sm:$0xff]  }
 0x194   :  { %6941 = vmatpush3.bf16.msra.mxu0 %v7510_v50  ;;  %v7558_v50 = vld [vmem:[%s9658_s1 + $0xe38] sm:$0xff]  }
 0x195   :  { %6963 = vmatpush3.bf16.msra.mxu1 %v7511_v51  ;;  %6942 = vmatprep.subr.bf16.mxu0 %v7512_v52  ;;  %v7559_v51 = vld [vmem:[%s9658_s1 + $0xeb8] sm:$0xff]   ;;  %v7560_v52 = vld [vmem:[%s9658_s1 + $0xe70] sm:$0xff]  }
 0x196   :  { %6964 = vmatprep.subr.bf16.mxu1 %v7513_v53  ;;  %v7561_v53 = vld [vmem:[%s9658_s1 + $0xef0] sm:$0xff]  }
 0x198   :  { %6943 = vmatpush3.bf16.msra.mxu0 %v7514_v54  ;;  %v7562_v54 = vld [vmem:[%s9658_s1 + $0xe30] sm:$0xff]  }
 0x199   :  { %6965 = vmatpush3.bf16.msra.mxu1 %v7515_v55  ;;  %6944 = vmatprep.subr.bf16.mxu0 %v7516_v56  ;;  %v7563_v55 = vld [vmem:[%s9658_s1 + $0xeb0] sm:$0xff]   ;;  %v7564_v56 = vld [vmem:[%s9658_s1 + $0xe68] sm:$0xff]  }
 0x19a   :  { %6966 = vmatprep.subr.bf16.mxu1 %v7517_v57  ;;  %v7565_v57 = vld [vmem:[%s9658_s1 + $0xee8] sm:$0xff]  }
 0x19c   :  { %6945 = vmatpush3.bf16.msra.mxu0 %v7518_v58  ;;  %v7566_v58 = vld [vmem:[%s9658_s1 + $0xe28] sm:$0xff]  }
 0x19d   :  { %6967 = vmatpush3.bf16.msra.mxu1 %v7519_v59  ;;  %6946 = vmatprep.subr.bf16.mxu0 %v7520_v60  ;;  %v7567_v59 = vld [vmem:[%s9658_s1 + $0xea8] sm:$0xff]   ;;  %v7568_v60 = vld [vmem:[%s9658_s1 + $0xe60] sm:$0xff]  }
 0x19e   :  { %6968 = vmatprep.subr.bf16.mxu1 %v7521_v61  ;;  %v7569_v61 = vld [vmem:[%s9658_s1 + $0xee0] sm:$0xff]  }
 0x1a0   :  { %6947 = vmatpush3.bf16.msra.mxu0 %v7522_v62  ;;  %v7570_v62 = vld [vmem:[%s9658_s1 + $0xe20] sm:$0xff]  }
 0x1a1   :  { %6969 = vmatpush3.bf16.msra.mxu1 %v7523_v63  ;;  %6976 = vmatprep.subr.bf16.mxu0 %v7524_v8  ;;  %v7571_v63 = vld [vmem:[%s9658_s1 + $0xea0] sm:$0xff]   ;;  %v7580_v8 = vld [vmem:[%s9658_s1 + $0xe48] sm:$0xff]  }
 0x1a2   :  { %6998 = vmatprep.subr.bf16.mxu1 %v7525_v9  ;;  %v7581_v9 = vld [vmem:[%s9658_s1 + $0xec8] sm:$0xff]  }
 0x1a3   :  { %5511 = vmatmul.mubr.bf16.vlgmr.msra.gmra.mxu0 %v5876_v3  ;;  %v7575_v3 = vld [vmem:[%s9658_s1 + $0xe98] sm:$0xff]  }
 0x1a4   :  { %5552 = vmatmul.mubr.bf16.vlgmr.msra.gmra.mxu1 %v5878_v6  ;;  %6977 = vmatpush3.bf16.msra.mxu0 %v7526_v10  ;;  %v7578_v6 = vld [vmem:[%s9658_s1 + $0xe10] sm:$0xff]   ;;  %v7582_v10 = vld [vmem:[%s9658_s1 + $0xe08] sm:$0xff]  }
 0x1a5   :  { %6999 = vmatpush3.bf16.msra.mxu1 %v7527_v11  ;;  %6978 = vmatprep.subr.bf16.mxu0 %v7528_v12  ;;  %v7583_v11 = vld [vmem:[%s9658_s1 + $0xe88] sm:$0xff]   ;;  %v7584_v12 = vld [vmem:[%s9658_s1 + $0xe40] sm:$0xff]  }
 0x1a6   :  { %7000 = vmatprep.subr.bf16.mxu1 %v7529_v13  ;;  %5592 = vmatprep.mubr.bf16.mxu0 %v5881_v43  ;;  %v7585_v13 = vld [vmem:[%s9658_s1 + $0xec0] sm:$0xff]   ;;  %v7606_v43 = vld [vmem:[%s9658_s1 + $0xf18] sm:$0xff]  }
 0x1a7   :  { %5633 = vmatprep.mubr.bf16.mxu1 %v5883_v47  ;;  %v7608_v47 = vld [vmem:[%s9658_s1 + $0xf50] sm:$0xff]  }
 0x1a8   :  { %6979 = vmatpush3.bf16.msra.mxu0 %v7530_v14  ;;  %v7586_v14 = vld [vmem:[%s9658_s1 + $0xe00] sm:$0xff]  }
 0x1a9   :  { %7001 = vmatpush3.bf16.msra.mxu1 %v7531_v15  ;;  %6980 = vmatprep.subr.bf16.mxu0 %v7532_v16  ;;  %v7587_v15 = vld [vmem:[%s9658_s1 + $0xe80] sm:$0xff]  }
 0x1aa   :  { %7002 = vmatprep.subr.bf16.mxu1 %v7533_v17  ;;  %v42_v16 = vld [vmem:[%s9659_s0 + $0xe0] sm:$0xff] }
 0x1ab   :  { %v74_v17 = vld [vmem:[%s9659_s0 + $0x1e0] sm:$0xff] }
 0x1ac   :  { %6981 = vmatpush3.bf16.msra.mxu0 %v7534_v18  ;;  %v43_v18 = vld [vmem:[%s9659_s0 + $0xe8] sm:$0xff] }
 0x1ad   :  { %7003 = vmatpush3.bf16.msra.mxu1 %v7535_v19  ;;  %6982 = vmatprep.subr.bf16.mxu0 %v7536_v20  ;;  %v75_v19 = vld [vmem:[%s9659_s0 + $0x1e8] sm:$0xff]  ;;  %v5884_v20 = vcombine.low %v42_v16, %v74_v17 }
 0x1ae   :  { %7004 = vmatprep.subr.bf16.mxu1 %v7537_v21  ;;  %v5885_v21 = vcombine.high %v42_v16, %v74_v17 }
 0x1b0   :  { %6983 = vmatpush3.bf16.msra.mxu0 %v7538_v22  ;;  %v5886_v22 = vcombine.low %v43_v18, %v75_v19 }
 0x1b1   :  { %7005 = vmatpush3.bf16.msra.mxu1 %v7539_v23  ;;  %6984 = vmatprep.subr.bf16.mxu0 %v7540_v24  ;;  %v5887_v23 = vcombine.high %v43_v18, %v75_v19  ;;  %v7588_v24 = vld [vmem:[%s9658_s1 + $0xf78] sm:$0xff]  }
 0x1b2   :  { %7006 = vmatprep.subr.bf16.mxu1 %v7541_v25  ;;  %v7589_v25 = vld [vmem:[%s9658_s1 + $0xff8] sm:$0xff]  }
 0x1b4   :  { %6985 = vmatpush3.bf16.msra.mxu0 %v7542_v26  ;;  %v7590_v26 = vld [vmem:[%s9658_s1 + $0xf38] sm:$0xff]  }
 0x1b5   :  { %7007 = vmatpush3.bf16.msra.mxu1 %v7543_v27  ;;  %6986 = vmatprep.subr.bf16.mxu0 %v7544_v28  ;;  %v7591_v27 = vld [vmem:[%s9658_s1 + $0xfb8] sm:$0xff]   ;;  %v7592_v28 = vld [vmem:[%s9658_s1 + $0xf70] sm:$0xff]  }
 0x1b6   :  { %7008 = vmatprep.subr.bf16.mxu1 %v7545_v29  ;;  %v7593_v29 = vld [vmem:[%s9658_s1 + $0xff0] sm:$0xff]  }
 0x1b8   :  { %6987 = vmatpush3.bf16.msra.mxu0 %v7546_v30  ;;  %v7594_v30 = vld [vmem:[%s9658_s1 + $0xf30] sm:$0xff]  }
 0x1b9   :  { %7009 = vmatpush3.bf16.msra.mxu1 %v7547_v31  ;;  %6988 = vmatprep.subr.bf16.mxu0 %v7548_v32  ;;  %v7595_v31 = vld [vmem:[%s9658_s1 + $0xfb0] sm:$0xff]   ;;  %v7596_v32 = vld [vmem:[%s9658_s1 + $0xf68] sm:$0xff]  }
 0x1ba   :  { %7010 = vmatprep.subr.bf16.mxu1 %v7549_v33  ;;  %v7597_v33 = vld [vmem:[%s9658_s1 + $0xfe8] sm:$0xff]  }
 0x1bc   :  { %6989 = vmatpush3.bf16.msra.mxu0 %v7550_v34  ;;  %v7598_v34 = vld [vmem:[%s9658_s1 + $0xf28] sm:$0xff]  }
 0x1bd   :  { %7011 = vmatpush3.bf16.msra.mxu1 %v7551_v35  ;;  %6990 = vmatprep.subr.bf16.mxu0 %v7552_v36  ;;  %v7599_v35 = vld [vmem:[%s9658_s1 + $0xfa8] sm:$0xff]   ;;  %v7600_v36 = vld [vmem:[%s9658_s1 + $0xf60] sm:$0xff]  }
 0x1be   :  { %7012 = vmatprep.subr.bf16.mxu1 %v7553_v37  ;;  %v7601_v37 = vld [vmem:[%s9658_s1 + $0xfe0] sm:$0xff]  }
 0x1c0   :  { %6991 = vmatpush3.bf16.msra.mxu0 %v7554_v38  ;;  %v7602_v38 = vld [vmem:[%s9658_s1 + $0xf20] sm:$0xff]  }
 0x1c1   :  { %7013 = vmatpush3.bf16.msra.mxu1 %v7555_v39  ;;  %7020 = vmatprep.subr.bf16.mxu0 %v7556_v48  ;;  %v7603_v39 = vld [vmem:[%s9658_s1 + $0xfa0] sm:$0xff]   ;;  %v7609_v48 = vld [vmem:[%s9658_s1 + $0xfd0] sm:$0xff]  }
 0x1c2   :  { %7042 = vmatprep.subr.bf16.mxu1 %v7557_v49  ;;  %v7610_v49 = vld [vmem:[%s9658_s1 + $0xf10] sm:$0xff]  }
 0x1c3   :  { %5593 = vmatmul.mubr.bf16.vlgmr.msra.gmra.mxu0 %v5880_v42  ;;  %v7605_v42 = vld [vmem:[%s9658_s1 + $0xfd8] sm:$0xff]  }
 0x1c4   :  { %5634 = vmatmul.mubr.bf16.vlgmr.msra.gmra.mxu1 %v5882_v46  ;;  %7021 = vmatpush3.bf16.msra.mxu0 %v7558_v50  ;;  %v9332_v46 = vpop.f32.mrf.mxu0  ;;  %v9343_v50 = vpop.f32.mrf.mxu1 }
 0x1c5   :  { %7043 = vmatpush3.bf16.msra.mxu1 %v7559_v51  ;;  %7022 = vmatprep.subr.bf16.mxu0 %v7560_v52  ;;  %v7611_v51 = vld [vmem:[%s9658_s1 + $0xf90] sm:$0xff]  }
 0x1c6   :  { %7044 = vmatprep.subr.bf16.mxu1 %v7561_v53  ;;  %5674 = vmatprep.mubr.bf16.mxu0 %v5885_v21  ;;  %v9348_v52 = vpop.f32.mrf.mxu0  ;;  %v7612_v53 = vld [vmem:[%s9658_s1 + $0xf48] sm:$0xff]  }
 0x1c7   :  { %5715 = vmatprep.mubr.bf16.mxu1 %v5887_v23 }
 0x1c8   :  { %7023 = vmatpush3.bf16.msra.mxu0 %v7562_v54  ;;  %v7613_v54 = vld [vmem:[%s9658_s1 + $0xfc8] sm:$0xff]  }
 0x1c9   :  { %7045 = vmatpush3.bf16.msra.mxu1 %v7563_v55  ;;  %7024 = vmatprep.subr.bf16.mxu0 %v7564_v56  ;;  %v7614_v55 = vld [vmem:[%s9658_s1 + $0xf08] sm:$0xff]   ;;  %v9359_v56 = vpop.f32.mrf.mxu1 }
 0x1ca   :  { %7046 = vmatprep.subr.bf16.mxu1 %v7565_v57  ;;  %v7615_v57 = vld [vmem:[%s9658_s1 + $0xf88] sm:$0xff]  }
 0x1cc   :  { %7025 = vmatpush3.bf16.msra.mxu0 %v7566_v58  ;;  %v9364_v58 = vpop.f32.mrf.mxu0 }
 0x1cd   :  { %7047 = vmatpush3.bf16.msra.mxu1 %v7567_v59  ;;  %7026 = vmatprep.subr.bf16.mxu0 %v7568_v60  ;;  %v7616_v59 = vld [vmem:[%s9658_s1 + $0xf40] sm:$0xff]  }
 0x1ce   :  { %7048 = vmatprep.subr.bf16.mxu1 %v7569_v61  ;;  %v7617_v60 = vld [vmem:[%s9658_s1 + $0xfc0] sm:$0xff]   ;;  %v9372_v61 = vpop.f32.mrf.mxu0 }
 0x1d0   :  { %7027 = vmatpush3.bf16.msra.mxu0 %v7570_v62  ;;  %v7618_v62 = vld [vmem:[%s9658_s1 + $0xf00] sm:$0xff]  }
 0x1d1   :  { %7049 = vmatpush3.bf16.msra.mxu1 %v7571_v63  ;;  %7028 = vmatprep.subr.bf16.mxu0 %v7572_v0  ;;  %v9377_v63 = vpop.f32.mrf.mxu1  ;;  %v7619_v0 = vld [vmem:[%s9658_s1 + $0xf80] sm:$0xff]  }
 0x1d2   :  { %7050 = vmatprep.subr.bf16.mxu1 %v7573_v1  ;;  %v44_v1 = vld [vmem:[%s9659_s0 + $0xf0] sm:$0xff] }
 0x1d4   :  { %7029 = vmatpush3.bf16.msra.mxu0 %v7574_v2  ;;  %v76_v2 = vld [vmem:[%s9659_s0 + $0x1f0] sm:$0xff] }
 0x1d5   :  { %7051 = vmatpush3.bf16.msra.mxu1 %v7575_v3  ;;  %7030 = vmatprep.subr.bf16.mxu0 %v7576_v4  ;;  %v45_v3 = vld [vmem:[%s9659_s0 + $0xf8] sm:$0xff]  ;;  %v9391_v4 = vpop.f32.mrf.mxu1 }
 0x1d6   :  { %7052 = vmatprep.subr.bf16.mxu1 %v7577_v5  ;;  %v5888_v5 = vcombine.low %v44_v1, %v76_v2 }
 0x1d8   :  { %7031 = vmatpush3.bf16.msra.mxu0 %v7578_v6  ;;  %v5889_v6 = vcombine.high %v44_v1, %v76_v2 }
 0x1d9   :  { %7053 = vmatpush3.bf16.msra.mxu1 %v7579_v7  ;;  %7032 = vmatprep.subr.bf16.mxu0 %v7580_v8  ;;  %v77_v7 = vld [vmem:[%s9659_s0 + $0x1f8] sm:$0xff]  ;;  %v9396_v8 = vpop.f32.mrf.mxu0 }
 0x1da   :  { %7054 = vmatprep.subr.bf16.mxu1 %v7581_v9  ;;  %v5890_v9 = vcombine.low %v45_v3, %v77_v7 }
 0x1dc   :  { %7033 = vmatpush3.bf16.msra.mxu0 %v7582_v10  ;;  %v5891_v10 = vcombine.high %v45_v3, %v77_v7 }
 0x1dd   :  { %7055 = vmatpush3.bf16.msra.mxu1 %v7583_v11  ;;  %7034 = vmatprep.subr.bf16.mxu0 %v7584_v12  ;;  %v9398_v11 = vpop.f32.mrf.mxu1  ;;  %v9400_v12 = vpop.f32.mrf.mxu0 }
 0x1de   :  { %7056 = vmatprep.subr.bf16.mxu1 %v7585_v13 }
 0x1df   :  { %v9402_v13 = vpop.f32.mrf.mxu1 }
 0x1e0   :  { %7035 = vmatpush3.bf16.msra.mxu0 %v7586_v14  ;;  %v9404_v14 = vpop.f32.mrf.mxu0 }
 0x1e1   :  { %7057 = vmatpush3.bf16.msra.mxu1 %v7587_v15  ;;  %7064 = vmatprep.subr.bf16.mxu0 %v7588_v24  ;;  %v9408_v16 = vpop.f32.mrf.mxu1 }
 0x1e2   :  { %7086 = vmatprep.subr.bf16.mxu1 %v7589_v25  ;;  %v9406_v15 = vpop.f32.mrf.mxu0 }
 0x1e3   :  { %5675 = vmatmul.mubr.bf16.vlgmr.msra.gmra.mxu0 %v5884_v20  ;;  %v9410_v17 = vpop.f32.mrf.mxu1 }
 0x1e4   :  { %5716 = vmatmul.mubr.bf16.vlgmr.msra.gmra.mxu1 %v5886_v22  ;;  %7065 = vmatpush3.bf16.msra.mxu0 %v7590_v26  ;;  %v9412_v18 = vpop.f32.mrf.mxu0 }
 0x1e5   :  { %7087 = vmatpush3.bf16.msra.mxu1 %v7591_v27  ;;  %7066 = vmatprep.subr.bf16.mxu0 %v7592_v28  ;;  %v9414_v19 = vpop.f32.mrf.mxu1 }
 0x1e6   :  { %7088 = vmatprep.subr.bf16.mxu1 %v7593_v29  ;;  %5756 = vmatprep.mubr.bf16.mxu0 %v5889_v6  ;;  %v9416_v20 = vpop.f32.mrf.mxu0 }
 0x1e7   :  { %5797 = vmatprep.mubr.bf16.mxu1 %v5891_v10  ;;  %v9418_v21 = vpop.f32.mrf.mxu1 }
 0x1e8   :  { %7067 = vmatpush3.bf16.msra.mxu0 %v7594_v30  ;;  %v9420_v22 = vpop.f32.mrf.mxu0 }
 0x1e9   :  { %7089 = vmatpush3.bf16.msra.mxu1 %v7595_v31  ;;  %7068 = vmatprep.subr.bf16.mxu0 %v7596_v32  ;;  %v9424_v24 = vpop.f32.mrf.mxu1 }
 0x1ea   :  { %7090 = vmatprep.subr.bf16.mxu1 %v7597_v33  ;;  %v9422_v23 = vpop.f32.mrf.mxu0 }
 0x1eb   :  { %v9426_v25 = vpop.f32.mrf.mxu1 }
 0x1ec   :  { %7069 = vmatpush3.bf16.msra.mxu0 %v7598_v34  ;;  %v9428_v26 = vpop.f32.mrf.mxu0 }
 0x1ed   :  { %7091 = vmatpush3.bf16.msra.mxu1 %v7599_v35  ;;  %7070 = vmatprep.subr.bf16.mxu0 %v7600_v36  ;;  %v9430_v27 = vpop.f32.mrf.mxu1 }
 0x1ee   :  { %7092 = vmatprep.subr.bf16.mxu1 %v7601_v37  ;;  %v9432_v28 = vpop.f32.mrf.mxu0 }
 0x1ef   :  { %v9434_v29 = vpop.f32.mrf.mxu1 }
 0x1f0   :  { %7071 = vmatpush3.bf16.msra.mxu0 %v7602_v38  ;;  %v9436_v30 = vpop.f32.mrf.mxu0 }
 0x1f1   :  { %7093 = vmatpush3.bf16.msra.mxu1 %v7603_v39  ;;  %7072 = vmatprep.subr.bf16.mxu0 %v7604_v41  ;;  %v9440_v32 = vpop.f32.mrf.mxu1 }
 0x1f2   :  { %7094 = vmatprep.subr.bf16.mxu1 %v7605_v42  ;;  %v9438_v31 = vpop.f32.mrf.mxu0 }
 0x1f3   :  { %v9442_v33 = vpop.f32.mrf.mxu1 }
 0x1f4   :  { %7073 = vmatpush3.bf16.msra.mxu0 %v7606_v43  ;;  %v9444_v34 = vpop.f32.mrf.mxu0 }
 0x1f5   :  { %7095 = vmatpush3.bf16.msra.mxu1 %v7607_v45  ;;  %7074 = vmatprep.subr.bf16.mxu0 %v7608_v47  ;;  %v9446_v35 = vpop.f32.mrf.mxu1 }
 0x1f6   :  { %7096 = vmatprep.subr.bf16.mxu1 %v7609_v48  ;;  %v9448_v36 = vpop.f32.mrf.mxu0 }
 0x1f7   :  { %v9450_v37 = vpop.f32.mrf.mxu1 }
 0x1f8   :  { %7075 = vmatpush3.bf16.msra.mxu0 %v7610_v49  ;;  %v9452_v38 = vpop.f32.mrf.mxu0 }
 0x1f9   :  { %7097 = vmatpush3.bf16.msra.mxu1 %v7611_v51  ;;  %7076 = vmatprep.subr.bf16.mxu0 %v7612_v53  ;;  %v9456_v41 = vpop.f32.mrf.mxu1 }
 0x1fa   :  { %7098 = vmatprep.subr.bf16.mxu1 %v7613_v54  ;;  %v9454_v39 = vpop.f32.mrf.mxu0 }
 0x1fb   :  { %v9458_v42 = vpop.f32.mrf.mxu1 }
 0x1fc   :  { %7077 = vmatpush3.bf16.msra.mxu0 %v7614_v55  ;;  %v9460_v43 = vpop.f32.mrf.mxu0 }
 0x1fd   :  { %7099 = vmatpush3.bf16.msra.mxu1 %v7615_v57  ;;  %7078 = vmatprep.subr.bf16.mxu0 %v7616_v59  ;;  %v9462_v45 = vpop.f32.mrf.mxu1 }
 0x1fe   :  { %7100 = vmatprep.subr.bf16.mxu1 %v7617_v60  ;;  %v9464_v47 = vpop.f32.mrf.mxu0 }
 0x1ff   :  { %v9466_v48 = vpop.f32.mrf.mxu1 }
 0x200   :  { %7079 = vmatpush3.bf16.msra.mxu0 %v7618_v62  ;;  %v9468_v49 = vpop.f32.mrf.mxu0 }
 0x201   :  { %7101 = vmatpush3.bf16.msra.mxu1 %v7619_v0  ;;  %v9472_v53 = vpop.f32.mrf.mxu1 }
 0x202   :  { %v9470_v51 = vpop.f32.mrf.mxu0 }
 0x203   :  { %5757 = vmatmul.mubr.bf16.vlgmr.msra.gmra.mxu0 %v5888_v5  ;;  %v9474_v54 = vpop.f32.mrf.mxu1 }
 0x204   :  { %5798 = vmatmul.mubr.bf16.vlgmr.msra.gmra.mxu1 %v5890_v9  ;;  %v9476_v55 = vpop.f32.mrf.mxu0 }
 0x205   :  { %v9478_v57 = vpop.f32.mrf.mxu1 }
 0x206   :  { %v9480_v59 = vpop.f32.mrf.mxu0 }
 0x207   :  { %v9482_v60 = vpop.f32.mrf.mxu1 }
 0x208   :  { %9662 = vst [vmem:[#allocation2_spill] sm:$0xff] %v9482_v60  ;;  %v9484_v62 = vpop.f32.mrf.mxu0 }
 0x209   :  { %9663 = vst [vmem:[#allocation3_spill] sm:$0xff] %v9484_v62  ;;  %v9488_v1 = vpop.f32.mrf.mxu1 }
 0x20a   :  { %v9486_v0 = vpop.f32.mrf.mxu0  ;;  %9665 = vst [vmem:[#allocation5_spill] sm:$0xff] %v9488_v1 }
 0x20b   :  { %9664 = vst [vmem:[#allocation4_spill] sm:$0xff] %v9486_v0  ;;  %v9490_v2 = vpop.f32.mrf.mxu1 }
 0x20c   :  { %9666 = vst [vmem:[#allocation6_spill] sm:$0xff] %v9490_v2  ;;  %v9492_v3 = vpop.f32.mrf.mxu0 }
 0x20d   :  { %9667 = vst [vmem:[#allocation7_spill] sm:$0xff] %v9492_v3  ;;  %v9494_v5 = vpop.f32.mrf.mxu1 }
 0x20e   :  { %9668 = vst [vmem:[#allocation8_spill] sm:$0xff] %v9494_v5  ;;  %v9496_v6 = vpop.f32.mrf.mxu0 }
 0x20f   :  { %9669 = vst [vmem:[#allocation9_spill] sm:$0xff] %v9496_v6  ;;  %v9498_v7 = vpop.f32.mrf.mxu1 }
 0x210   :  { %9670 = vst [vmem:[#allocation10_spill] sm:$0xff] %v9498_v7  ;;  %v9500_v9 = vpop.f32.mrf.mxu0  ;;  %v6422_v7 = vadd.f32 %v9332_v46, %v9316_v40  ;;  %v6469_v46 = vadd.f32 %v9404_v14, %v9400_v12  ;;  %v6513_v12 = vadd.f32 %v9420_v22, %v9416_v20  ;;  %v6557_v20 = vadd.f32 %v9436_v30, %v9432_v28 }
 0x211   :  { %v9504_v60 = vpop.f32.mrf.mxu1 }
 0x212   :  { %v9502_v10 = vpop.f32.mrf.mxu0  ;;  %9672 = vst [vmem:[#allocation12_spill] sm:$0xff] %v9504_v60  ;;  %v6444_v60 = vadd.f32 %v9343_v50, %v9327_v44  ;;  %v6488_v44 = vadd.f32 %v9398_v11, %v9391_v4  ;;  %v6532_v11 = vadd.f32 %v9414_v19, %v9410_v17  ;;  %v6576_v19 = vadd.f32 %v9430_v27, %v9426_v25 }
 0x213   :  { %9671 = vst [vmem:[#allocation11_spill] sm:$0xff] %v9502_v10  ;;  %v9506_v62 = vpop.f32.mrf.mxu1  ;;  %v6620_v25 = vadd.f32 %v9446_v35, %v9442_v33  ;;  %v6601_v27 = vadd.f32 %v9452_v38, %v9448_v36  ;;  %v6664_v35 = vadd.f32 %v9462_v45, %v9458_v42  ;;  %v6645_v36 = vadd.f32 %v9468_v49, %v9464_v47  ;;  %v9679_v45 = vld [vmem:[#allocation3_spill] sm:$0xff] }
 0x214   :  { %9673 = vst [vmem:[#allocation13_spill] sm:$0xff] %v9506_v62  ;;  %v9508_v0 = vpop.f32.mrf.mxu0  ;;  %v6466_v62 = vadd.f32 %v9396_v8, %v9372_v61  ;;  %v6708_v42 = vadd.f32 %v9478_v57, %v9474_v54  ;;  %v6689_v47 = vadd.f32 %v9679_v45, %v9480_v59 }
 0x215   :  { %v9510_v1 = vpop.f32.mrf.mxu1 }
 0x216   :  { %9674 = vst [vmem:[#allocation14_spill] sm:$0xff] %v9510_v1  ;;  %v9512_v2 = vpop.f32.mrf.mxu0  ;;  %v9686_v54 = vld [vmem:[#allocation9_spill] sm:$0xff] }
 0x217   :  { %9675 = vst [vmem:[#allocation15_spill] sm:$0xff] %v9512_v2  ;;  %v9514_v3 = vpop.f32.mrf.mxu1  ;;  %v6733_v57 = vadd.f32 %v9500_v9, %v9686_v54 }
 0x218   :  { %9676 = vst [vmem:[#allocation16_spill] sm:$0xff] %v9514_v3  ;;  %v9516_v5 = vpop.f32.mrf.mxu0  ;;  %v4570_v3 = vadd.f32 %v6444_v60, %v6422_v7  ;;  %v6510_v60 = vadd.f32 %v9412_v18, %v9406_v15  ;;  %v6554_v15 = vadd.f32 %v9428_v26, %v9422_v23  ;;  %v6598_v23 = vadd.f32 %v9444_v34, %v9438_v31 }
 0x219   :  { %9677 = vst [vmem:[#allocation17_spill] sm:$0xff] %v9516_v5  ;;  %v9524_v10 = vpop.f32.mrf.mxu1  ;;  %v6425_v5 = vadd.f32 %v9364_v58, %v9348_v52  ;;  %v6642_v34 = vadd.f32 %v9460_v43, %v9454_v39  ;;  %v6686_v43 = vadd.f32 %v9476_v55, %v9470_v51 }
 0x21a   :  { %v9518_v6 = vpop.f32.mrf.mxu0  ;;  %v4611_v40 = vadd.f32 %v6466_v62, %v4570_v3 }
 0x21b   :  { %9678 = vst [vmem:[#allocation18_spill] sm:$0xff] %v9518_v6  ;;  %v9528_v1 = vpop.f32.mrf.mxu1  ;;  %v6447_v6 = vadd.f32 %v9377_v63, %v9359_v56  ;;  %v6491_v63 = vadd.f32 %v9408_v16, %v9402_v13  ;;  %v6535_v16 = vadd.f32 %v9424_v24, %v9418_v21  ;;  %v6579_v21 = vadd.f32 %v9440_v32, %v9434_v29 }
 0x21c   :  { %v9530_v2 = vpop.f32.mrf.mxu0  ;;  %v4652_v7 = vadd.f32 %v6488_v44, %v4611_v40  ;;  %v6623_v32 = vadd.f32 %v9456_v41, %v9450_v37  ;;  %v6667_v37 = vadd.f32 %v9472_v53, %v9466_v48  ;;  %v9684_v53 = vld [vmem:[#allocation6_spill] sm:$0xff] }
 0x21d   :  { %v9540_v50 = vpop.f32.mrf.mxu1  ;;  %v4573_v8 = vadd.f32 %v6447_v6, %v6425_v5 }
 0x21e   :  { %v9542_v61 = vpop.f32.mrf.mxu0  ;;  %v4693_v4 = vadd.f32 %v6510_v60, %v4652_v7 }
 0x21f   :  { %v4614_v52 = vadd.f32 %v6469_v46, %v4573_v8  ;;  %v9546_v58 = vpop.f32.mrf.mxu1 }
 0x220   :  { %v9548_v56 = vpop.f32.mrf.mxu0  ;;  %v4734_v3 = vadd.f32 %v6532_v11, %v4693_v4 }
 0x221   :  { %v4655_v62 = vadd.f32 %v6491_v63, %v4614_v52  ;;  %v9560_v18 = vpop.f32.mrf.mxu1 }
 0x222   :  { %v4775_v17 = vadd.f32 %v6554_v15, %v4734_v3  ;;  %v9681_v15 = vld [vmem:[#allocation7_spill] sm:$0xff] }
 0x223   :  { %v9556_v14 = vpop.f32.mrf.mxu0  ;;  %v4696_v5 = vadd.f32 %v6513_v12, %v4655_v62  ;;  %v9680_v62 = vld [vmem:[#allocation4_spill] sm:$0xff] }
 0x224   :  { %v9562_v6 = vpop.f32.mrf.mxu1  ;;  %v4816_v44 = vadd.f32 %v6576_v19, %v4775_v17  ;;  %v6730_v3 = vadd.f32 %v9681_v15, %v9680_v62  ;;  %v9682_v19 = vld [vmem:[#allocation2_spill] sm:$0xff]  ;;  %v9695_v15 = vld [vmem:[#allocation16_spill] sm:$0xff] }
 0x225   :  { %v9564_v13 = vpop.f32.mrf.mxu0  ;;  %v4737_v22 = vadd.f32 %v6535_v16, %v4696_v5 }
 0x226   :  { %v9574_v26 = vpop.f32.mrf.mxu1  ;;  %v4857_v24 = vadd.f32 %v6598_v23, %v4816_v44  ;;  %v9685_v23 = vld [vmem:[#allocation8_spill] sm:$0xff] }
 0x227   :  { %v9576_v40 = vpop.f32.mrf.mxu0  ;;  %v4778_v46 = vadd.f32 %v6557_v20, %v4737_v22  ;;  %v9683_v20 = vld [vmem:[#allocation5_spill] sm:$0xff]  ;;  %v6752_v44 = vadd.f32 %v9685_v23, %v9684_v53 }
 0x228   :  { %v9584_v28 = vpop.f32.mrf.mxu1  ;;  %v4898_v60 = vadd.f32 %v6620_v25, %v4857_v24  ;;  %v6711_v22 = vadd.f32 %v9683_v20, %v9682_v19  ;;  %v6821_v19 = vadd.f32 %v9548_v56, %v9542_v61 }
 0x229   :  { %v9586_v30 = vpop.f32.mrf.mxu0  ;;  %v4819_v31 = vadd.f32 %v6579_v21, %v4778_v46  ;;  %v9687_v21 = vld [vmem:[#allocation11_spill] sm:$0xff] }
 0x22a   :  { %v9592_v29 = vpop.f32.mrf.mxu1  ;;  %v4939_v33 = vadd.f32 %v6642_v34, %v4898_v60  ;;  %v6774_v24 = vadd.f32 %v9508_v0, %v9687_v21  ;;  %v9688_v60 = vld [vmem:[#allocation10_spill] sm:$0xff] }
 0x22b   :  { %v4860_v7 = vadd.f32 %v6601_v27, %v4819_v31 }
 0x22c   :  { %v4980_v63 = vadd.f32 %v6664_v35, %v4939_v33  ;;  %v9690_v35 = vld [vmem:[#allocation13_spill] sm:$0xff] }
 0x22d   :  { %v4901_v39 = vadd.f32 %v6623_v32, %v4860_v7  ;;  %v9689_v7 = vld [vmem:[#allocation12_spill] sm:$0xff] }
 0x22e   :  { %v5021_v41 = vadd.f32 %v6686_v43, %v4980_v63  ;;  %v6755_v32 = vadd.f32 %v9689_v7, %v9688_v60  ;;  %v9692_v43 = vld [vmem:[#allocation15_spill] sm:$0xff]  ;;  %v9693_v63 = vld [vmem:[#allocation17_spill] sm:$0xff] }
 0x22f   :  { %v4942_v4 = vadd.f32 %v6645_v36, %v4901_v39  ;;  %v9691_v36 = vld [vmem:[#allocation14_spill] sm:$0xff] }
 0x230   :  { %v5062_v55 = vadd.f32 %v6708_v42, %v5021_v41  ;;  %v6796_v39 = vadd.f32 %v9691_v36, %v9690_v35  ;;  %v9694_v42 = vld [vmem:[#allocation18_spill] sm:$0xff] }
 0x231   :  { %v4983_v49 = vadd.f32 %v6667_v37, %v4942_v4  ;;  %v6777_v4 = vadd.f32 %v9693_v63, %v9692_v43  ;;  %v6818_v0 = vadd.f32 %v9530_v2, %v9694_v42 }
 0x232   :  { %v5103_v48 = vadd.f32 %v6730_v3, %v5062_v55  ;;  %v6799_v3 = vadd.f32 %v9524_v10, %v9695_v15  ;;  %v6843_v10 = vadd.f32 %v9560_v18, %v9546_v58 }
 0x233   :  { %v5024_v16 = vadd.f32 %v6689_v47, %v4983_v49 }
 0x234   :  { %v5144_v31 = vadd.f32 %v6752_v44, %v5103_v48  ;;  %v6862_v48 = vadd.f32 %v9564_v13, %v9556_v14 }
 0x235   :  { %v5065_v46 = vadd.f32 %v6711_v22, %v5024_v16  ;;  %v6840_v16 = vadd.f32 %v9540_v50, %v9528_v1  ;;  %v6884_v1 = vadd.f32 %v9574_v26, %v9562_v6  ;;  %v6865_v50 = vadd.f32 %v9586_v30, %v9576_v40 }
 0x236   :  { %v5185_v33 = vadd.f32 %v6774_v24, %v5144_v31  ;;  %v6887_v24 = vadd.f32 %v9592_v29, %v9584_v28 }
 0x237   :  { %v5106_v34 = vadd.f32 %v6733_v57, %v5065_v46 }
 0x238   :  { %v5226_v45 = vadd.f32 %v6796_v39, %v5185_v33 }
 0x239   :  { %v5147_v41 = vadd.f32 %v6755_v32, %v5106_v34 }
 0x23a   :  { %v5267_v55 = vadd.f32 %v6818_v0, %v5226_v45 }
 0x23b   :  { %v5188_v47 = vadd.f32 %v6777_v4, %v5147_v41 }
 0x23c   :  { %v5308_v53 = vadd.f32 %v6840_v16, %v5267_v55 }
 0x23d   :  { %v5229_v22 = vadd.f32 %v6799_v3, %v5188_v47 }
 0x23e   :  { %v5349_v57 = vadd.f32 %v6862_v48, %v5308_v53 }
 0x23f   :  { %v5270_v23 = vadd.f32 %v6821_v19, %v5229_v22 }
 0x240   :  { %v5390_v13 = vadd.f32 %v6884_v1, %v5349_v57 }
 0x241   :  { %v5311_v61 = vadd.f32 %v6843_v10, %v5270_v23 }
 0x243   :  { %v9590_v8 = vpop.f32.mrf.mxu0  ;;  %v5352_v21 = vadd.f32 %v6865_v50, %v5311_v61 }
 0x244   :  { %v9600_v38 = vpop.f32.mrf.mxu1 }
 0x245   :  { %v6905_v52 = vpop.f32.mrf.mxu0  ;;  %v5393_v6 = vadd.f32 %v6887_v24, %v5352_v21 }
 0x246   :  { %v6927_v11 = vpop.f32.mrf.mxu1  ;;  %v6906_v56 = vadd.f32 %v6905_v52, %v9590_v8 }
 0x247   :  { %v6907_v12 = vpop.f32.mrf.mxu0  ;;  %v6928_v58 = vadd.f32 %v6927_v11, %v9600_v38 }
 0x248   :  { %v6929_v5 = vpop.f32.mrf.mxu1  ;;  %v5431_v31 = vadd.f32 %v6906_v56, %v5390_v13 }
 0x249   :  { %v6908_v51 = vpop.f32.mrf.mxu0 }
 0x24a   :  { %v6930_v59 = vpop.f32.mrf.mxu1  ;;  %v6909_v18 = vadd.f32 %v6908_v51, %v6907_v12  ;;  %v5472_v40 = vadd.f32 %v6928_v58, %v5431_v31 }
 0x24b   :  { %v6931_v8 = vadd.f32 %v6930_v59, %v6929_v5 }
 0x24c   :  { %v5434_v30 = vadd.f32 %v6909_v18, %v5393_v6 }
 0x24e   :  { %v5475_v43 = vadd.f32 %v6931_v8, %v5434_v30 }
 0x263   :  { %v6948_v17 = vpop.f32.mrf.mxu0 }
 0x264   :  { %v6970_v25 = vpop.f32.mrf.mxu1 }
 0x265   :  { %v6949_v27 = vpop.f32.mrf.mxu0 }
 0x266   :  { %v6971_v9 = vpop.f32.mrf.mxu1  ;;  %v6950_v26 = vadd.f32 %v6949_v27, %v6948_v17 }
 0x267   :  { %v6951_v37 = vpop.f32.mrf.mxu0  ;;  %v6972_v33 = vadd.f32 %v6971_v9, %v6970_v25 }
 0x268   :  { %v6973_v49 = vpop.f32.mrf.mxu1  ;;  %v5513_v52 = vadd.f32 %v6950_v26, %v5472_v40 }
 0x269   :  { %v6952_v62 = vpop.f32.mrf.mxu0 }
 0x26a   :  { %v6974_v2 = vpop.f32.mrf.mxu1  ;;  %v6953_v35 = vadd.f32 %v6952_v62, %v6951_v37  ;;  %v5554_v29 = vadd.f32 %v6972_v33, %v5513_v52 }
 0x26b   :  { %v6975_v12 = vadd.f32 %v6974_v2, %v6973_v49 }
 0x26c   :  { %v5516_v63 = vadd.f32 %v6953_v35, %v5475_v43 }
 0x26e   :  { %v5557_v27 = vadd.f32 %v6975_v12, %v5516_v63 }
 0x283   :  { %v6992_v20 = vpop.f32.mrf.mxu0 }
 0x284   :  { %v7014_v44 = vpop.f32.mrf.mxu1 }
 0x285   :  { %v6993_v54 = vpop.f32.mrf.mxu0 }
 0x286   :  { %v7015_v46 = vpop.f32.mrf.mxu1  ;;  %v6994_v28 = vadd.f32 %v6993_v54, %v6992_v20 }
 0x287   :  { %v6995_v14 = vpop.f32.mrf.mxu0  ;;  %v7016_v4 = vadd.f32 %v7015_v46, %v7014_v44 }
 0x288   :  { %v7017_v34 = vpop.f32.mrf.mxu1  ;;  %v5595_v51 = vadd.f32 %v6994_v28, %v5554_v29 }
 0x289   :  { %v6996_v60 = vpop.f32.mrf.mxu0 }
 0x28a   :  { %v7018_v32 = vpop.f32.mrf.mxu1  ;;  %v6997_v17 = vadd.f32 %v6996_v60, %v6995_v14  ;;  %v5636_v5 = vadd.f32 %v7016_v4, %v5595_v51 }
 0x28b   :  { %v7019_v25 = vadd.f32 %v7018_v32, %v7017_v34 }
 0x28c   :  { %v5598_v59 = vadd.f32 %v6997_v17, %v5557_v27 }
 0x28e   :  { %v5639_v15 = vadd.f32 %v7019_v25, %v5598_v59 }
 0x2a3   :  { %v7036_v7 = vpop.f32.mrf.mxu0 }
 0x2a4   :  { %v7058_v36 = vpop.f32.mrf.mxu1 }
 0x2a5   :  { %v7037_v39 = vpop.f32.mrf.mxu0 }
 0x2a6   :  { %v7059_v38 = vpop.f32.mrf.mxu1  ;;  %v7038_v41 = vadd.f32 %v7037_v39, %v7036_v7 }
 0x2a7   :  { %v7039_v11 = vpop.f32.mrf.mxu0  ;;  %v7060_v37 = vadd.f32 %v7059_v38, %v7058_v36 }
 0x2a8   :  { %v7061_v42 = vpop.f32.mrf.mxu1  ;;  %v5677_v9 = vadd.f32 %v7038_v41, %v5636_v5 }
 0x2a9   :  { %v7040_v0 = vpop.f32.mrf.mxu0 }
 0x2aa   :  { %v7041_v45 = vadd.f32 %v7040_v0, %v7039_v11  ;;  %v7062_v47 = vpop.f32.mrf.mxu1  ;;  %v5718_v16 = vadd.f32 %v7060_v37, %v5677_v9 }
 0x2ab   :  { %v7063_v48 = vadd.f32 %v7062_v47, %v7061_v42 }
 0x2ac   :  { %v5680_v49 = vadd.f32 %v7041_v45, %v5639_v15 }
 0x2ae   :  { %v5721_v54 = vadd.f32 %v7063_v48, %v5680_v49 }
 0x2c3   :  { %v7080_v62 = vpop.f32.mrf.mxu0 }
 0x2c4   :  { %v7102_v3 = vpop.f32.mrf.mxu1 }
 0x2c5   :  { %v7081_v55 = vpop.f32.mrf.mxu0 }
 0x2c6   :  { %v7082_v19 = vadd.f32 %v7081_v55, %v7080_v62  ;;  %v7103_v20 = vpop.f32.mrf.mxu1 }
 0x2c7   :  { %v7083_v22 = vpop.f32.mrf.mxu0  ;;  %v7104_v53 = vadd.f32 %v7103_v20, %v7102_v3 }
 0x2c8   :  { %v5759_v2 = vadd.f32 %v7082_v19, %v5718_v16  ;;  %v7105_v23 = vpop.f32.mrf.mxu1 }
 0x2c9   :  { %v7084_v44 = vpop.f32.mrf.mxu0 }
 0x2ca   :  { %v5800_v10 = vadd.f32 %v7104_v53, %v5759_v2  ;;  %v7085_v57 = vadd.f32 %v7084_v44, %v7083_v22  ;;  %v7106_v1 = vpop.f32.mrf.mxu1 }
 0x2cb   :  { %v7107_v56 = vadd.f32 %v7106_v1, %v7105_v23 }
 0x2cc   :  { %5806 = vst [vmem:[%s9660_s2] sm:$0xff] %v5800_v10  ;;  %v5808_v50 = vsub.f32 0.0, %v5800_v10  ;;  %v5762_v61 = vadd.f32 %v7085_v57, %v5721_v54 }
 0x2ce   :  { %v5810_v46 = vmul.f32 1.442695, %v5808_v50  ;;  %v5803_v14 = vadd.f32 %v7107_v56, %v5762_v61 }
 0x2d0   :  { %7620 = vpow2.f32 %v5810_v46  ;;  %5807 = vst [vmem:[%s9660_s2 + $0x8] sm:$0xff] %v5803_v14  ;;  %v5809_v13 = vsub.f32 0.0, %v5803_v14 }
 0x2d2   :  { %v5812_v21 = vmul.f32 1.442695, %v5809_v13 }
 0x2d4   :  { %7622 = vpow2.f32 %v5812_v21 }
 0x2dd   :  { %v7621_v24 = vpop.eup %7620 }
 0x2de   :  { %v5814_v31 = vadd.f32 1.0, %v7621_v24 }
 0x2e0   :  { %7624 = vrcp.f32 %v5814_v31 }
 0x2e1   :  { %v7623_v58 = vpop.eup %7622 }
 0x2e2   :  { %v5815_v18 = vadd.f32 1.0, %v7623_v58 }
 0x2e4   :  { %7626 = vrcp.f32 %v5815_v18 }
 0x2ed   :  { %v7625_v34 = vpop.eup %7624 }
 0x2ee   :  { %5818 = vst [vmem:[%s9661_s3] sm:$0xff] %v7625_v34 }
 0x2f1   :  { %v7627_v60 = vpop.eup %7626 }
 0x2f2   :  { %5819 = vst [vmem:[%s9661_s3 + $0x8] sm:$0xff] %v7627_v60 }

</bundles_post_ra>
